<compile_context>
chip_gen: v7x
topology: tpu7x:2x2x1
jax: 0.10.0
libtpu: 0.0.40
codegen_flags: <defaults>
</compile_context>

<pallas_src>
import functools

import numpy as np
import jax
import jax.numpy as jnp
from jax import lax
from jax.experimental import pallas as pl
from jax.experimental.pallas import tpu as pltpu

NEG_SLOPE = 0.2   # nn.LeakyReLU(0.2)
BN_EPS = 1e-5     # nn.BatchNorm2d default eps
LANE = 128


def _round_up(x, m):
    return (x + m - 1) // m * m


# ---------------------------------------------------------------------------
# Host-side operand construction (constants + weight-only transforms).
# ---------------------------------------------------------------------------

def _build_r_stack(h_in, n, stride, pad, k):
    """0/1 row-selection matrix, tap-major stack: (k*N*Ho, N*H_in).

    Row tap*(N*Ho) + (b*Ho + ho) selects input row b*H_in + (stride*ho - pad + tap);
    out-of-range rows stay all-zero (== H-direction zero padding)."""
    ho_n = (h_in + 2 * pad - k) // stride + 1
    r = np.zeros((k, n * ho_n, n * h_in), np.float32)
    for i in range(k):
        for b in range(n):
            for ho in range(ho_n):
                h = stride * ho - pad + i
                if 0 <= h < h_in:
                    r[i, b * ho_n + ho, b * h_in + h] = 1.0
    return jnp.asarray(r.reshape(k * n * ho_n, n * h_in), jnp.bfloat16)


def _build_w_stack(w, w_in, stride, pad, cols_pad):
    """Conv weight (Cout,Cin,k,k) -> tap-major stacked matrix (k*cols_pad, Wo*Cout).

    stack[tap*cols_pad + w*Cin + ci, wo*Cout + co] = W[co, ci, tap, w - (stride*wo - pad)]
    (zero outside the kernel window and in the lane padding), so
    (lane-concat of tap rows) @ stack folds the kw loop, the channel contraction
    and the W-direction stride/padding into one fat-K matmul."""
    cout, cin, k, _ = w.shape
    wo_n = (w_in + 2 * pad - k) // stride + 1
    sel = np.zeros((k, w_in, wo_n), np.float32)          # constant 0/1 mask
    wo_idx = np.arange(wo_n)
    for j in range(k):
        src = stride * wo_idx - pad + j
        ok = (src >= 0) & (src < w_in)
        sel[j, src[ok], wo_idx[ok]] = 1.0
    wt = jnp.transpose(w, (2, 3, 1, 0))                  # (kh, kw, Cin, Cout)
    taps = jnp.einsum("jwv,ijcd->iwcvd", sel, wt)        # (kh, w, Cin, wo, Cout)
    taps = taps.reshape(k, w_in * cin, wo_n * cout)
    if cols_pad > w_in * cin:
        taps = jnp.pad(taps, ((0, 0), (0, cols_pad - w_in * cin), (0, 0)))
    return taps.reshape(k * cols_pad, wo_n * cout).astype(jnp.bfloat16)


def _build_bn_p(wo_n, cout, count):
    """Fused per-channel reduce+broadcast: P[(wo,c),(wo',c')] = 1/count iff c==c'.
    (1/count is an exact power of two for this net, so bf16 storage is exact.)"""
    m = np.tile(np.eye(cout, dtype=np.float32), (wo_n, 1))      # (Wo*C, C)
    return jnp.asarray((m @ m.T) / float(count), jnp.bfloat16)  # (Wo*C, Wo*C)


# ---------------------------------------------------------------------------
# Fused kernel: conv1 -> lrelu -> (conv+BN+lrelu) x3 -> conv5 -> sigmoid.
# ---------------------------------------------------------------------------

def _disc_kernel(x_ref,
                 r1_ref, r2_ref, r3_ref, r4_ref,
                 wt1_ref, b5_ref, s5_ref,
                 g2_ref, g3_ref, g4_ref,
                 bb2_ref, bb3_ref, bb4_ref,
                 wt2_hbm, wt3_hbm, wt4_hbm, p2_hbm, p3_hbm, p4_hbm,
                 o_ref,
                 wt2_v, wt3_v, wt4_v, p2_v, p3_v, p4_v, dma_sem,
                 *, num_taps):

    # -- start the big-weight DMAs immediately; they overlap with conv1 compute --
    deferred = ((wt2_hbm, wt2_v), (p2_hbm, p2_v),
                (wt3_hbm, wt3_v), (p3_hbm, p3_v),
                (wt4_hbm, wt4_v), (p4_hbm, p4_v))
    copies = []
    for idx, (src, dst) in enumerate(deferred):
        cp = pltpu.make_async_copy(src, dst, dma_sem.at[idx])
        cp.start()
        copies.append(cp)
    wt2_cp, p2_cp, wt3_cp, p3_cp, wt4_cp, p4_cp = copies

    def conv(x_bf16, r_ref, w_ref):
        # One row-gather matmul, lane-concat of the tap slices, one fat-K matmul.
        rows = jnp.dot(r_ref[...], x_bf16, preferred_element_type=jnp.float32)
        nho = rows.shape[0] // num_taps
        cat = jnp.concatenate(
            [rows[i * nho:(i + 1) * nho, :] for i in range(num_taps)], axis=1)
        # R rows are 0/1 selectors of bf16 values -> cast back to bf16 is lossless.
        return jnp.dot(cat.astype(jnp.bfloat16), w_ref[...],
                       preferred_element_type=jnp.float32)

    def batchnorm(y, p_ref, g_ref, b_ref):
        # Training-mode BN; P fuses the per-channel reduce + broadcast (and 1/count).
        s = jnp.sum(y, axis=0, keepdims=True).astype(jnp.bfloat16)
        mean_b = jnp.dot(s, p_ref[...], preferred_element_type=jnp.float32)
        d = y - mean_b
        v = jnp.sum(d * d, axis=0, keepdims=True).astype(jnp.bfloat16)
        var_b = jnp.dot(v, p_ref[...], preferred_element_type=jnp.float32)
        return d * (g_ref[...] * lax.rsqrt(var_b + BN_EPS)) + b_ref[...]

    def lrelu(y):
        return jnp.maximum(y, NEG_SLOPE * y)

    y = lrelu(conv(x_ref[...], r1_ref, wt1_ref))                      # (N*32, 256)

    wt2_cp.wait(); p2_cp.wait()
    y = lrelu(batchnorm(conv(y.astype(jnp.bfloat16), r2_ref, wt2_v),
                        p2_v, g2_ref, bb2_ref))                       # (N*16, 256)
    wt3_cp.wait(); p3_cp.wait()
    y = lrelu(batchnorm(conv(y.astype(jnp.bfloat16), r3_ref, wt3_v),
                        p3_v, g3_ref, bb3_ref))                       # (N*8, 256)
    wt4_cp.wait(); p4_cp.wait()
    y = lrelu(batchnorm(conv(y.astype(jnp.bfloat16), r4_ref, wt4_v),
                        p4_v, g4_ref, bb4_ref))                       # (N*4, 256)

    # conv5 (4x4, stride 1, pad 0, Cout=1): per-image dot of the flattened act.
    prod = y * b5_ref[...]                                            # (N*4, 256) f32
    rowsum = jnp.sum(prod, axis=1, keepdims=True)                     # (N*4, 1)
    logit = jnp.dot(s5_ref[...], rowsum,
                    preferred_element_type=jnp.float32)               # (N, 1)
    # Exact sigmoid keeps the output strictly inside [0, 1].
    o_ref[...] = (1.0 / (1.0 + jnp.exp(-logit))).astype(o_ref.dtype)


# ---------------------------------------------------------------------------
# Wrapper.
# ---------------------------------------------------------------------------

def discriminator_forward(p, x):
    """Discriminator forward: x (N, C, H, W) NCHW -> (N,) probabilities."""
    n, c, h, w = x.shape
    weights = [p["w1"], p["w2"], p["w3"], p["w4"], p["w5"]]
    strides = [2, 2, 2, 2, 1]
    pads = [1, 1, 1, 1, 0]

    # Per-layer geometry.
    dims = []
    hc, wc, cc = h, w, c
    for wgt, st, pd in zip(weights, strides, pads):
        cout, cin, k, _ = wgt.shape
        assert cin == cc, "channel mismatch"
        ho = (hc + 2 * pd - k) // st + 1
        wo = (wc + 2 * pd - k) // st + 1
        dims.append((hc, wc, cc, ho, wo, cout, k, st, pd))
        hc, wc, cc = ho, wo, cout
    assert dims[4][3] == 1 and dims[4][4] == 1, "final conv must reduce to 1x1"
    num_taps = dims[0][6]

    # Input image in lane-dense (N*H, W*C) layout; layer-1 columns padded to 128.
    cols1 = w * c
    cols1_pad = _round_up(cols1, LANE)
    x_rows = jnp.transpose(x, (0, 2, 3, 1)).reshape(n * h, cols1)
    if cols1_pad > cols1:
        x_rows = jnp.pad(x_rows, ((0, 0), (0, cols1_pad - cols1)))
    x_rows = x_rows.astype(jnp.bfloat16)

    # Conv1-4 operands (weight-only prep; cacheable across training steps).
    r_stacks, w_stacks = [], []
    flops = 0
    for li in range(4):
        hin, win, cin, ho, wo, cout, k, st, pd = dims[li]
        cols = win * cin
        cols_pad = _round_up(cols, LANE) if li == 0 else cols
        r_stacks.append(_build_r_stack(hin, n, st, pd, k))
        w_stacks.append(_build_w_stack(weights[li], win, st, pd, cols_pad))
        flops += 2 * (k * n * ho) * (n * hin) * cols_pad          # R matmul
        flops += 2 * (n * ho) * (k * cols_pad) * (wo * cout)      # W matmul

    # BatchNorm operands (layers 2-4): fused P + pre-broadcast gamma/beta rows.
    p_mats, g_bcasts, b_bcasts = [], [], []
    for li in (1, 2, 3):
        _, _, _, ho, wo, cout, _, _, _ = dims[li]
        count = n * ho * wo
        p_mats.append(_build_bn_p(wo, cout, count))
        g_bcasts.append(jnp.tile(p[f"g{li + 1}"].astype(jnp.float32), wo)
                        .reshape(1, wo * cout))
        b_bcasts.append(jnp.tile(p[f"b{li + 1}"].astype(jnp.float32), wo)
                        .reshape(1, wo * cout))
        flops += 2 * 2 * (wo * cout) * (wo * cout)

    # Conv5 operands: per-image flattened dot (weight broadcast + group-sum matrix).
    h5, w5d, c5, _, _, _, k5, _, _ = dims[4]
    w5m = jnp.transpose(weights[4], (2, 3, 1, 0)).reshape(k5, w5d * c5)  # (kh, W*C)
    b5 = jnp.tile(w5m, (n, 1)).astype(jnp.bfloat16)                      # (N*H5, W*C)
    s5 = np.zeros((n, n * h5), np.float32)                               # group-sum
    for b in range(n):
        s5[b, b * h5:(b + 1) * h5] = 1.0
    s5 = jnp.asarray(s5)
    flops += 2 * n * h5 * w5d * c5

    auto_ops = [x_rows, *r_stacks, w_stacks[0], b5, s5, *g_bcasts, *b_bcasts]
    deferred_ops = [w_stacks[1], w_stacks[2], w_stacks[3], *p_mats]      # manual DMA
    operands = auto_ops + deferred_ops

    bytes_accessed = sum(int(a.size) * a.dtype.itemsize for a in operands) + n * 4
    transcendentals = n + sum(dims[li][4] * dims[li][5] for li in (1, 2, 3))

    in_specs = ([pl.BlockSpec(a.shape, lambda i, nd=a.ndim: (0,) * nd)
                 for a in auto_ops]
                + [pl.BlockSpec(memory_space=pl.ANY) for _ in deferred_ops])
    scratch_shapes = ([pltpu.VMEM(a.shape, a.dtype) for a in deferred_ops]
                      + [pltpu.SemaphoreType.DMA((len(deferred_ops),))])

    kern = functools.partial(_disc_kernel, num_taps=num_taps)
    out = pl.pallas_call(
        kern,
        out_shape=jax.ShapeDtypeStruct((n, 1), jnp.float32),
        grid=(1,),
        in_specs=in_specs,
        out_specs=pl.BlockSpec((n, 1), lambda i: (0, 0)),
        scratch_shapes=scratch_shapes,
        compiler_params=pltpu.CompilerParams(dimension_semantics=("arbitrary",)),
        cost_estimate=pl.CostEstimate(flops=int(flops),
                                      transcendentals=int(transcendentals),
                                      bytes_accessed=int(bytes_accessed)),
    )(*operands)
    return out.reshape(-1)                                  # .view(-1,1).squeeze(1)


def init_params(key, image_channel=1, ndf=8):
    """Deterministic DCGAN-style init (weights ~ N(0, 0.02), BN gamma ~ N(1, 0.02))."""
    keys = jax.random.split(key, 8)

    def conv_w(k_, cout, cin):
        return 0.02 * jax.random.normal(k_, (cout, cin, 4, 4), jnp.float32)

    return {
        "w1": conv_w(keys[0], ndf, image_channel),
        "w2": conv_w(keys[1], ndf * 2, ndf),
        "w3": conv_w(keys[2], ndf * 4, ndf * 2),
        "w4": conv_w(keys[3], ndf * 8, ndf * 4),
        "w5": conv_w(keys[4], 1, ndf * 8),
        "g2": 1.0 + 0.02 * jax.random.normal(keys[5], (ndf * 2,), jnp.float32),
        "g3": 1.0 + 0.02 * jax.random.normal(keys[6], (ndf * 4,), jnp.float32),
        "g4": 1.0 + 0.02 * jax.random.normal(keys[7], (ndf * 8,), jnp.float32),
        "b2": jnp.zeros((ndf * 2,), jnp.float32),
        "b3": jnp.zeros((ndf * 4,), jnp.float32),
        "b4": jnp.zeros((ndf * 8,), jnp.float32),
    }


if __name__ == "__main__":
    key = jax.random.PRNGKey(0)
    k_param, k_input = jax.random.split(key)

    # DCGAN discriminator requires imsize=64 (64->32->16->8->4->1).  Small
    # batch / width: batch=2, image_channel=1, ndf=8.
    params = init_params(k_param, image_channel=1, ndf=8)
    x = jax.random.normal(k_input, (2, 1, 64, 64), jnp.float32)

    out = jax.jit(discriminator_forward)(params, x)
    out = jax.block_until_ready(out)
    assert out.shape == (2,)
    assert bool(jnp.all((out >= 0.0) & (out <= 1.0)))
    print("KERNEL_OK")
</pallas_src>

<mosaic_0001>
module attributes {stable_mosaic.version = 11 : i64} {
  func.func @_disc_kernel(%arg0: i32, %arg1: memref<128x128xbf16, #tpu.memory_space<vmem>>, %arg2: memref<256x128xbf16, #tpu.memory_space<vmem>>, %arg3: memref<128x64xbf16, #tpu.memory_space<vmem>>, %arg4: memref<64x32xbf16, #tpu.memory_space<vmem>>, %arg5: memref<32x16xbf16, #tpu.memory_space<vmem>>, %arg6: memref<512x256xbf16, #tpu.memory_space<vmem>>, %arg7: memref<8x256xbf16, #tpu.memory_space<vmem>>, %arg8: memref<2x8xf32, #tpu.memory_space<vmem>>, %arg9: memref<1x256xf32, #tpu.memory_space<vmem>>, %arg10: memref<1x256xf32, #tpu.memory_space<vmem>>, %arg11: memref<1x256xf32, #tpu.memory_space<vmem>>, %arg12: memref<1x256xf32, #tpu.memory_space<vmem>>, %arg13: memref<1x256xf32, #tpu.memory_space<vmem>>, %arg14: memref<1x256xf32, #tpu.memory_space<vmem>>, %arg15: memref<1024x256xbf16, #tpu.memory_space<any>>, %arg16: memref<1024x256xbf16, #tpu.memory_space<any>>, %arg17: memref<1024x256xbf16, #tpu.memory_space<any>>, %arg18: memref<256x256xbf16, #tpu.memory_space<any>>, %arg19: memref<256x256xbf16, #tpu.memory_space<any>>, %arg20: memref<256x256xbf16, #tpu.memory_space<any>>, %arg21: memref<2x1xf32, #tpu.memory_space<vmem>>, %arg22: memref<1024x256xbf16, #tpu.memory_space<vmem>>, %arg23: memref<1024x256xbf16, #tpu.memory_space<vmem>>, %arg24: memref<1024x256xbf16, #tpu.memory_space<vmem>>, %arg25: memref<256x256xbf16, #tpu.memory_space<vmem>>, %arg26: memref<256x256xbf16, #tpu.memory_space<vmem>>, %arg27: memref<256x256xbf16, #tpu.memory_space<vmem>>, %arg28: memref<6x!tpu.dma_semaphore, #tpu.memory_space<semaphore_mem>>) attributes {dimension_semantics = [#tpu.dimension_semantics<arbitrary>], iteration_bounds = array<i64: 1>, scalar_prefetch = 0 : i64, scratch_operands = 7 : i64, tpu.core_type = #tpu.core_type<tc>, window_params = [{pipeline_mode = #tpu.pipeline_mode<synchronous>, transform_indices = @transform_0, window_bounds = array<i64: 128, 128>}, {pipeline_mode = #tpu.pipeline_mode<synchronous>, transform_indices = @transform_1, window_bounds = array<i64: 256, 128>}, {pipeline_mode = #tpu.pipeline_mode<synchronous>, transform_indices = @transform_2, window_bounds = array<i64: 128, 64>}, {pipeline_mode = #tpu.pipeline_mode<synchronous>, transform_indices = @transform_3, window_bounds = array<i64: 64, 32>}, {pipeline_mode = #tpu.pipeline_mode<synchronous>, transform_indices = @transform_4, window_bounds = array<i64: 32, 16>}, {pipeline_mode = #tpu.pipeline_mode<synchronous>, transform_indices = @transform_5, window_bounds = array<i64: 512, 256>}, {pipeline_mode = #tpu.pipeline_mode<synchronous>, transform_indices = @transform_6, window_bounds = array<i64: 8, 256>}, {pipeline_mode = #tpu.pipeline_mode<synchronous>, transform_indices = @transform_7, window_bounds = array<i64: 2, 8>}, {pipeline_mode = #tpu.pipeline_mode<synchronous>, transform_indices = @transform_8, window_bounds = array<i64: 1, 256>}, {pipeline_mode = #tpu.pipeline_mode<synchronous>, transform_indices = @transform_9, window_bounds = array<i64: 1, 256>}, {pipeline_mode = #tpu.pipeline_mode<synchronous>, transform_indices = @transform_10, window_bounds = array<i64: 1, 256>}, {pipeline_mode = #tpu.pipeline_mode<synchronous>, transform_indices = @transform_11, window_bounds = array<i64: 1, 256>}, {pipeline_mode = #tpu.pipeline_mode<synchronous>, transform_indices = @transform_12, window_bounds = array<i64: 1, 256>}, {pipeline_mode = #tpu.pipeline_mode<synchronous>, transform_indices = @transform_13, window_bounds = array<i64: 1, 256>}, {}, {}, {}, {}, {}, {}, {pipeline_mode = #tpu.pipeline_mode<synchronous>, transform_indices = @transform_20, window_bounds = array<i64: 2, 1>}]} {
    %c0_i32 = arith.constant 0 : i32
    %0 = tpu.memref_slice %arg28[%c0_i32] : memref<6x!tpu.dma_semaphore, #tpu.memory_space<semaphore_mem>> -> memref<1x!tpu.dma_semaphore, #tpu.memory_space<semaphore_mem>>
    %1 = tpu.memref_squeeze %0 : memref<1x!tpu.dma_semaphore, #tpu.memory_space<semaphore_mem>> -> memref<!tpu.dma_semaphore, #tpu.memory_space<semaphore_mem>>
    tpu.enqueue_dma source(%arg15 : memref<1024x256xbf16, #tpu.memory_space<any>>) target(%arg22 : memref<1024x256xbf16, #tpu.memory_space<vmem>>) target_semaphore(%1 : memref<!tpu.dma_semaphore, #tpu.memory_space<semaphore_mem>>)
    %c1_i32 = arith.constant 1 : i32
    %2 = tpu.memref_slice %arg28[%c1_i32] : memref<6x!tpu.dma_semaphore, #tpu.memory_space<semaphore_mem>> -> memref<1x!tpu.dma_semaphore, #tpu.memory_space<semaphore_mem>>
    %3 = tpu.memref_squeeze %2 : memref<1x!tpu.dma_semaphore, #tpu.memory_space<semaphore_mem>> -> memref<!tpu.dma_semaphore, #tpu.memory_space<semaphore_mem>>
    tpu.enqueue_dma source(%arg18 : memref<256x256xbf16, #tpu.memory_space<any>>) target(%arg25 : memref<256x256xbf16, #tpu.memory_space<vmem>>) target_semaphore(%3 : memref<!tpu.dma_semaphore, #tpu.memory_space<semaphore_mem>>)
    %c2_i32 = arith.constant 2 : i32
    %4 = tpu.memref_slice %arg28[%c2_i32] : memref<6x!tpu.dma_semaphore, #tpu.memory_space<semaphore_mem>> -> memref<1x!tpu.dma_semaphore, #tpu.memory_space<semaphore_mem>>
    %5 = tpu.memref_squeeze %4 : memref<1x!tpu.dma_semaphore, #tpu.memory_space<semaphore_mem>> -> memref<!tpu.dma_semaphore, #tpu.memory_space<semaphore_mem>>
    tpu.enqueue_dma source(%arg16 : memref<1024x256xbf16, #tpu.memory_space<any>>) target(%arg23 : memref<1024x256xbf16, #tpu.memory_space<vmem>>) target_semaphore(%5 : memref<!tpu.dma_semaphore, #tpu.memory_space<semaphore_mem>>)
    %c3_i32 = arith.constant 3 : i32
    %6 = tpu.memref_slice %arg28[%c3_i32] : memref<6x!tpu.dma_semaphore, #tpu.memory_space<semaphore_mem>> -> memref<1x!tpu.dma_semaphore, #tpu.memory_space<semaphore_mem>>
    %7 = tpu.memref_squeeze %6 : memref<1x!tpu.dma_semaphore, #tpu.memory_space<semaphore_mem>> -> memref<!tpu.dma_semaphore, #tpu.memory_space<semaphore_mem>>
    tpu.enqueue_dma source(%arg19 : memref<256x256xbf16, #tpu.memory_space<any>>) target(%arg26 : memref<256x256xbf16, #tpu.memory_space<vmem>>) target_semaphore(%7 : memref<!tpu.dma_semaphore, #tpu.memory_space<semaphore_mem>>)
    %c4_i32 = arith.constant 4 : i32
    %8 = tpu.memref_slice %arg28[%c4_i32] : memref<6x!tpu.dma_semaphore, #tpu.memory_space<semaphore_mem>> -> memref<1x!tpu.dma_semaphore, #tpu.memory_space<semaphore_mem>>
    %9 = tpu.memref_squeeze %8 : memref<1x!tpu.dma_semaphore, #tpu.memory_space<semaphore_mem>> -> memref<!tpu.dma_semaphore, #tpu.memory_space<semaphore_mem>>
    tpu.enqueue_dma source(%arg17 : memref<1024x256xbf16, #tpu.memory_space<any>>) target(%arg24 : memref<1024x256xbf16, #tpu.memory_space<vmem>>) target_semaphore(%9 : memref<!tpu.dma_semaphore, #tpu.memory_space<semaphore_mem>>)
    %c5_i32 = arith.constant 5 : i32
    %10 = tpu.memref_slice %arg28[%c5_i32] : memref<6x!tpu.dma_semaphore, #tpu.memory_space<semaphore_mem>> -> memref<1x!tpu.dma_semaphore, #tpu.memory_space<semaphore_mem>>
    %11 = tpu.memref_squeeze %10 : memref<1x!tpu.dma_semaphore, #tpu.memory_space<semaphore_mem>> -> memref<!tpu.dma_semaphore, #tpu.memory_space<semaphore_mem>>
    tpu.enqueue_dma source(%arg20 : memref<256x256xbf16, #tpu.memory_space<any>>) target(%arg27 : memref<256x256xbf16, #tpu.memory_space<vmem>>) target_semaphore(%11 : memref<!tpu.dma_semaphore, #tpu.memory_space<semaphore_mem>>)
    %c0 = arith.constant 0 : index
    %c0_0 = arith.constant 0 : index
    %12 = vector.load %arg1[%c0, %c0_0] : memref<128x128xbf16, #tpu.memory_space<vmem>>, vector<128x128xbf16>
    %c0_1 = arith.constant 0 : index
    %c0_2 = arith.constant 0 : index
    %13 = vector.load %arg2[%c0_1, %c0_2] : memref<256x128xbf16, #tpu.memory_space<vmem>>, vector<256x128xbf16>
    %cst = arith.constant dense<0.000000e+00> : vector<256x128xf32>
    %14 = tpu.matmul %13, %12, %cst {dimension_numbers = #tpu.dot_dimension_numbers<[1], [0], [0], [1], [0, 0, 1, 1], [], []>} : vector<256x128xbf16>, vector<128x128xbf16>, vector<256x128xf32> -> vector<256x128xf32>
    %15 = vector.extract_strided_slice %14 {offsets = [0, 0], sizes = [64, 128], strides = [1, 1]} : vector<256x128xf32> to vector<64x128xf32>
    %16 = vector.extract_strided_slice %14 {offsets = [64, 0], sizes = [64, 128], strides = [1, 1]} : vector<256x128xf32> to vector<64x128xf32>
    %17 = vector.extract_strided_slice %14 {offsets = [128, 0], sizes = [64, 128], strides = [1, 1]} : vector<256x128xf32> to vector<64x128xf32>
    %18 = vector.extract_strided_slice %14 {offsets = [192, 0], sizes = [64, 128], strides = [1, 1]} : vector<256x128xf32> to vector<64x128xf32>
    %19 = tpu.concatenate %15, %16, %17, %18 in 1 : vector<64x128xf32>, vector<64x128xf32>, vector<64x128xf32>, vector<64x128xf32> -> vector<64x512xf32>
    %20 = arith.truncf %19 : vector<64x512xf32> to vector<64x512xbf16>
    %c0_3 = arith.constant 0 : index
    %c0_4 = arith.constant 0 : index
    %21 = vector.load %arg6[%c0_3, %c0_4] : memref<512x256xbf16, #tpu.memory_space<vmem>>, vector<512x256xbf16>
    %cst_5 = arith.constant dense<0.000000e+00> : vector<64x256xf32>
    %22 = tpu.matmul %20, %21, %cst_5 {dimension_numbers = #tpu.dot_dimension_numbers<[1], [0], [0], [1], [0, 0, 1, 1], [], []>} : vector<64x512xbf16>, vector<512x256xbf16>, vector<64x256xf32> -> vector<64x256xf32>
    %cst_6 = arith.constant 2.000000e-01 : f32
    %23 = vector.broadcast %cst_6 : f32 to vector<64x256xf32>
    %24 = arith.mulf %23, %22 : vector<64x256xf32>
    %25 = arith.maximumf %22, %24 : vector<64x256xf32>
    %c0_i32_7 = arith.constant 0 : i32
    %26 = tpu.memref_slice %arg28[%c0_i32_7] : memref<6x!tpu.dma_semaphore, #tpu.memory_space<semaphore_mem>> -> memref<1x!tpu.dma_semaphore, #tpu.memory_space<semaphore_mem>>
    %27 = tpu.memref_squeeze %26 : memref<1x!tpu.dma_semaphore, #tpu.memory_space<semaphore_mem>> -> memref<!tpu.dma_semaphore, #tpu.memory_space<semaphore_mem>>
    tpu.wait_dma2 semaphore(%27 : memref<!tpu.dma_semaphore, #tpu.memory_space<semaphore_mem>>) src(%arg15 : memref<1024x256xbf16, #tpu.memory_space<any>>) dst(%arg22 : memref<1024x256xbf16, #tpu.memory_space<vmem>>)
    %c1_i32_8 = arith.constant 1 : i32
    %28 = tpu.memref_slice %arg28[%c1_i32_8] : memref<6x!tpu.dma_semaphore, #tpu.memory_space<semaphore_mem>> -> memref<1x!tpu.dma_semaphore, #tpu.memory_space<semaphore_mem>>
    %29 = tpu.memref_squeeze %28 : memref<1x!tpu.dma_semaphore, #tpu.memory_space<semaphore_mem>> -> memref<!tpu.dma_semaphore, #tpu.memory_space<semaphore_mem>>
    tpu.wait_dma2 semaphore(%29 : memref<!tpu.dma_semaphore, #tpu.memory_space<semaphore_mem>>) src(%arg18 : memref<256x256xbf16, #tpu.memory_space<any>>) dst(%arg25 : memref<256x256xbf16, #tpu.memory_space<vmem>>)
    %30 = arith.truncf %25 : vector<64x256xf32> to vector<64x256xbf16>
    %c0_9 = arith.constant 0 : index
    %c0_10 = arith.constant 0 : index
    %31 = vector.load %arg3[%c0_9, %c0_10] : memref<128x64xbf16, #tpu.memory_space<vmem>>, vector<128x64xbf16>
    %cst_11 = arith.constant dense<0.000000e+00> : vector<128x256xf32>
    %32 = tpu.matmul %31, %30, %cst_11 {dimension_numbers = #tpu.dot_dimension_numbers<[1], [0], [0], [1], [0, 0, 1, 1], [], []>} : vector<128x64xbf16>, vector<64x256xbf16>, vector<128x256xf32> -> vector<128x256xf32>
    %33 = vector.extract_strided_slice %32 {offsets = [0, 0], sizes = [32, 256], strides = [1, 1]} : vector<128x256xf32> to vector<32x256xf32>
    %34 = vector.extract_strided_slice %32 {offsets = [32, 0], sizes = [32, 256], strides = [1, 1]} : vector<128x256xf32> to vector<32x256xf32>
    %35 = vector.extract_strided_slice %32 {offsets = [64, 0], sizes = [32, 256], strides = [1, 1]} : vector<128x256xf32> to vector<32x256xf32>
    %36 = vector.extract_strided_slice %32 {offsets = [96, 0], sizes = [32, 256], strides = [1, 1]} : vector<128x256xf32> to vector<32x256xf32>
    %37 = tpu.concatenate %33, %34, %35, %36 in 1 : vector<32x256xf32>, vector<32x256xf32>, vector<32x256xf32>, vector<32x256xf32> -> vector<32x1024xf32>
    %38 = arith.truncf %37 : vector<32x1024xf32> to vector<32x1024xbf16>
    %c0_12 = arith.constant 0 : index
    %c0_13 = arith.constant 0 : index
    %39 = vector.load %arg22[%c0_12, %c0_13] : memref<1024x256xbf16, #tpu.memory_space<vmem>>, vector<1024x256xbf16>
    %cst_14 = arith.constant dense<0.000000e+00> : vector<32x256xf32>
    %40 = tpu.matmul %38, %39, %cst_14 {dimension_numbers = #tpu.dot_dimension_numbers<[1], [0], [0], [1], [0, 0, 1, 1], [], []>} : vector<32x1024xbf16>, vector<1024x256xbf16>, vector<32x256xf32> -> vector<32x256xf32>
    %cst_15 = arith.constant dense<0.000000e+00> : vector<256xf32>
    %41 = vector.multi_reduction <add>, %40, %cst_15 [0] : vector<32x256xf32> to vector<256xf32>
    %42 = vector.shape_cast %41 : vector<256xf32> to vector<1x256xf32>
    %43 = arith.truncf %42 : vector<1x256xf32> to vector<1x256xbf16>
    %c0_16 = arith.constant 0 : index
    %c0_17 = arith.constant 0 : index
    %44 = vector.load %arg25[%c0_16, %c0_17] : memref<256x256xbf16, #tpu.memory_space<vmem>>, vector<256x256xbf16>
    %cst_18 = arith.constant dense<0.000000e+00> : vector<1x256xf32>
    %45 = tpu.matmul %43, %44, %cst_18 {dimension_numbers = #tpu.dot_dimension_numbers<[1], [0], [0], [1], [0, 0, 1, 1], [], []>} : vector<1x256xbf16>, vector<256x256xbf16>, vector<1x256xf32> -> vector<1x256xf32>
    %46 = vector.broadcast %45 : vector<1x256xf32> to vector<32x256xf32>
    %47 = arith.subf %40, %46 : vector<32x256xf32>
    %48 = arith.mulf %47, %47 : vector<32x256xf32>
    %cst_19 = arith.constant dense<0.000000e+00> : vector<256xf32>
    %49 = vector.multi_reduction <add>, %48, %cst_19 [0] : vector<32x256xf32> to vector<256xf32>
    %50 = vector.shape_cast %49 : vector<256xf32> to vector<1x256xf32>
    %51 = arith.truncf %50 : vector<1x256xf32> to vector<1x256xbf16>
    %c0_20 = arith.constant 0 : index
    %c0_21 = arith.constant 0 : index
    %52 = vector.load %arg25[%c0_20, %c0_21] : memref<256x256xbf16, #tpu.memory_space<vmem>>, vector<256x256xbf16>
    %cst_22 = arith.constant dense<0.000000e+00> : vector<1x256xf32>
    %53 = tpu.matmul %51, %52, %cst_22 {dimension_numbers = #tpu.dot_dimension_numbers<[1], [0], [0], [1], [0, 0, 1, 1], [], []>} : vector<1x256xbf16>, vector<256x256xbf16>, vector<1x256xf32> -> vector<1x256xf32>
    %c0_23 = arith.constant 0 : index
    %c0_24 = arith.constant 0 : index
    %54 = vector.load %arg9[%c0_23, %c0_24] : memref<1x256xf32, #tpu.memory_space<vmem>>, vector<1x256xf32>
    %cst_25 = arith.constant 9.99999974E-6 : f32
    %55 = vector.broadcast %cst_25 : f32 to vector<1x256xf32>
    %56 = arith.addf %53, %55 : vector<1x256xf32>
    %57 = math.rsqrt %56 : vector<1x256xf32>
    %58 = arith.mulf %54, %57 : vector<1x256xf32>
    %59 = vector.broadcast %58 : vector<1x256xf32> to vector<32x256xf32>
    %60 = arith.mulf %47, %59 : vector<32x256xf32>
    %c0_26 = arith.constant 0 : index
    %c0_27 = arith.constant 0 : index
    %61 = vector.load %arg12[%c0_26, %c0_27] : memref<1x256xf32, #tpu.memory_space<vmem>>, vector<1x256xf32>
    %62 = vector.broadcast %61 : vector<1x256xf32> to vector<32x256xf32>
    %63 = arith.addf %60, %62 : vector<32x256xf32>
    %cst_28 = arith.constant 2.000000e-01 : f32
    %64 = vector.broadcast %cst_28 : f32 to vector<32x256xf32>
    %65 = arith.mulf %64, %63 : vector<32x256xf32>
    %66 = arith.maximumf %63, %65 : vector<32x256xf32>
    %c2_i32_29 = arith.constant 2 : i32
    %67 = tpu.memref_slice %arg28[%c2_i32_29] : memref<6x!tpu.dma_semaphore, #tpu.memory_space<semaphore_mem>> -> memref<1x!tpu.dma_semaphore, #tpu.memory_space<semaphore_mem>>
    %68 = tpu.memref_squeeze %67 : memref<1x!tpu.dma_semaphore, #tpu.memory_space<semaphore_mem>> -> memref<!tpu.dma_semaphore, #tpu.memory_space<semaphore_mem>>
    tpu.wait_dma2 semaphore(%68 : memref<!tpu.dma_semaphore, #tpu.memory_space<semaphore_mem>>) src(%arg16 : memref<1024x256xbf16, #tpu.memory_space<any>>) dst(%arg23 : memref<1024x256xbf16, #tpu.memory_space<vmem>>)
    %c3_i32_30 = arith.constant 3 : i32
    %69 = tpu.memref_slice %arg28[%c3_i32_30] : memref<6x!tpu.dma_semaphore, #tpu.memory_space<semaphore_mem>> -> memref<1x!tpu.dma_semaphore, #tpu.memory_space<semaphore_mem>>
    %70 = tpu.memref_squeeze %69 : memref<1x!tpu.dma_semaphore, #tpu.memory_space<semaphore_mem>> -> memref<!tpu.dma_semaphore, #tpu.memory_space<semaphore_mem>>
    tpu.wait_dma2 semaphore(%70 : memref<!tpu.dma_semaphore, #tpu.memory_space<semaphore_mem>>) src(%arg19 : memref<256x256xbf16, #tpu.memory_space<any>>) dst(%arg26 : memref<256x256xbf16, #tpu.memory_space<vmem>>)
    %71 = arith.truncf %66 : vector<32x256xf32> to vector<32x256xbf16>
    %c0_31 = arith.constant 0 : index
    %c0_32 = arith.constant 0 : index
    %72 = vector.load %arg4[%c0_31, %c0_32] : memref<64x32xbf16, #tpu.memory_space<vmem>>, vector<64x32xbf16>
    %cst_33 = arith.constant dense<0.000000e+00> : vector<64x256xf32>
    %73 = tpu.matmul %72, %71, %cst_33 {dimension_numbers = #tpu.dot_dimension_numbers<[1], [0], [0], [1], [0, 0, 1, 1], [], []>} : vector<64x32xbf16>, vector<32x256xbf16>, vector<64x256xf32> -> vector<64x256xf32>
    %74 = vector.extract_strided_slice %73 {offsets = [0, 0], sizes = [16, 256], strides = [1, 1]} : vector<64x256xf32> to vector<16x256xf32>
    %75 = vector.extract_strided_slice %73 {offsets = [16, 0], sizes = [16, 256], strides = [1, 1]} : vector<64x256xf32> to vector<16x256xf32>
    %76 = vector.extract_strided_slice %73 {offsets = [32, 0], sizes = [16, 256], strides = [1, 1]} : vector<64x256xf32> to vector<16x256xf32>
    %77 = vector.extract_strided_slice %73 {offsets = [48, 0], sizes = [16, 256], strides = [1, 1]} : vector<64x256xf32> to vector<16x256xf32>
    %78 = tpu.concatenate %74, %75, %76, %77 in 1 : vector<16x256xf32>, vector<16x256xf32>, vector<16x256xf32>, vector<16x256xf32> -> vector<16x1024xf32>
    %79 = arith.truncf %78 : vector<16x1024xf32> to vector<16x1024xbf16>
    %c0_34 = arith.constant 0 : index
    %c0_35 = arith.constant 0 : index
    %80 = vector.load %arg23[%c0_34, %c0_35] : memref<1024x256xbf16, #tpu.memory_space<vmem>>, vector<1024x256xbf16>
    %cst_36 = arith.constant dense<0.000000e+00> : vector<16x256xf32>
    %81 = tpu.matmul %79, %80, %cst_36 {dimension_numbers = #tpu.dot_dimension_numbers<[1], [0], [0], [1], [0, 0, 1, 1], [], []>} : vector<16x1024xbf16>, vector<1024x256xbf16>, vector<16x256xf32> -> vector<16x256xf32>
    %cst_37 = arith.constant dense<0.000000e+00> : vector<256xf32>
    %82 = vector.multi_reduction <add>, %81, %cst_37 [0] : vector<16x256xf32> to vector<256xf32>
    %83 = vector.shape_cast %82 : vector<256xf32> to vector<1x256xf32>
    %84 = arith.truncf %83 : vector<1x256xf32> to vector<1x256xbf16>
    %c0_38 = arith.constant 0 : index
    %c0_39 = arith.constant 0 : index
    %85 = vector.load %arg26[%c0_38, %c0_39] : memref<256x256xbf16, #tpu.memory_space<vmem>>, vector<256x256xbf16>
    %cst_40 = arith.constant dense<0.000000e+00> : vector<1x256xf32>
    %86 = tpu.matmul %84, %85, %cst_40 {dimension_numbers = #tpu.dot_dimension_numbers<[1], [0], [0], [1], [0, 0, 1, 1], [], []>} : vector<1x256xbf16>, vector<256x256xbf16>, vector<1x256xf32> -> vector<1x256xf32>
    %87 = vector.broadcast %86 : vector<1x256xf32> to vector<16x256xf32>
    %88 = arith.subf %81, %87 : vector<16x256xf32>
    %89 = arith.mulf %88, %88 : vector<16x256xf32>
    %cst_41 = arith.constant dense<0.000000e+00> : vector<256xf32>
    %90 = vector.multi_reduction <add>, %89, %cst_41 [0] : vector<16x256xf32> to vector<256xf32>
    %91 = vector.shape_cast %90 : vector<256xf32> to vector<1x256xf32>
    %92 = arith.truncf %91 : vector<1x256xf32> to vector<1x256xbf16>
    %c0_42 = arith.constant 0 : index
    %c0_43 = arith.constant 0 : index
    %93 = vector.load %arg26[%c0_42, %c0_43] : memref<256x256xbf16, #tpu.memory_space<vmem>>, vector<256x256xbf16>
    %cst_44 = arith.constant dense<0.000000e+00> : vector<1x256xf32>
    %94 = tpu.matmul %92, %93, %cst_44 {dimension_numbers = #tpu.dot_dimension_numbers<[1], [0], [0], [1], [0, 0, 1, 1], [], []>} : vector<1x256xbf16>, vector<256x256xbf16>, vector<1x256xf32> -> vector<1x256xf32>
    %c0_45 = arith.constant 0 : index
    %c0_46 = arith.constant 0 : index
    %95 = vector.load %arg10[%c0_45, %c0_46] : memref<1x256xf32, #tpu.memory_space<vmem>>, vector<1x256xf32>
    %cst_47 = arith.constant 9.99999974E-6 : f32
    %96 = vector.broadcast %cst_47 : f32 to vector<1x256xf32>
    %97 = arith.addf %94, %96 : vector<1x256xf32>
    %98 = math.rsqrt %97 : vector<1x256xf32>
    %99 = arith.mulf %95, %98 : vector<1x256xf32>
    %100 = vector.broadcast %99 : vector<1x256xf32> to vector<16x256xf32>
    %101 = arith.mulf %88, %100 : vector<16x256xf32>
    %c0_48 = arith.constant 0 : index
    %c0_49 = arith.constant 0 : index
    %102 = vector.load %arg13[%c0_48, %c0_49] : memref<1x256xf32, #tpu.memory_space<vmem>>, vector<1x256xf32>
    %103 = vector.broadcast %102 : vector<1x256xf32> to vector<16x256xf32>
    %104 = arith.addf %101, %103 : vector<16x256xf32>
    %cst_50 = arith.constant 2.000000e-01 : f32
    %105 = vector.broadcast %cst_50 : f32 to vector<16x256xf32>
    %106 = arith.mulf %105, %104 : vector<16x256xf32>
    %107 = arith.maximumf %104, %106 : vector<16x256xf32>
    %c4_i32_51 = arith.constant 4 : i32
    %108 = tpu.memref_slice %arg28[%c4_i32_51] : memref<6x!tpu.dma_semaphore, #tpu.memory_space<semaphore_mem>> -> memref<1x!tpu.dma_semaphore, #tpu.memory_space<semaphore_mem>>
    %109 = tpu.memref_squeeze %108 : memref<1x!tpu.dma_semaphore, #tpu.memory_space<semaphore_mem>> -> memref<!tpu.dma_semaphore, #tpu.memory_space<semaphore_mem>>
    tpu.wait_dma2 semaphore(%109 : memref<!tpu.dma_semaphore, #tpu.memory_space<semaphore_mem>>) src(%arg17 : memref<1024x256xbf16, #tpu.memory_space<any>>) dst(%arg24 : memref<1024x256xbf16, #tpu.memory_space<vmem>>)
    %c5_i32_52 = arith.constant 5 : i32
    %110 = tpu.memref_slice %arg28[%c5_i32_52] : memref<6x!tpu.dma_semaphore, #tpu.memory_space<semaphore_mem>> -> memref<1x!tpu.dma_semaphore, #tpu.memory_space<semaphore_mem>>
    %111 = tpu.memref_squeeze %110 : memref<1x!tpu.dma_semaphore, #tpu.memory_space<semaphore_mem>> -> memref<!tpu.dma_semaphore, #tpu.memory_space<semaphore_mem>>
    tpu.wait_dma2 semaphore(%111 : memref<!tpu.dma_semaphore, #tpu.memory_space<semaphore_mem>>) src(%arg20 : memref<256x256xbf16, #tpu.memory_space<any>>) dst(%arg27 : memref<256x256xbf16, #tpu.memory_space<vmem>>)
    %112 = arith.truncf %107 : vector<16x256xf32> to vector<16x256xbf16>
    %c0_53 = arith.constant 0 : index
    %c0_54 = arith.constant 0 : index
    %113 = vector.load %arg5[%c0_53, %c0_54] : memref<32x16xbf16, #tpu.memory_space<vmem>>, vector<32x16xbf16>
    %cst_55 = arith.constant dense<0.000000e+00> : vector<32x256xf32>
    %114 = tpu.matmul %113, %112, %cst_55 {dimension_numbers = #tpu.dot_dimension_numbers<[1], [0], [0], [1], [0, 0, 1, 1], [], []>} : vector<32x16xbf16>, vector<16x256xbf16>, vector<32x256xf32> -> vector<32x256xf32>
    %115 = vector.extract_strided_slice %114 {offsets = [0, 0], sizes = [8, 256], strides = [1, 1]} : vector<32x256xf32> to vector<8x256xf32>
    %116 = vector.extract_strided_slice %114 {offsets = [8, 0], sizes = [8, 256], strides = [1, 1]} : vector<32x256xf32> to vector<8x256xf32>
    %117 = vector.extract_strided_slice %114 {offsets = [16, 0], sizes = [8, 256], strides = [1, 1]} : vector<32x256xf32> to vector<8x256xf32>
    %118 = vector.extract_strided_slice %114 {offsets = [24, 0], sizes = [8, 256], strides = [1, 1]} : vector<32x256xf32> to vector<8x256xf32>
    %119 = tpu.concatenate %115, %116, %117, %118 in 1 : vector<8x256xf32>, vector<8x256xf32>, vector<8x256xf32>, vector<8x256xf32> -> vector<8x1024xf32>
    %120 = arith.truncf %119 : vector<8x1024xf32> to vector<8x1024xbf16>
    %c0_56 = arith.constant 0 : index
    %c0_57 = arith.constant 0 : index
    %121 = vector.load %arg24[%c0_56, %c0_57] : memref<1024x256xbf16, #tpu.memory_space<vmem>>, vector<1024x256xbf16>
    %cst_58 = arith.constant dense<0.000000e+00> : vector<8x256xf32>
    %122 = tpu.matmul %120, %121, %cst_58 {dimension_numbers = #tpu.dot_dimension_numbers<[1], [0], [0], [1], [0, 0, 1, 1], [], []>} : vector<8x1024xbf16>, vector<1024x256xbf16>, vector<8x256xf32> -> vector<8x256xf32>
    %cst_59 = arith.constant dense<0.000000e+00> : vector<256xf32>
    %123 = vector.multi_reduction <add>, %122, %cst_59 [0] : vector<8x256xf32> to vector<256xf32>
    %124 = vector.shape_cast %123 : vector<256xf32> to vector<1x256xf32>
    %125 = arith.truncf %124 : vector<1x256xf32> to vector<1x256xbf16>
    %c0_60 = arith.constant 0 : index
    %c0_61 = arith.constant 0 : index
    %126 = vector.load %arg27[%c0_60, %c0_61] : memref<256x256xbf16, #tpu.memory_space<vmem>>, vector<256x256xbf16>
    %cst_62 = arith.constant dense<0.000000e+00> : vector<1x256xf32>
    %127 = tpu.matmul %125, %126, %cst_62 {dimension_numbers = #tpu.dot_dimension_numbers<[1], [0], [0], [1], [0, 0, 1, 1], [], []>} : vector<1x256xbf16>, vector<256x256xbf16>, vector<1x256xf32> -> vector<1x256xf32>
    %128 = vector.broadcast %127 : vector<1x256xf32> to vector<8x256xf32>
    %129 = arith.subf %122, %128 : vector<8x256xf32>
    %130 = arith.mulf %129, %129 : vector<8x256xf32>
    %cst_63 = arith.constant dense<0.000000e+00> : vector<256xf32>
    %131 = vector.multi_reduction <add>, %130, %cst_63 [0] : vector<8x256xf32> to vector<256xf32>
    %132 = vector.shape_cast %131 : vector<256xf32> to vector<1x256xf32>
    %133 = arith.truncf %132 : vector<1x256xf32> to vector<1x256xbf16>
    %c0_64 = arith.constant 0 : index
    %c0_65 = arith.constant 0 : index
    %134 = vector.load %arg27[%c0_64, %c0_65] : memref<256x256xbf16, #tpu.memory_space<vmem>>, vector<256x256xbf16>
    %cst_66 = arith.constant dense<0.000000e+00> : vector<1x256xf32>
    %135 = tpu.matmul %133, %134, %cst_66 {dimension_numbers = #tpu.dot_dimension_numbers<[1], [0], [0], [1], [0, 0, 1, 1], [], []>} : vector<1x256xbf16>, vector<256x256xbf16>, vector<1x256xf32> -> vector<1x256xf32>
    %c0_67 = arith.constant 0 : index
    %c0_68 = arith.constant 0 : index
    %136 = vector.load %arg11[%c0_67, %c0_68] : memref<1x256xf32, #tpu.memory_space<vmem>>, vector<1x256xf32>
    %cst_69 = arith.constant 9.99999974E-6 : f32
    %137 = vector.broadcast %cst_69 : f32 to vector<1x256xf32>
    %138 = arith.addf %135, %137 : vector<1x256xf32>
    %139 = math.rsqrt %138 : vector<1x256xf32>
    %140 = arith.mulf %136, %139 : vector<1x256xf32>
    %141 = vector.broadcast %140 : vector<1x256xf32> to vector<8x256xf32>
    %142 = arith.mulf %129, %141 : vector<8x256xf32>
    %c0_70 = arith.constant 0 : index
    %c0_71 = arith.constant 0 : index
    %143 = vector.load %arg14[%c0_70, %c0_71] : memref<1x256xf32, #tpu.memory_space<vmem>>, vector<1x256xf32>
    %144 = vector.broadcast %143 : vector<1x256xf32> to vector<8x256xf32>
    %145 = arith.addf %142, %144 : vector<8x256xf32>
    %cst_72 = arith.constant 2.000000e-01 : f32
    %146 = vector.broadcast %cst_72 : f32 to vector<8x256xf32>
    %147 = arith.mulf %146, %145 : vector<8x256xf32>
    %148 = arith.maximumf %145, %147 : vector<8x256xf32>
    %c0_73 = arith.constant 0 : index
    %c0_74 = arith.constant 0 : index
    %149 = vector.load %arg7[%c0_73, %c0_74] : memref<8x256xbf16, #tpu.memory_space<vmem>>, vector<8x256xbf16>
    %150 = arith.extf %149 : vector<8x256xbf16> to vector<8x256xf32>
    %151 = arith.mulf %148, %150 : vector<8x256xf32>
    %cst_75 = arith.constant dense<0.000000e+00> : vector<8xf32>
    %152 = vector.multi_reduction <add>, %151, %cst_75 [1] : vector<8x256xf32> to vector<8xf32>
    %153 = vector.shape_cast %152 : vector<8xf32> to vector<8x1xf32>
    %c0_76 = arith.constant 0 : index
    %c0_77 = arith.constant 0 : index
    %154 = vector.load %arg8[%c0_76, %c0_77] : memref<2x8xf32, #tpu.memory_space<vmem>>, vector<2x8xf32>
    %cst_78 = arith.constant dense<0.000000e+00> : vector<2x1xf32>
    %155 = tpu.matmul %154, %153, %cst_78 {dimension_numbers = #tpu.dot_dimension_numbers<[1], [0], [0], [1], [0, 0, 1, 1], [], []>} : vector<2x8xf32>, vector<8x1xf32>, vector<2x1xf32> -> vector<2x1xf32>
    %cst_79 = arith.constant 0.000000e+00 : f32
    %156 = vector.broadcast %cst_79 : f32 to vector<2x1xf32>
    %157 = arith.subf %156, %155 : vector<2x1xf32>
    %158 = math.exp %157 : vector<2x1xf32>
    %cst_80 = arith.constant 1.000000e+00 : f32
    %159 = vector.broadcast %cst_80 : f32 to vector<2x1xf32>
    %160 = arith.addf %159, %158 : vector<2x1xf32>
    %cst_81 = arith.constant 1.000000e+00 : f32
    %161 = vector.broadcast %cst_81 : f32 to vector<2x1xf32>
    %162 = arith.divf %161, %160 : vector<2x1xf32>
    %c0_82 = arith.constant 0 : index
    %c0_83 = arith.constant 0 : index
    %163 = vector.load %arg21[%c0_82, %c0_83] : memref<2x1xf32, #tpu.memory_space<vmem>>, vector<2x1xf32>
    tpu.vector_store %arg21[%c0_82, %c0_83], %162 {strides = array<i32>} : memref<2x1xf32, #tpu.memory_space<vmem>>, vector<2x1xf32>,
    return
  }
  func.func @transform_0(%arg0: i32) -> (i32, i32) {
    %c0_i32 = arith.constant 0 : i32
    %c0_i32_0 = arith.constant 0 : i32
    %c0_i32_1 = arith.constant 0 : i32
    return %c0_i32, %c0_i32_0 : i32, i32
  }
  func.func @transform_1(%arg0: i32) -> (i32, i32) {
    %c0_i32 = arith.constant 0 : i32
    %c0_i32_0 = arith.constant 0 : i32
    %c0_i32_1 = arith.constant 0 : i32
    return %c0_i32, %c0_i32_0 : i32, i32
  }
  func.func @transform_2(%arg0: i32) -> (i32, i32) {
    %c0_i32 = arith.constant 0 : i32
    %c0_i32_0 = arith.constant 0 : i32
    %c0_i32_1 = arith.constant 0 : i32
    return %c0_i32, %c0_i32_0 : i32, i32
  }
  func.func @transform_3(%arg0: i32) -> (i32, i32) {
    %c0_i32 = arith.constant 0 : i32
    %c0_i32_0 = arith.constant 0 : i32
    %c0_i32_1 = arith.constant 0 : i32
    return %c0_i32, %c0_i32_0 : i32, i32
  }
  func.func @transform_4(%arg0: i32) -> (i32, i32) {
    %c0_i32 = arith.constant 0 : i32
    %c0_i32_0 = arith.constant 0 : i32
    %c0_i32_1 = arith.constant 0 : i32
    return %c0_i32, %c0_i32_0 : i32, i32
  }
  func.func @transform_5(%arg0: i32) -> (i32, i32) {
    %c0_i32 = arith.constant 0 : i32
    %c0_i32_0 = arith.constant 0 : i32
    %c0_i32_1 = arith.constant 0 : i32
    return %c0_i32, %c0_i32_0 : i32, i32
  }
  func.func @transform_6(%arg0: i32) -> (i32, i32) {
    %c0_i32 = arith.constant 0 : i32
    %c0_i32_0 = arith.constant 0 : i32
    %c0_i32_1 = arith.constant 0 : i32
    return %c0_i32, %c0_i32_0 : i32, i32
  }
  func.func @transform_7(%arg0: i32) -> (i32, i32) {
    %c0_i32 = arith.constant 0 : i32
    %c0_i32_0 = arith.constant 0 : i32
    %c0_i32_1 = arith.constant 0 : i32
    return %c0_i32, %c0_i32_0 : i32, i32
  }
  func.func @transform_8(%arg0: i32) -> (i32, i32) {
    %c0_i32 = arith.constant 0 : i32
    %c0_i32_0 = arith.constant 0 : i32
    %c0_i32_1 = arith.constant 0 : i32
    return %c0_i32, %c0_i32_0 : i32, i32
  }
  func.func @transform_9(%arg0: i32) -> (i32, i32) {
    %c0_i32 = arith.constant 0 : i32
    %c0_i32_0 = arith.constant 0 : i32
    %c0_i32_1 = arith.constant 0 : i32
    return %c0_i32, %c0_i32_0 : i32, i32
  }
  func.func @transform_10(%arg0: i32) -> (i32, i32) {
    %c0_i32 = arith.constant 0 : i32
    %c0_i32_0 = arith.constant 0 : i32
    %c0_i32_1 = arith.constant 0 : i32
    return %c0_i32, %c0_i32_0 : i32, i32
  }
  func.func @transform_11(%arg0: i32) -> (i32, i32) {
    %c0_i32 = arith.constant 0 : i32
    %c0_i32_0 = arith.constant 0 : i32
    %c0_i32_1 = arith.constant 0 : i32
    return %c0_i32, %c0_i32_0 : i32, i32
  }
  func.func @transform_12(%arg0: i32) -> (i32, i32) {
    %c0_i32 = arith.constant 0 : i32
    %c0_i32_0 = arith.constant 0 : i32
    %c0_i32_1 = arith.constant 0 : i32
    return %c0_i32, %c0_i32_0 : i32, i32
  }
  func.func @transform_13(%arg0: i32) -> (i32, i32) {
    %c0_i32 = arith.constant 0 : i32
    %c0_i32_0 = arith.constant 0 : i32
    %c0_i32_1 = arith.constant 0 : i32
    return %c0_i32, %c0_i32_0 : i32, i32
  }
  func.func @transform_20(%arg0: i32) -> (i32, i32) {
    %c0_i32 = arith.constant 0 : i32
    %c0_i32_0 = arith.constant 0 : i32
    %c0_i32_1 = arith.constant 0 : i32
    return %c0_i32, %c0_i32_0 : i32, i32
  }
}

</mosaic_0001>

<bundles_post_ra>
// kernel: tile.37
= control target key start
LH: loop header
LB: loop body
LE: loop exit
PB: predicated region body
PF: predicated region fallthrough
CT: control target
= control target key end

     0   :  { %s28_s0 = inlined_call_operand.vmem [shape: f32[16], index: 0, kind: input, shape index: {}]   ;;  %s29_s1 = inlined_call_operand.vmem [shape: f32[16,16], index: 1, kind: output, shape index: {}]  }
   0x1   :  { %v4_v0 = vld [vmem:[%s28_s0] ss:$0 sm:$0xff] }
   0x2   :  { %5 = vst [vmem:[%s29_s1] sm:$0xff] %v4_v0  ;;  %8 = vst [vmem:[%s29_s1 + $0x8] sm:$0xff] %v4_v0 }

// kernel: tile.38
= control target key start
LH: loop header
LB: loop body
LE: loop exit
PB: predicated region body
PF: predicated region fallthrough
CT: control target
= control target key end

     0   :  { %s7_s6 = smov 3  ;;  %s21_s9 = smov 3  ;;  %vm4_vm0 = vcmask 130048   ;;  %vm11_vm1 = vcmask 1048448   ;;  %vm18_vm2 = vcmask 917248   ;;  %vm25_vm3 = vcmask 786048   ;;  %s128_s0 = inlined_call_operand.vmem [shape: f32[16,16], index: 0, kind: input, shape index: {}]   ;;  %s129_s1 = inlined_call_operand.vmem [shape: f32[1,256], index: 1, kind: output, shape index: {}]  }
   0x1   :  { %v66_v0 = vld [vmem:[%s128_s0 + $0x7] ss:$8 sm:%s7_s6]   ;;  %s81_s10 = smov 112   ;;  %v68_v1 = vld [vmem:[%s128_s0 + $0x5] ss:$8 sm:%s21_s9]   ;;  %s14_s13 = smov 3 }
   0x2   :  { %9 = vrot.lane.b32.xlu0 %v66_v0, %s81_s10  ;;  %s82_s14 = smov 80   ;;  %v67_v2 = vld [vmem:[%s128_s0 + $0x6] ss:$8 sm:%s14_s13]   ;;  %s28_s17 = smov 3  ;;  %vm32_vm4 = vcmask 654848   ;;  %vm39_vm5 = vcmask 523648  }
   0x3   :  { %23 = vrot.lane.b32.xlu1 %v68_v1, %s82_s14  ;;  %v69_v3 = vld [vmem:[%s128_s0 + $0x4] ss:$8 sm:%s28_s17]   ;;  %s35_s20 = smov 3  ;;  %s42_s21 = smov 3  ;;  %vm46_vm6 = vcmask 392448   ;;  %vm53_vm7 = vcmask 261248  }
   0x4   :  { %s83_s22 = smov 96   ;;  %s84_s23 = smov 64   ;;  %v70_v4 = vld [vmem:[%s128_s0 + $0x3] ss:$8 sm:%s35_s20]   ;;  %v71_v5 = vld [vmem:[%s128_s0 + $0x2] ss:$8 sm:%s42_s21]  }
   0x5   :  { %s2_s26 = smov 3  ;;  %s49_s29 = smov 3 }
   0x6   :  { %16 = vrot.lane.b32.xlu0 %v67_v2, %s83_s22  ;;  %v3_v6 = vld [vmem:[%s128_s0] ss:$8 sm:%s2_s26]   ;;  %s85_s3 = smov 48   ;;  %s86_s4 = smov 32  }
   0x7   :  { %30 = vrot.lane.b32.xlu1 %v69_v3, %s84_s23  ;;  %5 = vst.msk [vmem:[#allocation0] ss:$8 sm:$0x3] %vm4_vm0, %v3_v6   ;;  %v72_v7 = vld [vmem:[%s128_s0 + $0x1] ss:$8 sm:%s49_s29]   ;;  %s87_s0 = smov 16  }
   0xa   :  { %37 = vrot.lane.b32.xlu0 %v70_v4, %s85_s3 }
   0xb   :  { %44 = vrot.lane.b32.xlu1 %v71_v5, %s86_s4 }
   0xe   :  { %51 = vrot.lane.b32.xlu0 %v72_v7, %s87_s0 }
  0x74   :  { %v10_v8 = vpop.permute.xlu0 %9  }
  0x75   :  { %12 = vst.msk [vmem:[#allocation0] ss:$8 sm:$0x3] %vm11_vm1, %v10_v8   ;;  %v24_v9 = vpop.permute.xlu1 %23  }
  0x78   :  { %v17_v10 = vpop.permute.xlu0 %16  }
  0x79   :  { %19 = vst.msk [vmem:[#allocation0] ss:$8 sm:$0x3] %vm18_vm2, %v17_v10   ;;  %v31_v11 = vpop.permute.xlu1 %30  }
  0x7a   :  { %26 = vst.msk [vmem:[#allocation0] ss:$8 sm:$0x3] %vm25_vm3, %v24_v9  }
  0x7b   :  { %33 = vst.msk [vmem:[#allocation0] ss:$8 sm:$0x3] %vm32_vm4, %v31_v11  }
  0x7c   :  { %v38_v12 = vpop.permute.xlu0 %37  }
  0x7d   :  { %40 = vst.msk [vmem:[#allocation0] ss:$8 sm:$0x3] %vm39_vm5, %v38_v12   ;;  %v45_v13 = vpop.permute.xlu1 %44  }
  0x7e   :  { %47 = vst.msk [vmem:[#allocation0] ss:$8 sm:$0x3] %vm46_vm6, %v45_v13  }
  0x80   :  { %v52_v14 = vpop.permute.xlu0 %51  }
  0x81   :  { %54 = vst.msk [vmem:[#allocation0] ss:$8 sm:$0x3] %vm53_vm7, %v52_v14  }
  0x88   :  { %v58_v15 = vld [vmem:[#allocation0] sm:$0x1]  ;;  %v62_v16 = vld [vmem:[#allocation0 + $0x8] sm:$0x1] }
  0x89   :  { %60 = vst [vmem:[%s129_s1] sm:$0x1] %v58_v15  ;;  %73 = vst [vmem:[%s129_s1 + $0x1] sm:$0x1] %v62_v16 }

// kernel: tile.47
= control target key start
LH: loop header
LB: loop body
LE: loop exit
PB: predicated region body
PF: predicated region fallthrough
CT: control target
= control target key end

     0   :  { %s22_s0 = inlined_call_operand.vmem [shape: f32[32], index: 0, kind: input, shape index: {}]   ;;  %s23_s1 = inlined_call_operand.vmem [shape: f32[8,32], index: 1, kind: output, shape index: {}]  }
   0x1   :  { %v4_v0 = vld [vmem:[%s22_s0] ss:$0 sm:$0xff] }
   0x2   :  { %5 = vst [vmem:[%s23_s1] sm:$0xff] %v4_v0 }

// kernel: tile.48
= control target key start
LH: loop header
LB: loop body
LE: loop exit
PB: predicated region body
PF: predicated region fallthrough
CT: control target
= control target key end

     0   :  { %s7_s6 = smov 3  ;;  %s14_s9 = smov 3  ;;  %vm4_vm0 = vcmask 261120   ;;  %vm11_vm1 = vcmask 1048320   ;;  %vm18_vm2 = vcmask 785920   ;;  %vm25_vm3 = vcmask 523520   ;;  %s76_s0 = inlined_call_operand.vmem [shape: f32[8,32], index: 0, kind: input, shape index: {}]   ;;  %s77_s1 = inlined_call_operand.vmem [shape: f32[1,256], index: 1, kind: output, shape index: {}]  }
   0x1   :  { %v38_v0 = vld [vmem:[%s76_s0 + $0x3] ss:$4 sm:%s7_s6]   ;;  %s45_s10 = smov 96   ;;  %s21_s11 = smov 3  ;;  %v39_v1 = vld [vmem:[%s76_s0 + $0x2] ss:$4 sm:%s14_s9]  }
   0x2   :  { %9 = vrot.lane.b32.xlu0 %v38_v0, %s45_s10  ;;  %v40_v2 = vld [vmem:[%s76_s0 + $0x1] ss:$4 sm:%s21_s11]   ;;  %s2_s16 = smov 3  ;;  %s46_s17 = smov 32  }
   0x3   :  { %23 = vrot.lane.b32.xlu1 %v40_v2, %s46_s17  ;;  %v3_v3 = vld [vmem:[%s76_s0] ss:$4 sm:%s2_s16]   ;;  %s47_s0 = smov 64  }
   0x4   :  { %5 = vst.msk [vmem:[#allocation0] ss:$8 sm:$0x3] %vm4_vm0, %v3_v3  }
   0x6   :  { %16 = vrot.lane.b32.xlu0 %v39_v1, %s47_s0 }
  0x74   :  { %v10_v4 = vpop.permute.xlu0 %9  }
  0x75   :  { %12 = vst.msk [vmem:[#allocation0] ss:$8 sm:$0x3] %vm11_vm1, %v10_v4   ;;  %v24_v5 = vpop.permute.xlu1 %23  }
  0x78   :  { %v17_v6 = vpop.permute.xlu0 %16  }
  0x79   :  { %19 = vst.msk [vmem:[#allocation0] ss:$8 sm:$0x3] %vm18_vm2, %v17_v6  }
  0x7a   :  { %26 = vst.msk [vmem:[#allocation0] ss:$8 sm:$0x3] %vm25_vm3, %v24_v5  }
  0x81   :  { %v30_v7 = vld [vmem:[#allocation0] sm:$0x1]  ;;  %v34_v8 = vld [vmem:[#allocation0 + $0x8] sm:$0x1] }
  0x82   :  { %32 = vst [vmem:[%s77_s1] sm:$0x1] %v30_v7  ;;  %41 = vst [vmem:[%s77_s1 + $0x1] sm:$0x1] %v34_v8 }

// kernel: tile.57
= control target key start
LH: loop header
LB: loop body
LE: loop exit
PB: predicated region body
PF: predicated region fallthrough
CT: control target
= control target key end

     0   :  { %s22_s0 = inlined_call_operand.vmem [shape: f32[64], index: 0, kind: input, shape index: {}]   ;;  %s23_s1 = inlined_call_operand.vmem [shape: f32[4,64], index: 1, kind: output, shape index: {}]  }
   0x1   :  { %v4_v0 = vld [vmem:[%s22_s0] ss:$0 sm:$0xff] }
   0x2   :  { %5 = vst [vmem:[%s23_s1] sm:$0xf] %v4_v0 }

// kernel: tile.58
= control target key start
LH: loop header
LB: loop body
LE: loop exit
PB: predicated region body
PF: predicated region fallthrough
CT: control target
= control target key end

     0   :  { %s6_s8 = smov 3  ;;  %vm8_vm0 = vcmask 523264   ;;  %s30_s9 = smov 64   ;;  %vm15_vm1 = vcmask 1048064   ;;  %s50_s0 = inlined_call_operand.vmem [shape: f32[4,64], index: 0, kind: input, shape index: {}]   ;;  %s51_s1 = inlined_call_operand.vmem [shape: f32[1,256], index: 1, kind: output, shape index: {}]  }
   0x1   :  { %v4_v0 = vld [vmem:[%s50_s0] sm:$0xf]  ;;  %s11_s0 = smov 3 }
   0x2   :  { %5 = vst [vmem:[#allocation1] sm:$0xf] %v4_v0 }
   0x9   :  { %v12_v1 = vld [vmem:[#allocation1 + $0x1] ss:$2 sm:%s11_s0]   ;;  %v7_v2 = vld [vmem:[#allocation1] ss:$2 sm:%s6_s8]  }
   0xa   :  { %13 = vrot.lane.b32.xlu0 %v12_v1, %s30_s9  ;;  %9 = vst.msk [vmem:[#allocation0] ss:$8 sm:$0x3] %vm8_vm0, %v7_v2  }
  0x7c   :  { %v14_v3 = vpop.permute.xlu0 %13  }
  0x7d   :  { %16 = vst.msk [vmem:[#allocation0] ss:$8 sm:$0x3] %vm15_vm1, %v14_v3  }
  0x84   :  { %v20_v4 = vld [vmem:[#allocation0] sm:$0x1]  ;;  %v24_v5 = vld [vmem:[#allocation0 + $0x8] sm:$0x1] }
  0x85   :  { %22 = vst [vmem:[%s51_s1] sm:$0x1] %v20_v4  ;;  %28 = vst [vmem:[%s51_s1 + $0x1] sm:$0x1] %v24_v5 }

// kernel: discriminator_forward.1
= control target key start
LH: loop header
LB: loop body
LE: loop exit
PB: predicated region body
PF: predicated region fallthrough
CT: control target
= control target key end

     0   :  { %s11065_s0 = inlined_call_operand.vmem [shape: bf16[128,128], index: 0, kind: input, shape index: {}]   ;;  %s11066_s1 = inlined_call_operand.vmem [shape: bf16[256,128], index: 1, kind: input, shape index: {}]   ;;  %s11067_s2 = inlined_call_operand.vmem [shape: bf16[128,64], index: 2, kind: input, shape index: {}]   ;;  %s11068_s3 = inlined_call_operand.vmem [shape: bf16[64,32], index: 3, kind: input, shape index: {}]   ;;  %s11069_s4 = inlined_call_operand.vmem [shape: bf16[32,16], index: 4, kind: input, shape index: {}]   ;;  %s11070_s5 = inlined_call_operand.vmem [shape: bf16[512,256], index: 5, kind: input, shape index: {}]   ;;  %s11071_s6 = inlined_call_operand.vmem [shape: bf16[8,256], index: 6, kind: input, shape index: {}]   ;;  %s11072_s7 = inlined_call_operand.vmem [shape: f32[2,8], index: 7, kind: input, shape index: {}]   ;;  %s11073_s8 = inlined_call_operand.vmem [shape: f32[1,256], index: 8, kind: input, shape index: {}]   ;;  %s11074_s9 = inlined_call_operand.vmem [shape: f32[1,256], index: 9, kind: input, shape index: {}]   ;;  %s11075_s10 = inlined_call_operand.vmem [shape: f32[1,256], index: 10, kind: input, shape index: {}]   ;;  %s11076_s11 = inlined_call_operand.vmem [shape: f32[1,256], index: 11, kind: input, shape index: {}]   ;;  %s11077_s12 = inlined_call_operand.vmem [shape: f32[1,256], index: 12, kind: input, shape index: {}]   ;;  %s11078_s13 = inlined_call_operand.vmem [shape: f32[1,256], index: 13, kind: input, shape index: {}]   ;;  %s11079_s14 = inlined_call_operand.vmem [shape: bf16[1024,256], index: 14, kind: input, shape index: {}]   ;;  %s11080_s15 = inlined_call_operand.vmem [shape: bf16[1024,256], index: 15, kind: input, shape index: {}]   ;;  %s11081_s16 = inlined_call_operand.vmem [shape: bf16[1024,256], index: 16, kind: input, shape index: {}]   ;;  %s11082_s17 = inlined_call_operand.vmem [shape: bf16[256,256], index: 17, kind: input, shape index: {}]   ;;  %s11083_s18 = inlined_call_operand.vmem [shape: bf16[256,256], index: 18, kind: input, shape index: {}]   ;;  %s11084_s19 = inlined_call_operand.vmem [shape: bf16[256,256], index: 19, kind: input, shape index: {}]   ;;  %s11085_s20 = inlined_call_operand.vmem [shape: f32[2,1], index: 20, kind: output, shape index: {}]  }
   0x1   :  { %11091 = sst [smem:[#allocation21_spill]] %s11065_s0  ;;  %v71_v0 = vld [vmem:[%s11079_s14] sm:$0xf]  ;;  %v73_v1 = vld [vmem:[%s11079_s14 + $0x8] sm:$0xf]  ;;  %v77_v3 = vld [vmem:[%s11079_s14 + $0xc] sm:$0xff]  }
   0x2   :  { %11092 = sst [smem:[#allocation22_spill]] %s11066_s1  ;;  %v75_v2 = vld [vmem:[%s11079_s14 + $0x4] sm:$0xf]  ;;  %72 = vst [vmem:[#allocation2] sm:$0xf] %v71_v0  ;;  %78 = vst [vmem:[#allocation2 + $0xc] sm:$0xff] %v77_v3  }
   0x3   :  { %11093 = sst [smem:[#allocation23_spill]] %s11067_s2  ;;  %74 = vst [vmem:[#allocation2 + $0x4] sm:$0xf] %v73_v1  ;;  %76 = vst [vmem:[#allocation2 + $0x8] sm:$0xf] %v75_v2  ;;  %v85_v6 = vld [vmem:[%s11079_s14 + $0x1c] sm:$0xff]  }
   0x4   :  { %11094 = sst [smem:[#allocation24_spill]] %s11068_s3  ;;  %v81_v4 = vld [vmem:[%s11079_s14 + $0x18] sm:$0xf]  ;;  %v83_v5 = vld [vmem:[%s11079_s14 + $0x14] sm:$0xf]  ;;  %86 = vst [vmem:[#allocation2 + $0x1c] sm:$0xff] %v85_v6  }
   0x5   :  { %11095 = sst [smem:[#allocation25_spill]] %s11069_s4  ;;  %82 = vst [vmem:[#allocation2 + $0x14] sm:$0xf] %v81_v4  ;;  %84 = vst [vmem:[#allocation2 + $0x18] sm:$0xf] %v83_v5  ;;  %v93_v9 = vld [vmem:[%s11079_s14 + $0x2c] sm:$0xff]  }
   0x6   :  { %v89_v7 = vld [vmem:[%s11079_s14 + $0x28] sm:$0xf]  ;;  %v91_v8 = vld [vmem:[%s11079_s14 + $0x24] sm:$0xf]  ;;  %v97_v10 = vld [vmem:[%s11079_s14 + $0x38] sm:$0xf] }
   0x7   :  { %90 = vst [vmem:[#allocation2 + $0x24] sm:$0xf] %v89_v7  ;;  %92 = vst [vmem:[#allocation2 + $0x28] sm:$0xf] %v91_v8  ;;  %v99_v11 = vld [vmem:[%s11079_s14 + $0x34] sm:$0xf] }
   0x8   :  { %94 = vst [vmem:[#allocation2 + $0x2c] sm:$0xff] %v93_v9   ;;  %98 = vst [vmem:[#allocation2 + $0x34] sm:$0xf] %v97_v10  ;;  %v101_v12 = vld [vmem:[%s11079_s14 + $0x3c] sm:$0xff]   ;;  %v105_v13 = vld [vmem:[%s11079_s14 + $0x48] sm:$0xf] }
   0x9   :  { %100 = vst [vmem:[#allocation2 + $0x38] sm:$0xf] %v99_v11  ;;  %v107_v14 = vld [vmem:[%s11079_s14 + $0x44] sm:$0xf]  ;;  %102 = vst [vmem:[#allocation2 + $0x3c] sm:$0xff] %v101_v12   ;;  %v109_v15 = vld [vmem:[%s11079_s14 + $0x4c] sm:$0xff]  }
   0xa   :  { %106 = vst [vmem:[#allocation2 + $0x44] sm:$0xf] %v105_v13  ;;  %108 = vst [vmem:[#allocation2 + $0x48] sm:$0xf] %v107_v14  ;;  %v113_v16 = vld [vmem:[%s11079_s14 + $0x58] sm:$0xf] }
   0xb   :  { %v115_v17 = vld [vmem:[%s11079_s14 + $0x54] sm:$0xf]  ;;  %110 = vst [vmem:[#allocation2 + $0x4c] sm:$0xff] %v109_v15   ;;  %114 = vst [vmem:[#allocation2 + $0x54] sm:$0xf] %v113_v16  ;;  %v117_v18 = vld [vmem:[%s11079_s14 + $0x5c] sm:$0xff]  }
   0xc   :  { %116 = vst [vmem:[#allocation2 + $0x58] sm:$0xf] %v115_v17  ;;  %v121_v19 = vld [vmem:[%s11079_s14 + $0x68] sm:$0xf]  ;;  %v123_v20 = vld [vmem:[%s11079_s14 + $0x64] sm:$0xf] }
   0xd   :  { %118 = vst [vmem:[#allocation2 + $0x5c] sm:$0xff] %v117_v18   ;;  %122 = vst [vmem:[#allocation2 + $0x64] sm:$0xf] %v121_v19  ;;  %v125_v21 = vld [vmem:[%s11079_s14 + $0x6c] sm:$0xff]   ;;  %v129_v22 = vld [vmem:[%s11079_s14 + $0x78] sm:$0xf] }
   0xe   :  { %124 = vst [vmem:[#allocation2 + $0x68] sm:$0xf] %v123_v20  ;;  %v131_v23 = vld [vmem:[%s11079_s14 + $0x74] sm:$0xf]  ;;  %126 = vst [vmem:[#allocation2 + $0x6c] sm:$0xff] %v125_v21   ;;  %v133_v24 = vld [vmem:[%s11079_s14 + $0x7c] sm:$0xff]  }
   0xf   :  { %130 = vst [vmem:[#allocation2 + $0x74] sm:$0xf] %v129_v22  ;;  %132 = vst [vmem:[#allocation2 + $0x78] sm:$0xf] %v131_v23  ;;  %v137_v25 = vld [vmem:[%s11079_s14 + $0x88] sm:$0xf] }
  0x10   :  { %v139_v26 = vld [vmem:[%s11079_s14 + $0x84] sm:$0xf]  ;;  %134 = vst [vmem:[#allocation2 + $0x7c] sm:$0xff] %v133_v24   ;;  %138 = vst [vmem:[#allocation2 + $0x84] sm:$0xf] %v137_v25  ;;  %v141_v27 = vld [vmem:[%s11079_s14 + $0x8c] sm:$0xff]  }
  0x11   :  { %140 = vst [vmem:[#allocation2 + $0x88] sm:$0xf] %v139_v26  ;;  %v145_v28 = vld [vmem:[%s11079_s14 + $0x98] sm:$0xf]  ;;  %v147_v29 = vld [vmem:[%s11079_s14 + $0x94] sm:$0xf] }
  0x12   :  { %142 = vst [vmem:[#allocation2 + $0x8c] sm:$0xff] %v141_v27   ;;  %146 = vst [vmem:[#allocation2 + $0x94] sm:$0xf] %v145_v28  ;;  %v149_v30 = vld [vmem:[%s11079_s14 + $0x9c] sm:$0xff]   ;;  %v153_v31 = vld [vmem:[%s11079_s14 + $0xa8] sm:$0xf] }
  0x13   :  { %148 = vst [vmem:[#allocation2 + $0x98] sm:$0xf] %v147_v29  ;;  %v155_v32 = vld [vmem:[%s11079_s14 + $0xa4] sm:$0xf]  ;;  %150 = vst [vmem:[#allocation2 + $0x9c] sm:$0xff] %v149_v30   ;;  %v157_v33 = vld [vmem:[%s11079_s14 + $0xac] sm:$0xff]  }
  0x14   :  { %154 = vst [vmem:[#allocation2 + $0xa4] sm:$0xf] %v153_v31  ;;  %156 = vst [vmem:[#allocation2 + $0xa8] sm:$0xf] %v155_v32  ;;  %v161_v34 = vld [vmem:[%s11079_s14 + $0xb8] sm:$0xf] }
  0x15   :  { %v163_v35 = vld [vmem:[%s11079_s14 + $0xb4] sm:$0xf]  ;;  %158 = vst [vmem:[#allocation2 + $0xac] sm:$0xff] %v157_v33   ;;  %162 = vst [vmem:[#allocation2 + $0xb4] sm:$0xf] %v161_v34  ;;  %v165_v36 = vld [vmem:[%s11079_s14 + $0xbc] sm:$0xff]  }
  0x16   :  { %164 = vst [vmem:[#allocation2 + $0xb8] sm:$0xf] %v163_v35  ;;  %v169_v37 = vld [vmem:[%s11079_s14 + $0xc8] sm:$0xf]  ;;  %v171_v38 = vld [vmem:[%s11079_s14 + $0xc4] sm:$0xf] }
  0x17   :  { %166 = vst [vmem:[#allocation2 + $0xbc] sm:$0xff] %v165_v36   ;;  %170 = vst [vmem:[#allocation2 + $0xc4] sm:$0xf] %v169_v37  ;;  %v173_v39 = vld [vmem:[%s11079_s14 + $0xcc] sm:$0xff]   ;;  %v177_v40 = vld [vmem:[%s11079_s14 + $0xd8] sm:$0xf] }
  0x18   :  { %172 = vst [vmem:[#allocation2 + $0xc8] sm:$0xf] %v171_v38  ;;  %v179_v41 = vld [vmem:[%s11079_s14 + $0xd4] sm:$0xf]  ;;  %174 = vst [vmem:[#allocation2 + $0xcc] sm:$0xff] %v173_v39   ;;  %v181_v42 = vld [vmem:[%s11079_s14 + $0xdc] sm:$0xff]  }
  0x19   :  { %178 = vst [vmem:[#allocation2 + $0xd4] sm:$0xf] %v177_v40  ;;  %180 = vst [vmem:[#allocation2 + $0xd8] sm:$0xf] %v179_v41  ;;  %v185_v43 = vld [vmem:[%s11079_s14 + $0xe8] sm:$0xf] }
  0x1a   :  { %v187_v44 = vld [vmem:[%s11079_s14 + $0xe4] sm:$0xf]  ;;  %182 = vst [vmem:[#allocation2 + $0xdc] sm:$0xff] %v181_v42   ;;  %186 = vst [vmem:[#allocation2 + $0xe4] sm:$0xf] %v185_v43  ;;  %v189_v45 = vld [vmem:[%s11079_s14 + $0xec] sm:$0xff]  }
  0x1b   :  { %188 = vst [vmem:[#allocation2 + $0xe8] sm:$0xf] %v187_v44  ;;  %v193_v46 = vld [vmem:[%s11079_s14 + $0xf8] sm:$0xf]  ;;  %v195_v47 = vld [vmem:[%s11079_s14 + $0xf4] sm:$0xf] }
  0x1c   :  { %190 = vst [vmem:[#allocation2 + $0xec] sm:$0xff] %v189_v45   ;;  %194 = vst [vmem:[#allocation2 + $0xf4] sm:$0xf] %v193_v46  ;;  %v197_v48 = vld [vmem:[%s11079_s14 + $0xfc] sm:$0xff]   ;;  %v201_v49 = vld [vmem:[%s11079_s14 + $0x108] sm:$0xf] }
  0x1d   :  { %196 = vst [vmem:[#allocation2 + $0xf8] sm:$0xf] %v195_v47  ;;  %v203_v50 = vld [vmem:[%s11079_s14 + $0x104] sm:$0xf]  ;;  %198 = vst [vmem:[#allocation2 + $0xfc] sm:$0xff] %v197_v48   ;;  %v205_v51 = vld [vmem:[%s11079_s14 + $0x10c] sm:$0xff]  }
  0x1e   :  { %202 = vst [vmem:[#allocation2 + $0x104] sm:$0xf] %v201_v49  ;;  %204 = vst [vmem:[#allocation2 + $0x108] sm:$0xf] %v203_v50  ;;  %v209_v52 = vld [vmem:[%s11079_s14 + $0x118] sm:$0xf] }
  0x1f   :  { %v211_v53 = vld [vmem:[%s11079_s14 + $0x114] sm:$0xf]  ;;  %206 = vst [vmem:[#allocation2 + $0x10c] sm:$0xff] %v205_v51   ;;  %210 = vst [vmem:[#allocation2 + $0x114] sm:$0xf] %v209_v52  ;;  %v213_v54 = vld [vmem:[%s11079_s14 + $0x11c] sm:$0xff]  }
  0x20   :  { %212 = vst [vmem:[#allocation2 + $0x118] sm:$0xf] %v211_v53  ;;  %v217_v55 = vld [vmem:[%s11079_s14 + $0x128] sm:$0xf]  ;;  %v219_v56 = vld [vmem:[%s11079_s14 + $0x124] sm:$0xf] }
  0x21   :  { %214 = vst [vmem:[#allocation2 + $0x11c] sm:$0xff] %v213_v54   ;;  %218 = vst [vmem:[#allocation2 + $0x124] sm:$0xf] %v217_v55  ;;  %v221_v57 = vld [vmem:[%s11079_s14 + $0x12c] sm:$0xff]   ;;  %v225_v58 = vld [vmem:[%s11079_s14 + $0x138] sm:$0xf] }
  0x22   :  { %220 = vst [vmem:[#allocation2 + $0x128] sm:$0xf] %v219_v56  ;;  %v227_v59 = vld [vmem:[%s11079_s14 + $0x134] sm:$0xf]  ;;  %222 = vst [vmem:[#allocation2 + $0x12c] sm:$0xff] %v221_v57   ;;  %v229_v60 = vld [vmem:[%s11079_s14 + $0x13c] sm:$0xff]  }
  0x23   :  { %226 = vst [vmem:[#allocation2 + $0x134] sm:$0xf] %v225_v58  ;;  %228 = vst [vmem:[#allocation2 + $0x138] sm:$0xf] %v227_v59  ;;  %v233_v61 = vld [vmem:[%s11079_s14 + $0x148] sm:$0xf] }
  0x24   :  { %v235_v62 = vld [vmem:[%s11079_s14 + $0x144] sm:$0xf]  ;;  %230 = vst [vmem:[#allocation2 + $0x13c] sm:$0xff] %v229_v60   ;;  %234 = vst [vmem:[#allocation2 + $0x144] sm:$0xf] %v233_v61  ;;  %v237_v63 = vld [vmem:[%s11079_s14 + $0x14c] sm:$0xff]  }
  0x25   :  { %236 = vst [vmem:[#allocation2 + $0x148] sm:$0xf] %v235_v62  ;;  %v241_v0 = vld [vmem:[%s11079_s14 + $0x158] sm:$0xf]  ;;  %v243_v1 = vld [vmem:[%s11079_s14 + $0x154] sm:$0xf] }
  0x26   :  { %238 = vst [vmem:[#allocation2 + $0x14c] sm:$0xff] %v237_v63   ;;  %242 = vst [vmem:[#allocation2 + $0x154] sm:$0xf] %v241_v0  ;;  %v245_v2 = vld [vmem:[%s11079_s14 + $0x15c] sm:$0xff]   ;;  %v249_v3 = vld [vmem:[%s11079_s14 + $0x168] sm:$0xf] }
  0x27   :  { %244 = vst [vmem:[#allocation2 + $0x158] sm:$0xf] %v243_v1  ;;  %v251_v4 = vld [vmem:[%s11079_s14 + $0x164] sm:$0xf]  ;;  %246 = vst [vmem:[#allocation2 + $0x15c] sm:$0xff] %v245_v2   ;;  %v253_v5 = vld [vmem:[%s11079_s14 + $0x16c] sm:$0xff]  }
  0x28   :  { %250 = vst [vmem:[#allocation2 + $0x164] sm:$0xf] %v249_v3  ;;  %252 = vst [vmem:[#allocation2 + $0x168] sm:$0xf] %v251_v4  ;;  %v257_v6 = vld [vmem:[%s11079_s14 + $0x178] sm:$0xf] }
  0x29   :  { %v259_v7 = vld [vmem:[%s11079_s14 + $0x174] sm:$0xf]  ;;  %254 = vst [vmem:[#allocation2 + $0x16c] sm:$0xff] %v253_v5   ;;  %258 = vst [vmem:[#allocation2 + $0x174] sm:$0xf] %v257_v6  ;;  %v261_v8 = vld [vmem:[%s11079_s14 + $0x17c] sm:$0xff]  }
  0x2a   :  { %260 = vst [vmem:[#allocation2 + $0x178] sm:$0xf] %v259_v7  ;;  %v265_v9 = vld [vmem:[%s11079_s14 + $0x188] sm:$0xf]  ;;  %v267_v10 = vld [vmem:[%s11079_s14 + $0x184] sm:$0xf] }
  0x2b   :  { %262 = vst [vmem:[#allocation2 + $0x17c] sm:$0xff] %v261_v8   ;;  %266 = vst [vmem:[#allocation2 + $0x184] sm:$0xf] %v265_v9  ;;  %v269_v11 = vld [vmem:[%s11079_s14 + $0x18c] sm:$0xff]   ;;  %v273_v12 = vld [vmem:[%s11079_s14 + $0x198] sm:$0xf] }
  0x2c   :  { %268 = vst [vmem:[#allocation2 + $0x188] sm:$0xf] %v267_v10  ;;  %v275_v13 = vld [vmem:[%s11079_s14 + $0x194] sm:$0xf]  ;;  %270 = vst [vmem:[#allocation2 + $0x18c] sm:$0xff] %v269_v11   ;;  %v277_v14 = vld [vmem:[%s11079_s14 + $0x19c] sm:$0xff]  }
  0x2d   :  { %274 = vst [vmem:[#allocation2 + $0x194] sm:$0xf] %v273_v12  ;;  %276 = vst [vmem:[#allocation2 + $0x198] sm:$0xf] %v275_v13  ;;  %v281_v15 = vld [vmem:[%s11079_s14 + $0x1a8] sm:$0xf] }
  0x2e   :  { %v283_v16 = vld [vmem:[%s11079_s14 + $0x1a4] sm:$0xf]  ;;  %278 = vst [vmem:[#allocation2 + $0x19c] sm:$0xff] %v277_v14   ;;  %282 = vst [vmem:[#allocation2 + $0x1a4] sm:$0xf] %v281_v15  ;;  %v285_v17 = vld [vmem:[%s11079_s14 + $0x1ac] sm:$0xff]  }
  0x2f   :  { %284 = vst [vmem:[#allocation2 + $0x1a8] sm:$0xf] %v283_v16  ;;  %v289_v18 = vld [vmem:[%s11079_s14 + $0x1b8] sm:$0xf]  ;;  %v291_v19 = vld [vmem:[%s11079_s14 + $0x1b4] sm:$0xf] }
  0x30   :  { %286 = vst [vmem:[#allocation2 + $0x1ac] sm:$0xff] %v285_v17   ;;  %290 = vst [vmem:[#allocation2 + $0x1b4] sm:$0xf] %v289_v18  ;;  %v293_v20 = vld [vmem:[%s11079_s14 + $0x1bc] sm:$0xff]   ;;  %v297_v21 = vld [vmem:[%s11079_s14 + $0x1c8] sm:$0xf] }
  0x31   :  { %292 = vst [vmem:[#allocation2 + $0x1b8] sm:$0xf] %v291_v19  ;;  %v299_v22 = vld [vmem:[%s11079_s14 + $0x1c4] sm:$0xf]  ;;  %294 = vst [vmem:[#allocation2 + $0x1bc] sm:$0xff] %v293_v20   ;;  %v301_v23 = vld [vmem:[%s11079_s14 + $0x1cc] sm:$0xff]  }
  0x32   :  { %298 = vst [vmem:[#allocation2 + $0x1c4] sm:$0xf] %v297_v21  ;;  %300 = vst [vmem:[#allocation2 + $0x1c8] sm:$0xf] %v299_v22  ;;  %v305_v24 = vld [vmem:[%s11079_s14 + $0x1d8] sm:$0xf] }
  0x33   :  { %v307_v25 = vld [vmem:[%s11079_s14 + $0x1d4] sm:$0xf]  ;;  %302 = vst [vmem:[#allocation2 + $0x1cc] sm:$0xff] %v301_v23   ;;  %306 = vst [vmem:[#allocation2 + $0x1d4] sm:$0xf] %v305_v24  ;;  %v309_v26 = vld [vmem:[%s11079_s14 + $0x1dc] sm:$0xff]  }
  0x34   :  { %308 = vst [vmem:[#allocation2 + $0x1d8] sm:$0xf] %v307_v25  ;;  %v313_v27 = vld [vmem:[%s11079_s14 + $0x1e8] sm:$0xf]  ;;  %v315_v28 = vld [vmem:[%s11079_s14 + $0x1e4] sm:$0xf] }
  0x35   :  { %310 = vst [vmem:[#allocation2 + $0x1dc] sm:$0xff] %v309_v26   ;;  %314 = vst [vmem:[#allocation2 + $0x1e4] sm:$0xf] %v313_v27  ;;  %v317_v29 = vld [vmem:[%s11079_s14 + $0x1ec] sm:$0xff]   ;;  %v321_v30 = vld [vmem:[%s11079_s14 + $0x1f8] sm:$0xf] }
  0x36   :  { %316 = vst [vmem:[#allocation2 + $0x1e8] sm:$0xf] %v315_v28  ;;  %v323_v31 = vld [vmem:[%s11079_s14 + $0x1f4] sm:$0xf]  ;;  %318 = vst [vmem:[#allocation2 + $0x1ec] sm:$0xff] %v317_v29   ;;  %v325_v32 = vld [vmem:[%s11079_s14 + $0x1fc] sm:$0xff]  }
  0x37   :  { %322 = vst [vmem:[#allocation2 + $0x1f4] sm:$0xf] %v321_v30  ;;  %324 = vst [vmem:[#allocation2 + $0x1f8] sm:$0xf] %v323_v31  ;;  %v329_v33 = vld [vmem:[%s11079_s14 + $0x208] sm:$0xf] }
  0x38   :  { %v331_v34 = vld [vmem:[%s11079_s14 + $0x204] sm:$0xf]  ;;  %326 = vst [vmem:[#allocation2 + $0x1fc] sm:$0xff] %v325_v32   ;;  %330 = vst [vmem:[#allocation2 + $0x204] sm:$0xf] %v329_v33  ;;  %v333_v35 = vld [vmem:[%s11079_s14 + $0x20c] sm:$0xff]  }
  0x39   :  { %332 = vst [vmem:[#allocation2 + $0x208] sm:$0xf] %v331_v34  ;;  %v337_v36 = vld [vmem:[%s11079_s14 + $0x218] sm:$0xf]  ;;  %v339_v37 = vld [vmem:[%s11079_s14 + $0x214] sm:$0xf] }
  0x3a   :  { %334 = vst [vmem:[#allocation2 + $0x20c] sm:$0xff] %v333_v35   ;;  %338 = vst [vmem:[#allocation2 + $0x214] sm:$0xf] %v337_v36  ;;  %v341_v38 = vld [vmem:[%s11079_s14 + $0x21c] sm:$0xff]   ;;  %v345_v39 = vld [vmem:[%s11079_s14 + $0x228] sm:$0xf] }
  0x3b   :  { %340 = vst [vmem:[#allocation2 + $0x218] sm:$0xf] %v339_v37  ;;  %v347_v40 = vld [vmem:[%s11079_s14 + $0x224] sm:$0xf]  ;;  %342 = vst [vmem:[#allocation2 + $0x21c] sm:$0xff] %v341_v38   ;;  %v349_v41 = vld [vmem:[%s11079_s14 + $0x22c] sm:$0xff]  }
  0x3c   :  { %346 = vst [vmem:[#allocation2 + $0x224] sm:$0xf] %v345_v39  ;;  %348 = vst [vmem:[#allocation2 + $0x228] sm:$0xf] %v347_v40  ;;  %v353_v42 = vld [vmem:[%s11079_s14 + $0x238] sm:$0xf] }
  0x3d   :  { %v355_v43 = vld [vmem:[%s11079_s14 + $0x234] sm:$0xf]  ;;  %350 = vst [vmem:[#allocation2 + $0x22c] sm:$0xff] %v349_v41   ;;  %354 = vst [vmem:[#allocation2 + $0x234] sm:$0xf] %v353_v42  ;;  %v357_v44 = vld [vmem:[%s11079_s14 + $0x23c] sm:$0xff]  }
  0x3e   :  { %356 = vst [vmem:[#allocation2 + $0x238] sm:$0xf] %v355_v43  ;;  %v361_v45 = vld [vmem:[%s11079_s14 + $0x248] sm:$0xf]  ;;  %v363_v46 = vld [vmem:[%s11079_s14 + $0x244] sm:$0xf] }
  0x3f   :  { %358 = vst [vmem:[#allocation2 + $0x23c] sm:$0xff] %v357_v44   ;;  %362 = vst [vmem:[#allocation2 + $0x244] sm:$0xf] %v361_v45  ;;  %v365_v47 = vld [vmem:[%s11079_s14 + $0x24c] sm:$0xff]   ;;  %v369_v48 = vld [vmem:[%s11079_s14 + $0x258] sm:$0xf] }
  0x40   :  { %364 = vst [vmem:[#allocation2 + $0x248] sm:$0xf] %v363_v46  ;;  %v371_v49 = vld [vmem:[%s11079_s14 + $0x254] sm:$0xf]  ;;  %366 = vst [vmem:[#allocation2 + $0x24c] sm:$0xff] %v365_v47   ;;  %v373_v50 = vld [vmem:[%s11079_s14 + $0x25c] sm:$0xff]  }
  0x41   :  { %370 = vst [vmem:[#allocation2 + $0x254] sm:$0xf] %v369_v48  ;;  %372 = vst [vmem:[#allocation2 + $0x258] sm:$0xf] %v371_v49  ;;  %v377_v51 = vld [vmem:[%s11079_s14 + $0x268] sm:$0xf] }
  0x42   :  { %v379_v52 = vld [vmem:[%s11079_s14 + $0x264] sm:$0xf]  ;;  %374 = vst [vmem:[#allocation2 + $0x25c] sm:$0xff] %v373_v50   ;;  %378 = vst [vmem:[#allocation2 + $0x264] sm:$0xf] %v377_v51  ;;  %v381_v53 = vld [vmem:[%s11079_s14 + $0x26c] sm:$0xff]  }
  0x43   :  { %380 = vst [vmem:[#allocation2 + $0x268] sm:$0xf] %v379_v52  ;;  %v385_v54 = vld [vmem:[%s11079_s14 + $0x278] sm:$0xf]  ;;  %v387_v55 = vld [vmem:[%s11079_s14 + $0x274] sm:$0xf] }
  0x44   :  { %382 = vst [vmem:[#allocation2 + $0x26c] sm:$0xff] %v381_v53   ;;  %386 = vst [vmem:[#allocation2 + $0x274] sm:$0xf] %v385_v54  ;;  %v389_v56 = vld [vmem:[%s11079_s14 + $0x27c] sm:$0xff]   ;;  %v393_v57 = vld [vmem:[%s11079_s14 + $0x288] sm:$0xf] }
  0x45   :  { %388 = vst [vmem:[#allocation2 + $0x278] sm:$0xf] %v387_v55  ;;  %v395_v58 = vld [vmem:[%s11079_s14 + $0x284] sm:$0xf]  ;;  %390 = vst [vmem:[#allocation2 + $0x27c] sm:$0xff] %v389_v56   ;;  %v397_v59 = vld [vmem:[%s11079_s14 + $0x28c] sm:$0xff]  }
  0x46   :  { %394 = vst [vmem:[#allocation2 + $0x284] sm:$0xf] %v393_v57  ;;  %396 = vst [vmem:[#allocation2 + $0x288] sm:$0xf] %v395_v58  ;;  %v401_v60 = vld [vmem:[%s11079_s14 + $0x298] sm:$0xf] }
  0x47   :  { %v403_v61 = vld [vmem:[%s11079_s14 + $0x294] sm:$0xf]  ;;  %398 = vst [vmem:[#allocation2 + $0x28c] sm:$0xff] %v397_v59   ;;  %402 = vst [vmem:[#allocation2 + $0x294] sm:$0xf] %v401_v60  ;;  %v405_v62 = vld [vmem:[%s11079_s14 + $0x29c] sm:$0xff]  }
  0x48   :  { %404 = vst [vmem:[#allocation2 + $0x298] sm:$0xf] %v403_v61  ;;  %v409_v63 = vld [vmem:[%s11079_s14 + $0x2a8] sm:$0xf]  ;;  %v411_v0 = vld [vmem:[%s11079_s14 + $0x2a4] sm:$0xf] }
  0x49   :  { %406 = vst [vmem:[#allocation2 + $0x29c] sm:$0xff] %v405_v62   ;;  %410 = vst [vmem:[#allocation2 + $0x2a4] sm:$0xf] %v409_v63  ;;  %v413_v1 = vld [vmem:[%s11079_s14 + $0x2ac] sm:$0xff]   ;;  %v417_v2 = vld [vmem:[%s11079_s14 + $0x2b8] sm:$0xf] }
  0x4a   :  { %412 = vst [vmem:[#allocation2 + $0x2a8] sm:$0xf] %v411_v0  ;;  %v419_v3 = vld [vmem:[%s11079_s14 + $0x2b4] sm:$0xf]  ;;  %414 = vst [vmem:[#allocation2 + $0x2ac] sm:$0xff] %v413_v1   ;;  %v421_v4 = vld [vmem:[%s11079_s14 + $0x2bc] sm:$0xff]  }
  0x4b   :  { %418 = vst [vmem:[#allocation2 + $0x2b4] sm:$0xf] %v417_v2  ;;  %420 = vst [vmem:[#allocation2 + $0x2b8] sm:$0xf] %v419_v3  ;;  %v425_v5 = vld [vmem:[%s11079_s14 + $0x2c8] sm:$0xf] }
  0x4c   :  { %v427_v6 = vld [vmem:[%s11079_s14 + $0x2c4] sm:$0xf]  ;;  %422 = vst [vmem:[#allocation2 + $0x2bc] sm:$0xff] %v421_v4   ;;  %426 = vst [vmem:[#allocation2 + $0x2c4] sm:$0xf] %v425_v5  ;;  %v429_v7 = vld [vmem:[%s11079_s14 + $0x2cc] sm:$0xff]  }
  0x4d   :  { %428 = vst [vmem:[#allocation2 + $0x2c8] sm:$0xf] %v427_v6  ;;  %v433_v8 = vld [vmem:[%s11079_s14 + $0x2d8] sm:$0xf]  ;;  %v435_v9 = vld [vmem:[%s11079_s14 + $0x2d4] sm:$0xf] }
  0x4e   :  { %430 = vst [vmem:[#allocation2 + $0x2cc] sm:$0xff] %v429_v7   ;;  %434 = vst [vmem:[#allocation2 + $0x2d4] sm:$0xf] %v433_v8  ;;  %v437_v10 = vld [vmem:[%s11079_s14 + $0x2dc] sm:$0xff]   ;;  %v441_v11 = vld [vmem:[%s11079_s14 + $0x2e8] sm:$0xf] }
  0x4f   :  { %436 = vst [vmem:[#allocation2 + $0x2d8] sm:$0xf] %v435_v9  ;;  %v443_v12 = vld [vmem:[%s11079_s14 + $0x2e4] sm:$0xf]  ;;  %438 = vst [vmem:[#allocation2 + $0x2dc] sm:$0xff] %v437_v10   ;;  %v445_v13 = vld [vmem:[%s11079_s14 + $0x2ec] sm:$0xff]  }
  0x50   :  { %442 = vst [vmem:[#allocation2 + $0x2e4] sm:$0xf] %v441_v11  ;;  %444 = vst [vmem:[#allocation2 + $0x2e8] sm:$0xf] %v443_v12  ;;  %v449_v14 = vld [vmem:[%s11079_s14 + $0x2f8] sm:$0xf] }
  0x51   :  { %v451_v15 = vld [vmem:[%s11079_s14 + $0x2f4] sm:$0xf]  ;;  %446 = vst [vmem:[#allocation2 + $0x2ec] sm:$0xff] %v445_v13   ;;  %450 = vst [vmem:[#allocation2 + $0x2f4] sm:$0xf] %v449_v14  ;;  %v453_v16 = vld [vmem:[%s11079_s14 + $0x2fc] sm:$0xff]  }
  0x52   :  { %452 = vst [vmem:[#allocation2 + $0x2f8] sm:$0xf] %v451_v15  ;;  %v457_v17 = vld [vmem:[%s11079_s14 + $0x308] sm:$0xf]  ;;  %v459_v18 = vld [vmem:[%s11079_s14 + $0x304] sm:$0xf] }
  0x53   :  { %454 = vst [vmem:[#allocation2 + $0x2fc] sm:$0xff] %v453_v16   ;;  %458 = vst [vmem:[#allocation2 + $0x304] sm:$0xf] %v457_v17  ;;  %v461_v19 = vld [vmem:[%s11079_s14 + $0x30c] sm:$0xff]   ;;  %v465_v20 = vld [vmem:[%s11079_s14 + $0x318] sm:$0xf] }
  0x54   :  { %460 = vst [vmem:[#allocation2 + $0x308] sm:$0xf] %v459_v18  ;;  %v467_v21 = vld [vmem:[%s11079_s14 + $0x314] sm:$0xf]  ;;  %462 = vst [vmem:[#allocation2 + $0x30c] sm:$0xff] %v461_v19   ;;  %v469_v22 = vld [vmem:[%s11079_s14 + $0x31c] sm:$0xff]  }
  0x55   :  { %466 = vst [vmem:[#allocation2 + $0x314] sm:$0xf] %v465_v20  ;;  %468 = vst [vmem:[#allocation2 + $0x318] sm:$0xf] %v467_v21  ;;  %v473_v23 = vld [vmem:[%s11079_s14 + $0x328] sm:$0xf] }
  0x56   :  { %v475_v24 = vld [vmem:[%s11079_s14 + $0x324] sm:$0xf]  ;;  %470 = vst [vmem:[#allocation2 + $0x31c] sm:$0xff] %v469_v22   ;;  %474 = vst [vmem:[#allocation2 + $0x324] sm:$0xf] %v473_v23  ;;  %v477_v25 = vld [vmem:[%s11079_s14 + $0x32c] sm:$0xff]  }
  0x57   :  { %476 = vst [vmem:[#allocation2 + $0x328] sm:$0xf] %v475_v24  ;;  %v481_v26 = vld [vmem:[%s11079_s14 + $0x338] sm:$0xf]  ;;  %v483_v27 = vld [vmem:[%s11079_s14 + $0x334] sm:$0xf] }
  0x58   :  { %478 = vst [vmem:[#allocation2 + $0x32c] sm:$0xff] %v477_v25   ;;  %482 = vst [vmem:[#allocation2 + $0x334] sm:$0xf] %v481_v26  ;;  %v485_v28 = vld [vmem:[%s11079_s14 + $0x33c] sm:$0xff]   ;;  %v489_v29 = vld [vmem:[%s11079_s14 + $0x348] sm:$0xf] }
  0x59   :  { %484 = vst [vmem:[#allocation2 + $0x338] sm:$0xf] %v483_v27  ;;  %v491_v30 = vld [vmem:[%s11079_s14 + $0x344] sm:$0xf]  ;;  %486 = vst [vmem:[#allocation2 + $0x33c] sm:$0xff] %v485_v28   ;;  %v493_v31 = vld [vmem:[%s11079_s14 + $0x34c] sm:$0xff]  }
  0x5a   :  { %490 = vst [vmem:[#allocation2 + $0x344] sm:$0xf] %v489_v29  ;;  %492 = vst [vmem:[#allocation2 + $0x348] sm:$0xf] %v491_v30  ;;  %v497_v32 = vld [vmem:[%s11079_s14 + $0x358] sm:$0xf] }
  0x5b   :  { %v499_v33 = vld [vmem:[%s11079_s14 + $0x354] sm:$0xf]  ;;  %494 = vst [vmem:[#allocation2 + $0x34c] sm:$0xff] %v493_v31   ;;  %498 = vst [vmem:[#allocation2 + $0x354] sm:$0xf] %v497_v32  ;;  %v501_v34 = vld [vmem:[%s11079_s14 + $0x35c] sm:$0xff]  }
  0x5c   :  { %500 = vst [vmem:[#allocation2 + $0x358] sm:$0xf] %v499_v33  ;;  %v505_v35 = vld [vmem:[%s11079_s14 + $0x368] sm:$0xf]  ;;  %v507_v36 = vld [vmem:[%s11079_s14 + $0x364] sm:$0xf] }
  0x5d   :  { %502 = vst [vmem:[#allocation2 + $0x35c] sm:$0xff] %v501_v34   ;;  %506 = vst [vmem:[#allocation2 + $0x364] sm:$0xf] %v505_v35  ;;  %v509_v37 = vld [vmem:[%s11079_s14 + $0x36c] sm:$0xff]   ;;  %v513_v38 = vld [vmem:[%s11079_s14 + $0x378] sm:$0xf] }
  0x5e   :  { %508 = vst [vmem:[#allocation2 + $0x368] sm:$0xf] %v507_v36  ;;  %v515_v39 = vld [vmem:[%s11079_s14 + $0x374] sm:$0xf]  ;;  %510 = vst [vmem:[#allocation2 + $0x36c] sm:$0xff] %v509_v37   ;;  %v517_v40 = vld [vmem:[%s11079_s14 + $0x37c] sm:$0xff]  }
  0x5f   :  { %514 = vst [vmem:[#allocation2 + $0x374] sm:$0xf] %v513_v38  ;;  %516 = vst [vmem:[#allocation2 + $0x378] sm:$0xf] %v515_v39  ;;  %v521_v41 = vld [vmem:[%s11079_s14 + $0x388] sm:$0xf] }
  0x60   :  { %v523_v42 = vld [vmem:[%s11079_s14 + $0x384] sm:$0xf]  ;;  %518 = vst [vmem:[#allocation2 + $0x37c] sm:$0xff] %v517_v40   ;;  %522 = vst [vmem:[#allocation2 + $0x384] sm:$0xf] %v521_v41  ;;  %v525_v43 = vld [vmem:[%s11079_s14 + $0x38c] sm:$0xff]  }
  0x61   :  { %524 = vst [vmem:[#allocation2 + $0x388] sm:$0xf] %v523_v42  ;;  %v529_v44 = vld [vmem:[%s11079_s14 + $0x398] sm:$0xf]  ;;  %v531_v45 = vld [vmem:[%s11079_s14 + $0x394] sm:$0xf] }
  0x62   :  { %526 = vst [vmem:[#allocation2 + $0x38c] sm:$0xff] %v525_v43   ;;  %530 = vst [vmem:[#allocation2 + $0x394] sm:$0xf] %v529_v44  ;;  %v533_v46 = vld [vmem:[%s11079_s14 + $0x39c] sm:$0xff]   ;;  %v537_v47 = vld [vmem:[%s11079_s14 + $0x3a8] sm:$0xf] }
  0x63   :  { %532 = vst [vmem:[#allocation2 + $0x398] sm:$0xf] %v531_v45  ;;  %v539_v48 = vld [vmem:[%s11079_s14 + $0x3a4] sm:$0xf]  ;;  %534 = vst [vmem:[#allocation2 + $0x39c] sm:$0xff] %v533_v46   ;;  %v541_v49 = vld [vmem:[%s11079_s14 + $0x3ac] sm:$0xff]  }
  0x64   :  { %538 = vst [vmem:[#allocation2 + $0x3a4] sm:$0xf] %v537_v47  ;;  %540 = vst [vmem:[#allocation2 + $0x3a8] sm:$0xf] %v539_v48  ;;  %v545_v50 = vld [vmem:[%s11079_s14 + $0x3b8] sm:$0xf] }
  0x65   :  { %v547_v51 = vld [vmem:[%s11079_s14 + $0x3b4] sm:$0xf]  ;;  %542 = vst [vmem:[#allocation2 + $0x3ac] sm:$0xff] %v541_v49   ;;  %546 = vst [vmem:[#allocation2 + $0x3b4] sm:$0xf] %v545_v50  ;;  %v549_v52 = vld [vmem:[%s11079_s14 + $0x3bc] sm:$0xff]  }
  0x66   :  { %548 = vst [vmem:[#allocation2 + $0x3b8] sm:$0xf] %v547_v51  ;;  %v553_v53 = vld [vmem:[%s11079_s14 + $0x3c8] sm:$0xf]  ;;  %v555_v54 = vld [vmem:[%s11079_s14 + $0x3c4] sm:$0xf] }
  0x67   :  { %550 = vst [vmem:[#allocation2 + $0x3bc] sm:$0xff] %v549_v52   ;;  %554 = vst [vmem:[#allocation2 + $0x3c4] sm:$0xf] %v553_v53  ;;  %v557_v55 = vld [vmem:[%s11079_s14 + $0x3cc] sm:$0xff]   ;;  %v561_v56 = vld [vmem:[%s11079_s14 + $0x3d8] sm:$0xf] }
  0x68   :  { %556 = vst [vmem:[#allocation2 + $0x3c8] sm:$0xf] %v555_v54  ;;  %v563_v57 = vld [vmem:[%s11079_s14 + $0x3d4] sm:$0xf]  ;;  %558 = vst [vmem:[#allocation2 + $0x3cc] sm:$0xff] %v557_v55   ;;  %v565_v58 = vld [vmem:[%s11079_s14 + $0x3dc] sm:$0xff]  }
  0x69   :  { %562 = vst [vmem:[#allocation2 + $0x3d4] sm:$0xf] %v561_v56  ;;  %564 = vst [vmem:[#allocation2 + $0x3d8] sm:$0xf] %v563_v57  ;;  %v569_v59 = vld [vmem:[%s11079_s14 + $0x3e8] sm:$0xf] }
  0x6a   :  { %v571_v60 = vld [vmem:[%s11079_s14 + $0x3e4] sm:$0xf]  ;;  %566 = vst [vmem:[#allocation2 + $0x3dc] sm:$0xff] %v565_v58   ;;  %570 = vst [vmem:[#allocation2 + $0x3e4] sm:$0xf] %v569_v59  ;;  %v573_v61 = vld [vmem:[%s11079_s14 + $0x3ec] sm:$0xff]  }
  0x6b   :  { %572 = vst [vmem:[#allocation2 + $0x3e8] sm:$0xf] %v571_v60  ;;  %v577_v62 = vld [vmem:[%s11079_s14 + $0x3f8] sm:$0xf]  ;;  %v579_v63 = vld [vmem:[%s11079_s14 + $0x3f4] sm:$0xf] }
  0x6c   :  { %574 = vst [vmem:[#allocation2 + $0x3ec] sm:$0xff] %v573_v61   ;;  %578 = vst [vmem:[#allocation2 + $0x3f4] sm:$0xf] %v577_v62  ;;  %v581_v0 = vld [vmem:[%s11079_s14 + $0x3fc] sm:$0xf] }
  0x6d   :  { %580 = vst [vmem:[#allocation2 + $0x3f8] sm:$0xf] %v579_v63  ;;  %582 = vst [vmem:[#allocation2 + $0x3fc] sm:$0xf] %v581_v0 }
  0x6e   :  { %1125 = vsyncadd [#allocation8], 16384  ;;  %v1144_v1 = vld [vmem:[%s11082_s17] sm:$0xf]  ;;  %v1146_v2 = vld [vmem:[%s11082_s17 + $0x8] sm:$0xf] }
  0x6f   :  { %1145 = vst [vmem:[#allocation5] sm:$0xf] %v1144_v1  ;;  %1147 = vst [vmem:[#allocation5 + $0x4] sm:$0xf] %v1146_v2  ;;  %v1148_v3 = vld [vmem:[%s11082_s17 + $0x4] sm:$0xf] }
  0x70   :  { %v1150_v4 = vld [vmem:[%s11082_s17 + $0xc] sm:$0xff]   ;;  %v1154_v5 = vld [vmem:[%s11082_s17 + $0x18] sm:$0xf]  ;;  %1149 = vst [vmem:[#allocation5 + $0x8] sm:$0xf] %v1148_v3  ;;  %v1158_v7 = vld [vmem:[%s11082_s17 + $0x1c] sm:$0xff]  }
  0x71   :  { %1151 = vst [vmem:[#allocation5 + $0xc] sm:$0xff] %v1150_v4   ;;  %1155 = vst [vmem:[#allocation5 + $0x14] sm:$0xf] %v1154_v5  ;;  %v1156_v6 = vld [vmem:[%s11082_s17 + $0x14] sm:$0xf]  ;;  %v1166_v10 = vld [vmem:[%s11082_s17 + $0x2c] sm:$0xff]  }
  0x72   :  { %v1162_v8 = vld [vmem:[%s11082_s17 + $0x28] sm:$0xf]  ;;  %1157 = vst [vmem:[#allocation5 + $0x18] sm:$0xf] %v1156_v6  ;;  %1159 = vst [vmem:[#allocation5 + $0x1c] sm:$0xff] %v1158_v7   ;;  %v1174_v13 = vld [vmem:[%s11082_s17 + $0x3c] sm:$0xff]  }
  0x73   :  { %1163 = vst [vmem:[#allocation5 + $0x24] sm:$0xf] %v1162_v8  ;;  %v1164_v9 = vld [vmem:[%s11082_s17 + $0x24] sm:$0xf]  ;;  %v1170_v11 = vld [vmem:[%s11082_s17 + $0x38] sm:$0xf] }
  0x74   :  { %1165 = vst [vmem:[#allocation5 + $0x28] sm:$0xf] %v1164_v9  ;;  %1167 = vst [vmem:[#allocation5 + $0x2c] sm:$0xff] %v1166_v10   ;;  %v1172_v12 = vld [vmem:[%s11082_s17 + $0x34] sm:$0xf]  ;;  %v1182_v16 = vld [vmem:[%s11082_s17 + $0x4c] sm:$0xff]  }
  0x75   :  { %1171 = vst [vmem:[#allocation5 + $0x34] sm:$0xf] %v1170_v11  ;;  %v1178_v14 = vld [vmem:[%s11082_s17 + $0x48] sm:$0xf]  ;;  %1173 = vst [vmem:[#allocation5 + $0x38] sm:$0xf] %v1172_v12 }
  0x76   :  { %1175 = vst [vmem:[#allocation5 + $0x3c] sm:$0xff] %v1174_v13   ;;  %1179 = vst [vmem:[#allocation5 + $0x44] sm:$0xf] %v1178_v14  ;;  %v1180_v15 = vld [vmem:[%s11082_s17 + $0x44] sm:$0xf]  ;;  %v1190_v19 = vld [vmem:[%s11082_s17 + $0x5c] sm:$0xff]  }
  0x77   :  { %v1186_v17 = vld [vmem:[%s11082_s17 + $0x58] sm:$0xf]  ;;  %1181 = vst [vmem:[#allocation5 + $0x48] sm:$0xf] %v1180_v15  ;;  %1183 = vst [vmem:[#allocation5 + $0x4c] sm:$0xff] %v1182_v16   ;;  %v1198_v22 = vld [vmem:[%s11082_s17 + $0x6c] sm:$0xff]  }
  0x78   :  { %1187 = vst [vmem:[#allocation5 + $0x54] sm:$0xf] %v1186_v17  ;;  %v1188_v18 = vld [vmem:[%s11082_s17 + $0x54] sm:$0xf]  ;;  %v1194_v20 = vld [vmem:[%s11082_s17 + $0x68] sm:$0xf] }
  0x79   :  { %1189 = vst [vmem:[#allocation5 + $0x58] sm:$0xf] %v1188_v18  ;;  %1191 = vst [vmem:[#allocation5 + $0x5c] sm:$0xff] %v1190_v19   ;;  %v1196_v21 = vld [vmem:[%s11082_s17 + $0x64] sm:$0xf]  ;;  %v1206_v25 = vld [vmem:[%s11082_s17 + $0x7c] sm:$0xff]  }
  0x7a   :  { %1195 = vst [vmem:[#allocation5 + $0x64] sm:$0xf] %v1194_v20  ;;  %v1202_v23 = vld [vmem:[%s11082_s17 + $0x78] sm:$0xf]  ;;  %1197 = vst [vmem:[#allocation5 + $0x68] sm:$0xf] %v1196_v21 }
  0x7b   :  { %1199 = vst [vmem:[#allocation5 + $0x6c] sm:$0xff] %v1198_v22   ;;  %1203 = vst [vmem:[#allocation5 + $0x74] sm:$0xf] %v1202_v23  ;;  %v1204_v24 = vld [vmem:[%s11082_s17 + $0x74] sm:$0xf]  ;;  %v1214_v28 = vld [vmem:[%s11082_s17 + $0x8c] sm:$0xff]  }
  0x7c   :  { %v1210_v26 = vld [vmem:[%s11082_s17 + $0x88] sm:$0xf]  ;;  %1205 = vst [vmem:[#allocation5 + $0x78] sm:$0xf] %v1204_v24  ;;  %1207 = vst [vmem:[#allocation5 + $0x7c] sm:$0xff] %v1206_v25   ;;  %v1222_v31 = vld [vmem:[%s11082_s17 + $0x9c] sm:$0xff]  }
  0x7d   :  { %1211 = vst [vmem:[#allocation5 + $0x84] sm:$0xf] %v1210_v26  ;;  %v1212_v27 = vld [vmem:[%s11082_s17 + $0x84] sm:$0xf]  ;;  %v1218_v29 = vld [vmem:[%s11082_s17 + $0x98] sm:$0xf] }
  0x7e   :  { %1213 = vst [vmem:[#allocation5 + $0x88] sm:$0xf] %v1212_v27  ;;  %1215 = vst [vmem:[#allocation5 + $0x8c] sm:$0xff] %v1214_v28   ;;  %v1220_v30 = vld [vmem:[%s11082_s17 + $0x94] sm:$0xf]  ;;  %v1230_v34 = vld [vmem:[%s11082_s17 + $0xac] sm:$0xff]  }
  0x7f   :  { %1219 = vst [vmem:[#allocation5 + $0x94] sm:$0xf] %v1218_v29  ;;  %v1226_v32 = vld [vmem:[%s11082_s17 + $0xa8] sm:$0xf]  ;;  %1221 = vst [vmem:[#allocation5 + $0x98] sm:$0xf] %v1220_v30 }
  0x80   :  { %1223 = vst [vmem:[#allocation5 + $0x9c] sm:$0xff] %v1222_v31   ;;  %1227 = vst [vmem:[#allocation5 + $0xa4] sm:$0xf] %v1226_v32  ;;  %v1228_v33 = vld [vmem:[%s11082_s17 + $0xa4] sm:$0xf]  ;;  %v1238_v37 = vld [vmem:[%s11082_s17 + $0xbc] sm:$0xff]  }
  0x81   :  { %v1234_v35 = vld [vmem:[%s11082_s17 + $0xb8] sm:$0xf]  ;;  %1229 = vst [vmem:[#allocation5 + $0xa8] sm:$0xf] %v1228_v33  ;;  %1231 = vst [vmem:[#allocation5 + $0xac] sm:$0xff] %v1230_v34   ;;  %v1246_v40 = vld [vmem:[%s11082_s17 + $0xcc] sm:$0xff]  }
  0x82   :  { %1235 = vst [vmem:[#allocation5 + $0xb4] sm:$0xf] %v1234_v35  ;;  %v1236_v36 = vld [vmem:[%s11082_s17 + $0xb4] sm:$0xf]  ;;  %v1242_v38 = vld [vmem:[%s11082_s17 + $0xc8] sm:$0xf] }
  0x83   :  { %1237 = vst [vmem:[#allocation5 + $0xb8] sm:$0xf] %v1236_v36  ;;  %1239 = vst [vmem:[#allocation5 + $0xbc] sm:$0xff] %v1238_v37   ;;  %v1244_v39 = vld [vmem:[%s11082_s17 + $0xc4] sm:$0xf]  ;;  %v1254_v43 = vld [vmem:[%s11082_s17 + $0xdc] sm:$0xff]  }
  0x84   :  { %1243 = vst [vmem:[#allocation5 + $0xc4] sm:$0xf] %v1242_v38  ;;  %v1250_v41 = vld [vmem:[%s11082_s17 + $0xd8] sm:$0xf]  ;;  %1245 = vst [vmem:[#allocation5 + $0xc8] sm:$0xf] %v1244_v39 }
  0x85   :  { %1247 = vst [vmem:[#allocation5 + $0xcc] sm:$0xff] %v1246_v40   ;;  %1251 = vst [vmem:[#allocation5 + $0xd4] sm:$0xf] %v1250_v41  ;;  %v1252_v42 = vld [vmem:[%s11082_s17 + $0xd4] sm:$0xf]  ;;  %v1262_v46 = vld [vmem:[%s11082_s17 + $0xec] sm:$0xff]  }
  0x86   :  { %v1258_v44 = vld [vmem:[%s11082_s17 + $0xe8] sm:$0xf]  ;;  %1253 = vst [vmem:[#allocation5 + $0xd8] sm:$0xf] %v1252_v42  ;;  %1255 = vst [vmem:[#allocation5 + $0xdc] sm:$0xff] %v1254_v43  }
  0x87   :  { %1259 = vst [vmem:[#allocation5 + $0xe4] sm:$0xf] %v1258_v44  ;;  %v1260_v45 = vld [vmem:[%s11082_s17 + $0xe4] sm:$0xf]  ;;  %v1266_v47 = vld [vmem:[%s11082_s17 + $0xf8] sm:$0xf] }
  0x88   :  { %1261 = vst [vmem:[#allocation5 + $0xe8] sm:$0xf] %v1260_v45  ;;  %1263 = vst [vmem:[#allocation5 + $0xec] sm:$0xff] %v1262_v46   ;;  %v1268_v48 = vld [vmem:[%s11082_s17 + $0xf4] sm:$0xf] }
  0x89   :  { %1267 = vst [vmem:[#allocation5 + $0xf4] sm:$0xf] %v1266_v47  ;;  %v1270_v49 = vld [vmem:[%s11082_s17 + $0xfc] sm:$0xf]  ;;  %1269 = vst [vmem:[#allocation5 + $0xf8] sm:$0xf] %v1268_v48 }
  0x8a   :  { %1271 = vst [vmem:[#allocation5 + $0xfc] sm:$0xf] %v1270_v49 }
  0x8b   :  { %1430 = vsyncadd [#allocation8 + $0x1], 4096  ;;  %v1449_v50 = vld [vmem:[%s11080_s15] sm:$0xf]  ;;  %v1451_v51 = vld [vmem:[%s11080_s15 + $0x8] sm:$0xf] }
  0x8c   :  { %1450 = vst [vmem:[#allocation3] sm:$0xf] %v1449_v50  ;;  %1452 = vst [vmem:[#allocation3 + $0x4] sm:$0xf] %v1451_v51  ;;  %v1453_v52 = vld [vmem:[%s11080_s15 + $0x4] sm:$0xf] }
  0x8d   :  { %v1455_v53 = vld [vmem:[%s11080_s15 + $0xc] sm:$0xff]   ;;  %v1459_v54 = vld [vmem:[%s11080_s15 + $0x18] sm:$0xf]  ;;  %1454 = vst [vmem:[#allocation3 + $0x8] sm:$0xf] %v1453_v52  ;;  %v1463_v56 = vld [vmem:[%s11080_s15 + $0x1c] sm:$0xff]  }
  0x8e   :  { %1456 = vst [vmem:[#allocation3 + $0xc] sm:$0xff] %v1455_v53   ;;  %1460 = vst [vmem:[#allocation3 + $0x14] sm:$0xf] %v1459_v54  ;;  %v1461_v55 = vld [vmem:[%s11080_s15 + $0x14] sm:$0xf]  ;;  %v1471_v59 = vld [vmem:[%s11080_s15 + $0x2c] sm:$0xff]  }
  0x8f   :  { %v1467_v57 = vld [vmem:[%s11080_s15 + $0x28] sm:$0xf]  ;;  %1462 = vst [vmem:[#allocation3 + $0x18] sm:$0xf] %v1461_v55  ;;  %1464 = vst [vmem:[#allocation3 + $0x1c] sm:$0xff] %v1463_v56   ;;  %v1479_v62 = vld [vmem:[%s11080_s15 + $0x3c] sm:$0xff]  }
  0x90   :  { %1468 = vst [vmem:[#allocation3 + $0x24] sm:$0xf] %v1467_v57  ;;  %v1469_v58 = vld [vmem:[%s11080_s15 + $0x24] sm:$0xf]  ;;  %v1475_v60 = vld [vmem:[%s11080_s15 + $0x38] sm:$0xf] }
  0x91   :  { %1470 = vst [vmem:[#allocation3 + $0x28] sm:$0xf] %v1469_v58  ;;  %1472 = vst [vmem:[#allocation3 + $0x2c] sm:$0xff] %v1471_v59   ;;  %v1477_v61 = vld [vmem:[%s11080_s15 + $0x34] sm:$0xf]  ;;  %v1487_v1 = vld [vmem:[%s11080_s15 + $0x4c] sm:$0xff]  }
  0x92   :  { %1476 = vst [vmem:[#allocation3 + $0x34] sm:$0xf] %v1475_v60  ;;  %v1483_v63 = vld [vmem:[%s11080_s15 + $0x48] sm:$0xf]  ;;  %1478 = vst [vmem:[#allocation3 + $0x38] sm:$0xf] %v1477_v61 }
  0x93   :  { %1480 = vst [vmem:[#allocation3 + $0x3c] sm:$0xff] %v1479_v62   ;;  %1484 = vst [vmem:[#allocation3 + $0x44] sm:$0xf] %v1483_v63  ;;  %v1485_v0 = vld [vmem:[%s11080_s15 + $0x44] sm:$0xf]  ;;  %v1495_v4 = vld [vmem:[%s11080_s15 + $0x5c] sm:$0xff]  }
  0x94   :  { %v1491_v2 = vld [vmem:[%s11080_s15 + $0x58] sm:$0xf]  ;;  %1486 = vst [vmem:[#allocation3 + $0x48] sm:$0xf] %v1485_v0  ;;  %1488 = vst [vmem:[#allocation3 + $0x4c] sm:$0xff] %v1487_v1   ;;  %v1503_v7 = vld [vmem:[%s11080_s15 + $0x6c] sm:$0xff]  }
  0x95   :  { %1492 = vst [vmem:[#allocation3 + $0x54] sm:$0xf] %v1491_v2  ;;  %v1493_v3 = vld [vmem:[%s11080_s15 + $0x54] sm:$0xf]  ;;  %v1499_v5 = vld [vmem:[%s11080_s15 + $0x68] sm:$0xf] }
  0x96   :  { %1494 = vst [vmem:[#allocation3 + $0x58] sm:$0xf] %v1493_v3  ;;  %1496 = vst [vmem:[#allocation3 + $0x5c] sm:$0xff] %v1495_v4   ;;  %v1501_v6 = vld [vmem:[%s11080_s15 + $0x64] sm:$0xf]  ;;  %v1511_v10 = vld [vmem:[%s11080_s15 + $0x7c] sm:$0xff]  }
  0x97   :  { %1500 = vst [vmem:[#allocation3 + $0x64] sm:$0xf] %v1499_v5  ;;  %v1507_v8 = vld [vmem:[%s11080_s15 + $0x78] sm:$0xf]  ;;  %1502 = vst [vmem:[#allocation3 + $0x68] sm:$0xf] %v1501_v6 }
  0x98   :  { %1504 = vst [vmem:[#allocation3 + $0x6c] sm:$0xff] %v1503_v7   ;;  %1508 = vst [vmem:[#allocation3 + $0x74] sm:$0xf] %v1507_v8  ;;  %v1509_v9 = vld [vmem:[%s11080_s15 + $0x74] sm:$0xf]  ;;  %v1519_v13 = vld [vmem:[%s11080_s15 + $0x8c] sm:$0xff]  }
  0x99   :  { %v1515_v11 = vld [vmem:[%s11080_s15 + $0x88] sm:$0xf]  ;;  %1510 = vst [vmem:[#allocation3 + $0x78] sm:$0xf] %v1509_v9  ;;  %1512 = vst [vmem:[#allocation3 + $0x7c] sm:$0xff] %v1511_v10   ;;  %v1527_v16 = vld [vmem:[%s11080_s15 + $0x9c] sm:$0xff]  }
  0x9a   :  { %1516 = vst [vmem:[#allocation3 + $0x84] sm:$0xf] %v1515_v11  ;;  %v1517_v12 = vld [vmem:[%s11080_s15 + $0x84] sm:$0xf]  ;;  %v1523_v14 = vld [vmem:[%s11080_s15 + $0x98] sm:$0xf] }
  0x9b   :  { %1518 = vst [vmem:[#allocation3 + $0x88] sm:$0xf] %v1517_v12  ;;  %1520 = vst [vmem:[#allocation3 + $0x8c] sm:$0xff] %v1519_v13   ;;  %v1525_v15 = vld [vmem:[%s11080_s15 + $0x94] sm:$0xf]  ;;  %v1535_v19 = vld [vmem:[%s11080_s15 + $0xac] sm:$0xff]  }
  0x9c   :  { %1524 = vst [vmem:[#allocation3 + $0x94] sm:$0xf] %v1523_v14  ;;  %v1531_v17 = vld [vmem:[%s11080_s15 + $0xa8] sm:$0xf]  ;;  %1526 = vst [vmem:[#allocation3 + $0x98] sm:$0xf] %v1525_v15 }
  0x9d   :  { %1528 = vst [vmem:[#allocation3 + $0x9c] sm:$0xff] %v1527_v16   ;;  %1532 = vst [vmem:[#allocation3 + $0xa4] sm:$0xf] %v1531_v17  ;;  %v1533_v18 = vld [vmem:[%s11080_s15 + $0xa4] sm:$0xf]  ;;  %v1543_v22 = vld [vmem:[%s11080_s15 + $0xbc] sm:$0xff]  }
  0x9e   :  { %v1539_v20 = vld [vmem:[%s11080_s15 + $0xb8] sm:$0xf]  ;;  %1534 = vst [vmem:[#allocation3 + $0xa8] sm:$0xf] %v1533_v18  ;;  %1536 = vst [vmem:[#allocation3 + $0xac] sm:$0xff] %v1535_v19   ;;  %v1551_v25 = vld [vmem:[%s11080_s15 + $0xcc] sm:$0xff]  }
  0x9f   :  { %1540 = vst [vmem:[#allocation3 + $0xb4] sm:$0xf] %v1539_v20  ;;  %v1541_v21 = vld [vmem:[%s11080_s15 + $0xb4] sm:$0xf]  ;;  %v1547_v23 = vld [vmem:[%s11080_s15 + $0xc8] sm:$0xf] }
  0xa0   :  { %1542 = vst [vmem:[#allocation3 + $0xb8] sm:$0xf] %v1541_v21  ;;  %1544 = vst [vmem:[#allocation3 + $0xbc] sm:$0xff] %v1543_v22   ;;  %v1549_v24 = vld [vmem:[%s11080_s15 + $0xc4] sm:$0xf]  ;;  %v1559_v28 = vld [vmem:[%s11080_s15 + $0xdc] sm:$0xff]  }
  0xa1   :  { %1548 = vst [vmem:[#allocation3 + $0xc4] sm:$0xf] %v1547_v23  ;;  %v1555_v26 = vld [vmem:[%s11080_s15 + $0xd8] sm:$0xf]  ;;  %1550 = vst [vmem:[#allocation3 + $0xc8] sm:$0xf] %v1549_v24 }
  0xa2   :  { %1552 = vst [vmem:[#allocation3 + $0xcc] sm:$0xff] %v1551_v25   ;;  %1556 = vst [vmem:[#allocation3 + $0xd4] sm:$0xf] %v1555_v26  ;;  %v1557_v27 = vld [vmem:[%s11080_s15 + $0xd4] sm:$0xf]  ;;  %v1567_v31 = vld [vmem:[%s11080_s15 + $0xec] sm:$0xff]  }
  0xa3   :  { %v1563_v29 = vld [vmem:[%s11080_s15 + $0xe8] sm:$0xf]  ;;  %1558 = vst [vmem:[#allocation3 + $0xd8] sm:$0xf] %v1557_v27  ;;  %1560 = vst [vmem:[#allocation3 + $0xdc] sm:$0xff] %v1559_v28   ;;  %v1575_v34 = vld [vmem:[%s11080_s15 + $0xfc] sm:$0xff]  }
  0xa4   :  { %1564 = vst [vmem:[#allocation3 + $0xe4] sm:$0xf] %v1563_v29  ;;  %v1565_v30 = vld [vmem:[%s11080_s15 + $0xe4] sm:$0xf]  ;;  %v1571_v32 = vld [vmem:[%s11080_s15 + $0xf8] sm:$0xf] }
  0xa5   :  { %1566 = vst [vmem:[#allocation3 + $0xe8] sm:$0xf] %v1565_v30  ;;  %1568 = vst [vmem:[#allocation3 + $0xec] sm:$0xff] %v1567_v31   ;;  %v1573_v33 = vld [vmem:[%s11080_s15 + $0xf4] sm:$0xf]  ;;  %v1583_v37 = vld [vmem:[%s11080_s15 + $0x10c] sm:$0xff]  }
  0xa6   :  { %1572 = vst [vmem:[#allocation3 + $0xf4] sm:$0xf] %v1571_v32  ;;  %v1579_v35 = vld [vmem:[%s11080_s15 + $0x108] sm:$0xf]  ;;  %1574 = vst [vmem:[#allocation3 + $0xf8] sm:$0xf] %v1573_v33 }
  0xa7   :  { %1576 = vst [vmem:[#allocation3 + $0xfc] sm:$0xff] %v1575_v34   ;;  %1580 = vst [vmem:[#allocation3 + $0x104] sm:$0xf] %v1579_v35  ;;  %v1581_v36 = vld [vmem:[%s11080_s15 + $0x104] sm:$0xf]  ;;  %v1591_v40 = vld [vmem:[%s11080_s15 + $0x11c] sm:$0xff]  }
  0xa8   :  { %v1587_v38 = vld [vmem:[%s11080_s15 + $0x118] sm:$0xf]  ;;  %1582 = vst [vmem:[#allocation3 + $0x108] sm:$0xf] %v1581_v36  ;;  %1584 = vst [vmem:[#allocation3 + $0x10c] sm:$0xff] %v1583_v37   ;;  %v1599_v43 = vld [vmem:[%s11080_s15 + $0x12c] sm:$0xff]  }
  0xa9   :  { %1588 = vst [vmem:[#allocation3 + $0x114] sm:$0xf] %v1587_v38  ;;  %v1589_v39 = vld [vmem:[%s11080_s15 + $0x114] sm:$0xf]  ;;  %v1595_v41 = vld [vmem:[%s11080_s15 + $0x128] sm:$0xf] }
  0xaa   :  { %1590 = vst [vmem:[#allocation3 + $0x118] sm:$0xf] %v1589_v39  ;;  %1592 = vst [vmem:[#allocation3 + $0x11c] sm:$0xff] %v1591_v40   ;;  %v1597_v42 = vld [vmem:[%s11080_s15 + $0x124] sm:$0xf]  ;;  %v1607_v46 = vld [vmem:[%s11080_s15 + $0x13c] sm:$0xff]  }
  0xab   :  { %1596 = vst [vmem:[#allocation3 + $0x124] sm:$0xf] %v1595_v41  ;;  %v1603_v44 = vld [vmem:[%s11080_s15 + $0x138] sm:$0xf]  ;;  %1598 = vst [vmem:[#allocation3 + $0x128] sm:$0xf] %v1597_v42 }
  0xac   :  { %1600 = vst [vmem:[#allocation3 + $0x12c] sm:$0xff] %v1599_v43   ;;  %1604 = vst [vmem:[#allocation3 + $0x134] sm:$0xf] %v1603_v44  ;;  %v1605_v45 = vld [vmem:[%s11080_s15 + $0x134] sm:$0xf]  ;;  %v1615_v49 = vld [vmem:[%s11080_s15 + $0x14c] sm:$0xff]  }
  0xad   :  { %v1611_v47 = vld [vmem:[%s11080_s15 + $0x148] sm:$0xf]  ;;  %1606 = vst [vmem:[#allocation3 + $0x138] sm:$0xf] %v1605_v45  ;;  %1608 = vst [vmem:[#allocation3 + $0x13c] sm:$0xff] %v1607_v46   ;;  %v1623_v52 = vld [vmem:[%s11080_s15 + $0x15c] sm:$0xff]  }
  0xae   :  { %1612 = vst [vmem:[#allocation3 + $0x144] sm:$0xf] %v1611_v47  ;;  %v1613_v48 = vld [vmem:[%s11080_s15 + $0x144] sm:$0xf]  ;;  %v1619_v50 = vld [vmem:[%s11080_s15 + $0x158] sm:$0xf] }
  0xaf   :  { %1614 = vst [vmem:[#allocation3 + $0x148] sm:$0xf] %v1613_v48  ;;  %1616 = vst [vmem:[#allocation3 + $0x14c] sm:$0xff] %v1615_v49   ;;  %v1621_v51 = vld [vmem:[%s11080_s15 + $0x154] sm:$0xf]  ;;  %v1631_v55 = vld [vmem:[%s11080_s15 + $0x16c] sm:$0xff]  }
  0xb0   :  { %1620 = vst [vmem:[#allocation3 + $0x154] sm:$0xf] %v1619_v50  ;;  %v1627_v53 = vld [vmem:[%s11080_s15 + $0x168] sm:$0xf]  ;;  %1622 = vst [vmem:[#allocation3 + $0x158] sm:$0xf] %v1621_v51 }
  0xb1   :  { %1624 = vst [vmem:[#allocation3 + $0x15c] sm:$0xff] %v1623_v52   ;;  %1628 = vst [vmem:[#allocation3 + $0x164] sm:$0xf] %v1627_v53  ;;  %v1629_v54 = vld [vmem:[%s11080_s15 + $0x164] sm:$0xf]  ;;  %v1639_v58 = vld [vmem:[%s11080_s15 + $0x17c] sm:$0xff]  }
  0xb2   :  { %v1635_v56 = vld [vmem:[%s11080_s15 + $0x178] sm:$0xf]  ;;  %1630 = vst [vmem:[#allocation3 + $0x168] sm:$0xf] %v1629_v54  ;;  %1632 = vst [vmem:[#allocation3 + $0x16c] sm:$0xff] %v1631_v55   ;;  %v1647_v61 = vld [vmem:[%s11080_s15 + $0x18c] sm:$0xff]  }
  0xb3   :  { %1636 = vst [vmem:[#allocation3 + $0x174] sm:$0xf] %v1635_v56  ;;  %v1637_v57 = vld [vmem:[%s11080_s15 + $0x174] sm:$0xf]  ;;  %v1643_v59 = vld [vmem:[%s11080_s15 + $0x188] sm:$0xf] }
  0xb4   :  { %1638 = vst [vmem:[#allocation3 + $0x178] sm:$0xf] %v1637_v57  ;;  %1640 = vst [vmem:[#allocation3 + $0x17c] sm:$0xff] %v1639_v58   ;;  %v1645_v60 = vld [vmem:[%s11080_s15 + $0x184] sm:$0xf]  ;;  %v1655_v0 = vld [vmem:[%s11080_s15 + $0x19c] sm:$0xff]  }
  0xb5   :  { %1644 = vst [vmem:[#allocation3 + $0x184] sm:$0xf] %v1643_v59  ;;  %v1651_v62 = vld [vmem:[%s11080_s15 + $0x198] sm:$0xf]  ;;  %1646 = vst [vmem:[#allocation3 + $0x188] sm:$0xf] %v1645_v60 }
  0xb6   :  { %1648 = vst [vmem:[#allocation3 + $0x18c] sm:$0xff] %v1647_v61   ;;  %1652 = vst [vmem:[#allocation3 + $0x194] sm:$0xf] %v1651_v62  ;;  %v1653_v63 = vld [vmem:[%s11080_s15 + $0x194] sm:$0xf]  ;;  %v1663_v3 = vld [vmem:[%s11080_s15 + $0x1ac] sm:$0xff]  }
  0xb7   :  { %v1659_v1 = vld [vmem:[%s11080_s15 + $0x1a8] sm:$0xf]  ;;  %1654 = vst [vmem:[#allocation3 + $0x198] sm:$0xf] %v1653_v63  ;;  %1656 = vst [vmem:[#allocation3 + $0x19c] sm:$0xff] %v1655_v0   ;;  %v1671_v6 = vld [vmem:[%s11080_s15 + $0x1bc] sm:$0xff]  }
  0xb8   :  { %1660 = vst [vmem:[#allocation3 + $0x1a4] sm:$0xf] %v1659_v1  ;;  %v1661_v2 = vld [vmem:[%s11080_s15 + $0x1a4] sm:$0xf]  ;;  %v1667_v4 = vld [vmem:[%s11080_s15 + $0x1b8] sm:$0xf] }
  0xb9   :  { %1662 = vst [vmem:[#allocation3 + $0x1a8] sm:$0xf] %v1661_v2  ;;  %1664 = vst [vmem:[#allocation3 + $0x1ac] sm:$0xff] %v1663_v3   ;;  %v1669_v5 = vld [vmem:[%s11080_s15 + $0x1b4] sm:$0xf]  ;;  %v1679_v9 = vld [vmem:[%s11080_s15 + $0x1cc] sm:$0xff]  }
  0xba   :  { %1668 = vst [vmem:[#allocation3 + $0x1b4] sm:$0xf] %v1667_v4  ;;  %v1675_v7 = vld [vmem:[%s11080_s15 + $0x1c8] sm:$0xf]  ;;  %1670 = vst [vmem:[#allocation3 + $0x1b8] sm:$0xf] %v1669_v5 }
  0xbb   :  { %1672 = vst [vmem:[#allocation3 + $0x1bc] sm:$0xff] %v1671_v6   ;;  %1676 = vst [vmem:[#allocation3 + $0x1c4] sm:$0xf] %v1675_v7  ;;  %v1677_v8 = vld [vmem:[%s11080_s15 + $0x1c4] sm:$0xf]  ;;  %v1687_v12 = vld [vmem:[%s11080_s15 + $0x1dc] sm:$0xff]  }
  0xbc   :  { %v1683_v10 = vld [vmem:[%s11080_s15 + $0x1d8] sm:$0xf]  ;;  %1678 = vst [vmem:[#allocation3 + $0x1c8] sm:$0xf] %v1677_v8  ;;  %1680 = vst [vmem:[#allocation3 + $0x1cc] sm:$0xff] %v1679_v9   ;;  %v1695_v15 = vld [vmem:[%s11080_s15 + $0x1ec] sm:$0xff]  }
  0xbd   :  { %1684 = vst [vmem:[#allocation3 + $0x1d4] sm:$0xf] %v1683_v10  ;;  %v1685_v11 = vld [vmem:[%s11080_s15 + $0x1d4] sm:$0xf]  ;;  %v1691_v13 = vld [vmem:[%s11080_s15 + $0x1e8] sm:$0xf] }
  0xbe   :  { %1686 = vst [vmem:[#allocation3 + $0x1d8] sm:$0xf] %v1685_v11  ;;  %1688 = vst [vmem:[#allocation3 + $0x1dc] sm:$0xff] %v1687_v12   ;;  %v1693_v14 = vld [vmem:[%s11080_s15 + $0x1e4] sm:$0xf]  ;;  %v1703_v18 = vld [vmem:[%s11080_s15 + $0x1fc] sm:$0xff]  }
  0xbf   :  { %1692 = vst [vmem:[#allocation3 + $0x1e4] sm:$0xf] %v1691_v13  ;;  %v1699_v16 = vld [vmem:[%s11080_s15 + $0x1f8] sm:$0xf]  ;;  %1694 = vst [vmem:[#allocation3 + $0x1e8] sm:$0xf] %v1693_v14 }
  0xc0   :  { %1696 = vst [vmem:[#allocation3 + $0x1ec] sm:$0xff] %v1695_v15   ;;  %1700 = vst [vmem:[#allocation3 + $0x1f4] sm:$0xf] %v1699_v16  ;;  %v1701_v17 = vld [vmem:[%s11080_s15 + $0x1f4] sm:$0xf]  ;;  %v1711_v21 = vld [vmem:[%s11080_s15 + $0x20c] sm:$0xff]  }
  0xc1   :  { %v1707_v19 = vld [vmem:[%s11080_s15 + $0x208] sm:$0xf]  ;;  %1702 = vst [vmem:[#allocation3 + $0x1f8] sm:$0xf] %v1701_v17  ;;  %1704 = vst [vmem:[#allocation3 + $0x1fc] sm:$0xff] %v1703_v18   ;;  %v1719_v24 = vld [vmem:[%s11080_s15 + $0x21c] sm:$0xff]  }
  0xc2   :  { %1708 = vst [vmem:[#allocation3 + $0x204] sm:$0xf] %v1707_v19  ;;  %v1709_v20 = vld [vmem:[%s11080_s15 + $0x204] sm:$0xf]  ;;  %v1715_v22 = vld [vmem:[%s11080_s15 + $0x218] sm:$0xf] }
  0xc3   :  { %1710 = vst [vmem:[#allocation3 + $0x208] sm:$0xf] %v1709_v20  ;;  %1712 = vst [vmem:[#allocation3 + $0x20c] sm:$0xff] %v1711_v21   ;;  %v1717_v23 = vld [vmem:[%s11080_s15 + $0x214] sm:$0xf]  ;;  %v1727_v27 = vld [vmem:[%s11080_s15 + $0x22c] sm:$0xff]  }
  0xc4   :  { %1716 = vst [vmem:[#allocation3 + $0x214] sm:$0xf] %v1715_v22  ;;  %v1723_v25 = vld [vmem:[%s11080_s15 + $0x228] sm:$0xf]  ;;  %1718 = vst [vmem:[#allocation3 + $0x218] sm:$0xf] %v1717_v23 }
  0xc5   :  { %1720 = vst [vmem:[#allocation3 + $0x21c] sm:$0xff] %v1719_v24   ;;  %1724 = vst [vmem:[#allocation3 + $0x224] sm:$0xf] %v1723_v25  ;;  %v1725_v26 = vld [vmem:[%s11080_s15 + $0x224] sm:$0xf]  ;;  %v1735_v30 = vld [vmem:[%s11080_s15 + $0x23c] sm:$0xff]  }
  0xc6   :  { %v1731_v28 = vld [vmem:[%s11080_s15 + $0x238] sm:$0xf]  ;;  %1726 = vst [vmem:[#allocation3 + $0x228] sm:$0xf] %v1725_v26  ;;  %1728 = vst [vmem:[#allocation3 + $0x22c] sm:$0xff] %v1727_v27   ;;  %v1743_v33 = vld [vmem:[%s11080_s15 + $0x24c] sm:$0xff]  }
  0xc7   :  { %1732 = vst [vmem:[#allocation3 + $0x234] sm:$0xf] %v1731_v28  ;;  %v1733_v29 = vld [vmem:[%s11080_s15 + $0x234] sm:$0xf]  ;;  %v1739_v31 = vld [vmem:[%s11080_s15 + $0x248] sm:$0xf] }
  0xc8   :  { %1734 = vst [vmem:[#allocation3 + $0x238] sm:$0xf] %v1733_v29  ;;  %1736 = vst [vmem:[#allocation3 + $0x23c] sm:$0xff] %v1735_v30   ;;  %v1741_v32 = vld [vmem:[%s11080_s15 + $0x244] sm:$0xf]  ;;  %v1751_v36 = vld [vmem:[%s11080_s15 + $0x25c] sm:$0xff]  }
  0xc9   :  { %1740 = vst [vmem:[#allocation3 + $0x244] sm:$0xf] %v1739_v31  ;;  %v1747_v34 = vld [vmem:[%s11080_s15 + $0x258] sm:$0xf]  ;;  %1742 = vst [vmem:[#allocation3 + $0x248] sm:$0xf] %v1741_v32 }
  0xca   :  { %1744 = vst [vmem:[#allocation3 + $0x24c] sm:$0xff] %v1743_v33   ;;  %1748 = vst [vmem:[#allocation3 + $0x254] sm:$0xf] %v1747_v34  ;;  %v1749_v35 = vld [vmem:[%s11080_s15 + $0x254] sm:$0xf]  ;;  %v1759_v39 = vld [vmem:[%s11080_s15 + $0x26c] sm:$0xff]  }
  0xcb   :  { %v1755_v37 = vld [vmem:[%s11080_s15 + $0x268] sm:$0xf]  ;;  %1750 = vst [vmem:[#allocation3 + $0x258] sm:$0xf] %v1749_v35  ;;  %1752 = vst [vmem:[#allocation3 + $0x25c] sm:$0xff] %v1751_v36   ;;  %v1767_v42 = vld [vmem:[%s11080_s15 + $0x27c] sm:$0xff]  }
  0xcc   :  { %1756 = vst [vmem:[#allocation3 + $0x264] sm:$0xf] %v1755_v37  ;;  %v1757_v38 = vld [vmem:[%s11080_s15 + $0x264] sm:$0xf]  ;;  %v1763_v40 = vld [vmem:[%s11080_s15 + $0x278] sm:$0xf] }
  0xcd   :  { %1758 = vst [vmem:[#allocation3 + $0x268] sm:$0xf] %v1757_v38  ;;  %1760 = vst [vmem:[#allocation3 + $0x26c] sm:$0xff] %v1759_v39   ;;  %v1765_v41 = vld [vmem:[%s11080_s15 + $0x274] sm:$0xf]  ;;  %v1775_v45 = vld [vmem:[%s11080_s15 + $0x28c] sm:$0xff]  }
  0xce   :  { %1764 = vst [vmem:[#allocation3 + $0x274] sm:$0xf] %v1763_v40  ;;  %v1771_v43 = vld [vmem:[%s11080_s15 + $0x288] sm:$0xf]  ;;  %1766 = vst [vmem:[#allocation3 + $0x278] sm:$0xf] %v1765_v41 }
  0xcf   :  { %1768 = vst [vmem:[#allocation3 + $0x27c] sm:$0xff] %v1767_v42   ;;  %1772 = vst [vmem:[#allocation3 + $0x284] sm:$0xf] %v1771_v43  ;;  %v1773_v44 = vld [vmem:[%s11080_s15 + $0x284] sm:$0xf]  ;;  %v1783_v48 = vld [vmem:[%s11080_s15 + $0x29c] sm:$0xff]  }
  0xd0   :  { %v1779_v46 = vld [vmem:[%s11080_s15 + $0x298] sm:$0xf]  ;;  %1774 = vst [vmem:[#allocation3 + $0x288] sm:$0xf] %v1773_v44  ;;  %1776 = vst [vmem:[#allocation3 + $0x28c] sm:$0xff] %v1775_v45   ;;  %v1791_v51 = vld [vmem:[%s11080_s15 + $0x2ac] sm:$0xff]  }
  0xd1   :  { %1780 = vst [vmem:[#allocation3 + $0x294] sm:$0xf] %v1779_v46  ;;  %v1781_v47 = vld [vmem:[%s11080_s15 + $0x294] sm:$0xf]  ;;  %v1787_v49 = vld [vmem:[%s11080_s15 + $0x2a8] sm:$0xf] }
  0xd2   :  { %1782 = vst [vmem:[#allocation3 + $0x298] sm:$0xf] %v1781_v47  ;;  %1784 = vst [vmem:[#allocation3 + $0x29c] sm:$0xff] %v1783_v48   ;;  %v1789_v50 = vld [vmem:[%s11080_s15 + $0x2a4] sm:$0xf]  ;;  %v1799_v54 = vld [vmem:[%s11080_s15 + $0x2bc] sm:$0xff]  }
  0xd3   :  { %1788 = vst [vmem:[#allocation3 + $0x2a4] sm:$0xf] %v1787_v49  ;;  %v1795_v52 = vld [vmem:[%s11080_s15 + $0x2b8] sm:$0xf]  ;;  %1790 = vst [vmem:[#allocation3 + $0x2a8] sm:$0xf] %v1789_v50 }
  0xd4   :  { %1792 = vst [vmem:[#allocation3 + $0x2ac] sm:$0xff] %v1791_v51   ;;  %1796 = vst [vmem:[#allocation3 + $0x2b4] sm:$0xf] %v1795_v52  ;;  %v1797_v53 = vld [vmem:[%s11080_s15 + $0x2b4] sm:$0xf]  ;;  %v1807_v57 = vld [vmem:[%s11080_s15 + $0x2cc] sm:$0xff]  }
  0xd5   :  { %v1803_v55 = vld [vmem:[%s11080_s15 + $0x2c8] sm:$0xf]  ;;  %1798 = vst [vmem:[#allocation3 + $0x2b8] sm:$0xf] %v1797_v53  ;;  %1800 = vst [vmem:[#allocation3 + $0x2bc] sm:$0xff] %v1799_v54   ;;  %v1815_v60 = vld [vmem:[%s11080_s15 + $0x2dc] sm:$0xff]  }
  0xd6   :  { %1804 = vst [vmem:[#allocation3 + $0x2c4] sm:$0xf] %v1803_v55  ;;  %v1805_v56 = vld [vmem:[%s11080_s15 + $0x2c4] sm:$0xf]  ;;  %v1811_v58 = vld [vmem:[%s11080_s15 + $0x2d8] sm:$0xf] }
  0xd7   :  { %1806 = vst [vmem:[#allocation3 + $0x2c8] sm:$0xf] %v1805_v56  ;;  %1808 = vst [vmem:[#allocation3 + $0x2cc] sm:$0xff] %v1807_v57   ;;  %v1813_v59 = vld [vmem:[%s11080_s15 + $0x2d4] sm:$0xf]  ;;  %v1823_v63 = vld [vmem:[%s11080_s15 + $0x2ec] sm:$0xff]  }
  0xd8   :  { %1812 = vst [vmem:[#allocation3 + $0x2d4] sm:$0xf] %v1811_v58  ;;  %v1819_v61 = vld [vmem:[%s11080_s15 + $0x2e8] sm:$0xf]  ;;  %1814 = vst [vmem:[#allocation3 + $0x2d8] sm:$0xf] %v1813_v59 }
  0xd9   :  { %1816 = vst [vmem:[#allocation3 + $0x2dc] sm:$0xff] %v1815_v60   ;;  %1820 = vst [vmem:[#allocation3 + $0x2e4] sm:$0xf] %v1819_v61  ;;  %v1821_v62 = vld [vmem:[%s11080_s15 + $0x2e4] sm:$0xf]  ;;  %v1831_v2 = vld [vmem:[%s11080_s15 + $0x2fc] sm:$0xff]  }
  0xda   :  { %v1827_v0 = vld [vmem:[%s11080_s15 + $0x2f8] sm:$0xf]  ;;  %1822 = vst [vmem:[#allocation3 + $0x2e8] sm:$0xf] %v1821_v62  ;;  %1824 = vst [vmem:[#allocation3 + $0x2ec] sm:$0xff] %v1823_v63   ;;  %v1839_v5 = vld [vmem:[%s11080_s15 + $0x30c] sm:$0xff]  }
  0xdb   :  { %1828 = vst [vmem:[#allocation3 + $0x2f4] sm:$0xf] %v1827_v0  ;;  %v1829_v1 = vld [vmem:[%s11080_s15 + $0x2f4] sm:$0xf]  ;;  %v1835_v3 = vld [vmem:[%s11080_s15 + $0x308] sm:$0xf] }
  0xdc   :  { %1830 = vst [vmem:[#allocation3 + $0x2f8] sm:$0xf] %v1829_v1  ;;  %1832 = vst [vmem:[#allocation3 + $0x2fc] sm:$0xff] %v1831_v2   ;;  %v1837_v4 = vld [vmem:[%s11080_s15 + $0x304] sm:$0xf]  ;;  %v1847_v8 = vld [vmem:[%s11080_s15 + $0x31c] sm:$0xff]  }
  0xdd   :  { %1836 = vst [vmem:[#allocation3 + $0x304] sm:$0xf] %v1835_v3  ;;  %v1843_v6 = vld [vmem:[%s11080_s15 + $0x318] sm:$0xf]  ;;  %1838 = vst [vmem:[#allocation3 + $0x308] sm:$0xf] %v1837_v4 }
  0xde   :  { %1840 = vst [vmem:[#allocation3 + $0x30c] sm:$0xff] %v1839_v5   ;;  %1844 = vst [vmem:[#allocation3 + $0x314] sm:$0xf] %v1843_v6  ;;  %v1845_v7 = vld [vmem:[%s11080_s15 + $0x314] sm:$0xf]  ;;  %v1855_v11 = vld [vmem:[%s11080_s15 + $0x32c] sm:$0xff]  }
  0xdf   :  { %v1851_v9 = vld [vmem:[%s11080_s15 + $0x328] sm:$0xf]  ;;  %1846 = vst [vmem:[#allocation3 + $0x318] sm:$0xf] %v1845_v7  ;;  %1848 = vst [vmem:[#allocation3 + $0x31c] sm:$0xff] %v1847_v8   ;;  %v1863_v14 = vld [vmem:[%s11080_s15 + $0x33c] sm:$0xff]  }
  0xe0   :  { %1852 = vst [vmem:[#allocation3 + $0x324] sm:$0xf] %v1851_v9  ;;  %v1853_v10 = vld [vmem:[%s11080_s15 + $0x324] sm:$0xf]  ;;  %v1859_v12 = vld [vmem:[%s11080_s15 + $0x338] sm:$0xf] }
  0xe1   :  { %1854 = vst [vmem:[#allocation3 + $0x328] sm:$0xf] %v1853_v10  ;;  %1856 = vst [vmem:[#allocation3 + $0x32c] sm:$0xff] %v1855_v11   ;;  %v1861_v13 = vld [vmem:[%s11080_s15 + $0x334] sm:$0xf]  ;;  %v1871_v17 = vld [vmem:[%s11080_s15 + $0x34c] sm:$0xff]  }
  0xe2   :  { %1860 = vst [vmem:[#allocation3 + $0x334] sm:$0xf] %v1859_v12  ;;  %v1867_v15 = vld [vmem:[%s11080_s15 + $0x348] sm:$0xf]  ;;  %1862 = vst [vmem:[#allocation3 + $0x338] sm:$0xf] %v1861_v13 }
  0xe3   :  { %1864 = vst [vmem:[#allocation3 + $0x33c] sm:$0xff] %v1863_v14   ;;  %1868 = vst [vmem:[#allocation3 + $0x344] sm:$0xf] %v1867_v15  ;;  %v1869_v16 = vld [vmem:[%s11080_s15 + $0x344] sm:$0xf]  ;;  %v1879_v20 = vld [vmem:[%s11080_s15 + $0x35c] sm:$0xff]  }
  0xe4   :  { %v1875_v18 = vld [vmem:[%s11080_s15 + $0x358] sm:$0xf]  ;;  %1870 = vst [vmem:[#allocation3 + $0x348] sm:$0xf] %v1869_v16  ;;  %1872 = vst [vmem:[#allocation3 + $0x34c] sm:$0xff] %v1871_v17   ;;  %v1887_v23 = vld [vmem:[%s11080_s15 + $0x36c] sm:$0xff]  }
  0xe5   :  { %1876 = vst [vmem:[#allocation3 + $0x354] sm:$0xf] %v1875_v18  ;;  %v1877_v19 = vld [vmem:[%s11080_s15 + $0x354] sm:$0xf]  ;;  %v1883_v21 = vld [vmem:[%s11080_s15 + $0x368] sm:$0xf] }
  0xe6   :  { %1878 = vst [vmem:[#allocation3 + $0x358] sm:$0xf] %v1877_v19  ;;  %1880 = vst [vmem:[#allocation3 + $0x35c] sm:$0xff] %v1879_v20   ;;  %v1885_v22 = vld [vmem:[%s11080_s15 + $0x364] sm:$0xf]  ;;  %v1895_v26 = vld [vmem:[%s11080_s15 + $0x37c] sm:$0xff]  }
  0xe7   :  { %1884 = vst [vmem:[#allocation3 + $0x364] sm:$0xf] %v1883_v21  ;;  %v1891_v24 = vld [vmem:[%s11080_s15 + $0x378] sm:$0xf]  ;;  %1886 = vst [vmem:[#allocation3 + $0x368] sm:$0xf] %v1885_v22 }
  0xe8   :  { %1888 = vst [vmem:[#allocation3 + $0x36c] sm:$0xff] %v1887_v23   ;;  %1892 = vst [vmem:[#allocation3 + $0x374] sm:$0xf] %v1891_v24  ;;  %v1893_v25 = vld [vmem:[%s11080_s15 + $0x374] sm:$0xf]  ;;  %v1903_v29 = vld [vmem:[%s11080_s15 + $0x38c] sm:$0xff]  }
  0xe9   :  { %v1899_v27 = vld [vmem:[%s11080_s15 + $0x388] sm:$0xf]  ;;  %1894 = vst [vmem:[#allocation3 + $0x378] sm:$0xf] %v1893_v25  ;;  %1896 = vst [vmem:[#allocation3 + $0x37c] sm:$0xff] %v1895_v26   ;;  %v1911_v32 = vld [vmem:[%s11080_s15 + $0x39c] sm:$0xff]  }
  0xea   :  { %1900 = vst [vmem:[#allocation3 + $0x384] sm:$0xf] %v1899_v27  ;;  %v1901_v28 = vld [vmem:[%s11080_s15 + $0x384] sm:$0xf]  ;;  %v1907_v30 = vld [vmem:[%s11080_s15 + $0x398] sm:$0xf] }
  0xeb   :  { %1902 = vst [vmem:[#allocation3 + $0x388] sm:$0xf] %v1901_v28  ;;  %1904 = vst [vmem:[#allocation3 + $0x38c] sm:$0xff] %v1903_v29   ;;  %v1909_v31 = vld [vmem:[%s11080_s15 + $0x394] sm:$0xf]  ;;  %v1919_v35 = vld [vmem:[%s11080_s15 + $0x3ac] sm:$0xff]  }
  0xec   :  { %1908 = vst [vmem:[#allocation3 + $0x394] sm:$0xf] %v1907_v30  ;;  %v1915_v33 = vld [vmem:[%s11080_s15 + $0x3a8] sm:$0xf]  ;;  %1910 = vst [vmem:[#allocation3 + $0x398] sm:$0xf] %v1909_v31 }
  0xed   :  { %1912 = vst [vmem:[#allocation3 + $0x39c] sm:$0xff] %v1911_v32   ;;  %1916 = vst [vmem:[#allocation3 + $0x3a4] sm:$0xf] %v1915_v33  ;;  %v1917_v34 = vld [vmem:[%s11080_s15 + $0x3a4] sm:$0xf]  ;;  %v1927_v38 = vld [vmem:[%s11080_s15 + $0x3bc] sm:$0xff]  }
  0xee   :  { %v1923_v36 = vld [vmem:[%s11080_s15 + $0x3b8] sm:$0xf]  ;;  %1918 = vst [vmem:[#allocation3 + $0x3a8] sm:$0xf] %v1917_v34  ;;  %1920 = vst [vmem:[#allocation3 + $0x3ac] sm:$0xff] %v1919_v35   ;;  %v1935_v41 = vld [vmem:[%s11080_s15 + $0x3cc] sm:$0xff]  }
  0xef   :  { %1924 = vst [vmem:[#allocation3 + $0x3b4] sm:$0xf] %v1923_v36  ;;  %v1925_v37 = vld [vmem:[%s11080_s15 + $0x3b4] sm:$0xf]  ;;  %v1931_v39 = vld [vmem:[%s11080_s15 + $0x3c8] sm:$0xf] }
  0xf0   :  { %1926 = vst [vmem:[#allocation3 + $0x3b8] sm:$0xf] %v1925_v37  ;;  %1928 = vst [vmem:[#allocation3 + $0x3bc] sm:$0xff] %v1927_v38   ;;  %v1933_v40 = vld [vmem:[%s11080_s15 + $0x3c4] sm:$0xf]  ;;  %v1943_v44 = vld [vmem:[%s11080_s15 + $0x3dc] sm:$0xff]  }
  0xf1   :  { %1932 = vst [vmem:[#allocation3 + $0x3c4] sm:$0xf] %v1931_v39  ;;  %v1939_v42 = vld [vmem:[%s11080_s15 + $0x3d8] sm:$0xf]  ;;  %1934 = vst [vmem:[#allocation3 + $0x3c8] sm:$0xf] %v1933_v40 }
  0xf2   :  { %1936 = vst [vmem:[#allocation3 + $0x3cc] sm:$0xff] %v1935_v41   ;;  %1940 = vst [vmem:[#allocation3 + $0x3d4] sm:$0xf] %v1939_v42  ;;  %v1941_v43 = vld [vmem:[%s11080_s15 + $0x3d4] sm:$0xf]  ;;  %v1951_v47 = vld [vmem:[%s11080_s15 + $0x3ec] sm:$0xff]  }
  0xf3   :  { %v1947_v45 = vld [vmem:[%s11080_s15 + $0x3e8] sm:$0xf]  ;;  %1942 = vst [vmem:[#allocation3 + $0x3d8] sm:$0xf] %v1941_v43  ;;  %1944 = vst [vmem:[#allocation3 + $0x3dc] sm:$0xff] %v1943_v44  }
  0xf4   :  { %1948 = vst [vmem:[#allocation3 + $0x3e4] sm:$0xf] %v1947_v45  ;;  %v1949_v46 = vld [vmem:[%s11080_s15 + $0x3e4] sm:$0xf]  ;;  %v1955_v48 = vld [vmem:[%s11080_s15 + $0x3f8] sm:$0xf] }
  0xf5   :  { %1950 = vst [vmem:[#allocation3 + $0x3e8] sm:$0xf] %v1949_v46  ;;  %1952 = vst [vmem:[#allocation3 + $0x3ec] sm:$0xff] %v1951_v47   ;;  %v1957_v49 = vld [vmem:[%s11080_s15 + $0x3f4] sm:$0xf] }
  0xf6   :  { %1956 = vst [vmem:[#allocation3 + $0x3f4] sm:$0xf] %v1955_v48  ;;  %v1959_v50 = vld [vmem:[%s11080_s15 + $0x3fc] sm:$0xf]  ;;  %1958 = vst [vmem:[#allocation3 + $0x3f8] sm:$0xf] %v1957_v49 }
  0xf7   :  { %1960 = vst [vmem:[#allocation3 + $0x3fc] sm:$0xf] %v1959_v50 }
  0xf8   :  { %2503 = vsyncadd [#allocation8 + $0x2], 16384  ;;  %v2522_v51 = vld [vmem:[%s11083_s18] sm:$0xf]  ;;  %v2524_v52 = vld [vmem:[%s11083_s18 + $0x8] sm:$0xf] }
  0xf9   :  { %2523 = vst [vmem:[#allocation6] sm:$0xf] %v2522_v51  ;;  %2525 = vst [vmem:[#allocation6 + $0x4] sm:$0xf] %v2524_v52  ;;  %v2526_v53 = vld [vmem:[%s11083_s18 + $0x4] sm:$0xf] }
  0xfa   :  { %v2528_v54 = vld [vmem:[%s11083_s18 + $0xc] sm:$0xff]   ;;  %v2532_v55 = vld [vmem:[%s11083_s18 + $0x18] sm:$0xf]  ;;  %2527 = vst [vmem:[#allocation6 + $0x8] sm:$0xf] %v2526_v53  ;;  %v2536_v57 = vld [vmem:[%s11083_s18 + $0x1c] sm:$0xff]  }
  0xfb   :  { %2529 = vst [vmem:[#allocation6 + $0xc] sm:$0xff] %v2528_v54   ;;  %2533 = vst [vmem:[#allocation6 + $0x14] sm:$0xf] %v2532_v55  ;;  %v2534_v56 = vld [vmem:[%s11083_s18 + $0x14] sm:$0xf]  ;;  %v2544_v60 = vld [vmem:[%s11083_s18 + $0x2c] sm:$0xff]  }
  0xfc   :  { %v2540_v58 = vld [vmem:[%s11083_s18 + $0x28] sm:$0xf]  ;;  %2535 = vst [vmem:[#allocation6 + $0x18] sm:$0xf] %v2534_v56  ;;  %2537 = vst [vmem:[#allocation6 + $0x1c] sm:$0xff] %v2536_v57   ;;  %v2552_v63 = vld [vmem:[%s11083_s18 + $0x3c] sm:$0xff]  }
  0xfd   :  { %2541 = vst [vmem:[#allocation6 + $0x24] sm:$0xf] %v2540_v58  ;;  %v2542_v59 = vld [vmem:[%s11083_s18 + $0x24] sm:$0xf]  ;;  %v2548_v61 = vld [vmem:[%s11083_s18 + $0x38] sm:$0xf] }
  0xfe   :  { %2543 = vst [vmem:[#allocation6 + $0x28] sm:$0xf] %v2542_v59  ;;  %2545 = vst [vmem:[#allocation6 + $0x2c] sm:$0xff] %v2544_v60   ;;  %v2550_v62 = vld [vmem:[%s11083_s18 + $0x34] sm:$0xf]  ;;  %v2560_v2 = vld [vmem:[%s11083_s18 + $0x4c] sm:$0xff]  }
  0xff   :  { %2549 = vst [vmem:[#allocation6 + $0x34] sm:$0xf] %v2548_v61  ;;  %v2556_v0 = vld [vmem:[%s11083_s18 + $0x48] sm:$0xf]  ;;  %2551 = vst [vmem:[#allocation6 + $0x38] sm:$0xf] %v2550_v62 }
 0x100   :  { %2553 = vst [vmem:[#allocation6 + $0x3c] sm:$0xff] %v2552_v63   ;;  %2557 = vst [vmem:[#allocation6 + $0x44] sm:$0xf] %v2556_v0  ;;  %v2558_v1 = vld [vmem:[%s11083_s18 + $0x44] sm:$0xf]  ;;  %v2568_v5 = vld [vmem:[%s11083_s18 + $0x5c] sm:$0xff]  }
 0x101   :  { %v2564_v3 = vld [vmem:[%s11083_s18 + $0x58] sm:$0xf]  ;;  %2559 = vst [vmem:[#allocation6 + $0x48] sm:$0xf] %v2558_v1  ;;  %2561 = vst [vmem:[#allocation6 + $0x4c] sm:$0xff] %v2560_v2   ;;  %v2576_v8 = vld [vmem:[%s11083_s18 + $0x6c] sm:$0xff]  }
 0x102   :  { %2565 = vst [vmem:[#allocation6 + $0x54] sm:$0xf] %v2564_v3  ;;  %v2566_v4 = vld [vmem:[%s11083_s18 + $0x54] sm:$0xf]  ;;  %v2572_v6 = vld [vmem:[%s11083_s18 + $0x68] sm:$0xf] }
 0x103   :  { %2567 = vst [vmem:[#allocation6 + $0x58] sm:$0xf] %v2566_v4  ;;  %2569 = vst [vmem:[#allocation6 + $0x5c] sm:$0xff] %v2568_v5   ;;  %v2574_v7 = vld [vmem:[%s11083_s18 + $0x64] sm:$0xf]  ;;  %v2584_v11 = vld [vmem:[%s11083_s18 + $0x7c] sm:$0xff]  }
 0x104   :  { %2573 = vst [vmem:[#allocation6 + $0x64] sm:$0xf] %v2572_v6  ;;  %v2580_v9 = vld [vmem:[%s11083_s18 + $0x78] sm:$0xf]  ;;  %2575 = vst [vmem:[#allocation6 + $0x68] sm:$0xf] %v2574_v7 }
 0x105   :  { %2577 = vst [vmem:[#allocation6 + $0x6c] sm:$0xff] %v2576_v8   ;;  %2581 = vst [vmem:[#allocation6 + $0x74] sm:$0xf] %v2580_v9  ;;  %v2582_v10 = vld [vmem:[%s11083_s18 + $0x74] sm:$0xf]  ;;  %v2592_v14 = vld [vmem:[%s11083_s18 + $0x8c] sm:$0xff]  }
 0x106   :  { %v2588_v12 = vld [vmem:[%s11083_s18 + $0x88] sm:$0xf]  ;;  %2583 = vst [vmem:[#allocation6 + $0x78] sm:$0xf] %v2582_v10  ;;  %2585 = vst [vmem:[#allocation6 + $0x7c] sm:$0xff] %v2584_v11   ;;  %v2600_v17 = vld [vmem:[%s11083_s18 + $0x9c] sm:$0xff]  }
 0x107   :  { %2589 = vst [vmem:[#allocation6 + $0x84] sm:$0xf] %v2588_v12  ;;  %v2590_v13 = vld [vmem:[%s11083_s18 + $0x84] sm:$0xf]  ;;  %v2596_v15 = vld [vmem:[%s11083_s18 + $0x98] sm:$0xf] }
 0x108   :  { %2591 = vst [vmem:[#allocation6 + $0x88] sm:$0xf] %v2590_v13  ;;  %2593 = vst [vmem:[#allocation6 + $0x8c] sm:$0xff] %v2592_v14   ;;  %v2598_v16 = vld [vmem:[%s11083_s18 + $0x94] sm:$0xf]  ;;  %v2608_v20 = vld [vmem:[%s11083_s18 + $0xac] sm:$0xff]  }
 0x109   :  { %2597 = vst [vmem:[#allocation6 + $0x94] sm:$0xf] %v2596_v15  ;;  %v2604_v18 = vld [vmem:[%s11083_s18 + $0xa8] sm:$0xf]  ;;  %2599 = vst [vmem:[#allocation6 + $0x98] sm:$0xf] %v2598_v16 }
 0x10a   :  { %2601 = vst [vmem:[#allocation6 + $0x9c] sm:$0xff] %v2600_v17   ;;  %2605 = vst [vmem:[#allocation6 + $0xa4] sm:$0xf] %v2604_v18  ;;  %v2606_v19 = vld [vmem:[%s11083_s18 + $0xa4] sm:$0xf]  ;;  %v2616_v23 = vld [vmem:[%s11083_s18 + $0xbc] sm:$0xff]  }
 0x10b   :  { %v2612_v21 = vld [vmem:[%s11083_s18 + $0xb8] sm:$0xf]  ;;  %2607 = vst [vmem:[#allocation6 + $0xa8] sm:$0xf] %v2606_v19  ;;  %2609 = vst [vmem:[#allocation6 + $0xac] sm:$0xff] %v2608_v20   ;;  %v2624_v26 = vld [vmem:[%s11083_s18 + $0xcc] sm:$0xff]  }
 0x10c   :  { %2613 = vst [vmem:[#allocation6 + $0xb4] sm:$0xf] %v2612_v21  ;;  %v2614_v22 = vld [vmem:[%s11083_s18 + $0xb4] sm:$0xf]  ;;  %v2620_v24 = vld [vmem:[%s11083_s18 + $0xc8] sm:$0xf] }
 0x10d   :  { %2615 = vst [vmem:[#allocation6 + $0xb8] sm:$0xf] %v2614_v22  ;;  %2617 = vst [vmem:[#allocation6 + $0xbc] sm:$0xff] %v2616_v23   ;;  %v2622_v25 = vld [vmem:[%s11083_s18 + $0xc4] sm:$0xf]  ;;  %v2632_v29 = vld [vmem:[%s11083_s18 + $0xdc] sm:$0xff]  }
 0x10e   :  { %2621 = vst [vmem:[#allocation6 + $0xc4] sm:$0xf] %v2620_v24  ;;  %v2628_v27 = vld [vmem:[%s11083_s18 + $0xd8] sm:$0xf]  ;;  %2623 = vst [vmem:[#allocation6 + $0xc8] sm:$0xf] %v2622_v25 }
 0x10f   :  { %2625 = vst [vmem:[#allocation6 + $0xcc] sm:$0xff] %v2624_v26   ;;  %2629 = vst [vmem:[#allocation6 + $0xd4] sm:$0xf] %v2628_v27  ;;  %v2630_v28 = vld [vmem:[%s11083_s18 + $0xd4] sm:$0xf]  ;;  %v2640_v32 = vld [vmem:[%s11083_s18 + $0xec] sm:$0xff]  }
 0x110   :  { %v2636_v30 = vld [vmem:[%s11083_s18 + $0xe8] sm:$0xf]  ;;  %2631 = vst [vmem:[#allocation6 + $0xd8] sm:$0xf] %v2630_v28  ;;  %2633 = vst [vmem:[#allocation6 + $0xdc] sm:$0xff] %v2632_v29  }
 0x111   :  { %2637 = vst [vmem:[#allocation6 + $0xe4] sm:$0xf] %v2636_v30  ;;  %v2638_v31 = vld [vmem:[%s11083_s18 + $0xe4] sm:$0xf]  ;;  %v2644_v33 = vld [vmem:[%s11083_s18 + $0xf8] sm:$0xf] }
 0x112   :  { %2639 = vst [vmem:[#allocation6 + $0xe8] sm:$0xf] %v2638_v31  ;;  %2641 = vst [vmem:[#allocation6 + $0xec] sm:$0xff] %v2640_v32   ;;  %v2646_v34 = vld [vmem:[%s11083_s18 + $0xf4] sm:$0xf] }
 0x113   :  { %2645 = vst [vmem:[#allocation6 + $0xf4] sm:$0xf] %v2644_v33  ;;  %v2648_v35 = vld [vmem:[%s11083_s18 + $0xfc] sm:$0xf]  ;;  %2647 = vst [vmem:[#allocation6 + $0xf8] sm:$0xf] %v2646_v34 }
 0x114   :  { %2649 = vst [vmem:[#allocation6 + $0xfc] sm:$0xf] %v2648_v35 }
 0x115   :  { %2808 = vsyncadd [#allocation8 + $0x3], 4096  ;;  %v2827_v36 = vld [vmem:[%s11081_s16] sm:$0xf]  ;;  %v2829_v37 = vld [vmem:[%s11081_s16 + $0x8] sm:$0xf] }
 0x116   :  { %2828 = vst [vmem:[#allocation4] sm:$0xf] %v2827_v36  ;;  %2830 = vst [vmem:[#allocation4 + $0x4] sm:$0xf] %v2829_v37  ;;  %v2831_v38 = vld [vmem:[%s11081_s16 + $0x4] sm:$0xf] }
 0x117   :  { %v2833_v39 = vld [vmem:[%s11081_s16 + $0xc] sm:$0xff]   ;;  %v2837_v40 = vld [vmem:[%s11081_s16 + $0x18] sm:$0xf]  ;;  %2832 = vst [vmem:[#allocation4 + $0x8] sm:$0xf] %v2831_v38  ;;  %v2841_v42 = vld [vmem:[%s11081_s16 + $0x1c] sm:$0xff]  }
 0x118   :  { %2834 = vst [vmem:[#allocation4 + $0xc] sm:$0xff] %v2833_v39   ;;  %2838 = vst [vmem:[#allocation4 + $0x14] sm:$0xf] %v2837_v40  ;;  %v2839_v41 = vld [vmem:[%s11081_s16 + $0x14] sm:$0xf]  ;;  %v2849_v45 = vld [vmem:[%s11081_s16 + $0x2c] sm:$0xff]  }
 0x119   :  { %v2845_v43 = vld [vmem:[%s11081_s16 + $0x28] sm:$0xf]  ;;  %2840 = vst [vmem:[#allocation4 + $0x18] sm:$0xf] %v2839_v41  ;;  %2842 = vst [vmem:[#allocation4 + $0x1c] sm:$0xff] %v2841_v42   ;;  %v2857_v48 = vld [vmem:[%s11081_s16 + $0x3c] sm:$0xff]  }
 0x11a   :  { %2846 = vst [vmem:[#allocation4 + $0x24] sm:$0xf] %v2845_v43  ;;  %v2847_v44 = vld [vmem:[%s11081_s16 + $0x24] sm:$0xf]  ;;  %v2853_v46 = vld [vmem:[%s11081_s16 + $0x38] sm:$0xf] }
 0x11b   :  { %2848 = vst [vmem:[#allocation4 + $0x28] sm:$0xf] %v2847_v44  ;;  %2850 = vst [vmem:[#allocation4 + $0x2c] sm:$0xff] %v2849_v45   ;;  %v2855_v47 = vld [vmem:[%s11081_s16 + $0x34] sm:$0xf]  ;;  %v2865_v51 = vld [vmem:[%s11081_s16 + $0x4c] sm:$0xff]  }
 0x11c   :  { %2854 = vst [vmem:[#allocation4 + $0x34] sm:$0xf] %v2853_v46  ;;  %v2861_v49 = vld [vmem:[%s11081_s16 + $0x48] sm:$0xf]  ;;  %2856 = vst [vmem:[#allocation4 + $0x38] sm:$0xf] %v2855_v47 }
 0x11d   :  { %2858 = vst [vmem:[#allocation4 + $0x3c] sm:$0xff] %v2857_v48   ;;  %2862 = vst [vmem:[#allocation4 + $0x44] sm:$0xf] %v2861_v49  ;;  %v2863_v50 = vld [vmem:[%s11081_s16 + $0x44] sm:$0xf]  ;;  %v2873_v54 = vld [vmem:[%s11081_s16 + $0x5c] sm:$0xff]  }
 0x11e   :  { %v2869_v52 = vld [vmem:[%s11081_s16 + $0x58] sm:$0xf]  ;;  %2864 = vst [vmem:[#allocation4 + $0x48] sm:$0xf] %v2863_v50  ;;  %2866 = vst [vmem:[#allocation4 + $0x4c] sm:$0xff] %v2865_v51   ;;  %v2881_v57 = vld [vmem:[%s11081_s16 + $0x6c] sm:$0xff]  }
 0x11f   :  { %2870 = vst [vmem:[#allocation4 + $0x54] sm:$0xf] %v2869_v52  ;;  %v2871_v53 = vld [vmem:[%s11081_s16 + $0x54] sm:$0xf]  ;;  %v2877_v55 = vld [vmem:[%s11081_s16 + $0x68] sm:$0xf] }
 0x120   :  { %2872 = vst [vmem:[#allocation4 + $0x58] sm:$0xf] %v2871_v53  ;;  %2874 = vst [vmem:[#allocation4 + $0x5c] sm:$0xff] %v2873_v54   ;;  %v2879_v56 = vld [vmem:[%s11081_s16 + $0x64] sm:$0xf]  ;;  %v2889_v60 = vld [vmem:[%s11081_s16 + $0x7c] sm:$0xff]  }
 0x121   :  { %2878 = vst [vmem:[#allocation4 + $0x64] sm:$0xf] %v2877_v55  ;;  %v2885_v58 = vld [vmem:[%s11081_s16 + $0x78] sm:$0xf]  ;;  %2880 = vst [vmem:[#allocation4 + $0x68] sm:$0xf] %v2879_v56 }
 0x122   :  { %2882 = vst [vmem:[#allocation4 + $0x6c] sm:$0xff] %v2881_v57   ;;  %2886 = vst [vmem:[#allocation4 + $0x74] sm:$0xf] %v2885_v58  ;;  %v2887_v59 = vld [vmem:[%s11081_s16 + $0x74] sm:$0xf]  ;;  %v2897_v63 = vld [vmem:[%s11081_s16 + $0x8c] sm:$0xff]  }
 0x123   :  { %v2893_v61 = vld [vmem:[%s11081_s16 + $0x88] sm:$0xf]  ;;  %2888 = vst [vmem:[#allocation4 + $0x78] sm:$0xf] %v2887_v59  ;;  %2890 = vst [vmem:[#allocation4 + $0x7c] sm:$0xff] %v2889_v60   ;;  %v2905_v2 = vld [vmem:[%s11081_s16 + $0x9c] sm:$0xff]  }
 0x124   :  { %2894 = vst [vmem:[#allocation4 + $0x84] sm:$0xf] %v2893_v61  ;;  %v2895_v62 = vld [vmem:[%s11081_s16 + $0x84] sm:$0xf]  ;;  %v2901_v0 = vld [vmem:[%s11081_s16 + $0x98] sm:$0xf] }
 0x125   :  { %2896 = vst [vmem:[#allocation4 + $0x88] sm:$0xf] %v2895_v62  ;;  %2898 = vst [vmem:[#allocation4 + $0x8c] sm:$0xff] %v2897_v63   ;;  %v2903_v1 = vld [vmem:[%s11081_s16 + $0x94] sm:$0xf]  ;;  %v2913_v5 = vld [vmem:[%s11081_s16 + $0xac] sm:$0xff]  }
 0x126   :  { %2902 = vst [vmem:[#allocation4 + $0x94] sm:$0xf] %v2901_v0  ;;  %v2909_v3 = vld [vmem:[%s11081_s16 + $0xa8] sm:$0xf]  ;;  %2904 = vst [vmem:[#allocation4 + $0x98] sm:$0xf] %v2903_v1 }
 0x127   :  { %2906 = vst [vmem:[#allocation4 + $0x9c] sm:$0xff] %v2905_v2   ;;  %2910 = vst [vmem:[#allocation4 + $0xa4] sm:$0xf] %v2909_v3  ;;  %v2911_v4 = vld [vmem:[%s11081_s16 + $0xa4] sm:$0xf]  ;;  %v2921_v8 = vld [vmem:[%s11081_s16 + $0xbc] sm:$0xff]  }
 0x128   :  { %v2917_v6 = vld [vmem:[%s11081_s16 + $0xb8] sm:$0xf]  ;;  %2912 = vst [vmem:[#allocation4 + $0xa8] sm:$0xf] %v2911_v4  ;;  %2914 = vst [vmem:[#allocation4 + $0xac] sm:$0xff] %v2913_v5   ;;  %v2929_v11 = vld [vmem:[%s11081_s16 + $0xcc] sm:$0xff]  }
 0x129   :  { %2918 = vst [vmem:[#allocation4 + $0xb4] sm:$0xf] %v2917_v6  ;;  %v2919_v7 = vld [vmem:[%s11081_s16 + $0xb4] sm:$0xf]  ;;  %v2925_v9 = vld [vmem:[%s11081_s16 + $0xc8] sm:$0xf] }
 0x12a   :  { %2920 = vst [vmem:[#allocation4 + $0xb8] sm:$0xf] %v2919_v7  ;;  %2922 = vst [vmem:[#allocation4 + $0xbc] sm:$0xff] %v2921_v8   ;;  %v2927_v10 = vld [vmem:[%s11081_s16 + $0xc4] sm:$0xf]  ;;  %v2937_v14 = vld [vmem:[%s11081_s16 + $0xdc] sm:$0xff]  }
 0x12b   :  { %2926 = vst [vmem:[#allocation4 + $0xc4] sm:$0xf] %v2925_v9  ;;  %v2933_v12 = vld [vmem:[%s11081_s16 + $0xd8] sm:$0xf]  ;;  %2928 = vst [vmem:[#allocation4 + $0xc8] sm:$0xf] %v2927_v10 }
 0x12c   :  { %2930 = vst [vmem:[#allocation4 + $0xcc] sm:$0xff] %v2929_v11   ;;  %2934 = vst [vmem:[#allocation4 + $0xd4] sm:$0xf] %v2933_v12  ;;  %v2935_v13 = vld [vmem:[%s11081_s16 + $0xd4] sm:$0xf]  ;;  %v2945_v17 = vld [vmem:[%s11081_s16 + $0xec] sm:$0xff]  }
 0x12d   :  { %v2941_v15 = vld [vmem:[%s11081_s16 + $0xe8] sm:$0xf]  ;;  %2936 = vst [vmem:[#allocation4 + $0xd8] sm:$0xf] %v2935_v13  ;;  %2938 = vst [vmem:[#allocation4 + $0xdc] sm:$0xff] %v2937_v14   ;;  %v2953_v20 = vld [vmem:[%s11081_s16 + $0xfc] sm:$0xff]  }
 0x12e   :  { %2942 = vst [vmem:[#allocation4 + $0xe4] sm:$0xf] %v2941_v15  ;;  %v2943_v16 = vld [vmem:[%s11081_s16 + $0xe4] sm:$0xf]  ;;  %v2949_v18 = vld [vmem:[%s11081_s16 + $0xf8] sm:$0xf] }
 0x12f   :  { %2944 = vst [vmem:[#allocation4 + $0xe8] sm:$0xf] %v2943_v16  ;;  %2946 = vst [vmem:[#allocation4 + $0xec] sm:$0xff] %v2945_v17   ;;  %v2951_v19 = vld [vmem:[%s11081_s16 + $0xf4] sm:$0xf]  ;;  %v2961_v23 = vld [vmem:[%s11081_s16 + $0x10c] sm:$0xff]  }
 0x130   :  { %2950 = vst [vmem:[#allocation4 + $0xf4] sm:$0xf] %v2949_v18  ;;  %v2957_v21 = vld [vmem:[%s11081_s16 + $0x108] sm:$0xf]  ;;  %2952 = vst [vmem:[#allocation4 + $0xf8] sm:$0xf] %v2951_v19 }
 0x131   :  { %2954 = vst [vmem:[#allocation4 + $0xfc] sm:$0xff] %v2953_v20   ;;  %2958 = vst [vmem:[#allocation4 + $0x104] sm:$0xf] %v2957_v21  ;;  %v2959_v22 = vld [vmem:[%s11081_s16 + $0x104] sm:$0xf]  ;;  %v2969_v26 = vld [vmem:[%s11081_s16 + $0x11c] sm:$0xff]  }
 0x132   :  { %v2965_v24 = vld [vmem:[%s11081_s16 + $0x118] sm:$0xf]  ;;  %2960 = vst [vmem:[#allocation4 + $0x108] sm:$0xf] %v2959_v22  ;;  %2962 = vst [vmem:[#allocation4 + $0x10c] sm:$0xff] %v2961_v23   ;;  %v2977_v29 = vld [vmem:[%s11081_s16 + $0x12c] sm:$0xff]  }
 0x133   :  { %2966 = vst [vmem:[#allocation4 + $0x114] sm:$0xf] %v2965_v24  ;;  %v2967_v25 = vld [vmem:[%s11081_s16 + $0x114] sm:$0xf]  ;;  %v2973_v27 = vld [vmem:[%s11081_s16 + $0x128] sm:$0xf] }
 0x134   :  { %2968 = vst [vmem:[#allocation4 + $0x118] sm:$0xf] %v2967_v25  ;;  %2970 = vst [vmem:[#allocation4 + $0x11c] sm:$0xff] %v2969_v26   ;;  %v2975_v28 = vld [vmem:[%s11081_s16 + $0x124] sm:$0xf]  ;;  %v2985_v32 = vld [vmem:[%s11081_s16 + $0x13c] sm:$0xff]  }
 0x135   :  { %2974 = vst [vmem:[#allocation4 + $0x124] sm:$0xf] %v2973_v27  ;;  %v2981_v30 = vld [vmem:[%s11081_s16 + $0x138] sm:$0xf]  ;;  %2976 = vst [vmem:[#allocation4 + $0x128] sm:$0xf] %v2975_v28 }
 0x136   :  { %2978 = vst [vmem:[#allocation4 + $0x12c] sm:$0xff] %v2977_v29   ;;  %2982 = vst [vmem:[#allocation4 + $0x134] sm:$0xf] %v2981_v30  ;;  %v2983_v31 = vld [vmem:[%s11081_s16 + $0x134] sm:$0xf]  ;;  %v2993_v35 = vld [vmem:[%s11081_s16 + $0x14c] sm:$0xff]  }
 0x137   :  { %v2989_v33 = vld [vmem:[%s11081_s16 + $0x148] sm:$0xf]  ;;  %2984 = vst [vmem:[#allocation4 + $0x138] sm:$0xf] %v2983_v31  ;;  %2986 = vst [vmem:[#allocation4 + $0x13c] sm:$0xff] %v2985_v32   ;;  %v3001_v38 = vld [vmem:[%s11081_s16 + $0x15c] sm:$0xff]  }
 0x138   :  { %2990 = vst [vmem:[#allocation4 + $0x144] sm:$0xf] %v2989_v33  ;;  %v2991_v34 = vld [vmem:[%s11081_s16 + $0x144] sm:$0xf]  ;;  %v2997_v36 = vld [vmem:[%s11081_s16 + $0x158] sm:$0xf] }
 0x139   :  { %2992 = vst [vmem:[#allocation4 + $0x148] sm:$0xf] %v2991_v34  ;;  %2994 = vst [vmem:[#allocation4 + $0x14c] sm:$0xff] %v2993_v35   ;;  %v2999_v37 = vld [vmem:[%s11081_s16 + $0x154] sm:$0xf]  ;;  %v3009_v41 = vld [vmem:[%s11081_s16 + $0x16c] sm:$0xff]  }
 0x13a   :  { %2998 = vst [vmem:[#allocation4 + $0x154] sm:$0xf] %v2997_v36  ;;  %v3005_v39 = vld [vmem:[%s11081_s16 + $0x168] sm:$0xf]  ;;  %3000 = vst [vmem:[#allocation4 + $0x158] sm:$0xf] %v2999_v37 }
 0x13b   :  { %3002 = vst [vmem:[#allocation4 + $0x15c] sm:$0xff] %v3001_v38   ;;  %3006 = vst [vmem:[#allocation4 + $0x164] sm:$0xf] %v3005_v39  ;;  %v3007_v40 = vld [vmem:[%s11081_s16 + $0x164] sm:$0xf]  ;;  %v3017_v44 = vld [vmem:[%s11081_s16 + $0x17c] sm:$0xff]  }
 0x13c   :  { %v3013_v42 = vld [vmem:[%s11081_s16 + $0x178] sm:$0xf]  ;;  %3008 = vst [vmem:[#allocation4 + $0x168] sm:$0xf] %v3007_v40  ;;  %3010 = vst [vmem:[#allocation4 + $0x16c] sm:$0xff] %v3009_v41   ;;  %v3025_v47 = vld [vmem:[%s11081_s16 + $0x18c] sm:$0xff]  }
 0x13d   :  { %3014 = vst [vmem:[#allocation4 + $0x174] sm:$0xf] %v3013_v42  ;;  %v3015_v43 = vld [vmem:[%s11081_s16 + $0x174] sm:$0xf]  ;;  %v3021_v45 = vld [vmem:[%s11081_s16 + $0x188] sm:$0xf] }
 0x13e   :  { %3016 = vst [vmem:[#allocation4 + $0x178] sm:$0xf] %v3015_v43  ;;  %3018 = vst [vmem:[#allocation4 + $0x17c] sm:$0xff] %v3017_v44   ;;  %v3023_v46 = vld [vmem:[%s11081_s16 + $0x184] sm:$0xf]  ;;  %v3033_v50 = vld [vmem:[%s11081_s16 + $0x19c] sm:$0xff]  }
 0x13f   :  { %3022 = vst [vmem:[#allocation4 + $0x184] sm:$0xf] %v3021_v45  ;;  %v3029_v48 = vld [vmem:[%s11081_s16 + $0x198] sm:$0xf]  ;;  %3024 = vst [vmem:[#allocation4 + $0x188] sm:$0xf] %v3023_v46 }
 0x140   :  { %3026 = vst [vmem:[#allocation4 + $0x18c] sm:$0xff] %v3025_v47   ;;  %3030 = vst [vmem:[#allocation4 + $0x194] sm:$0xf] %v3029_v48  ;;  %v3031_v49 = vld [vmem:[%s11081_s16 + $0x194] sm:$0xf]  ;;  %v3041_v53 = vld [vmem:[%s11081_s16 + $0x1ac] sm:$0xff]  }
 0x141   :  { %v3037_v51 = vld [vmem:[%s11081_s16 + $0x1a8] sm:$0xf]  ;;  %3032 = vst [vmem:[#allocation4 + $0x198] sm:$0xf] %v3031_v49  ;;  %3034 = vst [vmem:[#allocation4 + $0x19c] sm:$0xff] %v3033_v50   ;;  %v3049_v56 = vld [vmem:[%s11081_s16 + $0x1bc] sm:$0xff]  }
 0x142   :  { %3038 = vst [vmem:[#allocation4 + $0x1a4] sm:$0xf] %v3037_v51  ;;  %v3039_v52 = vld [vmem:[%s11081_s16 + $0x1a4] sm:$0xf]  ;;  %v3045_v54 = vld [vmem:[%s11081_s16 + $0x1b8] sm:$0xf] }
 0x143   :  { %3040 = vst [vmem:[#allocation4 + $0x1a8] sm:$0xf] %v3039_v52  ;;  %3042 = vst [vmem:[#allocation4 + $0x1ac] sm:$0xff] %v3041_v53   ;;  %v3047_v55 = vld [vmem:[%s11081_s16 + $0x1b4] sm:$0xf]  ;;  %v3057_v59 = vld [vmem:[%s11081_s16 + $0x1cc] sm:$0xff]  }
 0x144   :  { %3046 = vst [vmem:[#allocation4 + $0x1b4] sm:$0xf] %v3045_v54  ;;  %v3053_v57 = vld [vmem:[%s11081_s16 + $0x1c8] sm:$0xf]  ;;  %3048 = vst [vmem:[#allocation4 + $0x1b8] sm:$0xf] %v3047_v55 }
 0x145   :  { %3050 = vst [vmem:[#allocation4 + $0x1bc] sm:$0xff] %v3049_v56   ;;  %3054 = vst [vmem:[#allocation4 + $0x1c4] sm:$0xf] %v3053_v57  ;;  %v3055_v58 = vld [vmem:[%s11081_s16 + $0x1c4] sm:$0xf]  ;;  %v3065_v62 = vld [vmem:[%s11081_s16 + $0x1dc] sm:$0xff]  }
 0x146   :  { %v3061_v60 = vld [vmem:[%s11081_s16 + $0x1d8] sm:$0xf]  ;;  %3056 = vst [vmem:[#allocation4 + $0x1c8] sm:$0xf] %v3055_v58  ;;  %3058 = vst [vmem:[#allocation4 + $0x1cc] sm:$0xff] %v3057_v59   ;;  %v3073_v1 = vld [vmem:[%s11081_s16 + $0x1ec] sm:$0xff]  }
 0x147   :  { %3062 = vst [vmem:[#allocation4 + $0x1d4] sm:$0xf] %v3061_v60  ;;  %v3063_v61 = vld [vmem:[%s11081_s16 + $0x1d4] sm:$0xf]  ;;  %v3069_v63 = vld [vmem:[%s11081_s16 + $0x1e8] sm:$0xf] }
 0x148   :  { %3064 = vst [vmem:[#allocation4 + $0x1d8] sm:$0xf] %v3063_v61  ;;  %3066 = vst [vmem:[#allocation4 + $0x1dc] sm:$0xff] %v3065_v62   ;;  %v3071_v0 = vld [vmem:[%s11081_s16 + $0x1e4] sm:$0xf]  ;;  %v3081_v4 = vld [vmem:[%s11081_s16 + $0x1fc] sm:$0xff]  }
 0x149   :  { %3070 = vst [vmem:[#allocation4 + $0x1e4] sm:$0xf] %v3069_v63  ;;  %v3077_v2 = vld [vmem:[%s11081_s16 + $0x1f8] sm:$0xf]  ;;  %3072 = vst [vmem:[#allocation4 + $0x1e8] sm:$0xf] %v3071_v0 }
 0x14a   :  { %3074 = vst [vmem:[#allocation4 + $0x1ec] sm:$0xff] %v3073_v1   ;;  %3078 = vst [vmem:[#allocation4 + $0x1f4] sm:$0xf] %v3077_v2  ;;  %v3079_v3 = vld [vmem:[%s11081_s16 + $0x1f4] sm:$0xf]  ;;  %v3089_v7 = vld [vmem:[%s11081_s16 + $0x20c] sm:$0xff]  }
 0x14b   :  { %v3085_v5 = vld [vmem:[%s11081_s16 + $0x208] sm:$0xf]  ;;  %3080 = vst [vmem:[#allocation4 + $0x1f8] sm:$0xf] %v3079_v3  ;;  %3082 = vst [vmem:[#allocation4 + $0x1fc] sm:$0xff] %v3081_v4   ;;  %v3097_v10 = vld [vmem:[%s11081_s16 + $0x21c] sm:$0xff]  }
 0x14c   :  { %3086 = vst [vmem:[#allocation4 + $0x204] sm:$0xf] %v3085_v5  ;;  %v3087_v6 = vld [vmem:[%s11081_s16 + $0x204] sm:$0xf]  ;;  %v3093_v8 = vld [vmem:[%s11081_s16 + $0x218] sm:$0xf] }
 0x14d   :  { %3088 = vst [vmem:[#allocation4 + $0x208] sm:$0xf] %v3087_v6  ;;  %3090 = vst [vmem:[#allocation4 + $0x20c] sm:$0xff] %v3089_v7   ;;  %v3095_v9 = vld [vmem:[%s11081_s16 + $0x214] sm:$0xf]  ;;  %v3105_v13 = vld [vmem:[%s11081_s16 + $0x22c] sm:$0xff]  }
 0x14e   :  { %3094 = vst [vmem:[#allocation4 + $0x214] sm:$0xf] %v3093_v8  ;;  %v3101_v11 = vld [vmem:[%s11081_s16 + $0x228] sm:$0xf]  ;;  %3096 = vst [vmem:[#allocation4 + $0x218] sm:$0xf] %v3095_v9 }
 0x14f   :  { %3098 = vst [vmem:[#allocation4 + $0x21c] sm:$0xff] %v3097_v10   ;;  %3102 = vst [vmem:[#allocation4 + $0x224] sm:$0xf] %v3101_v11  ;;  %v3103_v12 = vld [vmem:[%s11081_s16 + $0x224] sm:$0xf]  ;;  %v3113_v16 = vld [vmem:[%s11081_s16 + $0x23c] sm:$0xff]  }
 0x150   :  { %v3109_v14 = vld [vmem:[%s11081_s16 + $0x238] sm:$0xf]  ;;  %3104 = vst [vmem:[#allocation4 + $0x228] sm:$0xf] %v3103_v12  ;;  %3106 = vst [vmem:[#allocation4 + $0x22c] sm:$0xff] %v3105_v13   ;;  %v3121_v19 = vld [vmem:[%s11081_s16 + $0x24c] sm:$0xff]  }
 0x151   :  { %3110 = vst [vmem:[#allocation4 + $0x234] sm:$0xf] %v3109_v14  ;;  %v3111_v15 = vld [vmem:[%s11081_s16 + $0x234] sm:$0xf]  ;;  %v3117_v17 = vld [vmem:[%s11081_s16 + $0x248] sm:$0xf] }
 0x152   :  { %3112 = vst [vmem:[#allocation4 + $0x238] sm:$0xf] %v3111_v15  ;;  %3114 = vst [vmem:[#allocation4 + $0x23c] sm:$0xff] %v3113_v16   ;;  %v3119_v18 = vld [vmem:[%s11081_s16 + $0x244] sm:$0xf]  ;;  %v3129_v22 = vld [vmem:[%s11081_s16 + $0x25c] sm:$0xff]  }
 0x153   :  { %3118 = vst [vmem:[#allocation4 + $0x244] sm:$0xf] %v3117_v17  ;;  %v3125_v20 = vld [vmem:[%s11081_s16 + $0x258] sm:$0xf]  ;;  %3120 = vst [vmem:[#allocation4 + $0x248] sm:$0xf] %v3119_v18 }
 0x154   :  { %3122 = vst [vmem:[#allocation4 + $0x24c] sm:$0xff] %v3121_v19   ;;  %3126 = vst [vmem:[#allocation4 + $0x254] sm:$0xf] %v3125_v20  ;;  %v3127_v21 = vld [vmem:[%s11081_s16 + $0x254] sm:$0xf]  ;;  %v3137_v25 = vld [vmem:[%s11081_s16 + $0x26c] sm:$0xff]  }
 0x155   :  { %v3133_v23 = vld [vmem:[%s11081_s16 + $0x268] sm:$0xf]  ;;  %3128 = vst [vmem:[#allocation4 + $0x258] sm:$0xf] %v3127_v21  ;;  %3130 = vst [vmem:[#allocation4 + $0x25c] sm:$0xff] %v3129_v22   ;;  %v3145_v28 = vld [vmem:[%s11081_s16 + $0x27c] sm:$0xff]  }
 0x156   :  { %3134 = vst [vmem:[#allocation4 + $0x264] sm:$0xf] %v3133_v23  ;;  %v3135_v24 = vld [vmem:[%s11081_s16 + $0x264] sm:$0xf]  ;;  %v3141_v26 = vld [vmem:[%s11081_s16 + $0x278] sm:$0xf] }
 0x157   :  { %3136 = vst [vmem:[#allocation4 + $0x268] sm:$0xf] %v3135_v24  ;;  %3138 = vst [vmem:[#allocation4 + $0x26c] sm:$0xff] %v3137_v25   ;;  %v3143_v27 = vld [vmem:[%s11081_s16 + $0x274] sm:$0xf]  ;;  %v3153_v31 = vld [vmem:[%s11081_s16 + $0x28c] sm:$0xff]  }
 0x158   :  { %3142 = vst [vmem:[#allocation4 + $0x274] sm:$0xf] %v3141_v26  ;;  %v3149_v29 = vld [vmem:[%s11081_s16 + $0x288] sm:$0xf]  ;;  %3144 = vst [vmem:[#allocation4 + $0x278] sm:$0xf] %v3143_v27 }
 0x159   :  { %3146 = vst [vmem:[#allocation4 + $0x27c] sm:$0xff] %v3145_v28   ;;  %3150 = vst [vmem:[#allocation4 + $0x284] sm:$0xf] %v3149_v29  ;;  %v3151_v30 = vld [vmem:[%s11081_s16 + $0x284] sm:$0xf]  ;;  %v3161_v34 = vld [vmem:[%s11081_s16 + $0x29c] sm:$0xff]  }
 0x15a   :  { %v3157_v32 = vld [vmem:[%s11081_s16 + $0x298] sm:$0xf]  ;;  %3152 = vst [vmem:[#allocation4 + $0x288] sm:$0xf] %v3151_v30  ;;  %3154 = vst [vmem:[#allocation4 + $0x28c] sm:$0xff] %v3153_v31   ;;  %v3169_v37 = vld [vmem:[%s11081_s16 + $0x2ac] sm:$0xff]  }
 0x15b   :  { %3158 = vst [vmem:[#allocation4 + $0x294] sm:$0xf] %v3157_v32  ;;  %v3159_v33 = vld [vmem:[%s11081_s16 + $0x294] sm:$0xf]  ;;  %v3165_v35 = vld [vmem:[%s11081_s16 + $0x2a8] sm:$0xf] }
 0x15c   :  { %3160 = vst [vmem:[#allocation4 + $0x298] sm:$0xf] %v3159_v33  ;;  %3162 = vst [vmem:[#allocation4 + $0x29c] sm:$0xff] %v3161_v34   ;;  %v3167_v36 = vld [vmem:[%s11081_s16 + $0x2a4] sm:$0xf]  ;;  %v3177_v40 = vld [vmem:[%s11081_s16 + $0x2bc] sm:$0xff]  }
 0x15d   :  { %3166 = vst [vmem:[#allocation4 + $0x2a4] sm:$0xf] %v3165_v35  ;;  %v3173_v38 = vld [vmem:[%s11081_s16 + $0x2b8] sm:$0xf]  ;;  %3168 = vst [vmem:[#allocation4 + $0x2a8] sm:$0xf] %v3167_v36 }
 0x15e   :  { %3170 = vst [vmem:[#allocation4 + $0x2ac] sm:$0xff] %v3169_v37   ;;  %3174 = vst [vmem:[#allocation4 + $0x2b4] sm:$0xf] %v3173_v38  ;;  %v3175_v39 = vld [vmem:[%s11081_s16 + $0x2b4] sm:$0xf]  ;;  %v3185_v43 = vld [vmem:[%s11081_s16 + $0x2cc] sm:$0xff]  }
 0x15f   :  { %v3181_v41 = vld [vmem:[%s11081_s16 + $0x2c8] sm:$0xf]  ;;  %3176 = vst [vmem:[#allocation4 + $0x2b8] sm:$0xf] %v3175_v39  ;;  %3178 = vst [vmem:[#allocation4 + $0x2bc] sm:$0xff] %v3177_v40   ;;  %v3193_v46 = vld [vmem:[%s11081_s16 + $0x2dc] sm:$0xff]  }
 0x160   :  { %3182 = vst [vmem:[#allocation4 + $0x2c4] sm:$0xf] %v3181_v41  ;;  %v3183_v42 = vld [vmem:[%s11081_s16 + $0x2c4] sm:$0xf]  ;;  %v3189_v44 = vld [vmem:[%s11081_s16 + $0x2d8] sm:$0xf] }
 0x161   :  { %3184 = vst [vmem:[#allocation4 + $0x2c8] sm:$0xf] %v3183_v42  ;;  %3186 = vst [vmem:[#allocation4 + $0x2cc] sm:$0xff] %v3185_v43   ;;  %v3191_v45 = vld [vmem:[%s11081_s16 + $0x2d4] sm:$0xf]  ;;  %v3201_v49 = vld [vmem:[%s11081_s16 + $0x2ec] sm:$0xff]  }
 0x162   :  { %3190 = vst [vmem:[#allocation4 + $0x2d4] sm:$0xf] %v3189_v44  ;;  %v3197_v47 = vld [vmem:[%s11081_s16 + $0x2e8] sm:$0xf]  ;;  %3192 = vst [vmem:[#allocation4 + $0x2d8] sm:$0xf] %v3191_v45 }
 0x163   :  { %3194 = vst [vmem:[#allocation4 + $0x2dc] sm:$0xff] %v3193_v46   ;;  %3198 = vst [vmem:[#allocation4 + $0x2e4] sm:$0xf] %v3197_v47  ;;  %v3199_v48 = vld [vmem:[%s11081_s16 + $0x2e4] sm:$0xf]  ;;  %v3209_v52 = vld [vmem:[%s11081_s16 + $0x2fc] sm:$0xff]  }
 0x164   :  { %v3205_v50 = vld [vmem:[%s11081_s16 + $0x2f8] sm:$0xf]  ;;  %3200 = vst [vmem:[#allocation4 + $0x2e8] sm:$0xf] %v3199_v48  ;;  %3202 = vst [vmem:[#allocation4 + $0x2ec] sm:$0xff] %v3201_v49   ;;  %v3217_v55 = vld [vmem:[%s11081_s16 + $0x30c] sm:$0xff]  }
 0x165   :  { %3206 = vst [vmem:[#allocation4 + $0x2f4] sm:$0xf] %v3205_v50  ;;  %v3207_v51 = vld [vmem:[%s11081_s16 + $0x2f4] sm:$0xf]  ;;  %v3213_v53 = vld [vmem:[%s11081_s16 + $0x308] sm:$0xf] }
 0x166   :  { %3208 = vst [vmem:[#allocation4 + $0x2f8] sm:$0xf] %v3207_v51  ;;  %3210 = vst [vmem:[#allocation4 + $0x2fc] sm:$0xff] %v3209_v52   ;;  %v3215_v54 = vld [vmem:[%s11081_s16 + $0x304] sm:$0xf]  ;;  %v3225_v58 = vld [vmem:[%s11081_s16 + $0x31c] sm:$0xff]  }
 0x167   :  { %3214 = vst [vmem:[#allocation4 + $0x304] sm:$0xf] %v3213_v53  ;;  %v3221_v56 = vld [vmem:[%s11081_s16 + $0x318] sm:$0xf]  ;;  %3216 = vst [vmem:[#allocation4 + $0x308] sm:$0xf] %v3215_v54 }
 0x168   :  { %3218 = vst [vmem:[#allocation4 + $0x30c] sm:$0xff] %v3217_v55   ;;  %3222 = vst [vmem:[#allocation4 + $0x314] sm:$0xf] %v3221_v56  ;;  %v3223_v57 = vld [vmem:[%s11081_s16 + $0x314] sm:$0xf]  ;;  %v3233_v61 = vld [vmem:[%s11081_s16 + $0x32c] sm:$0xff]  }
 0x169   :  { %v3229_v59 = vld [vmem:[%s11081_s16 + $0x328] sm:$0xf]  ;;  %3224 = vst [vmem:[#allocation4 + $0x318] sm:$0xf] %v3223_v57  ;;  %3226 = vst [vmem:[#allocation4 + $0x31c] sm:$0xff] %v3225_v58   ;;  %v3241_v0 = vld [vmem:[%s11081_s16 + $0x33c] sm:$0xff]  }
 0x16a   :  { %3230 = vst [vmem:[#allocation4 + $0x324] sm:$0xf] %v3229_v59  ;;  %v3231_v60 = vld [vmem:[%s11081_s16 + $0x324] sm:$0xf]  ;;  %v3237_v62 = vld [vmem:[%s11081_s16 + $0x338] sm:$0xf] }
 0x16b   :  { %3232 = vst [vmem:[#allocation4 + $0x328] sm:$0xf] %v3231_v60  ;;  %3234 = vst [vmem:[#allocation4 + $0x32c] sm:$0xff] %v3233_v61   ;;  %v3239_v63 = vld [vmem:[%s11081_s16 + $0x334] sm:$0xf]  ;;  %v3249_v3 = vld [vmem:[%s11081_s16 + $0x34c] sm:$0xff]  }
 0x16c   :  { %3238 = vst [vmem:[#allocation4 + $0x334] sm:$0xf] %v3237_v62  ;;  %v3245_v1 = vld [vmem:[%s11081_s16 + $0x348] sm:$0xf]  ;;  %3240 = vst [vmem:[#allocation4 + $0x338] sm:$0xf] %v3239_v63 }
 0x16d   :  { %3242 = vst [vmem:[#allocation4 + $0x33c] sm:$0xff] %v3241_v0   ;;  %3246 = vst [vmem:[#allocation4 + $0x344] sm:$0xf] %v3245_v1  ;;  %v3247_v2 = vld [vmem:[%s11081_s16 + $0x344] sm:$0xf]  ;;  %v3257_v6 = vld [vmem:[%s11081_s16 + $0x35c] sm:$0xff]  }
 0x16e   :  { %v3253_v4 = vld [vmem:[%s11081_s16 + $0x358] sm:$0xf]  ;;  %3248 = vst [vmem:[#allocation4 + $0x348] sm:$0xf] %v3247_v2  ;;  %3250 = vst [vmem:[#allocation4 + $0x34c] sm:$0xff] %v3249_v3   ;;  %v3265_v9 = vld [vmem:[%s11081_s16 + $0x36c] sm:$0xff]  }
 0x16f   :  { %3254 = vst [vmem:[#allocation4 + $0x354] sm:$0xf] %v3253_v4  ;;  %v3255_v5 = vld [vmem:[%s11081_s16 + $0x354] sm:$0xf]  ;;  %v3261_v7 = vld [vmem:[%s11081_s16 + $0x368] sm:$0xf] }
 0x170   :  { %3256 = vst [vmem:[#allocation4 + $0x358] sm:$0xf] %v3255_v5  ;;  %3258 = vst [vmem:[#allocation4 + $0x35c] sm:$0xff] %v3257_v6   ;;  %v3263_v8 = vld [vmem:[%s11081_s16 + $0x364] sm:$0xf]  ;;  %v3273_v12 = vld [vmem:[%s11081_s16 + $0x37c] sm:$0xff]  }
 0x171   :  { %3262 = vst [vmem:[#allocation4 + $0x364] sm:$0xf] %v3261_v7  ;;  %v3269_v10 = vld [vmem:[%s11081_s16 + $0x378] sm:$0xf]  ;;  %3264 = vst [vmem:[#allocation4 + $0x368] sm:$0xf] %v3263_v8 }
 0x172   :  { %3266 = vst [vmem:[#allocation4 + $0x36c] sm:$0xff] %v3265_v9   ;;  %3270 = vst [vmem:[#allocation4 + $0x374] sm:$0xf] %v3269_v10  ;;  %v3271_v11 = vld [vmem:[%s11081_s16 + $0x374] sm:$0xf]  ;;  %v3281_v15 = vld [vmem:[%s11081_s16 + $0x38c] sm:$0xff]  }
 0x173   :  { %v3277_v13 = vld [vmem:[%s11081_s16 + $0x388] sm:$0xf]  ;;  %3272 = vst [vmem:[#allocation4 + $0x378] sm:$0xf] %v3271_v11  ;;  %3274 = vst [vmem:[#allocation4 + $0x37c] sm:$0xff] %v3273_v12   ;;  %v3289_v18 = vld [vmem:[%s11081_s16 + $0x39c] sm:$0xff]  }
 0x174   :  { %3278 = vst [vmem:[#allocation4 + $0x384] sm:$0xf] %v3277_v13  ;;  %v3279_v14 = vld [vmem:[%s11081_s16 + $0x384] sm:$0xf]  ;;  %v3285_v16 = vld [vmem:[%s11081_s16 + $0x398] sm:$0xf] }
 0x175   :  { %3280 = vst [vmem:[#allocation4 + $0x388] sm:$0xf] %v3279_v14  ;;  %3282 = vst [vmem:[#allocation4 + $0x38c] sm:$0xff] %v3281_v15   ;;  %v3287_v17 = vld [vmem:[%s11081_s16 + $0x394] sm:$0xf]  ;;  %v3297_v21 = vld [vmem:[%s11081_s16 + $0x3ac] sm:$0xff]  }
 0x176   :  { %3286 = vst [vmem:[#allocation4 + $0x394] sm:$0xf] %v3285_v16  ;;  %v3293_v19 = vld [vmem:[%s11081_s16 + $0x3a8] sm:$0xf]  ;;  %3288 = vst [vmem:[#allocation4 + $0x398] sm:$0xf] %v3287_v17 }
 0x177   :  { %3290 = vst [vmem:[#allocation4 + $0x39c] sm:$0xff] %v3289_v18   ;;  %3294 = vst [vmem:[#allocation4 + $0x3a4] sm:$0xf] %v3293_v19  ;;  %v3295_v20 = vld [vmem:[%s11081_s16 + $0x3a4] sm:$0xf]  ;;  %v3305_v24 = vld [vmem:[%s11081_s16 + $0x3bc] sm:$0xff]  }
 0x178   :  { %v3301_v22 = vld [vmem:[%s11081_s16 + $0x3b8] sm:$0xf]  ;;  %3296 = vst [vmem:[#allocation4 + $0x3a8] sm:$0xf] %v3295_v20  ;;  %3298 = vst [vmem:[#allocation4 + $0x3ac] sm:$0xff] %v3297_v21   ;;  %v3313_v27 = vld [vmem:[%s11081_s16 + $0x3cc] sm:$0xff]  }
 0x179   :  { %3302 = vst [vmem:[#allocation4 + $0x3b4] sm:$0xf] %v3301_v22  ;;  %v3303_v23 = vld [vmem:[%s11081_s16 + $0x3b4] sm:$0xf]  ;;  %v3309_v25 = vld [vmem:[%s11081_s16 + $0x3c8] sm:$0xf] }
 0x17a   :  { %3304 = vst [vmem:[#allocation4 + $0x3b8] sm:$0xf] %v3303_v23  ;;  %3306 = vst [vmem:[#allocation4 + $0x3bc] sm:$0xff] %v3305_v24   ;;  %v3311_v26 = vld [vmem:[%s11081_s16 + $0x3c4] sm:$0xf]  ;;  %v3321_v30 = vld [vmem:[%s11081_s16 + $0x3dc] sm:$0xff]  }
 0x17b   :  { %3310 = vst [vmem:[#allocation4 + $0x3c4] sm:$0xf] %v3309_v25  ;;  %v3317_v28 = vld [vmem:[%s11081_s16 + $0x3d8] sm:$0xf]  ;;  %3312 = vst [vmem:[#allocation4 + $0x3c8] sm:$0xf] %v3311_v26 }
 0x17c   :  { %3314 = vst [vmem:[#allocation4 + $0x3cc] sm:$0xff] %v3313_v27   ;;  %3318 = vst [vmem:[#allocation4 + $0x3d4] sm:$0xf] %v3317_v28  ;;  %v3319_v29 = vld [vmem:[%s11081_s16 + $0x3d4] sm:$0xf]  ;;  %v3329_v33 = vld [vmem:[%s11081_s16 + $0x3ec] sm:$0xff]  }
 0x17d   :  { %v3325_v31 = vld [vmem:[%s11081_s16 + $0x3e8] sm:$0xf]  ;;  %3320 = vst [vmem:[#allocation4 + $0x3d8] sm:$0xf] %v3319_v29  ;;  %3322 = vst [vmem:[#allocation4 + $0x3dc] sm:$0xff] %v3321_v30  }
 0x17e   :  { %3326 = vst [vmem:[#allocation4 + $0x3e4] sm:$0xf] %v3325_v31  ;;  %v3327_v32 = vld [vmem:[%s11081_s16 + $0x3e4] sm:$0xf]  ;;  %v3333_v34 = vld [vmem:[%s11081_s16 + $0x3f8] sm:$0xf] }
 0x17f   :  { %3328 = vst [vmem:[#allocation4 + $0x3e8] sm:$0xf] %v3327_v32  ;;  %3330 = vst [vmem:[#allocation4 + $0x3ec] sm:$0xff] %v3329_v33   ;;  %v3335_v35 = vld [vmem:[%s11081_s16 + $0x3f4] sm:$0xf] }
 0x180   :  { %3334 = vst [vmem:[#allocation4 + $0x3f4] sm:$0xf] %v3333_v34  ;;  %v3337_v36 = vld [vmem:[%s11081_s16 + $0x3fc] sm:$0xf]  ;;  %3336 = vst [vmem:[#allocation4 + $0x3f8] sm:$0xf] %v3335_v35 }
 0x181   :  { %3338 = vst [vmem:[#allocation4 + $0x3fc] sm:$0xf] %v3337_v36 }
 0x182   :  { %3881 = vsyncadd [#allocation8 + $0x4], 16384  ;;  %v3900_v37 = vld [vmem:[%s11084_s19] sm:$0xf]  ;;  %v3902_v38 = vld [vmem:[%s11084_s19 + $0x8] sm:$0xf] }
 0x183   :  { %3901 = vst [vmem:[#allocation7] sm:$0xf] %v3900_v37  ;;  %3903 = vst [vmem:[#allocation7 + $0x4] sm:$0xf] %v3902_v38  ;;  %v3904_v39 = vld [vmem:[%s11084_s19 + $0x4] sm:$0xf] }
 0x184   :  { %v3906_v40 = vld [vmem:[%s11084_s19 + $0xc] sm:$0xff]   ;;  %v3910_v41 = vld [vmem:[%s11084_s19 + $0x18] sm:$0xf]  ;;  %3905 = vst [vmem:[#allocation7 + $0x8] sm:$0xf] %v3904_v39  ;;  %v3914_v43 = vld [vmem:[%s11084_s19 + $0x1c] sm:$0xff]  }
 0x185   :  { %3907 = vst [vmem:[#allocation7 + $0xc] sm:$0xff] %v3906_v40   ;;  %3911 = vst [vmem:[#allocation7 + $0x14] sm:$0xf] %v3910_v41  ;;  %v3912_v42 = vld [vmem:[%s11084_s19 + $0x14] sm:$0xf]  ;;  %v3922_v46 = vld [vmem:[%s11084_s19 + $0x2c] sm:$0xff]  }
 0x186   :  { %v3918_v44 = vld [vmem:[%s11084_s19 + $0x28] sm:$0xf]  ;;  %3913 = vst [vmem:[#allocation7 + $0x18] sm:$0xf] %v3912_v42  ;;  %3915 = vst [vmem:[#allocation7 + $0x1c] sm:$0xff] %v3914_v43   ;;  %v3930_v49 = vld [vmem:[%s11084_s19 + $0x3c] sm:$0xff]  }
 0x187   :  { %3919 = vst [vmem:[#allocation7 + $0x24] sm:$0xf] %v3918_v44  ;;  %v3920_v45 = vld [vmem:[%s11084_s19 + $0x24] sm:$0xf]  ;;  %v3926_v47 = vld [vmem:[%s11084_s19 + $0x38] sm:$0xf] }
 0x188   :  { %3921 = vst [vmem:[#allocation7 + $0x28] sm:$0xf] %v3920_v45  ;;  %3923 = vst [vmem:[#allocation7 + $0x2c] sm:$0xff] %v3922_v46   ;;  %v3928_v48 = vld [vmem:[%s11084_s19 + $0x34] sm:$0xf]  ;;  %v3938_v52 = vld [vmem:[%s11084_s19 + $0x4c] sm:$0xff]  }
 0x189   :  { %3927 = vst [vmem:[#allocation7 + $0x34] sm:$0xf] %v3926_v47  ;;  %v3934_v50 = vld [vmem:[%s11084_s19 + $0x48] sm:$0xf]  ;;  %3929 = vst [vmem:[#allocation7 + $0x38] sm:$0xf] %v3928_v48 }
 0x18a   :  { %3931 = vst [vmem:[#allocation7 + $0x3c] sm:$0xff] %v3930_v49   ;;  %3935 = vst [vmem:[#allocation7 + $0x44] sm:$0xf] %v3934_v50  ;;  %v3936_v51 = vld [vmem:[%s11084_s19 + $0x44] sm:$0xf]  ;;  %v3946_v55 = vld [vmem:[%s11084_s19 + $0x5c] sm:$0xff]  }
 0x18b   :  { %v3942_v53 = vld [vmem:[%s11084_s19 + $0x58] sm:$0xf]  ;;  %3937 = vst [vmem:[#allocation7 + $0x48] sm:$0xf] %v3936_v51  ;;  %3939 = vst [vmem:[#allocation7 + $0x4c] sm:$0xff] %v3938_v52   ;;  %v3954_v58 = vld [vmem:[%s11084_s19 + $0x6c] sm:$0xff]  }
 0x18c   :  { %3943 = vst [vmem:[#allocation7 + $0x54] sm:$0xf] %v3942_v53  ;;  %v3944_v54 = vld [vmem:[%s11084_s19 + $0x54] sm:$0xf]  ;;  %v3950_v56 = vld [vmem:[%s11084_s19 + $0x68] sm:$0xf] }
 0x18d   :  { %3945 = vst [vmem:[#allocation7 + $0x58] sm:$0xf] %v3944_v54  ;;  %3947 = vst [vmem:[#allocation7 + $0x5c] sm:$0xff] %v3946_v55   ;;  %v3952_v57 = vld [vmem:[%s11084_s19 + $0x64] sm:$0xf]  ;;  %v3962_v61 = vld [vmem:[%s11084_s19 + $0x7c] sm:$0xff]  }
 0x18e   :  { %3951 = vst [vmem:[#allocation7 + $0x64] sm:$0xf] %v3950_v56  ;;  %v3958_v59 = vld [vmem:[%s11084_s19 + $0x78] sm:$0xf]  ;;  %3953 = vst [vmem:[#allocation7 + $0x68] sm:$0xf] %v3952_v57 }
 0x18f   :  { %3955 = vst [vmem:[#allocation7 + $0x6c] sm:$0xff] %v3954_v58   ;;  %3959 = vst [vmem:[#allocation7 + $0x74] sm:$0xf] %v3958_v59  ;;  %v3960_v60 = vld [vmem:[%s11084_s19 + $0x74] sm:$0xf]  ;;  %v3970_v0 = vld [vmem:[%s11084_s19 + $0x8c] sm:$0xff]  }
 0x190   :  { %v3966_v62 = vld [vmem:[%s11084_s19 + $0x88] sm:$0xf]  ;;  %3961 = vst [vmem:[#allocation7 + $0x78] sm:$0xf] %v3960_v60  ;;  %3963 = vst [vmem:[#allocation7 + $0x7c] sm:$0xff] %v3962_v61   ;;  %v3978_v3 = vld [vmem:[%s11084_s19 + $0x9c] sm:$0xff]  }
 0x191   :  { %3967 = vst [vmem:[#allocation7 + $0x84] sm:$0xf] %v3966_v62  ;;  %v3968_v63 = vld [vmem:[%s11084_s19 + $0x84] sm:$0xf]  ;;  %v3974_v1 = vld [vmem:[%s11084_s19 + $0x98] sm:$0xf] }
 0x192   :  { %3969 = vst [vmem:[#allocation7 + $0x88] sm:$0xf] %v3968_v63  ;;  %3971 = vst [vmem:[#allocation7 + $0x8c] sm:$0xff] %v3970_v0   ;;  %v3976_v2 = vld [vmem:[%s11084_s19 + $0x94] sm:$0xf]  ;;  %v3986_v6 = vld [vmem:[%s11084_s19 + $0xac] sm:$0xff]  }
 0x193   :  { %3975 = vst [vmem:[#allocation7 + $0x94] sm:$0xf] %v3974_v1  ;;  %v3982_v4 = vld [vmem:[%s11084_s19 + $0xa8] sm:$0xf]  ;;  %3977 = vst [vmem:[#allocation7 + $0x98] sm:$0xf] %v3976_v2 }
 0x194   :  { %3979 = vst [vmem:[#allocation7 + $0x9c] sm:$0xff] %v3978_v3   ;;  %3983 = vst [vmem:[#allocation7 + $0xa4] sm:$0xf] %v3982_v4  ;;  %v3984_v5 = vld [vmem:[%s11084_s19 + $0xa4] sm:$0xf]  ;;  %v3994_v9 = vld [vmem:[%s11084_s19 + $0xbc] sm:$0xff]  }
 0x195   :  { %v3990_v7 = vld [vmem:[%s11084_s19 + $0xb8] sm:$0xf]  ;;  %3985 = vst [vmem:[#allocation7 + $0xa8] sm:$0xf] %v3984_v5  ;;  %3987 = vst [vmem:[#allocation7 + $0xac] sm:$0xff] %v3986_v6   ;;  %v4002_v12 = vld [vmem:[%s11084_s19 + $0xcc] sm:$0xff]  }
 0x196   :  { %3991 = vst [vmem:[#allocation7 + $0xb4] sm:$0xf] %v3990_v7  ;;  %v3992_v8 = vld [vmem:[%s11084_s19 + $0xb4] sm:$0xf]  ;;  %v3998_v10 = vld [vmem:[%s11084_s19 + $0xc8] sm:$0xf] }
 0x197   :  { %3993 = vst [vmem:[#allocation7 + $0xb8] sm:$0xf] %v3992_v8  ;;  %3995 = vst [vmem:[#allocation7 + $0xbc] sm:$0xff] %v3994_v9   ;;  %v4000_v11 = vld [vmem:[%s11084_s19 + $0xc4] sm:$0xf]  ;;  %v4010_v15 = vld [vmem:[%s11084_s19 + $0xdc] sm:$0xff]  }
 0x198   :  { %3999 = vst [vmem:[#allocation7 + $0xc4] sm:$0xf] %v3998_v10  ;;  %v4006_v13 = vld [vmem:[%s11084_s19 + $0xd8] sm:$0xf]  ;;  %4001 = vst [vmem:[#allocation7 + $0xc8] sm:$0xf] %v4000_v11 }
 0x199   :  { %4003 = vst [vmem:[#allocation7 + $0xcc] sm:$0xff] %v4002_v12   ;;  %4007 = vst [vmem:[#allocation7 + $0xd4] sm:$0xf] %v4006_v13  ;;  %v4008_v14 = vld [vmem:[%s11084_s19 + $0xd4] sm:$0xf]  ;;  %v4018_v18 = vld [vmem:[%s11084_s19 + $0xec] sm:$0xff]  }
 0x19a   :  { %v4014_v16 = vld [vmem:[%s11084_s19 + $0xe8] sm:$0xf]  ;;  %4009 = vst [vmem:[#allocation7 + $0xd8] sm:$0xf] %v4008_v14  ;;  %4011 = vst [vmem:[#allocation7 + $0xdc] sm:$0xff] %v4010_v15  }
 0x19b   :  { %4015 = vst [vmem:[#allocation7 + $0xe4] sm:$0xf] %v4014_v16  ;;  %v4016_v17 = vld [vmem:[%s11084_s19 + $0xe4] sm:$0xf]  ;;  %v4022_v19 = vld [vmem:[%s11084_s19 + $0xf8] sm:$0xf] }
 0x19c   :  { %4017 = vst [vmem:[#allocation7 + $0xe8] sm:$0xf] %v4016_v17  ;;  %4019 = vst [vmem:[#allocation7 + $0xec] sm:$0xff] %v4018_v18   ;;  %v4024_v20 = vld [vmem:[%s11084_s19 + $0xf4] sm:$0xf] }
 0x19d   :  { %4023 = vst [vmem:[#allocation7 + $0xf4] sm:$0xf] %v4022_v19  ;;  %v4026_v21 = vld [vmem:[%s11084_s19 + $0xfc] sm:$0xf]  ;;  %4025 = vst [vmem:[#allocation7 + $0xf8] sm:$0xf] %v4024_v20 }
 0x19e   :  { %4027 = vst [vmem:[#allocation7 + $0xfc] sm:$0xf] %v4026_v21 }
 0x19f   :  { %4186 = vsyncadd [#allocation8 + $0x5], 4096  ;;  %s11096_s17 = sld [smem:[#allocation21_spill]]  ;;  %s11097_s16 = sld [smem:[#allocation22_spill]]  ;;  %v7695_v31 = vld [vmem:[%s11070_s5 + $0x4] ss:$8 sps:$4 sm:$0xff]  }
 0x1a0   :  { %v7693_v34 = vld [vmem:[%s11070_s5] ss:$8 sps:$4 sm:$0xff]   ;;  %v7698_v35 = vld [vmem:[%s11070_s5 + $0x14] ss:$8 sps:$4 sm:$0xff]   ;;  %v7696_v36 = vld [vmem:[%s11070_s5 + $0x10] ss:$8 sps:$4 sm:$0xff]  }
 0x1a1   :  { %v7701_v38 = vld [vmem:[%s11070_s5 + $0x24] ss:$8 sps:$4 sm:$0xff]   ;;  %v7699_v40 = vld [vmem:[%s11070_s5 + $0x20] ss:$8 sps:$4 sm:$0xff]   ;;  %v7704_v41 = vld [vmem:[%s11070_s5 + $0x34] ss:$8 sps:$4 sm:$0xff]  }
 0x1a2   :  { %v7702_v42 = vld [vmem:[%s11070_s5 + $0x30] ss:$8 sps:$4 sm:$0xff]   ;;  %v7707_v43 = vld [vmem:[%s11070_s5 + $0x44] ss:$8 sps:$4 sm:$0xff]   ;;  %v7705_v46 = vld [vmem:[%s11070_s5 + $0x40] ss:$8 sps:$4 sm:$0xff]  }
 0x1a3   :  { %v7710_v47 = vld [vmem:[%s11070_s5 + $0x54] ss:$8 sps:$4 sm:$0xff]   ;;  %v7708_v48 = vld [vmem:[%s11070_s5 + $0x50] ss:$8 sps:$4 sm:$0xff]   ;;  %v7713_v49 = vld [vmem:[%s11070_s5 + $0x64] ss:$8 sps:$4 sm:$0xff]  }
 0x1a4   :  { %v7711_v52 = vld [vmem:[%s11070_s5 + $0x60] ss:$8 sps:$4 sm:$0xff]   ;;  %v7716_v53 = vld [vmem:[%s11070_s5 + $0x74] ss:$8 sps:$4 sm:$0xff]   ;;  %v7714_v54 = vld [vmem:[%s11070_s5 + $0x70] ss:$8 sps:$4 sm:$0xff]  }
 0x1a5   :  { %v7669_v22 = vld [vmem:[%s11096_s17] sm:$0xff]   ;;  %v7670_v23 = vld [vmem:[%s11096_s17 + $0x8] sm:$0xff]   ;;  %v7671_v24 = vld [vmem:[%s11096_s17 + $0x10] sm:$0xff]  }
 0x1a6   :  { %7548 = vmatprep.subr.bf16.mxu1 %v7669_v22  ;;  %v7672_v25 = vld [vmem:[%s11096_s17 + $0x18] sm:$0xff]   ;;  %v7677_v26 = vld [vmem:[%s11097_s16] sm:$0xff]   ;;  %v7674_v28 = vld [vmem:[%s11096_s17 + $0x28] sm:$0xff]  }
 0x1a7   :  { %7549 = vmatpush3.bf16.msra.mxu1 %v7669_v22  ;;  %7564 = vmatprep.mubr.bf16.mxu1 %v7677_v26  ;;  %v7673_v27 = vld [vmem:[%s11096_s17 + $0x20] sm:$0xff]   ;;  %v7675_v29 = vld [vmem:[%s11096_s17 + $0x30] sm:$0xff]   ;;  %v7676_v30 = vld [vmem:[%s11096_s17 + $0x38] sm:$0xff]  }
 0x1a8   :  { %7550 = vmatprep.subr.bf16.mxu1 %v7670_v23  ;;  %v7678_v32 = vld [vmem:[%s11097_s16 + $0x8] sm:$0xff]   ;;  %v7679_v33 = vld [vmem:[%s11097_s16 + $0x10] sm:$0xff]   ;;  %v7680_v37 = vld [vmem:[%s11097_s16 + $0x18] sm:$0xff]  }
 0x1a9   :  { %v7681_v39 = vld [vmem:[%s11097_s16 + $0x20] sm:$0xff]   ;;  %v7682_v44 = vld [vmem:[%s11097_s16 + $0x28] sm:$0xff]   ;;  %v7683_v45 = vld [vmem:[%s11097_s16 + $0x30] sm:$0xff]  }
 0x1aa   :  { %v7684_v50 = vld [vmem:[%s11097_s16 + $0x38] sm:$0xff]   ;;  %v7685_v51 = vld [vmem:[%s11097_s16 + $0x40] sm:$0xff]   ;;  %v7686_v56 = vld [vmem:[%s11097_s16 + $0x48] sm:$0xff]  }
 0x1ab   :  { %7551 = vmatpush3.bf16.msra.mxu1 %v7670_v23  ;;  %v7719_v55 = vld [vmem:[%s11070_s5 + $0x84] ss:$8 sps:$4 sm:$0xff]   ;;  %v7687_v57 = vld [vmem:[%s11097_s16 + $0x50] sm:$0xff]   ;;  %v7717_v58 = vld [vmem:[%s11070_s5 + $0x80] ss:$8 sps:$4 sm:$0xff]  }
 0x1ac   :  { %7552 = vmatprep.subr.bf16.mxu1 %v7671_v24  ;;  %v7722_v59 = vld [vmem:[%s11070_s5 + $0x94] ss:$8 sps:$4 sm:$0xff]   ;;  %v7720_v60 = vld [vmem:[%s11070_s5 + $0x90] ss:$8 sps:$4 sm:$0xff]   ;;  %v7725_v61 = vld [vmem:[%s11070_s5 + $0xa4] ss:$8 sps:$4 sm:$0xff]  }
 0x1ad   :  { %v7688_v62 = vld [vmem:[%s11097_s16 + $0x58] sm:$0xff]   ;;  %v7689_v63 = vld [vmem:[%s11097_s16 + $0x60] sm:$0xff]   ;;  %v7690_v1 = vld [vmem:[%s11097_s16 + $0x68] sm:$0xff]  }
 0x1ae   :  { %v7723_v0 = vld [vmem:[%s11070_s5 + $0xa0] ss:$8 sps:$4 sm:$0xff]   ;;  %v7691_v2 = vld [vmem:[%s11097_s16 + $0x70] sm:$0xff]   ;;  %v7692_v3 = vld [vmem:[%s11097_s16 + $0x78] sm:$0xff]  }
 0x1af   :  { %7553 = vmatpush3.bf16.msra.mxu1 %v7671_v24  ;;  %v7728_v4 = vld [vmem:[%s11070_s5 + $0xb4] ss:$8 sps:$4 sm:$0xff]   ;;  %v7726_v5 = vld [vmem:[%s11070_s5 + $0xb0] ss:$8 sps:$4 sm:$0xff]   ;;  %v7729_v6 = vld [vmem:[%s11070_s5 + $0xc0] ss:$8 sps:$4 sm:$0xff]  }
 0x1b0   :  { %7554 = vmatprep.subr.bf16.mxu1 %v7672_v25  ;;  %v7731_v7 = vld [vmem:[%s11070_s5 + $0xc4] ss:$8 sps:$4 sm:$0xff]   ;;  %v7734_v8 = vld [vmem:[%s11070_s5 + $0xd4] ss:$8 sps:$4 sm:$0xff]   ;;  %v7732_v9 = vld [vmem:[%s11070_s5 + $0xd0] ss:$8 sps:$4 sm:$0xff]  }
 0x1b1   :  { %v7735_v10 = vld [vmem:[%s11070_s5 + $0xe0] ss:$8 sps:$4 sm:$0xff]   ;;  %v7737_v11 = vld [vmem:[%s11070_s5 + $0xe4] ss:$8 sps:$4 sm:$0xff]   ;;  %v7740_v12 = vld [vmem:[%s11070_s5 + $0xf4] ss:$8 sps:$4 sm:$0xff]  }
 0x1b2   :  { %v7738_v13 = vld [vmem:[%s11070_s5 + $0xf0] ss:$8 sps:$4 sm:$0xff]   ;;  %v7743_v14 = vld [vmem:[%s11070_s5 + $0x104] ss:$8 sps:$4 sm:$0xff]  }
 0x1b3   :  { %7555 = vmatpush3.bf16.msra.mxu1 %v7672_v25 }
 0x1b4   :  { %7556 = vmatprep.subr.bf16.mxu1 %v7673_v27 }
 0x1b7   :  { %7557 = vmatpush3.bf16.msra.mxu1 %v7673_v27 }
 0x1b8   :  { %7558 = vmatprep.subr.bf16.mxu1 %v7674_v28 }
 0x1bb   :  { %7559 = vmatpush3.bf16.msra.mxu1 %v7674_v28 }
 0x1bc   :  { %7560 = vmatprep.subr.bf16.mxu1 %v7675_v29 }
 0x1bf   :  { %7561 = vmatpush3.bf16.msra.mxu1 %v7675_v29 }
 0x1c0   :  { %7562 = vmatprep.subr.bf16.mxu1 %v7676_v30 }
 0x1c3   :  { %7563 = vmatpush3.bf16.msra.mxu1 %v7676_v30 }
 0x1c4   :  { %4940 = vmatprep.subr.bf16.mxu1 %v7695_v31 }
 0x1c6   :  { %7565 = vmatmul.mubr.bf16.vlgmr.msra.gmra.mrb[0].mxu1 %v7678_v32 }
 0x1c7   :  { %7568 = vmatprep.mubr.bf16.mxu1 %v7679_v33  ;;  %4941 = vmatpush1.bf16.msra.mxu1 %v7693_v34  ;;  %v7741_v33 = vld [vmem:[%s11070_s5 + $0x100] ss:$8 sps:$4 sm:$0xff]   ;;  %v7746_v34 = vld [vmem:[%s11070_s5 + $0x114] ss:$8 sps:$4 sm:$0xff]  }
 0x1c8   :  { %4942 = vmatprep.subr.bf16.mxu1 %v7698_v35  ;;  %v7744_v35 = vld [vmem:[%s11070_s5 + $0x110] ss:$8 sps:$4 sm:$0xff]  }
 0x1cb   :  { %4943 = vmatpush1.bf16.msra.mxu1 %v7696_v36 }
 0x1cc   :  { %4944 = vmatprep.subr.bf16.mxu1 %v7701_v38 }
 0x1ce   :  { %7569 = vmatmul.mubr.bf16.gmra.mrb[4].mxu1 %v7680_v37  ;;  %v7749_v37 = vld [vmem:[%s11070_s5 + $0x124] ss:$8 sps:$4 sm:$0xff]  }
 0x1cf   :  { %7572 = vmatprep.mubr.bf16.mxu1 %v7681_v39  ;;  %4945 = vmatpush1.bf16.msra.mxu1 %v7699_v40 }
 0x1d0   :  { %4946 = vmatprep.subr.bf16.mxu1 %v7704_v41 }
 0x1d3   :  { %4947 = vmatpush1.bf16.msra.mxu1 %v7702_v42  ;;  %v7747_v42 = vld [vmem:[%s11070_s5 + $0x120] ss:$8 sps:$4 sm:$0xff]  }
 0x1d4   :  { %4948 = vmatprep.subr.bf16.mxu1 %v7707_v43 }
 0x1d6   :  { %7573 = vmatmul.mubr.bf16.gmra.mrb[8].mxu1 %v7682_v44  ;;  %v7752_v44 = vld [vmem:[%s11070_s5 + $0x134] ss:$8 sps:$4 sm:$0xff]  }
 0x1d7   :  { %7576 = vmatprep.mubr.bf16.mxu1 %v7683_v45  ;;  %4949 = vmatpush1.bf16.msra.mxu1 %v7705_v46  ;;  %v7750_v45 = vld [vmem:[%s11070_s5 + $0x130] ss:$8 sps:$4 sm:$0xff]  }
 0x1d8   :  { %4950 = vmatprep.subr.bf16.mxu1 %v7710_v47  ;;  %v7755_v47 = vld [vmem:[%s11070_s5 + $0x144] ss:$8 sps:$4 sm:$0xff]  }
 0x1db   :  { %4951 = vmatpush1.bf16.msra.mxu1 %v7708_v48 }
 0x1dc   :  { %4952 = vmatprep.subr.bf16.mxu1 %v7713_v49 }
 0x1de   :  { %7577 = vmatmul.mubr.bf16.gmra.mrb[12].mxu1 %v7684_v50 }
 0x1df   :  { %7580 = vmatprep.mubr.bf16.mxu1 %v7685_v51  ;;  %4953 = vmatpush1.bf16.msra.mxu1 %v7711_v52  ;;  %v7753_v52 = vld [vmem:[%s11070_s5 + $0x140] ss:$8 sps:$4 sm:$0xff]  }
 0x1e0   :  { %4954 = vmatprep.subr.bf16.mxu1 %v7716_v53 }
 0x1e3   :  { %4955 = vmatpush1.bf16.msra.mxu1 %v7714_v54  ;;  %v7758_v54 = vld [vmem:[%s11070_s5 + $0x154] ss:$8 sps:$4 sm:$0xff]  }
 0x1e4   :  { %4956 = vmatprep.subr.bf16.mxu1 %v7719_v55  ;;  %v7756_v55 = vld [vmem:[%s11070_s5 + $0x150] ss:$8 sps:$4 sm:$0xff]  }
 0x1e6   :  { %7581 = vmatmul.mubr.bf16.gmra.mrb[16].mxu1 %v7686_v56 }
 0x1e7   :  { %7584 = vmatprep.mubr.bf16.mxu1 %v7687_v57  ;;  %4957 = vmatpush1.bf16.msra.mxu1 %v7717_v58  ;;  %v7761_v57 = vld [vmem:[%s11070_s5 + $0x164] ss:$8 sps:$4 sm:$0xff]  }
 0x1e8   :  { %4958 = vmatprep.subr.bf16.mxu1 %v7722_v59 }
 0x1eb   :  { %4959 = vmatpush1.bf16.msra.mxu1 %v7720_v60 }
 0x1ec   :  { %4960 = vmatprep.subr.bf16.mxu1 %v7725_v61 }
 0x1ee   :  { %7585 = vmatmul.mubr.bf16.gmra.mrb[20].mxu1 %v7688_v62  ;;  %v7759_v62 = vld [vmem:[%s11070_s5 + $0x160] ss:$8 sps:$4 sm:$0xff]  }
 0x1ef   :  { %7588 = vmatprep.mubr.bf16.mxu1 %v7689_v63  ;;  %4961 = vmatpush1.bf16.msra.mxu1 %v7723_v0  ;;  %v7764_v0 = vld [vmem:[%s11070_s5 + $0x174] ss:$8 sps:$4 sm:$0xff]  }
 0x1f0   :  { %4962 = vmatprep.subr.bf16.mxu1 %v7728_v4 }
 0x1f3   :  { %4963 = vmatpush1.bf16.msra.mxu1 %v7726_v5 }
 0x1f4   :  { %4964 = vmatprep.subr.bf16.mxu1 %v7731_v7 }
 0x1f6   :  { %7589 = vmatmul.mubr.bf16.gmra.mrb[24].mxu1 %v7690_v1  ;;  %v7762_v1 = vld [vmem:[%s11070_s5 + $0x170] ss:$8 sps:$4 sm:$0xff]  }
 0x1f7   :  { %7592 = vmatprep.mubr.bf16.mxu1 %v7691_v2  ;;  %4965 = vmatpush1.bf16.msra.mxu1 %v7729_v6 }
 0x1f8   :  { %4966 = vmatprep.subr.bf16.mxu1 %v7734_v8  ;;  %v7765_v8 = vld [vmem:[%s11070_s5 + $0x180] ss:$8 sps:$4 sm:$0xff]  }
 0x1fb   :  { %4967 = vmatpush1.bf16.msra.mxu1 %v7732_v9 }
 0x1fc   :  { %4968 = vmatprep.subr.bf16.mxu1 %v7737_v11  ;;  %v7768_v11 = vld [vmem:[%s11070_s5 + $0x190] ss:$8 sps:$4 sm:$0xff]  }
 0x1fe   :  { %7593 = vmatmul.mubr.bf16.gmra.mrb[28].mxu1 %v7692_v3  ;;  %v7767_v3 = vld [vmem:[%s11070_s5 + $0x184] ss:$8 sps:$4 sm:$0xff]  }
 0x1ff   :  { %4969 = vmatpush1.bf16.msra.mxu1 %v7735_v10  ;;  %v7770_v10 = vld [vmem:[%s11070_s5 + $0x194] ss:$8 sps:$4 sm:$0xff]  }
 0x200   :  { %4970 = vmatprep.subr.bf16.mxu1 %v7740_v12 }
 0x203   :  { %4971 = vmatpush1.bf16.msra.mxu1 %v7738_v13  ;;  %v7773_v13 = vld [vmem:[%s11070_s5 + $0x1a4] ss:$8 sps:$4 sm:$0xff]  }
 0x204   :  { %5013 = vmatprep.subr.bf16.mxu1 %v7743_v14 }
 0x299   :  { %v7566_v15 = vpop.f32.mrb[0].mxu1 }
 0x29a   :  { %v4413_v16 = vpop.f32.mrb[1].mxu1 }
 0x29b   :  { %v7567_v17 = vpop.f32.mrb[2].mxu1 }
 0x29c   :  { %v4544_v18 = vpack.c.bf16 %v7567_v17, %v7566_v15  ;;  %v4416_v19 = vpop.f32.mrb[3].mxu1 }
 0x29d   :  { %v4540_v20 = vpack.c.bf16 %v4416_v19, %v4413_v16 }
 0x2a1   :  { %v10289_v21 = vpop.f32.mrb[4].mxu1 }
 0x2a2   :  { %v4429_v22 = vpop.f32.mrb[5].mxu1 }
 0x2a3   :  { %v7571_v23 = vpop.f32.mrb[6].mxu1 }
 0x2a4   :  { %v4552_v24 = vpack.c.bf16 %v7571_v23, %v10289_v21  ;;  %v4432_v25 = vpop.f32.mrb[7].mxu1  ;;  %v7774_v21 = vld [vmem:[%s11070_s5 + $0x1b0] ss:$8 sps:$4 sm:$0xff]   ;;  %v7777_v23 = vld [vmem:[%s11070_s5 + $0x1c0] ss:$8 sps:$4 sm:$0xff]  }
 0x2a5   :  { %v4548_v26 = vpack.c.bf16 %v4432_v25, %v4429_v22  ;;  %v7779_v22 = vld [vmem:[%s11070_s5 + $0x1c4] ss:$8 sps:$4 sm:$0xff]   ;;  %v7780_v25 = vld [vmem:[%s11070_s5 + $0x1d0] ss:$8 sps:$4 sm:$0xff]  }
 0x2a9   :  { %v7574_v27 = vpop.f32.mrb[8].mxu1 }
 0x2aa   :  { %v4445_v28 = vpop.f32.mrb[9].mxu1 }
 0x2ab   :  { %v7575_v29 = vpop.f32.mrb[10].mxu1 }
 0x2ac   :  { %v4545_v30 = vpack.c.bf16 %v7575_v29, %v7574_v27  ;;  %v4448_v31 = vpop.f32.mrb[11].mxu1  ;;  %v7783_v27 = vld [vmem:[%s11070_s5 + $0x1e0] ss:$8 sps:$4 sm:$0xff]   ;;  %v7786_v29 = vld [vmem:[%s11070_s5 + $0x1f0] ss:$8 sps:$4 sm:$0xff]  }
 0x2ad   :  { %v4541_v32 = vpack.c.bf16 %v4448_v31, %v4445_v28  ;;  %v7788_v28 = vld [vmem:[%s11070_s5 + $0x1f4] ss:$8 sps:$4 sm:$0xff]  }
 0x2af   :  { %4972 = vmatprep.mubr.bf16.mxu1 %v4541_v32 }
 0x2b0   :  { %4973 = vmatmul.mubr.bf16.vlgmr.msra.gmra.mrb[32].mxu1 %v4540_v20  ;;  %v7776_v20 = vld [vmem:[%s11070_s5 + $0x1b4] ss:$8 sps:$4 sm:$0xff]  }
 0x2b1   :  { %5014 = vmatpush1.bf16.msra.mxu1 %v7741_v33  ;;  %4982 = vmatprep.mubr.bf16.mxu1 %v4545_v30  ;;  %v7578_v36 = vpop.f32.mrb[12].mxu1 }
 0x2b2   :  { %5015 = vmatprep.subr.bf16.mxu1 %v7746_v34  ;;  %v4461_v38 = vpop.f32.mrb[13].mxu1 }
 0x2b3   :  { %v7579_v39 = vpop.f32.mrb[14].mxu1 }
 0x2b4   :  { %v4553_v40 = vpack.c.bf16 %v7579_v39, %v7578_v36  ;;  %v4464_v41 = vpop.f32.mrb[15].mxu1 }
 0x2b5   :  { %5016 = vmatpush1.bf16.msra.mxu1 %v7744_v35  ;;  %v4549_v43 = vpack.c.bf16 %v4464_v41, %v4461_v38 }
 0x2b6   :  { %5017 = vmatprep.subr.bf16.mxu1 %v7749_v37 }
 0x2b8   :  { %4983 = vmatmul.mubr.bf16.gmra.mrb[36].mxu1 %v4544_v18  ;;  %v7771_v18 = vld [vmem:[%s11070_s5 + $0x1a0] ss:$8 sps:$4 sm:$0xff]  }
 0x2b9   :  { %5018 = vmatpush1.bf16.msra.mxu1 %v7747_v42  ;;  %4992 = vmatprep.mubr.bf16.mxu1 %v4549_v43  ;;  %v10313_v46 = vpop.f32.mrb[16].mxu1 }
 0x2ba   :  { %5019 = vmatprep.subr.bf16.mxu1 %v7752_v44  ;;  %v10318_v48 = vpop.f32.mrb[17].mxu1 }
 0x2bb   :  { %v10320_v49 = vpop.f32.mrb[18].mxu1 }
 0x2bc   :  { %v4546_v50 = vpack.c.bf16 %v10320_v49, %v10313_v46  ;;  %v10324_v51 = vpop.f32.mrb[19].mxu1 }
 0x2bd   :  { %5020 = vmatpush1.bf16.msra.mxu1 %v7750_v45  ;;  %v4542_v53 = vpack.c.bf16 %v10324_v51, %v10318_v48 }
 0x2be   :  { %5021 = vmatprep.subr.bf16.mxu1 %v7755_v47 }
 0x2c0   :  { %4993 = vmatmul.mubr.bf16.gmra.mrb[40].mxu1 %v4548_v26  ;;  %v7785_v26 = vld [vmem:[%s11070_s5 + $0x1e4] ss:$8 sps:$4 sm:$0xff]  }
 0x2c1   :  { %5022 = vmatpush1.bf16.msra.mxu1 %v7753_v52  ;;  %5002 = vmatprep.mubr.bf16.mxu1 %v4553_v40  ;;  %v10337_v56 = vpop.f32.mrb[20].mxu1 }
 0x2c2   :  { %5023 = vmatprep.subr.bf16.mxu1 %v7758_v54  ;;  %v10342_v58 = vpop.f32.mrb[21].mxu1 }
 0x2c3   :  { %v10344_v59 = vpop.f32.mrb[22].mxu1 }
 0x2c4   :  { %v4554_v60 = vpack.c.bf16 %v10344_v59, %v10337_v56  ;;  %v4496_v61 = vpop.f32.mrb[23].mxu1 }
 0x2c5   :  { %5024 = vmatpush1.bf16.msra.mxu1 %v7756_v55  ;;  %v4550_v63 = vpack.c.bf16 %v4496_v61, %v10342_v58 }
 0x2c6   :  { %5025 = vmatprep.subr.bf16.mxu1 %v7761_v57 }
 0x2c8   :  { %5003 = vmatmul.mubr.bf16.gmra.mrb[44].mxu1 %v4552_v24  ;;  %v7782_v24 = vld [vmem:[%s11070_s5 + $0x1d4] ss:$8 sps:$4 sm:$0xff]  }
 0x2c9   :  { %5026 = vmatpush1.bf16.msra.mxu1 %v7759_v62  ;;  %v7590_v2 = vpop.f32.mrb[24].mxu1 }
 0x2ca   :  { %5027 = vmatprep.subr.bf16.mxu1 %v7764_v0  ;;  %v4509_v4 = vpop.f32.mrb[25].mxu1 }
 0x2cb   :  { %v7591_v5 = vpop.f32.mrb[26].mxu1 }
 0x2cc   :  { %v4547_v6 = vpack.c.bf16 %v7591_v5, %v7590_v2  ;;  %v4512_v7 = vpop.f32.mrb[27].mxu1 }
 0x2cd   :  { %5028 = vmatpush1.bf16.msra.mxu1 %v7762_v1  ;;  %v4543_v9 = vpack.c.bf16 %v4512_v7, %v4509_v4 }
 0x2ce   :  { %5029 = vmatprep.subr.bf16.mxu1 %v7767_v3 }
 0x2cf   :  { %5045 = vmatprep.mubr.bf16.mxu1 %v4543_v9 }
 0x2d1   :  { %5030 = vmatpush1.bf16.msra.mxu1 %v7765_v8  ;;  %v7594_v12 = vpop.f32.mrb[28].mxu1 }
 0x2d2   :  { %5031 = vmatprep.subr.bf16.mxu1 %v7770_v10  ;;  %v4525_v14 = vpop.f32.mrb[29].mxu1 }
 0x2d3   :  { %v7595_v15 = vpop.f32.mrb[30].mxu1 }
 0x2d4   :  { %v4555_v16 = vpack.c.bf16 %v7595_v15, %v7594_v12  ;;  %v4528_v17 = vpop.f32.mrb[31].mxu1 }
 0x2d5   :  { %5032 = vmatpush1.bf16.msra.mxu1 %v7768_v11  ;;  %v4551_v19 = vpack.c.bf16 %v4528_v17, %v4525_v14 }
 0x2d6   :  { %5033 = vmatprep.subr.bf16.mxu1 %v7773_v13 }
 0x2d9   :  { %5034 = vmatpush1.bf16.msra.mxu1 %v7771_v18 }
 0x2da   :  { %5035 = vmatprep.subr.bf16.mxu1 %v7776_v20 }
 0x2dd   :  { %5036 = vmatpush1.bf16.msra.mxu1 %v7774_v21 }
 0x2de   :  { %5037 = vmatprep.subr.bf16.mxu1 %v7779_v22 }
 0x2e1   :  { %5038 = vmatpush1.bf16.msra.mxu1 %v7777_v23 }
 0x2e2   :  { %5039 = vmatprep.subr.bf16.mxu1 %v7782_v24 }
 0x2e5   :  { %5040 = vmatpush1.bf16.msra.mxu1 %v7780_v25 }
 0x2e6   :  { %5041 = vmatprep.subr.bf16.mxu1 %v7785_v26 }
 0x2e9   :  { %5042 = vmatpush1.bf16.msra.mxu1 %v7783_v27 }
 0x2ea   :  { %5043 = vmatprep.subr.bf16.mxu1 %v7788_v28 }
 0x2ed   :  { %5044 = vmatpush1.bf16.msra.mxu1 %v7786_v29 }
 0x2f0   :  { %5046 = vmatmul.mubr.bf16.vlgmr.msra.gmra.mrb[32].mxu1 %v4542_v53 }
 0x2f1   :  { %5055 = vmatprep.mubr.bf16.mxu1 %v4547_v6 }
 0x2f8   :  { %5056 = vmatmul.mubr.bf16.gmra.mrb[36].mxu1 %v4546_v50 }
 0x2f9   :  { %5065 = vmatprep.mubr.bf16.mxu1 %v4551_v19 }
 0x300   :  { %5066 = vmatmul.mubr.bf16.gmra.mrb[40].mxu1 %v4550_v63 }
 0x301   :  { %5075 = vmatprep.mubr.bf16.mxu1 %v4555_v16 }
 0x308   :  { %5076 = vmatmul.mubr.bf16.gmra.mrb[44].mxu1 %v4554_v60 }
 0x3c3   :  { %v5047_v30 = vpop.f32.mrb[32].mxu1 }
 0x3c4   :  { %v5086_v31 = vmul.f32 0.2, %v5047_v30  ;;  %v5049_v32 = vpop.f32.mrb[33].mxu1 }
 0x3c5   :  { %v5087_v33 = vmul.f32 0.2, %v5049_v32  ;;  %v5051_v34 = vpop.f32.mrb[34].mxu1 }
 0x3c6   :  { %v5102_v35 = vmax.f32 %v5047_v30, %v5086_v31  ;;  %v5088_v36 = vmul.f32 0.2, %v5051_v34  ;;  %v5053_v37 = vpop.f32.mrb[35].mxu1 }
 0x3c7   :  { %v5103_v38 = vmax.f32 %v5049_v32, %v5087_v33  ;;  %v5089_v39 = vmul.f32 0.2, %v5053_v37 }
 0x3c8   :  { %v5104_v40 = vmax.f32 %v5051_v34, %v5088_v36 }
 0x3c9   :  { %v5105_v41 = vmax.f32 %v5053_v37, %v5089_v39 }
 0x3cb   :  { %v5057_v42 = vpop.f32.mrb[36].mxu1 }
 0x3cc   :  { %v5090_v43 = vmul.f32 0.2, %v5057_v42  ;;  %v5059_v44 = vpop.f32.mrb[37].mxu1 }
 0x3cd   :  { %v5091_v45 = vmul.f32 0.2, %v5059_v44  ;;  %v5061_v46 = vpop.f32.mrb[38].mxu1 }
 0x3ce   :  { %v5106_v47 = vmax.f32 %v5057_v42, %v5090_v43  ;;  %v5092_v48 = vmul.f32 0.2, %v5061_v46  ;;  %v5063_v49 = vpop.f32.mrb[39].mxu1 }
 0x3cf   :  { %v5107_v50 = vmax.f32 %v5059_v44, %v5091_v45  ;;  %v5093_v51 = vmul.f32 0.2, %v5063_v49 }
 0x3d0   :  { %v5108_v52 = vmax.f32 %v5061_v46, %v5092_v48 }
 0x3d1   :  { %v5109_v53 = vmax.f32 %v5063_v49, %v5093_v51 }
 0x3d3   :  { %v5067_v54 = vpop.f32.mrb[40].mxu1 }
 0x3d4   :  { %v5094_v55 = vmul.f32 0.2, %v5067_v54  ;;  %v5069_v56 = vpop.f32.mrb[41].mxu1 }
 0x3d5   :  { %v5095_v57 = vmul.f32 0.2, %v5069_v56  ;;  %v5071_v58 = vpop.f32.mrb[42].mxu1 }
 0x3d6   :  { %v5110_v59 = vmax.f32 %v5067_v54, %v5094_v55  ;;  %v5096_v60 = vmul.f32 0.2, %v5071_v58  ;;  %v5073_v61 = vpop.f32.mrb[43].mxu1 }
 0x3d7   :  { %v5111_v62 = vmax.f32 %v5069_v56, %v5095_v57  ;;  %v5097_v63 = vmul.f32 0.2, %v5073_v61 }
 0x3d8   :  { %v5112_v0 = vmax.f32 %v5071_v58, %v5096_v60 }
 0x3d9   :  { %v5113_v1 = vmax.f32 %v5073_v61, %v5097_v63 }
 0x3db   :  { %v5077_v2 = vpop.f32.mrb[44].mxu1 }
 0x3dc   :  { %v5098_v3 = vmul.f32 0.2, %v5077_v2  ;;  %v5079_v4 = vpop.f32.mrb[45].mxu1 }
 0x3dd   :  { %v5099_v5 = vmul.f32 0.2, %v5079_v4  ;;  %v5081_v6 = vpop.f32.mrb[46].mxu1 }
 0x3de   :  { %v5114_v7 = vmax.f32 %v5077_v2, %v5098_v3  ;;  %v5100_v8 = vmul.f32 0.2, %v5081_v6  ;;  %v5083_v9 = vpop.f32.mrb[47].mxu1 }
 0x3df   :  { %v5115_v10 = vmax.f32 %v5079_v4, %v5099_v5  ;;  %v5101_v11 = vmul.f32 0.2, %v5083_v9 }
 0x3e0   :  { %v5116_v12 = vmax.f32 %v5081_v6, %v5100_v8 }
 0x3e1   :  { %v5117_v13 = vmax.f32 %v5083_v9, %v5101_v11 }
 0x3e2   :  { %7819 = dma.done.wait [#allocation8], 16384 }
 0x3e3   :  { %7820 = vsyncadd [#allocation8], 4294950912  ;;  %v5127_v14 = vpack.c.bf16 %v5105_v41, %v5103_v38  ;;  %v5126_v15 = vpack.c.bf16 %v5104_v40, %v5102_v35  ;;  %v5129_v16 = vpack.c.bf16 %v5109_v53, %v5107_v50 }
 0x3e4   :  { %7821 = dma.done.wait [#allocation8 + $0x1], 4096 }
 0x3e5   :  { %7822 = vsyncadd [#allocation8 + $0x1], 4294963200  ;;  %5215 = vmatprep.subr.bf16.mxu0 %v5127_v14  ;;  %v5128_v17 = vpack.c.bf16 %v5108_v52, %v5106_v47  ;;  %v7831_v18 = vmov 0   ;;  %v5131_v19 = vpack.c.bf16 %v5113_v1, %v5111_v62  ;;  %v5130_v20 = vpack.c.bf16 %v5112_v0, %v5110_v59  ;;  %v5345_v23 = vld [vmem:[#allocation2 + $0x8] sm:$0xff]  ;;  %s11098_s21 = sld [smem:[#allocation23_spill]]  ;;  %v5344_v25 = vld [vmem:[#allocation2] sm:$0xff] }
 0x3e6   :  { %5216 = vmatpush1.bf16.msra.mxu0 %v5126_v15  ;;  %5247 = vmatprep.mubr.bf16.mxu0 %v7831_v18  ;;  %v5133_v21 = vpack.c.bf16 %v5117_v13, %v5115_v10  ;;  %v5132_v22 = vpack.c.bf16 %v5116_v12, %v5114_v7  ;;  %vm5190_vm0 = vcmask 523264   ;;  %v5347_v26 = vld [vmem:[#allocation2 + $0x18] sm:$0xff]  ;;  %v5346_v27 = vld [vmem:[#allocation2 + $0x10] sm:$0xff]  ;;  %v5349_v28 = vld [vmem:[#allocation2 + $0x28] sm:$0xff] }
 0x3e7   :  { %5217 = vmatprep.subr.bf16.mxu0 %v5129_v16  ;;  %v5348_v30 = vld [vmem:[#allocation2 + $0x20] sm:$0xff]  ;;  %v5351_v31 = vld [vmem:[#allocation2 + $0x38] sm:$0xff]  ;;  %v5350_v32 = vld [vmem:[#allocation2 + $0x30] sm:$0xff] }
 0x3e8   :  { %v5353_v33 = vld [vmem:[#allocation2 + $0x48] sm:$0xff]  ;;  %v5352_v35 = vld [vmem:[#allocation2 + $0x40] sm:$0xff]  ;;  %v5355_v36 = vld [vmem:[#allocation2 + $0x58] sm:$0xff] }
 0x3e9   :  { %v5354_v37 = vld [vmem:[#allocation2 + $0x50] sm:$0xff]  ;;  %v5357_v38 = vld [vmem:[#allocation2 + $0x68] sm:$0xff]  ;;  %v5356_v40 = vld [vmem:[#allocation2 + $0x60] sm:$0xff] }
 0x3ea   :  { %5218 = vmatpush1.bf16.msra.mxu0 %v5128_v17  ;;  %v5359_v41 = vld [vmem:[#allocation2 + $0x78] sm:$0xff]  ;;  %v5358_v42 = vld [vmem:[#allocation2 + $0x70] sm:$0xff]  ;;  %v5361_v43 = vld [vmem:[#allocation2 + $0x88] sm:$0xff] }
 0x3eb   :  { %5219 = vmatprep.subr.bf16.mxu0 %v5131_v19  ;;  %v7789_v24 = vld [vmem:[%s11098_s21] sm:$0xff]   ;;  %v7790_v29 = vld [vmem:[%s11098_s21 + $0x8] sm:$0xff]   ;;  %v7791_v34 = vld [vmem:[%s11098_s21 + $0x10] sm:$0xff]  }
 0x3ec   :  { %v7792_v39 = vld [vmem:[%s11098_s21 + $0x18] sm:$0xff]   ;;  %v7793_v44 = vld [vmem:[%s11098_s21 + $0x20] sm:$0xff]   ;;  %v5362_v47 = vld [vmem:[#allocation2 + $0x90] sm:$0xff] }
 0x3ed   :  { %v5360_v45 = vld [vmem:[#allocation2 + $0x80] sm:$0xff]  ;;  %v5363_v46 = vld [vmem:[#allocation2 + $0x98] sm:$0xff]  ;;  %v5365_v48 = vld [vmem:[#allocation2 + $0xa8] sm:$0xff] }
 0x3ee   :  { %5220 = vmatpush1.bf16.msra.mxu0 %v5130_v20  ;;  %v7794_v49 = vld [vmem:[%s11098_s21 + $0x28] sm:$0xff]   ;;  %v5364_v50 = vld [vmem:[#allocation2 + $0xa0] sm:$0xff]  ;;  %v5367_v51 = vld [vmem:[#allocation2 + $0xb8] sm:$0xff] }
 0x3ef   :  { %5221 = vmatprep.subr.bf16.mxu0 %v5133_v21  ;;  %v5366_v52 = vld [vmem:[#allocation2 + $0xb0] sm:$0xff]  ;;  %v5369_v53 = vld [vmem:[#allocation2 + $0xc8] sm:$0xff]  ;;  %v5368_v55 = vld [vmem:[#allocation2 + $0xc0] sm:$0xff] }
 0x3f0   :  { %v7795_v54 = vld [vmem:[%s11098_s21 + $0x30] sm:$0xff]   ;;  %v5371_v56 = vld [vmem:[#allocation2 + $0xd8] sm:$0xff]  ;;  %v5373_v58 = vld [vmem:[#allocation2 + $0xe8] sm:$0xff] }
 0x3f1   :  { %v5370_v57 = vld [vmem:[#allocation2 + $0xd0] sm:$0xff]  ;;  %v7796_v59 = vld [vmem:[%s11098_s21 + $0x38] sm:$0xff]   ;;  %v5372_v60 = vld [vmem:[#allocation2 + $0xe0] sm:$0xff] }
 0x3f2   :  { %5222 = vmatpush1.bf16.msra.mxu0 %v5132_v22  ;;  %v5375_v61 = vld [vmem:[#allocation2 + $0xf8] sm:$0xff]  ;;  %v5374_v62 = vld [vmem:[#allocation2 + $0xf0] sm:$0xff]  ;;  %v5377_v63 = vld [vmem:[#allocation2 + $0x108] sm:$0xff] }
 0x3f3   :  { %5472 = vmatprep.subr.bf16.mxu0 %v5345_v23  ;;  %v5376_v6 = vld [vmem:[#allocation2 + $0x100] sm:$0xff]  ;;  %v5379_v7 = vld [vmem:[#allocation2 + $0x118] sm:$0xff]  ;;  %v5378_v9 = vld [vmem:[#allocation2 + $0x110] sm:$0xff] }
 0x3f4   :  { %v5381_v11 = vld [vmem:[#allocation2 + $0x128] sm:$0xff]  ;;  %v5380_v16 = vld [vmem:[#allocation2 + $0x120] sm:$0xff]  ;;  %v5383_v17 = vld [vmem:[#allocation2 + $0x138] sm:$0xff] }
 0x3f5   :  { %7495 = vmatmul.mubr.msk.bf16.vlgmr.msra.gmra.mrb[0].mxu0 %vm5190_vm0, %v7789_v24  ;;  %v5382_v20 = vld [vmem:[#allocation2 + $0x130] sm:$0xff]  ;;  %v5385_v22 = vld [vmem:[#allocation2 + $0x148] sm:$0xff] }
 0x3f6   :  { %5257 = vmatprep.mubr.bf16.mxu0 %v7831_v18  ;;  %5473 = vmatpush1.bf16.msra.mxu0 %v5344_v25 }
 0x3f7   :  { %5474 = vmatprep.subr.bf16.mxu0 %v5347_v26 }
 0x3fa   :  { %5475 = vmatpush1.bf16.msra.mxu0 %v5346_v27  ;;  %v5384_v27 = vld [vmem:[#allocation2 + $0x140] sm:$0xff] }
 0x3fb   :  { %5476 = vmatprep.subr.bf16.mxu0 %v5349_v28  ;;  %v5387_v28 = vld [vmem:[#allocation2 + $0x158] sm:$0xff] }
 0x3fd   :  { %7496 = vmatmul.mubr.msk.bf16.gmra.mrb[4].mxu0 %vm5190_vm0, %v7790_v29 }
 0x3fe   :  { %5267 = vmatprep.mubr.bf16.mxu0 %v7831_v18  ;;  %5477 = vmatpush1.bf16.msra.mxu0 %v5348_v30  ;;  %v5386_v30 = vld [vmem:[#allocation2 + $0x150] sm:$0xff] }
 0x3ff   :  { %5478 = vmatprep.subr.bf16.mxu0 %v5351_v31 }
 0x402   :  { %5479 = vmatpush1.bf16.msra.mxu0 %v5350_v32  ;;  %v5389_v32 = vld [vmem:[#allocation2 + $0x168] sm:$0xff] }
 0x403   :  { %5480 = vmatprep.subr.bf16.mxu0 %v5353_v33 }
 0x405   :  { %7497 = vmatmul.mubr.msk.bf16.gmra.mrb[8].mxu0 %vm5190_vm0, %v7791_v34 }
 0x406   :  { %5277 = vmatprep.mubr.bf16.mxu0 %v7831_v18  ;;  %5481 = vmatpush1.bf16.msra.mxu0 %v5352_v35 }
 0x407   :  { %5482 = vmatprep.subr.bf16.mxu0 %v5355_v36 }
 0x40a   :  { %5483 = vmatpush1.bf16.msra.mxu0 %v5354_v37  ;;  %v5388_v37 = vld [vmem:[#allocation2 + $0x160] sm:$0xff] }
 0x40b   :  { %5484 = vmatprep.subr.bf16.mxu0 %v5357_v38  ;;  %v5391_v38 = vld [vmem:[#allocation2 + $0x178] sm:$0xff] }
 0x40d   :  { %7498 = vmatmul.mubr.msk.bf16.gmra.mrb[12].mxu0 %vm5190_vm0, %v7792_v39 }
 0x40e   :  { %5287 = vmatprep.mubr.bf16.mxu0 %v7831_v18  ;;  %5485 = vmatpush1.bf16.msra.mxu0 %v5356_v40  ;;  %v5390_v40 = vld [vmem:[#allocation2 + $0x170] sm:$0xff] }
 0x40f   :  { %5486 = vmatprep.subr.bf16.mxu0 %v5359_v41 }
 0x412   :  { %5487 = vmatpush1.bf16.msra.mxu0 %v5358_v42  ;;  %v5393_v42 = vld [vmem:[#allocation2 + $0x188] sm:$0xff] }
 0x413   :  { %5488 = vmatprep.subr.bf16.mxu0 %v5361_v43 }
 0x415   :  { %7499 = vmatmul.mubr.msk.bf16.gmra.mrb[16].mxu0 %vm5190_vm0, %v7793_v44 }
 0x416   :  { %5297 = vmatprep.mubr.bf16.mxu0 %v7831_v18  ;;  %5489 = vmatpush1.bf16.msra.mxu0 %v5360_v45 }
 0x417   :  { %5490 = vmatprep.subr.bf16.mxu0 %v5363_v46 }
 0x41a   :  { %5491 = vmatpush1.bf16.msra.mxu0 %v5362_v47  ;;  %v5392_v47 = vld [vmem:[#allocation2 + $0x180] sm:$0xff] }
 0x41b   :  { %5492 = vmatprep.subr.bf16.mxu0 %v5365_v48  ;;  %v5395_v48 = vld [vmem:[#allocation2 + $0x198] sm:$0xff] }
 0x41d   :  { %7500 = vmatmul.mubr.msk.bf16.gmra.mrb[20].mxu0 %vm5190_vm0, %v7794_v49  ;;  %v5394_v49 = vld [vmem:[#allocation2 + $0x190] sm:$0xff] }
 0x41e   :  { %5307 = vmatprep.mubr.bf16.mxu0 %v7831_v18  ;;  %5493 = vmatpush1.bf16.msra.mxu0 %v5364_v50  ;;  %v5397_v50 = vld [vmem:[#allocation2 + $0x1a8] sm:$0xff] }
 0x41f   :  { %5494 = vmatprep.subr.bf16.mxu0 %v5367_v51  ;;  %v5396_v51 = vld [vmem:[#allocation2 + $0x1a0] sm:$0xff] }
 0x422   :  { %5495 = vmatpush1.bf16.msra.mxu0 %v5366_v52  ;;  %v5399_v52 = vld [vmem:[#allocation2 + $0x1b8] sm:$0xff] }
 0x423   :  { %5496 = vmatprep.subr.bf16.mxu0 %v5369_v53  ;;  %v5398_v53 = vld [vmem:[#allocation2 + $0x1b0] sm:$0xff] }
 0x425   :  { %7501 = vmatmul.mubr.msk.bf16.gmra.mrb[24].mxu0 %vm5190_vm0, %v7795_v54 }
 0x426   :  { %5317 = vmatprep.mubr.bf16.mxu0 %v7831_v18  ;;  %5497 = vmatpush1.bf16.msra.mxu0 %v5368_v55  ;;  %v5401_v55 = vld [vmem:[#allocation2 + $0x1c8] sm:$0xff] }
 0x427   :  { %5498 = vmatprep.subr.bf16.mxu0 %v5371_v56 }
 0x42a   :  { %5499 = vmatpush1.bf16.msra.mxu0 %v5370_v57  ;;  %v5400_v57 = vld [vmem:[#allocation2 + $0x1c0] sm:$0xff] }
 0x42b   :  { %5500 = vmatprep.subr.bf16.mxu0 %v5373_v58 }
 0x42d   :  { %7502 = vmatmul.mubr.msk.bf16.gmra.mrb[28].mxu0 %vm5190_vm0, %v7796_v59  ;;  %v5403_v59 = vld [vmem:[#allocation2 + $0x1d8] sm:$0xff] }
 0x42e   :  { %5501 = vmatpush1.bf16.msra.mxu0 %v5372_v60 }
 0x42f   :  { %5502 = vmatprep.subr.bf16.mxu0 %v5375_v61 }
 0x432   :  { %5503 = vmatpush1.bf16.msra.mxu0 %v5374_v62 }
 0x433   :  { %5525 = vmatprep.subr.bf16.mxu0 %v5377_v63  ;;  %v5402_v63 = vld [vmem:[#allocation2 + $0x1d0] sm:$0xff] }
 0x4c8   :  { %v5249_v0 = vpop.f32.mrb[0].mxu0 }
 0x4c9   :  { %v5251_v1 = vpop.f32.mrb[1].mxu0 }
 0x4ca   :  { %v5253_v2 = vpop.f32.mrb[2].mxu0 }
 0x4cb   :  { %v5328_v3 = vpack.c.bf16 %v5253_v2, %v5249_v0  ;;  %v5255_v4 = vpop.f32.mrb[3].mxu0  ;;  %v5405_v0 = vld [vmem:[#allocation2 + $0x1e8] sm:$0xff]  ;;  %v5404_v2 = vld [vmem:[#allocation2 + $0x1e0] sm:$0xff] }
 0x4cc   :  { %v5329_v5 = vpack.c.bf16 %v5255_v4, %v5251_v1  ;;  %v5407_v4 = vld [vmem:[#allocation2 + $0x1f8] sm:$0xff] }
 0x4ce   :  { %5504 = vmatprep.mubr.bf16.mxu0 %v5329_v5 }
 0x4cf   :  { %5505 = vmatmul.mubr.bf16.vlgmr.msra.gmra.mrb[32].mxu0 %v5328_v3 }
 0x4d0   :  { %5526 = vmatpush1.bf16.msra.mxu0 %v5376_v6  ;;  %v5259_v8 = vpop.f32.mrb[4].mxu0 }
 0x4d1   :  { %5527 = vmatprep.subr.bf16.mxu0 %v5379_v7  ;;  %v5261_v10 = vpop.f32.mrb[5].mxu0 }
 0x4d2   :  { %v5263_v12 = vpop.f32.mrb[6].mxu0 }
 0x4d3   :  { %v5336_v13 = vpack.c.bf16 %v5263_v12, %v5259_v8  ;;  %v5265_v14 = vpop.f32.mrb[7].mxu0  ;;  %v5408_v12 = vld [vmem:[#allocation2 + $0x200] sm:$0xff] }
 0x4d4   :  { %5528 = vmatpush1.bf16.msra.mxu0 %v5378_v9  ;;  %v5337_v15 = vpack.c.bf16 %v5265_v14, %v5261_v10  ;;  %v5406_v9 = vld [vmem:[#allocation2 + $0x1f0] sm:$0xff]  ;;  %v5409_v10 = vld [vmem:[#allocation2 + $0x208] sm:$0xff]  ;;  %v5411_v14 = vld [vmem:[#allocation2 + $0x218] sm:$0xff] }
 0x4d5   :  { %5529 = vmatprep.subr.bf16.mxu0 %v5381_v11 }
 0x4d6   :  { %5514 = vmatprep.mubr.bf16.mxu0 %v5337_v15 }
 0x4d7   :  { %5515 = vmatmul.mubr.bf16.gmra.mrb[36].mxu0 %v5336_v13 }
 0x4d8   :  { %5530 = vmatpush1.bf16.msra.mxu0 %v5380_v16  ;;  %v10452_v19 = vpop.f32.mrb[8].mxu0 }
 0x4d9   :  { %5531 = vmatprep.subr.bf16.mxu0 %v5383_v17  ;;  %v5271_v21 = vpop.f32.mrb[9].mxu0 }
 0x4da   :  { %v10454_v23 = vpop.f32.mrb[10].mxu0 }
 0x4db   :  { %v5330_v24 = vpack.c.bf16 %v10454_v23, %v10452_v19  ;;  %v5275_v25 = vpop.f32.mrb[11].mxu0  ;;  %v5412_v19 = vld [vmem:[#allocation2 + $0x220] sm:$0xff]  ;;  %v5415_v23 = vld [vmem:[#allocation2 + $0x238] sm:$0xff] }
 0x4dc   :  { %5532 = vmatpush1.bf16.msra.mxu0 %v5382_v20  ;;  %v5331_v26 = vpack.c.bf16 %v5275_v25, %v5271_v21  ;;  %v5410_v21 = vld [vmem:[#allocation2 + $0x210] sm:$0xff]  ;;  %v10529_v25 = vld [vmem:[#allocation5] sm:$0xff] }
 0x4dd   :  { %5533 = vmatprep.subr.bf16.mxu0 %v5385_v22  ;;  %v5413_v22 = vld [vmem:[#allocation2 + $0x228] sm:$0xff] }
 0x4de   :  { %5557 = vmatprep.mubr.bf16.mxu0 %v5331_v26  ;;  %v10534_v26 = vld [vmem:[#allocation5 + $0x18] sm:$0xff] }
 0x4e0   :  { %5534 = vmatpush1.bf16.msra.mxu0 %v5384_v27  ;;  %v10458_v29 = vpop.f32.mrb[12].mxu0  ;;  %v5414_v27 = vld [vmem:[#allocation2 + $0x230] sm:$0xff] }
 0x4e1   :  { %5535 = vmatprep.subr.bf16.mxu0 %v5387_v28  ;;  %v10460_v31 = vpop.f32.mrb[13].mxu0  ;;  %v5417_v28 = vld [vmem:[#allocation2 + $0x248] sm:$0xff] }
 0x4e2   :  { %v10462_v33 = vpop.f32.mrb[14].mxu0 }
 0x4e3   :  { %v5338_v34 = vpack.c.bf16 %v10462_v33, %v10458_v29  ;;  %v10466_v35 = vpop.f32.mrb[15].mxu0  ;;  %v10539_v29 = vld [vmem:[#allocation5 + $0x10] sm:$0xff]  ;;  %v10545_v33 = vld [vmem:[#allocation5 + $0x20] sm:$0xff] }
 0x4e4   :  { %5536 = vmatpush1.bf16.msra.mxu0 %v5386_v30  ;;  %v5339_v36 = vpack.c.bf16 %v10466_v35, %v10460_v31  ;;  %v10541_v30 = vld [vmem:[#allocation5 + $0x28] sm:$0xff]  ;;  %v5416_v31 = vld [vmem:[#allocation2 + $0x240] sm:$0xff]  ;;  %v5418_v35 = vld [vmem:[#allocation2 + $0x250] sm:$0xff] }
 0x4e5   :  { %5537 = vmatprep.subr.bf16.mxu0 %v5389_v32  ;;  %v5419_v32 = vld [vmem:[#allocation2 + $0x258] sm:$0xff] }
 0x4e8   :  { %5538 = vmatpush1.bf16.msra.mxu0 %v5388_v37  ;;  %v10470_v39 = vpop.f32.mrb[16].mxu0  ;;  %v10551_v37 = vld [vmem:[#allocation5 + $0x30] sm:$0xff] }
 0x4e9   :  { %5539 = vmatprep.subr.bf16.mxu0 %v5391_v38  ;;  %v10472_v41 = vpop.f32.mrb[17].mxu0  ;;  %v10553_v38 = vld [vmem:[#allocation5 + $0x48] sm:$0xff] }
 0x4ea   :  { %v10474_v43 = vpop.f32.mrb[18].mxu0 }
 0x4eb   :  { %v5332_v44 = vpack.c.bf16 %v10474_v43, %v10470_v39  ;;  %v10478_v45 = vpop.f32.mrb[19].mxu0  ;;  %v5446_v39 = vld [vmem:[#allocation2 + $0x330] sm:$0xff]  ;;  %v5449_v43 = vld [vmem:[#allocation2 + $0x348] sm:$0xff] }
 0x4ec   :  { %5540 = vmatpush1.bf16.msra.mxu0 %v5390_v40  ;;  %v5333_v46 = vpack.c.bf16 %v10478_v45, %v10472_v41  ;;  %v5420_v40 = vld [vmem:[#allocation2 + $0x260] sm:$0xff]  ;;  %v5423_v41 = vld [vmem:[#allocation2 + $0x278] sm:$0xff] }
 0x4ed   :  { %5541 = vmatprep.subr.bf16.mxu0 %v5393_v42  ;;  %v10557_v42 = vld [vmem:[#allocation5 + $0x40] sm:$0xff]  ;;  %v10559_v45 = vld [vmem:[#allocation5 + $0x58] sm:$0xff] }
 0x4f0   :  { %5542 = vmatpush1.bf16.msra.mxu0 %v5392_v47  ;;  %v10482_v54 = vpop.f32.mrb[20].mxu0  ;;  %v5425_v47 = vld [vmem:[#allocation2 + $0x288] sm:$0xff] }
 0x4f1   :  { %5543 = vmatprep.subr.bf16.mxu0 %v5395_v48  ;;  %v10484_v56 = vpop.f32.mrb[21].mxu0  ;;  %v10563_v48 = vld [vmem:[#allocation5 + $0x50] sm:$0xff] }
 0x4f2   :  { %v10486_v58 = vpop.f32.mrb[22].mxu0 }
 0x4f3   :  { %v5340_v60 = vpack.c.bf16 %v10486_v58, %v10482_v54  ;;  %v10490_v61 = vpop.f32.mrb[23].mxu0  ;;  %v5452_v54 = vld [vmem:[#allocation2 + $0x360] sm:$0xff]  ;;  %v5455_v58 = vld [vmem:[#allocation2 + $0x378] sm:$0xff] }
 0x4f4   :  { %5544 = vmatpush1.bf16.msra.mxu0 %v5394_v49  ;;  %v5341_v62 = vpack.c.bf16 %v10490_v61, %v10484_v56  ;;  %v10565_v49 = vld [vmem:[#allocation5 + $0x68] sm:$0xff]  ;;  %v5451_v56 = vld [vmem:[#allocation2 + $0x358] sm:$0xff]  ;;  %v5450_v61 = vld [vmem:[#allocation2 + $0x350] sm:$0xff] }
 0x4f5   :  { %5545 = vmatprep.subr.bf16.mxu0 %v5397_v50  ;;  %v5424_v50 = vld [vmem:[#allocation2 + $0x280] sm:$0xff] }
 0x4f8   :  { %5546 = vmatpush1.bf16.msra.mxu0 %v5396_v51  ;;  %v10494_v1 = vpop.f32.mrb[24].mxu0  ;;  %v5427_v51 = vld [vmem:[#allocation2 + $0x298] sm:$0xff] }
 0x4f9   :  { %5547 = vmatprep.subr.bf16.mxu0 %v5399_v52  ;;  %v10496_v3 = vpop.f32.mrb[25].mxu0  ;;  %v10569_v52 = vld [vmem:[#allocation5 + $0x60] sm:$0xff] }
 0x4fa   :  { %v10498_v5 = vpop.f32.mrb[26].mxu0 }
 0x4fb   :  { %v5334_v6 = vpack.c.bf16 %v10498_v5, %v10494_v1  ;;  %v10502_v7 = vpop.f32.mrb[27].mxu0  ;;  %v10613_v1 = vld [vmem:[#allocation5 + $0xa0] sm:$0xff]  ;;  %v10617_v5 = vld [vmem:[#allocation5 + $0xb8] sm:$0xff] }
 0x4fc   :  { %5548 = vmatpush1.bf16.msra.mxu0 %v5398_v53  ;;  %v5335_v8 = vpack.c.bf16 %v10502_v7, %v10496_v3  ;;  %v10571_v53 = vld [vmem:[#allocation5 + $0x78] sm:$0xff]  ;;  %v5457_v3 = vld [vmem:[#allocation2 + $0x388] sm:$0xff]  ;;  %v5456_v7 = vld [vmem:[#allocation2 + $0x380] sm:$0xff] }
 0x4fd   :  { %5549 = vmatprep.subr.bf16.mxu0 %v5401_v55  ;;  %v5426_v55 = vld [vmem:[#allocation2 + $0x290] sm:$0xff] }
 0x500   :  { %5550 = vmatpush1.bf16.msra.mxu0 %v5400_v57  ;;  %v10506_v11 = vpop.f32.mrb[28].mxu0  ;;  %v5429_v57 = vld [vmem:[#allocation2 + $0x2a8] sm:$0xff] }
 0x501   :  { %5551 = vmatprep.subr.bf16.mxu0 %v5403_v59  ;;  %v10508_v13 = vpop.f32.mrb[29].mxu0  ;;  %v10575_v59 = vld [vmem:[#allocation5 + $0x70] sm:$0xff] }
 0x502   :  { %v10510_v15 = vpop.f32.mrb[30].mxu0 }
 0x503   :  { %v5342_v16 = vpack.c.bf16 %v10510_v15, %v10506_v11  ;;  %v10517_v17 = vpop.f32.mrb[31].mxu0  ;;  %v10623_v11 = vld [vmem:[#allocation5 + $0xc8] sm:$0xff]  ;;  %v10629_v15 = vld [vmem:[#allocation5 + $0xd8] sm:$0xff] }
 0x504   :  { %5552 = vmatpush1.bf16.msra.mxu0 %v5402_v63  ;;  %v5343_v20 = vpack.c.bf16 %v10517_v17, %v10508_v13  ;;  %v10577_v63 = vld [vmem:[#allocation5 + $0x88] sm:$0xff]  ;;  %v10626_v13 = vld [vmem:[#allocation5 + $0xc0] sm:$0xff] }
 0x505   :  { %5553 = vmatprep.subr.bf16.mxu0 %v5405_v0  ;;  %v5428_v0 = vld [vmem:[#allocation2 + $0x2a0] sm:$0xff]  ;;  %v10635_v17 = vld [vmem:[#allocation5 + $0xe8] sm:$0xff] }
 0x508   :  { %5554 = vmatpush1.bf16.msra.mxu0 %v5404_v2  ;;  %v5431_v2 = vld [vmem:[#allocation2 + $0x2b8] sm:$0xff] }
 0x509   :  { %5555 = vmatprep.subr.bf16.mxu0 %v5407_v4  ;;  %v10581_v4 = vld [vmem:[#allocation5 + $0x80] sm:$0xff] }
 0x50c   :  { %5556 = vmatpush1.bf16.msra.mxu0 %v5406_v9  ;;  %v5430_v9 = vld [vmem:[#allocation2 + $0x2b0] sm:$0xff] }
 0x50d   :  { %5578 = vmatprep.subr.bf16.mxu0 %v5409_v10  ;;  %v5433_v10 = vld [vmem:[#allocation2 + $0x2c8] sm:$0xff] }
 0x50f   :  { %5558 = vmatmul.mubr.bf16.vlgmr.msra.gmra.mrb[32].mxu0 %v5330_v24  ;;  %v10527_v24 = vld [vmem:[#allocation5 + $0x8] sm:$0xff] }
 0x510   :  { %5579 = vmatpush1.bf16.msra.mxu0 %v5408_v12  ;;  %5567 = vmatprep.mubr.bf16.mxu0 %v5339_v36  ;;  %v5421_v36 = vld [vmem:[#allocation2 + $0x268] sm:$0xff]  ;;  %v5432_v12 = vld [vmem:[#allocation2 + $0x2c0] sm:$0xff] }
 0x511   :  { %5580 = vmatprep.subr.bf16.mxu0 %v5411_v14  ;;  %5736 = vmatprep.subr.bf16.mxu1 %v10527_v24  ;;  %v5435_v14 = vld [vmem:[#allocation2 + $0x2d8] sm:$0xff] }
 0x512   :  { %5737 = vmatpush1.bf16.msra.mxu1 %v10529_v25 }
 0x513   :  { %5738 = vmatprep.subr.bf16.mxu1 %v10534_v26 }
 0x514   :  { %5581 = vmatpush1.bf16.msra.mxu0 %v5410_v21  ;;  %v5434_v21 = vld [vmem:[#allocation2 + $0x2d0] sm:$0xff] }
 0x515   :  { %5582 = vmatprep.subr.bf16.mxu0 %v5413_v22  ;;  %v5437_v22 = vld [vmem:[#allocation2 + $0x2e8] sm:$0xff] }
 0x516   :  { %5739 = vmatpush1.bf16.msra.mxu1 %v10539_v29 }
 0x517   :  { %5568 = vmatmul.mubr.bf16.gmra.mrb[36].mxu0 %v5338_v34  ;;  %5740 = vmatprep.subr.bf16.mxu1 %v10541_v30  ;;  %v10547_v34 = vld [vmem:[#allocation5 + $0x38] sm:$0xff] }
 0x518   :  { %5583 = vmatpush1.bf16.msra.mxu0 %v5412_v19  ;;  %5610 = vmatprep.mubr.bf16.mxu0 %v5333_v46  ;;  %v5422_v46 = vld [vmem:[#allocation2 + $0x270] sm:$0xff]  ;;  %v5436_v19 = vld [vmem:[#allocation2 + $0x2e0] sm:$0xff] }
 0x519   :  { %5584 = vmatprep.subr.bf16.mxu0 %v5415_v23  ;;  %v5439_v23 = vld [vmem:[#allocation2 + $0x2f8] sm:$0xff] }
 0x51a   :  { %5741 = vmatpush1.bf16.msra.mxu1 %v10545_v33 }
 0x51b   :  { %5742 = vmatprep.subr.bf16.mxu1 %v10547_v34 }
 0x51c   :  { %5585 = vmatpush1.bf16.msra.mxu0 %v5414_v27  ;;  %v5438_v27 = vld [vmem:[#allocation2 + $0x2f0] sm:$0xff] }
 0x51d   :  { %5586 = vmatprep.subr.bf16.mxu0 %v5417_v28  ;;  %v5441_v28 = vld [vmem:[#allocation2 + $0x308] sm:$0xff] }
 0x51e   :  { %5743 = vmatpush1.bf16.msra.mxu1 %v10551_v37 }
 0x51f   :  { %5744 = vmatprep.subr.bf16.mxu1 %v10553_v38 }
 0x520   :  { %5587 = vmatpush1.bf16.msra.mxu0 %v5416_v31  ;;  %v5440_v31 = vld [vmem:[#allocation2 + $0x300] sm:$0xff] }
 0x521   :  { %5588 = vmatprep.subr.bf16.mxu0 %v5419_v32  ;;  %v5443_v32 = vld [vmem:[#allocation2 + $0x318] sm:$0xff] }
 0x522   :  { %5745 = vmatpush1.bf16.msra.mxu1 %v10557_v42 }
 0x523   :  { %5746 = vmatprep.subr.bf16.mxu1 %v10559_v45 }
 0x524   :  { %5589 = vmatpush1.bf16.msra.mxu0 %v5418_v35  ;;  %v5442_v35 = vld [vmem:[#allocation2 + $0x310] sm:$0xff] }
 0x525   :  { %5590 = vmatprep.subr.bf16.mxu0 %v5421_v36  ;;  %v5445_v36 = vld [vmem:[#allocation2 + $0x328] sm:$0xff] }
 0x526   :  { %5747 = vmatpush1.bf16.msra.mxu1 %v10563_v48 }
 0x527   :  { %5748 = vmatprep.subr.bf16.mxu1 %v10565_v49 }
 0x528   :  { %5591 = vmatpush1.bf16.msra.mxu0 %v5420_v40  ;;  %v5444_v40 = vld [vmem:[#allocation2 + $0x320] sm:$0xff] }
 0x529   :  { %5592 = vmatprep.subr.bf16.mxu0 %v5423_v41  ;;  %v5447_v41 = vld [vmem:[#allocation2 + $0x338] sm:$0xff] }
 0x52a   :  { %5749 = vmatpush1.bf16.msra.mxu1 %v10569_v52 }
 0x52b   :  { %5750 = vmatprep.subr.bf16.mxu1 %v10571_v53 }
 0x52c   :  { %5593 = vmatpush1.bf16.msra.mxu0 %v5422_v46  ;;  %v5458_v46 = vld [vmem:[#allocation2 + $0x390] sm:$0xff] }
 0x52d   :  { %5594 = vmatprep.subr.bf16.mxu0 %v5425_v47  ;;  %v5461_v47 = vld [vmem:[#allocation2 + $0x3a8] sm:$0xff] }
 0x52e   :  { %5751 = vmatpush1.bf16.msra.mxu1 %v10575_v59 }
 0x52f   :  { %5752 = vmatprep.subr.bf16.mxu1 %v10577_v63 }
 0x530   :  { %5595 = vmatpush1.bf16.msra.mxu0 %v5424_v50  ;;  %v5460_v50 = vld [vmem:[#allocation2 + $0x3a0] sm:$0xff] }
 0x531   :  { %5596 = vmatprep.subr.bf16.mxu0 %v5427_v51  ;;  %v5463_v51 = vld [vmem:[#allocation2 + $0x3b8] sm:$0xff] }
 0x532   :  { %5753 = vmatpush1.bf16.msra.mxu1 %v10581_v4 }
 0x534   :  { %5597 = vmatpush1.bf16.msra.mxu0 %v5426_v55  ;;  %v5462_v55 = vld [vmem:[#allocation2 + $0x3b0] sm:$0xff] }
 0x535   :  { %5598 = vmatprep.subr.bf16.mxu0 %v5429_v57  ;;  %v5465_v57 = vld [vmem:[#allocation2 + $0x3c8] sm:$0xff] }
 0x538   :  { %5599 = vmatpush1.bf16.msra.mxu0 %v5428_v0  ;;  %v5464_v0 = vld [vmem:[#allocation2 + $0x3c0] sm:$0xff] }
 0x539   :  { %5600 = vmatprep.subr.bf16.mxu0 %v5431_v2  ;;  %v5467_v2 = vld [vmem:[#allocation2 + $0x3d8] sm:$0xff] }
 0x53c   :  { %5601 = vmatpush1.bf16.msra.mxu0 %v5430_v9  ;;  %v5466_v9 = vld [vmem:[#allocation2 + $0x3d0] sm:$0xff] }
 0x53d   :  { %5602 = vmatprep.subr.bf16.mxu0 %v5433_v10  ;;  %v5469_v10 = vld [vmem:[#allocation2 + $0x3e8] sm:$0xff] }
 0x540   :  { %5603 = vmatpush1.bf16.msra.mxu0 %v5432_v12  ;;  %v5468_v12 = vld [vmem:[#allocation2 + $0x3e0] sm:$0xff] }
 0x541   :  { %5604 = vmatprep.subr.bf16.mxu0 %v5435_v14  ;;  %v5471_v14 = vld [vmem:[#allocation2 + $0x3f8] sm:$0xff] }
 0x544   :  { %5605 = vmatpush1.bf16.msra.mxu0 %v5434_v21  ;;  %v5470_v21 = vld [vmem:[#allocation2 + $0x3f0] sm:$0xff] }
 0x545   :  { %5606 = vmatprep.subr.bf16.mxu0 %v5437_v22  ;;  %v10605_v22 = vld [vmem:[#allocation5 + $0x98] sm:$0xff] }
 0x546   :  { %5754 = vmatprep.subr.bf16.mxu1 %v10605_v22 }
 0x548   :  { %5607 = vmatpush1.bf16.msra.mxu0 %v5436_v19  ;;  %v10608_v19 = vld [vmem:[#allocation5 + $0x90] sm:$0xff] }
 0x549   :  { %5608 = vmatprep.subr.bf16.mxu0 %v5439_v23  ;;  %5755 = vmatpush1.bf16.msra.mxu1 %v10608_v19  ;;  %v10611_v23 = vld [vmem:[#allocation5 + $0xa8] sm:$0xff] }
 0x54a   :  { %5756 = vmatprep.subr.bf16.mxu1 %v10611_v23 }
 0x54c   :  { %5609 = vmatpush1.bf16.msra.mxu0 %v5438_v27  ;;  %v10640_v27 = vld [vmem:[#allocation5 + $0xf8] sm:$0xff] }
 0x54d   :  { %5631 = vmatprep.subr.bf16.mxu0 %v5441_v28  ;;  %5757 = vmatpush1.bf16.msra.mxu1 %v10613_v1  ;;  %v5734_v28 = vld [vmem:[#allocation5 + $0xf0] sm:$0xff] }
 0x54e   :  { %5758 = vmatprep.subr.bf16.mxu1 %v10617_v5 }
 0x54f   :  { %5611 = vmatmul.mubr.bf16.vlgmr.msra.gmra.mrb[32].mxu0 %v5332_v44  ;;  %v5448_v44 = vld [vmem:[#allocation2 + $0x340] sm:$0xff] }
 0x550   :  { %5632 = vmatpush1.bf16.msra.mxu0 %v5440_v31  ;;  %5620 = vmatprep.mubr.bf16.mxu0 %v5341_v62  ;;  %v5453_v62 = vld [vmem:[#allocation2 + $0x368] sm:$0xff] }
 0x551   :  { %5633 = vmatprep.subr.bf16.mxu0 %v5443_v32 }
 0x554   :  { %5634 = vmatpush1.bf16.msra.mxu0 %v5442_v35 }
 0x555   :  { %5635 = vmatprep.subr.bf16.mxu0 %v5445_v36 }
 0x557   :  { %5621 = vmatmul.mubr.bf16.gmra.mrb[36].mxu0 %v5340_v60  ;;  %v5454_v60 = vld [vmem:[#allocation2 + $0x370] sm:$0xff] }
 0x558   :  { %5636 = vmatpush1.bf16.msra.mxu0 %v5444_v40  ;;  %5663 = vmatprep.mubr.bf16.mxu0 %v5335_v8  ;;  %v5459_v8 = vld [vmem:[#allocation2 + $0x398] sm:$0xff] }
 0x559   :  { %5637 = vmatprep.subr.bf16.mxu0 %v5447_v41 }
 0x55c   :  { %5638 = vmatpush1.bf16.msra.mxu0 %v5446_v39 }
 0x55d   :  { %5639 = vmatprep.subr.bf16.mxu0 %v5449_v43 }
 0x560   :  { %5640 = vmatpush1.bf16.msra.mxu0 %v5448_v44 }
 0x561   :  { %5641 = vmatprep.subr.bf16.mxu0 %v5451_v56 }
 0x564   :  { %5642 = vmatpush1.bf16.msra.mxu0 %v5450_v61 }
 0x565   :  { %5643 = vmatprep.subr.bf16.mxu0 %v5453_v62 }
 0x568   :  { %5644 = vmatpush1.bf16.msra.mxu0 %v5452_v54 }
 0x569   :  { %5645 = vmatprep.subr.bf16.mxu0 %v5455_v58 }
 0x56c   :  { %5646 = vmatpush1.bf16.msra.mxu0 %v5454_v60 }
 0x56d   :  { %5647 = vmatprep.subr.bf16.mxu0 %v5457_v3 }
 0x570   :  { %5648 = vmatpush1.bf16.msra.mxu0 %v5456_v7 }
 0x571   :  { %5649 = vmatprep.subr.bf16.mxu0 %v5459_v8 }
 0x574   :  { %5650 = vmatpush1.bf16.msra.mxu0 %v5458_v46 }
 0x575   :  { %5651 = vmatprep.subr.bf16.mxu0 %v5461_v47 }
 0x578   :  { %5652 = vmatpush1.bf16.msra.mxu0 %v5460_v50 }
 0x579   :  { %5653 = vmatprep.subr.bf16.mxu0 %v5463_v51 }
 0x57c   :  { %5654 = vmatpush1.bf16.msra.mxu0 %v5462_v55 }
 0x57d   :  { %5655 = vmatprep.subr.bf16.mxu0 %v5465_v57 }
 0x580   :  { %5656 = vmatpush1.bf16.msra.mxu0 %v5464_v0 }
 0x581   :  { %5657 = vmatprep.subr.bf16.mxu0 %v5467_v2 }
 0x584   :  { %5658 = vmatpush1.bf16.msra.mxu0 %v5466_v9 }
 0x585   :  { %5659 = vmatprep.subr.bf16.mxu0 %v5469_v10 }
 0x588   :  { %5660 = vmatpush1.bf16.msra.mxu0 %v5468_v12 }
 0x589   :  { %5661 = vmatprep.subr.bf16.mxu0 %v5471_v14 }
 0x58c   :  { %5662 = vmatpush1.bf16.msra.mxu0 %v5470_v21 }
 0x58f   :  { %5664 = vmatmul.mubr.bf16.vlgmr.msra.gmra.mrb[32].mxu0 %v5334_v6  ;;  %v10620_v6 = vld [vmem:[#allocation5 + $0xb0] sm:$0xff] }
 0x590   :  { %5673 = vmatprep.mubr.bf16.mxu0 %v5343_v20  ;;  %5759 = vmatpush1.bf16.msra.mxu1 %v10620_v6  ;;  %v10637_v20 = vld [vmem:[#allocation5 + $0xe0] sm:$0xff] }
 0x591   :  { %5760 = vmatprep.subr.bf16.mxu1 %v10623_v11 }
 0x594   :  { %5761 = vmatpush1.bf16.msra.mxu1 %v10626_v13 }
 0x595   :  { %5762 = vmatprep.subr.bf16.mxu1 %v10629_v15 }
 0x597   :  { %5674 = vmatmul.mubr.bf16.gmra.mrb[36].mxu0 %v5342_v16  ;;  %v10632_v16 = vld [vmem:[#allocation5 + $0xd0] sm:$0xff] }
 0x598   :  { %5763 = vmatpush1.bf16.msra.mxu1 %v10632_v16 }
 0x599   :  { %5764 = vmatprep.subr.bf16.mxu1 %v10635_v17 }
 0x59c   :  { %5765 = vmatpush1.bf16.msra.mxu1 %v10637_v20 }
 0x59d   :  { %5766 = vmatprep.subr.bf16.mxu1 %v10640_v27 }
 0x5a0   :  { %5767 = vmatpush1.bf16.msra.mxu1 %v5734_v28 }
 0x5a1   :  { %5822 = vmatprep.subr.bf16.mxu1 %v10527_v24 }
 0x662   :  { %v10645_v31 = vpop.f32.mrb[32].mxu0 }
 0x663   :  { %v10647_v32 = vpop.f32.mrb[33].mxu0 }
 0x664   :  { %v10649_v35 = vpop.f32.mrb[34].mxu0 }
 0x665   :  { %v5684_v36 = vadd.f32 %v10649_v35, %v10645_v31  ;;  %v10653_v40 = vpop.f32.mrb[35].mxu0 }
 0x666   :  { %v5693_v41 = vadd.f32 %v10653_v40, %v10647_v32 }
 0x66a   :  { %v10657_v39 = vpop.f32.mrb[36].mxu0 }
 0x66b   :  { %v5685_v43 = vadd.f32 %v5684_v36, %v10657_v39  ;;  %v10660_v44 = vpop.f32.mrb[37].mxu0 }
 0x66c   :  { %v5694_v24 = vadd.f32 %v5693_v41, %v10660_v44  ;;  %v5679_v56 = vpop.f32.mrb[38].mxu0 }
 0x66d   :  { %v5686_v61 = vadd.f32 %v5685_v43, %v5679_v56  ;;  %v10663_v62 = vpop.f32.mrb[39].mxu0 }
 0x66e   :  { %v5695_v54 = vadd.f32 %v5694_v24, %v10663_v62 }
 0x66f   :  { %v5687_v58 = vrot.slane %v5686_v61, 4 }
 0x670   :  { %v5696_v60 = vrot.slane %v5695_v54, 4 }
 0x671   :  { %v5688_v3 = vadd.f32 %v5687_v58, %v5686_v61 }
 0x672   :  { %v5697_v7 = vadd.f32 %v5696_v60, %v5695_v54 }
 0x673   :  { %v5689_v8 = vrot.slane %v5688_v3, 2 }
 0x674   :  { %v5698_v46 = vrot.slane %v5697_v7, 2 }
 0x675   :  { %v5690_v47 = vadd.f32 %v5689_v8, %v5688_v3  ;;  %v7832_v3 = vmov 1966171168  }
 0x676   :  { %v5699_v50 = vadd.f32 %v5698_v46, %v5697_v7  ;;  %v5869_v7 = vunpack.c.l.s4 %v7832_v3 }
 0x677   :  { %v5691_v51 = vrot.slane %v5690_v47, 1 }
 0x678   :  { %v5700_v55 = vrot.slane %v5699_v50, 1  ;;  %v5870_v8 = vunpack.c.0.s8 %v5869_v7 }
 0x679   :  { %v5692_v57 = vadd.f32 %v5691_v51, %v5690_v47 }
 0x67a   :  { %v5701_v0 = vadd.f32 %v5700_v55, %v5699_v50 }
 0x67b   :  { %v5702_v9 = vpack.c.bf16 %v5692_v57, %v5692_v57  ;;  %v5821_v57 = vld [vmem:[%s11073_s8] sm:$0x3] }
 0x67c   :  { %v5703_v2 = vpack.c.bf16 %v5701_v0, %v5701_v0 }
 0x67e   :  { %5768 = vmatprep.mubr.bf16.mxu1 %v5703_v2 }
 0x67f   :  { %5769 = vmatmul.mubr.bf16.vlgmr.msra.gmra.mrb[48].mxu1 %v5702_v9  ;;  %v5903_v9 = vld [vmem:[%s11076_s11] sm:$0x3] }
 0x680   :  { %5823 = vmatpush1.bf16.msra.mxu1 %v10529_v25  ;;  %v5777_v25 = vlaneseq }
 0x681   :  { %5824 = vmatprep.subr.bf16.mxu1 %v10534_v26 }
 0x682   :  { %v5778_v26 = vshrl.u32 %v5777_v25, 7 }
 0x684   :  { %5825 = vmatpush1.bf16.msra.mxu1 %v10539_v29  ;;  %v10696_v29 = vsub.s32 0, %v5778_v26  ;;  %v10727_v47 = vsub.s32 %v5870_v8, %v5778_v26  ;;  %v10733_v0 = vsub.s32 1, %v5778_v26 }
 0x685   :  { %5826 = vmatprep.subr.bf16.mxu1 %v10541_v30 }
 0x688   :  { %5827 = vmatpush1.bf16.msra.mxu1 %v10545_v33 }
 0x689   :  { %5828 = vmatprep.subr.bf16.mxu1 %v10547_v34 }
 0x68c   :  { %5829 = vmatpush1.bf16.msra.mxu1 %v10551_v37 }
 0x68d   :  { %5830 = vmatprep.subr.bf16.mxu1 %v10553_v38 }
 0x690   :  { %5831 = vmatpush1.bf16.msra.mxu1 %v10557_v42 }
 0x691   :  { %5832 = vmatprep.subr.bf16.mxu1 %v10559_v45 }
 0x694   :  { %5833 = vmatpush1.bf16.msra.mxu1 %v10563_v48 }
 0x695   :  { %5834 = vmatprep.subr.bf16.mxu1 %v10565_v49 }
 0x698   :  { %5835 = vmatpush1.bf16.msra.mxu1 %v10569_v52 }
 0x699   :  { %5836 = vmatprep.subr.bf16.mxu1 %v10571_v53 }
 0x69c   :  { %5837 = vmatpush1.bf16.msra.mxu1 %v10575_v59 }
 0x69d   :  { %5838 = vmatprep.subr.bf16.mxu1 %v10577_v63 }
 0x6a0   :  { %5839 = vmatpush1.bf16.msra.mxu1 %v10581_v4 }
 0x6a1   :  { %5840 = vmatprep.subr.bf16.mxu1 %v10605_v22 }
 0x6a4   :  { %5841 = vmatpush1.bf16.msra.mxu1 %v10608_v19 }
 0x6a5   :  { %5842 = vmatprep.subr.bf16.mxu1 %v10611_v23 }
 0x6a8   :  { %5843 = vmatpush1.bf16.msra.mxu1 %v10613_v1 }
 0x6a9   :  { %5844 = vmatprep.subr.bf16.mxu1 %v10617_v5 }
 0x6ac   :  { %5845 = vmatpush1.bf16.msra.mxu1 %v10620_v6 }
 0x6ad   :  { %5846 = vmatprep.subr.bf16.mxu1 %v10623_v11 }
 0x6b0   :  { %5847 = vmatpush1.bf16.msra.mxu1 %v10626_v13 }
 0x6b1   :  { %5848 = vmatprep.subr.bf16.mxu1 %v10629_v15 }
 0x6b4   :  { %5849 = vmatpush1.bf16.msra.mxu1 %v10632_v16 }
 0x6b5   :  { %5850 = vmatprep.subr.bf16.mxu1 %v10635_v17 }
 0x6b8   :  { %5851 = vmatpush1.bf16.msra.mxu1 %v10637_v20 }
 0x6b9   :  { %5852 = vmatprep.subr.bf16.mxu1 %v10640_v27 }
 0x6bc   :  { %5853 = vmatpush1.bf16.msra.mxu1 %v5734_v28 }
 0x752   :  { %v5770_v30 = vpop.f32.mrb[48].mxu1 }
 0x753   :  { %v5780_v33 = vrot.slane %v5770_v30, %v10696_v29  ;;  %v5772_v34 = vpop.f32.mrb[49].mxu1  ;;  %v5908_v30 = vrot.slane %v5903_v9, %v10696_v29 }
 0x754   :  { %v5784_v37 = vrot.slane %v5772_v34, %v10696_v29  ;;  %v5774_v38 = vpop.f32.mrb[50].mxu1 }
 0x755   :  { %v10701_v42 = vsub.f32 %v10645_v31, %v5780_v33  ;;  %v10704_v45 = vsub.f32 %v10649_v35, %v5780_v33  ;;  %v10707_v48 = vsub.f32 %v10657_v39, %v5780_v33  ;;  %v10709_v49 = vsub.f32 %v5679_v56, %v5780_v33  ;;  %v5775_v52 = vpop.f32.mrb[51].mxu1 }
 0x756   :  { %v5786_v53 = vsub.f32 %v10647_v32, %v5784_v37  ;;  %v5788_v59 = vsub.f32 %v10653_v40, %v5784_v37  ;;  %v5790_v63 = vsub.f32 %v10660_v44, %v5784_v37  ;;  %v10715_v4 = vsub.f32 %v10663_v62, %v5784_v37 }
 0x757   :  { %v5793_v10 = vmul.f32 %v10701_v42, %v10701_v42  ;;  %v5795_v12 = vmul.f32 %v10704_v45, %v10704_v45  ;;  %v5797_v22 = vmul.f32 %v10707_v48, %v10707_v48  ;;  %v5799_v5 = vmul.f32 %v10709_v49, %v10709_v49 }
 0x758   :  { %v5794_v14 = vmul.f32 %v5786_v53, %v5786_v53  ;;  %v5796_v21 = vmul.f32 %v5788_v59, %v5788_v59  ;;  %v5798_v23 = vmul.f32 %v5790_v63, %v5790_v63  ;;  %v5800_v11 = vmul.f32 %v10715_v4, %v10715_v4 }
 0x759   :  { %v5801_v19 = vadd.f32 %v5795_v12, %v5793_v10  ;;  %v5912_v33 = vrot.slane %v5903_v9, %v10733_v0 }
 0x75a   :  { %v5810_v1 = vadd.f32 %v5796_v21, %v5794_v14 }
 0x75b   :  { %v5802_v6 = vadd.f32 %v5801_v19, %v5797_v22 }
 0x75c   :  { %v5811_v13 = vadd.f32 %v5810_v1, %v5798_v23 }
 0x75d   :  { %v5803_v15 = vadd.f32 %v5802_v6, %v5799_v5 }
 0x75e   :  { %v5812_v16 = vadd.f32 %v5811_v13, %v5800_v11 }
 0x75f   :  { %v5804_v17 = vrot.slane %v5803_v15, 4 }
 0x760   :  { %v5813_v20 = vrot.slane %v5812_v16, 4 }
 0x761   :  { %v5805_v27 = vadd.f32 %v5804_v17, %v5803_v15 }
 0x762   :  { %v5814_v28 = vadd.f32 %v5813_v20, %v5812_v16 }
 0x763   :  { %v5806_v31 = vrot.slane %v5805_v27, 2 }
 0x764   :  { %v5815_v32 = vrot.slane %v5814_v28, 2 }
 0x765   :  { %v5807_v35 = vadd.f32 %v5806_v31, %v5805_v27 }
 0x766   :  { %v5816_v36 = vadd.f32 %v5815_v32, %v5814_v28 }
 0x767   :  { %v5808_v40 = vrot.slane %v5807_v35, 1 }
 0x768   :  { %v5817_v41 = vrot.slane %v5816_v36, 1 }
 0x769   :  { %v5809_v39 = vadd.f32 %v5808_v40, %v5807_v35 }
 0x76a   :  { %v5818_v43 = vadd.f32 %v5817_v41, %v5816_v36 }
 0x76b   :  { %v5819_v24 = vpack.c.bf16 %v5809_v39, %v5809_v39 }
 0x76c   :  { %v5820_v44 = vpack.c.bf16 %v5818_v43, %v5818_v43 }
 0x76e   :  { %5854 = vmatprep.mubr.bf16.mxu1 %v5820_v44 }
 0x76f   :  { %5855 = vmatmul.mubr.bf16.vlgmr.msra.gmra.mrb[52].mxu1 %v5819_v24 }
 0x842   :  { %v5856_v56 = vpop.f32.mrb[52].mxu1 }
 0x843   :  { %v5857_v61 = vadd.f32 1e-05, %v5856_v56  ;;  %v5858_v62 = vpop.f32.mrb[53].mxu1 }
 0x844   :  { %v5859_v54 = vadd.f32 1e-05, %v5858_v62  ;;  %v5860_v58 = vpop.f32.mrb[54].mxu1 }
 0x845   :  { %7797 = vrsqrt.f32 %v5857_v61  ;;  %v5861_v60 = vpop.f32.mrb[55].mxu1 }
 0x846   :  { %7799 = vrsqrt.f32 %v5859_v54 }
 0x84f   :  { %v7798_v46 = vpop.eup %7797 }
 0x850   :  { %v7800_v50 = vpop.eup %7799 }
 0x851   :  { %v5867_v51 = vcombine.low %v7798_v46, %v7800_v50 }
 0x853   :  { %v5874_v55 = vrot.slane %v5867_v51, %v10727_v47 }
 0x855   :  { %v5881_v2 = vrot.slane %v5874_v55, %v10727_v47 }
 0x857   :  { %v5883_v25 = vmul.f32 %v5881_v2, %v5821_v57 }
 0x859   :  { %v5888_v34 = vrot.slane %v5883_v25, %v10696_v29  ;;  %v5892_v37 = vrot.slane %v5883_v25, %v10733_v0 }
 0x85b   :  { %v5895_v38 = vmul.f32 %v5888_v34, %v10701_v42  ;;  %v5896_v52 = vmul.f32 %v5892_v37, %v5786_v53  ;;  %v5897_v26 = vmul.f32 %v5888_v34, %v10704_v45  ;;  %v5898_v10 = vmul.f32 %v5892_v37, %v5788_v59 }
 0x85c   :  { %v5899_v12 = vmul.f32 %v5888_v34, %v10707_v48  ;;  %v5900_v14 = vmul.f32 %v5892_v37, %v5790_v63  ;;  %v5901_v21 = vmul.f32 %v5888_v34, %v10709_v49  ;;  %v5902_v22 = vmul.f32 %v5892_v37, %v10715_v4 }
 0x85d   :  { %v5915_v19 = vadd.f32 %v5908_v30, %v5895_v38  ;;  %v5916_v23 = vadd.f32 %v5912_v33, %v5896_v52  ;;  %v5917_v1 = vadd.f32 %v5908_v30, %v5897_v26  ;;  %v5918_v5 = vadd.f32 %v5912_v33, %v5898_v10 }
 0x85e   :  { %v5919_v6 = vadd.f32 %v5908_v30, %v5899_v12  ;;  %v5920_v11 = vadd.f32 %v5912_v33, %v5900_v14  ;;  %v5921_v13 = vadd.f32 %v5908_v30, %v5901_v21  ;;  %v5922_v15 = vadd.f32 %v5912_v33, %v5902_v22 }
 0x85f   :  { %v5923_v42 = vmul.f32 0.2, %v5915_v19  ;;  %v5924_v53 = vmul.f32 0.2, %v5916_v23  ;;  %v5925_v16 = vmul.f32 0.2, %v5917_v1 }
 0x860   :  { %v5926_v45 = vmul.f32 0.2, %v5918_v5  ;;  %v5927_v59 = vmul.f32 0.2, %v5919_v6  ;;  %v5928_v17 = vmul.f32 0.2, %v5920_v11 }
 0x861   :  { %v5929_v48 = vmul.f32 0.2, %v5921_v13  ;;  %v5930_v63 = vmul.f32 0.2, %v5922_v15  ;;  %v5931_v20 = vmax.f32 %v5915_v19, %v5923_v42  ;;  %v5932_v49 = vmax.f32 %v5916_v23, %v5924_v53 }
 0x862   :  { %v5933_v27 = vmax.f32 %v5917_v1, %v5925_v16  ;;  %v5934_v4 = vmax.f32 %v5918_v5, %v5926_v45  ;;  %v5935_v28 = vmax.f32 %v5919_v6, %v5927_v59  ;;  %v5936_v31 = vmax.f32 %v5920_v11, %v5928_v17 }
 0x863   :  { %v5937_v32 = vmax.f32 %v5921_v13, %v5929_v48  ;;  %v5938_v35 = vmax.f32 %v5922_v15, %v5930_v63 }
 0x864   :  { %7823 = dma.done.wait [#allocation8 + $0x2], 16384 }
 0x865   :  { %7824 = vsyncadd [#allocation8 + $0x2], 4294950912 }
 0x866   :  { %7825 = dma.done.wait [#allocation8 + $0x3], 4096 }
 0x867   :  { %7826 = vsyncadd [#allocation8 + $0x3], 4294963200  ;;  %v5944_v36 = vpack.c.bf16 %v5934_v4, %v5932_v49  ;;  %v5943_v40 = vpack.c.bf16 %v5933_v27, %v5931_v20  ;;  %v5946_v41 = vpack.c.bf16 %v5938_v35, %v5936_v31  ;;  %6020 = vmatprep.mubr.bf16.mxu0 %v7831_v18  ;;  %v5945_v39 = vpack.c.bf16 %v5937_v32, %v5935_v28  ;;  %s11099_s30 = sld [smem:[#allocation24_spill]]  ;;  %v6070_v44 = vld [vmem:[#allocation3 + $0x8] sm:$0xff]  ;;  %v6069_v24 = vld [vmem:[#allocation3] sm:$0xff] }
 0x868   :  { %vm5975_vm1 = vcmask 261120   ;;  %v6072_v56 = vld [vmem:[#allocation3 + $0x18] sm:$0xff]  ;;  %6197 = vmatprep.subr.bf16.mxu1 %v6070_v44  ;;  %v6071_v61 = vld [vmem:[#allocation3 + $0x10] sm:$0xff]  ;;  %v6074_v54 = vld [vmem:[#allocation3 + $0x28] sm:$0xff] }
 0x869   :  { %5988 = vmatprep.subr.bf16.mxu0 %v5944_v36  ;;  %6198 = vmatpush1.bf16.msra.mxu1 %v6069_v24  ;;  %v6073_v58 = vld [vmem:[#allocation3 + $0x20] sm:$0xff]  ;;  %v6076_v60 = vld [vmem:[#allocation3 + $0x38] sm:$0xff]  ;;  %v6075_v3 = vld [vmem:[#allocation3 + $0x30] sm:$0xff] }
 0x86a   :  { %5989 = vmatpush1.bf16.msra.mxu0 %v5943_v40  ;;  %6199 = vmatprep.subr.bf16.mxu1 %v6072_v56  ;;  %v6078_v8 = vld [vmem:[#allocation3 + $0x48] sm:$0xff]  ;;  %v6077_v46 = vld [vmem:[#allocation3 + $0x40] sm:$0xff]  ;;  %v6080_v50 = vld [vmem:[#allocation3 + $0x58] sm:$0xff] }
 0x86b   :  { %5990 = vmatprep.subr.bf16.mxu0 %v5946_v41  ;;  %v6079_v51 = vld [vmem:[#allocation3 + $0x50] sm:$0xff]  ;;  %v6082_v55 = vld [vmem:[#allocation3 + $0x68] sm:$0xff]  ;;  %v6081_v2 = vld [vmem:[#allocation3 + $0x60] sm:$0xff] }
 0x86c   :  { %v6084_v9 = vld [vmem:[#allocation3 + $0x78] sm:$0xff]  ;;  %v6083_v25 = vld [vmem:[#allocation3 + $0x70] sm:$0xff]  ;;  %v6086_v30 = vld [vmem:[#allocation3 + $0x88] sm:$0xff] }
 0x86d   :  { %v7801_v43 = vld [vmem:[%s11099_s30] sm:$0xff]   ;;  %v7802_v62 = vld [vmem:[%s11099_s30 + $0x8] sm:$0xff]   ;;  %6200 = vmatpush1.bf16.msra.mxu1 %v6071_v61  ;;  %v7803_v7 = vld [vmem:[%s11099_s30 + $0x10] sm:$0xff]  }
 0x86e   :  { %5991 = vmatpush1.bf16.msra.mxu0 %v5945_v39  ;;  %6201 = vmatprep.subr.bf16.mxu1 %v6074_v54  ;;  %v7804_v57 = vld [vmem:[%s11099_s30 + $0x18] sm:$0xff]   ;;  %v6085_v33 = vld [vmem:[#allocation3 + $0x80] sm:$0xff]  ;;  %v6087_v37 = vld [vmem:[#allocation3 + $0x90] sm:$0xff] }
 0x86f   :  { %v6088_v34 = vld [vmem:[#allocation3 + $0x98] sm:$0xff]  ;;  %v6090_v38 = vld [vmem:[#allocation3 + $0xa8] sm:$0xff]  ;;  %v6089_v52 = vld [vmem:[#allocation3 + $0xa0] sm:$0xff] }
 0x870   :  { %v6092_v26 = vld [vmem:[#allocation3 + $0xb8] sm:$0xff]  ;;  %v6091_v10 = vld [vmem:[#allocation3 + $0xb0] sm:$0xff]  ;;  %v6094_v12 = vld [vmem:[#allocation3 + $0xc8] sm:$0xff] }
 0x871   :  { %7507 = vmatmul.mubr.msk.bf16.vlgmr.msra.gmra.mrb[40].mxu0 %vm5975_vm1, %v7801_v43  ;;  %6202 = vmatpush1.bf16.msra.mxu1 %v6073_v58  ;;  %v6093_v14 = vld [vmem:[#allocation3 + $0xc0] sm:$0xff]  ;;  %v6096_v21 = vld [vmem:[#allocation3 + $0xd8] sm:$0xff]  ;;  %v6095_v22 = vld [vmem:[#allocation3 + $0xd0] sm:$0xff] }
 0x872   :  { %6030 = vmatprep.mubr.bf16.mxu0 %v7831_v18  ;;  %6203 = vmatprep.subr.bf16.mxu1 %v6076_v60  ;;  %v6098_v19 = vld [vmem:[#allocation3 + $0xe8] sm:$0xff]  ;;  %v6097_v23 = vld [vmem:[#allocation3 + $0xe0] sm:$0xff]  ;;  %v6100_v1 = vld [vmem:[#allocation3 + $0xf8] sm:$0xff] }
 0x873   :  { %v6099_v5 = vld [vmem:[#allocation3 + $0xf0] sm:$0xff]  ;;  %v6102_v6 = vld [vmem:[#allocation3 + $0x108] sm:$0xff]  ;;  %v6101_v45 = vld [vmem:[#allocation3 + $0x100] sm:$0xff] }
 0x874   :  { %v6104_v59 = vld [vmem:[#allocation3 + $0x118] sm:$0xff]  ;;  %v6103_v48 = vld [vmem:[#allocation3 + $0x110] sm:$0xff]  ;;  %v6106_v20 = vld [vmem:[#allocation3 + $0x128] sm:$0xff] }
 0x875   :  { %6204 = vmatpush1.bf16.msra.mxu1 %v6075_v3  ;;  %v6105_v31 = vld [vmem:[#allocation3 + $0x120] sm:$0xff]  ;;  %v6108_v32 = vld [vmem:[#allocation3 + $0x138] sm:$0xff]  ;;  %v6107_v36 = vld [vmem:[#allocation3 + $0x130] sm:$0xff] }
 0x876   :  { %6205 = vmatprep.subr.bf16.mxu1 %v6078_v8  ;;  %v6110_v41 = vld [vmem:[#allocation3 + $0x148] sm:$0xff]  ;;  %v6109_v56 = vld [vmem:[#allocation3 + $0x140] sm:$0xff]  ;;  %v6112_v61 = vld [vmem:[#allocation3 + $0x158] sm:$0xff] }
 0x877   :  { %v6114_v54 = vld [vmem:[#allocation3 + $0x168] sm:$0xff]  ;;  %v6113_v58 = vld [vmem:[#allocation3 + $0x160] sm:$0xff]  ;;  %v6116_v60 = vld [vmem:[#allocation3 + $0x178] sm:$0xff] }
 0x878   :  { %v6115_v3 = vld [vmem:[#allocation3 + $0x170] sm:$0xff]  ;;  %v6117_v8 = vld [vmem:[#allocation3 + $0x180] sm:$0xff] }
 0x879   :  { %7508 = vmatmul.mubr.msk.bf16.gmra.mrb[44].mxu0 %vm5975_vm1, %v7802_v62  ;;  %6206 = vmatpush1.bf16.msra.mxu1 %v6077_v46  ;;  %v6111_v62 = vld [vmem:[#allocation3 + $0x150] sm:$0xff]  ;;  %v6120_v46 = vld [vmem:[#allocation3 + $0x198] sm:$0xff] }
 0x87a   :  { %6040 = vmatprep.mubr.bf16.mxu0 %v7831_v18  ;;  %6207 = vmatprep.subr.bf16.mxu1 %v6080_v50  ;;  %v6119_v50 = vld [vmem:[#allocation3 + $0x190] sm:$0xff] }
 0x87d   :  { %6208 = vmatpush1.bf16.msra.mxu1 %v6079_v51  ;;  %v6122_v51 = vld [vmem:[#allocation3 + $0x1a8] sm:$0xff] }
 0x87e   :  { %6209 = vmatprep.subr.bf16.mxu1 %v6082_v55  ;;  %v6121_v55 = vld [vmem:[#allocation3 + $0x1a0] sm:$0xff] }
 0x881   :  { %7509 = vmatmul.mubr.msk.bf16.gmra.mrb[48].mxu0 %vm5975_vm1, %v7803_v7  ;;  %6210 = vmatpush1.bf16.msra.mxu1 %v6081_v2  ;;  %v6118_v7 = vld [vmem:[#allocation3 + $0x188] sm:$0xff]  ;;  %v6123_v2 = vld [vmem:[#allocation3 + $0x1b0] sm:$0xff] }
 0x882   :  { %6050 = vmatprep.mubr.bf16.mxu0 %v7831_v18  ;;  %6211 = vmatprep.subr.bf16.mxu1 %v6084_v9  ;;  %v6126_v9 = vld [vmem:[#allocation3 + $0x1c8] sm:$0xff] }
 0x885   :  { %6212 = vmatpush1.bf16.msra.mxu1 %v6083_v25  ;;  %v6125_v25 = vld [vmem:[#allocation3 + $0x1c0] sm:$0xff] }
 0x886   :  { %6213 = vmatprep.subr.bf16.mxu1 %v6086_v30  ;;  %v6128_v30 = vld [vmem:[#allocation3 + $0x1d8] sm:$0xff] }
 0x889   :  { %7510 = vmatmul.mubr.msk.bf16.gmra.mrb[52].mxu0 %vm5975_vm1, %v7804_v57  ;;  %6214 = vmatpush1.bf16.msra.mxu1 %v6085_v33  ;;  %v6124_v57 = vld [vmem:[#allocation3 + $0x1b8] sm:$0xff]  ;;  %v6127_v33 = vld [vmem:[#allocation3 + $0x1d0] sm:$0xff] }
 0x88a   :  { %6215 = vmatprep.subr.bf16.mxu1 %v6088_v34  ;;  %v6130_v34 = vld [vmem:[#allocation3 + $0x1e8] sm:$0xff] }
 0x88d   :  { %6216 = vmatpush1.bf16.msra.mxu1 %v6087_v37 }
 0x88e   :  { %6217 = vmatprep.subr.bf16.mxu1 %v6090_v38  ;;  %v6129_v38 = vld [vmem:[#allocation3 + $0x1e0] sm:$0xff] }
 0x891   :  { %6218 = vmatpush1.bf16.msra.mxu1 %v6089_v52 }
 0x892   :  { %6219 = vmatprep.subr.bf16.mxu1 %v6092_v26  ;;  %v6132_v26 = vld [vmem:[#allocation3 + $0x1f8] sm:$0xff] }
 0x895   :  { %6220 = vmatpush1.bf16.msra.mxu1 %v6091_v10 }
 0x896   :  { %6221 = vmatprep.subr.bf16.mxu1 %v6094_v12 }
 0x899   :  { %6222 = vmatpush1.bf16.msra.mxu1 %v6093_v14 }
 0x89a   :  { %6223 = vmatprep.subr.bf16.mxu1 %v6096_v21 }
 0x89d   :  { %6224 = vmatpush1.bf16.msra.mxu1 %v6095_v22  ;;  %v6131_v22 = vld [vmem:[#allocation3 + $0x1f0] sm:$0xff] }
 0x89e   :  { %6225 = vmatprep.subr.bf16.mxu1 %v6098_v19  ;;  %v6134_v19 = vld [vmem:[#allocation3 + $0x208] sm:$0xff] }
 0x8a1   :  { %6226 = vmatpush1.bf16.msra.mxu1 %v6097_v23  ;;  %v6133_v23 = vld [vmem:[#allocation3 + $0x200] sm:$0xff] }
 0x8a2   :  { %6227 = vmatprep.subr.bf16.mxu1 %v6100_v1  ;;  %v6136_v1 = vld [vmem:[#allocation3 + $0x218] sm:$0xff] }
 0x8a5   :  { %6228 = vmatpush1.bf16.msra.mxu1 %v6099_v5  ;;  %v10801_v5 = vld [vmem:[#allocation6 + $0x8] sm:$0xff] }
 0x8a6   :  { %6240 = vmatprep.subr.bf16.mxu1 %v6102_v6  ;;  %v10803_v6 = vld [vmem:[#allocation6] sm:$0xff]  ;;  %6417 = vmatprep.subr.bf16.mxu0 %v10801_v5 }
 0x8a7   :  { %6418 = vmatpush1.bf16.msra.mxu0 %v10803_v6 }
 0x944   :  { %v6022_v11 = vpop.f32.mrb[40].mxu0 }
 0x945   :  { %v6024_v13 = vpop.f32.mrb[41].mxu0 }
 0x946   :  { %v6026_v15 = vpop.f32.mrb[42].mxu0 }
 0x947   :  { %v6061_v42 = vpack.c.bf16 %v6026_v15, %v6022_v11  ;;  %v6028_v53 = vpop.f32.mrb[43].mxu0  ;;  %v10805_v11 = vld [vmem:[#allocation6 + $0x18] sm:$0xff]  ;;  %v6138_v15 = vld [vmem:[#allocation3 + $0x228] sm:$0xff] }
 0x948   :  { %v6062_v16 = vpack.c.bf16 %v6028_v53, %v6024_v13  ;;  %v6135_v13 = vld [vmem:[#allocation3 + $0x210] sm:$0xff]  ;;  %6419 = vmatprep.subr.bf16.mxu0 %v10805_v11  ;;  %v10812_v53 = vld [vmem:[#allocation6 + $0x28] sm:$0xff] }
 0x94a   :  { %6229 = vmatprep.mubr.bf16.mxu1 %v6062_v16  ;;  %v6137_v16 = vld [vmem:[#allocation3 + $0x220] sm:$0xff] }
 0x94b   :  { %6230 = vmatmul.mubr.bf16.vlgmr.msra.gmra.mrb[56].mxu1 %v6061_v42  ;;  %v10810_v42 = vld [vmem:[#allocation6 + $0x10] sm:$0xff] }
 0x94c   :  { %6241 = vmatpush1.bf16.msra.mxu1 %v6101_v45  ;;  %v10768_v17 = vpop.f32.mrb[44].mxu0  ;;  %v6140_v45 = vld [vmem:[#allocation3 + $0x238] sm:$0xff]  ;;  %6420 = vmatpush1.bf16.msra.mxu0 %v10810_v42 }
 0x94d   :  { %6242 = vmatprep.subr.bf16.mxu1 %v6104_v59  ;;  %v6034_v63 = vpop.f32.mrb[45].mxu0  ;;  %6421 = vmatprep.subr.bf16.mxu0 %v10812_v53  ;;  %v10816_v59 = vld [vmem:[#allocation6 + $0x20] sm:$0xff] }
 0x94e   :  { %v10770_v49 = vpop.f32.mrb[46].mxu0 }
 0x94f   :  { %v6063_v27 = vpack.c.bf16 %v10770_v49, %v10768_v17  ;;  %v6038_v4 = vpop.f32.mrb[47].mxu0  ;;  %v10818_v17 = vld [vmem:[#allocation6 + $0x38] sm:$0xff]  ;;  %v10824_v49 = vld [vmem:[#allocation6 + $0x48] sm:$0xff] }
 0x950   :  { %6243 = vmatpush1.bf16.msra.mxu1 %v6103_v48  ;;  %v6064_v28 = vpack.c.bf16 %v6038_v4, %v6034_v63  ;;  %v6139_v48 = vld [vmem:[#allocation3 + $0x230] sm:$0xff]  ;;  %v6142_v63 = vld [vmem:[#allocation3 + $0x248] sm:$0xff]  ;;  %6422 = vmatpush1.bf16.msra.mxu0 %v10816_v59  ;;  %v6144_v4 = vld [vmem:[#allocation3 + $0x258] sm:$0xff] }
 0x951   :  { %6244 = vmatprep.subr.bf16.mxu1 %v6106_v20  ;;  %6423 = vmatprep.subr.bf16.mxu0 %v10818_v17  ;;  %v10822_v20 = vld [vmem:[#allocation6 + $0x30] sm:$0xff] }
 0x952   :  { %6272 = vmatprep.mubr.bf16.mxu1 %v6064_v28  ;;  %v10828_v28 = vld [vmem:[#allocation6 + $0x40] sm:$0xff] }
 0x954   :  { %6245 = vmatpush1.bf16.msra.mxu1 %v6105_v31  ;;  %v10774_v35 = vpop.f32.mrb[48].mxu0  ;;  %6424 = vmatpush1.bf16.msra.mxu0 %v10822_v20  ;;  %v10830_v31 = vld [vmem:[#allocation6 + $0x58] sm:$0xff] }
 0x955   :  { %6246 = vmatprep.subr.bf16.mxu1 %v6108_v32  ;;  %v10776_v40 = vpop.f32.mrb[49].mxu0  ;;  %6425 = vmatprep.subr.bf16.mxu0 %v10824_v49  ;;  %v6143_v32 = vld [vmem:[#allocation3 + $0x250] sm:$0xff] }
 0x956   :  { %v10778_v39 = vpop.f32.mrb[50].mxu0 }
 0x957   :  { %v6065_v43 = vpack.c.bf16 %v10778_v39, %v10774_v35  ;;  %v10782_v44 = vpop.f32.mrb[51].mxu0  ;;  %v6173_v35 = vld [vmem:[#allocation3 + $0x340] sm:$0xff]  ;;  %v6176_v39 = vld [vmem:[#allocation3 + $0x358] sm:$0xff] }
 0x958   :  { %6247 = vmatpush1.bf16.msra.mxu1 %v6107_v36  ;;  %v6066_v24 = vpack.c.bf16 %v10782_v44, %v10776_v40  ;;  %v6146_v36 = vld [vmem:[#allocation3 + $0x268] sm:$0xff]  ;;  %6426 = vmatpush1.bf16.msra.mxu0 %v10828_v28  ;;  %v10834_v40 = vld [vmem:[#allocation6 + $0x50] sm:$0xff]  ;;  %v6145_v44 = vld [vmem:[#allocation3 + $0x260] sm:$0xff] }
 0x959   :  { %6248 = vmatprep.subr.bf16.mxu1 %v6110_v41  ;;  %6427 = vmatprep.subr.bf16.mxu0 %v10830_v31  ;;  %v10836_v41 = vld [vmem:[#allocation6 + $0x68] sm:$0xff] }
 0x95c   :  { %6249 = vmatpush1.bf16.msra.mxu1 %v6109_v56  ;;  %v10786_v37 = vpop.f32.mrb[52].mxu0  ;;  %6428 = vmatpush1.bf16.msra.mxu0 %v10834_v40  ;;  %v10840_v56 = vld [vmem:[#allocation6 + $0x60] sm:$0xff] }
 0x95d   :  { %6250 = vmatprep.subr.bf16.mxu1 %v6112_v61  ;;  %v10788_v52 = vpop.f32.mrb[53].mxu0  ;;  %6429 = vmatprep.subr.bf16.mxu0 %v10836_v41  ;;  %v10842_v61 = vld [vmem:[#allocation6 + $0x78] sm:$0xff] }
 0x95e   :  { %v10790_v10 = vpop.f32.mrb[54].mxu0 }
 0x95f   :  { %v6067_v12 = vpack.c.bf16 %v10790_v10, %v10786_v37  ;;  %v10794_v14 = vpop.f32.mrb[55].mxu0  ;;  %v6416_v37 = vld [vmem:[#allocation6 + $0xf8] sm:$0xff]  ;;  %v6415_v10 = vld [vmem:[#allocation6 + $0xf0] sm:$0xff] }
 0x960   :  { %6251 = vmatpush1.bf16.msra.mxu1 %v6111_v62  ;;  %v6068_v21 = vpack.c.bf16 %v10794_v14, %v10788_v52  ;;  %v6147_v62 = vld [vmem:[#allocation3 + $0x270] sm:$0xff]  ;;  %6430 = vmatpush1.bf16.msra.mxu0 %v10840_v56  ;;  %v6178_v52 = vld [vmem:[#allocation3 + $0x368] sm:$0xff]  ;;  %v6177_v14 = vld [vmem:[#allocation3 + $0x360] sm:$0xff] }
 0x961   :  { %6252 = vmatprep.subr.bf16.mxu1 %v6114_v54  ;;  %v6150_v54 = vld [vmem:[#allocation3 + $0x288] sm:$0xff]  ;;  %6431 = vmatprep.subr.bf16.mxu0 %v10842_v61 }
 0x964   :  { %6253 = vmatpush1.bf16.msra.mxu1 %v6113_v58  ;;  %v10846_v58 = vld [vmem:[#allocation6 + $0x70] sm:$0xff] }
 0x965   :  { %6254 = vmatprep.subr.bf16.mxu1 %v6116_v60  ;;  %v10848_v60 = vld [vmem:[#allocation6 + $0x88] sm:$0xff]  ;;  %6432 = vmatpush1.bf16.msra.mxu0 %v10846_v58 }
 0x966   :  { %6433 = vmatprep.subr.bf16.mxu0 %v10848_v60 }
 0x968   :  { %6255 = vmatpush1.bf16.msra.mxu1 %v6115_v3  ;;  %v6149_v3 = vld [vmem:[#allocation3 + $0x280] sm:$0xff] }
 0x969   :  { %6256 = vmatprep.subr.bf16.mxu1 %v6118_v7  ;;  %v6152_v7 = vld [vmem:[#allocation3 + $0x298] sm:$0xff] }
 0x96c   :  { %6257 = vmatpush1.bf16.msra.mxu1 %v6117_v8  ;;  %v10852_v8 = vld [vmem:[#allocation6 + $0x80] sm:$0xff] }
 0x96d   :  { %6258 = vmatprep.subr.bf16.mxu1 %v6120_v46  ;;  %v10854_v46 = vld [vmem:[#allocation6 + $0x98] sm:$0xff]  ;;  %6434 = vmatpush1.bf16.msra.mxu0 %v10852_v8 }
 0x96e   :  { %6435 = vmatprep.subr.bf16.mxu0 %v10854_v46 }
 0x970   :  { %6259 = vmatpush1.bf16.msra.mxu1 %v6119_v50  ;;  %v6151_v50 = vld [vmem:[#allocation3 + $0x290] sm:$0xff] }
 0x971   :  { %6260 = vmatprep.subr.bf16.mxu1 %v6122_v51  ;;  %v6154_v51 = vld [vmem:[#allocation3 + $0x2a8] sm:$0xff] }
 0x974   :  { %6261 = vmatpush1.bf16.msra.mxu1 %v6121_v55  ;;  %v10858_v55 = vld [vmem:[#allocation6 + $0x90] sm:$0xff] }
 0x975   :  { %6262 = vmatprep.subr.bf16.mxu1 %v6124_v57  ;;  %v10860_v57 = vld [vmem:[#allocation6 + $0xa8] sm:$0xff]  ;;  %6436 = vmatpush1.bf16.msra.mxu0 %v10858_v55 }
 0x976   :  { %6437 = vmatprep.subr.bf16.mxu0 %v10860_v57 }
 0x978   :  { %6263 = vmatpush1.bf16.msra.mxu1 %v6123_v2  ;;  %v6153_v2 = vld [vmem:[#allocation3 + $0x2a0] sm:$0xff] }
 0x979   :  { %6264 = vmatprep.subr.bf16.mxu1 %v6126_v9  ;;  %v6156_v9 = vld [vmem:[#allocation3 + $0x2b8] sm:$0xff] }
 0x97c   :  { %6265 = vmatpush1.bf16.msra.mxu1 %v6125_v25  ;;  %v10864_v25 = vld [vmem:[#allocation6 + $0xa0] sm:$0xff] }
 0x97d   :  { %6266 = vmatprep.subr.bf16.mxu1 %v6128_v30  ;;  %v6155_v30 = vld [vmem:[#allocation3 + $0x2b0] sm:$0xff]  ;;  %6438 = vmatpush1.bf16.msra.mxu0 %v10864_v25 }
 0x980   :  { %6267 = vmatpush1.bf16.msra.mxu1 %v6127_v33  ;;  %v6158_v33 = vld [vmem:[#allocation3 + $0x2c8] sm:$0xff] }
 0x981   :  { %6268 = vmatprep.subr.bf16.mxu1 %v6130_v34  ;;  %v6157_v34 = vld [vmem:[#allocation3 + $0x2c0] sm:$0xff] }
 0x984   :  { %6269 = vmatpush1.bf16.msra.mxu1 %v6129_v38  ;;  %v6160_v38 = vld [vmem:[#allocation3 + $0x2d8] sm:$0xff] }
 0x985   :  { %6270 = vmatprep.subr.bf16.mxu1 %v6132_v26  ;;  %v6159_v26 = vld [vmem:[#allocation3 + $0x2d0] sm:$0xff] }
 0x988   :  { %6271 = vmatpush1.bf16.msra.mxu1 %v6131_v22  ;;  %v6162_v22 = vld [vmem:[#allocation3 + $0x2e8] sm:$0xff] }
 0x989   :  { %6283 = vmatprep.subr.bf16.mxu1 %v6134_v19  ;;  %v6161_v19 = vld [vmem:[#allocation3 + $0x2e0] sm:$0xff] }
 0x98b   :  { %6273 = vmatmul.mubr.bf16.vlgmr.msra.gmra.mrb[56].mxu1 %v6063_v27  ;;  %v6141_v27 = vld [vmem:[#allocation3 + $0x240] sm:$0xff] }
 0x98c   :  { %6284 = vmatpush1.bf16.msra.mxu1 %v6133_v23  ;;  %6315 = vmatprep.mubr.bf16.mxu1 %v6066_v24  ;;  %v6148_v24 = vld [vmem:[#allocation3 + $0x278] sm:$0xff] }
 0x98d   :  { %6285 = vmatprep.subr.bf16.mxu1 %v6136_v1  ;;  %v6164_v23 = vld [vmem:[#allocation3 + $0x2f8] sm:$0xff]  ;;  %v6163_v1 = vld [vmem:[#allocation3 + $0x2f0] sm:$0xff] }
 0x990   :  { %6286 = vmatpush1.bf16.msra.mxu1 %v6135_v13  ;;  %v6166_v13 = vld [vmem:[#allocation3 + $0x308] sm:$0xff] }
 0x991   :  { %6287 = vmatprep.subr.bf16.mxu1 %v6138_v15  ;;  %v6165_v15 = vld [vmem:[#allocation3 + $0x300] sm:$0xff] }
 0x994   :  { %6288 = vmatpush1.bf16.msra.mxu1 %v6137_v16  ;;  %v6168_v16 = vld [vmem:[#allocation3 + $0x318] sm:$0xff] }
 0x995   :  { %6289 = vmatprep.subr.bf16.mxu1 %v6140_v45  ;;  %v6167_v45 = vld [vmem:[#allocation3 + $0x310] sm:$0xff] }
 0x998   :  { %6290 = vmatpush1.bf16.msra.mxu1 %v6139_v48  ;;  %v6170_v48 = vld [vmem:[#allocation3 + $0x328] sm:$0xff] }
 0x999   :  { %6291 = vmatprep.subr.bf16.mxu1 %v6142_v63  ;;  %v6169_v63 = vld [vmem:[#allocation3 + $0x320] sm:$0xff] }
 0x99c   :  { %6292 = vmatpush1.bf16.msra.mxu1 %v6141_v27  ;;  %v6172_v27 = vld [vmem:[#allocation3 + $0x338] sm:$0xff] }
 0x99d   :  { %6293 = vmatprep.subr.bf16.mxu1 %v6144_v4  ;;  %v6171_v4 = vld [vmem:[#allocation3 + $0x330] sm:$0xff] }
 0x9a0   :  { %6294 = vmatpush1.bf16.msra.mxu1 %v6143_v32  ;;  %v6174_v32 = vld [vmem:[#allocation3 + $0x348] sm:$0xff] }
 0x9a1   :  { %6295 = vmatprep.subr.bf16.mxu1 %v6146_v36  ;;  %v6179_v36 = vld [vmem:[#allocation3 + $0x370] sm:$0xff] }
 0x9a4   :  { %6296 = vmatpush1.bf16.msra.mxu1 %v6145_v44  ;;  %v6182_v44 = vld [vmem:[#allocation3 + $0x388] sm:$0xff] }
 0x9a5   :  { %6297 = vmatprep.subr.bf16.mxu1 %v6148_v24  ;;  %v6181_v24 = vld [vmem:[#allocation3 + $0x380] sm:$0xff] }
 0x9a8   :  { %6298 = vmatpush1.bf16.msra.mxu1 %v6147_v62  ;;  %v6184_v62 = vld [vmem:[#allocation3 + $0x398] sm:$0xff] }
 0x9a9   :  { %6299 = vmatprep.subr.bf16.mxu1 %v6150_v54  ;;  %v6183_v54 = vld [vmem:[#allocation3 + $0x390] sm:$0xff] }
 0x9ac   :  { %6300 = vmatpush1.bf16.msra.mxu1 %v6149_v3  ;;  %v6186_v3 = vld [vmem:[#allocation3 + $0x3a8] sm:$0xff] }
 0x9ad   :  { %6301 = vmatprep.subr.bf16.mxu1 %v6152_v7  ;;  %v6185_v7 = vld [vmem:[#allocation3 + $0x3a0] sm:$0xff] }
 0x9b0   :  { %6302 = vmatpush1.bf16.msra.mxu1 %v6151_v50  ;;  %v6188_v50 = vld [vmem:[#allocation3 + $0x3b8] sm:$0xff] }
 0x9b1   :  { %6303 = vmatprep.subr.bf16.mxu1 %v6154_v51  ;;  %v6187_v51 = vld [vmem:[#allocation3 + $0x3b0] sm:$0xff] }
 0x9b4   :  { %6304 = vmatpush1.bf16.msra.mxu1 %v6153_v2  ;;  %v6190_v2 = vld [vmem:[#allocation3 + $0x3c8] sm:$0xff] }
 0x9b5   :  { %6305 = vmatprep.subr.bf16.mxu1 %v6156_v9  ;;  %v6189_v9 = vld [vmem:[#allocation3 + $0x3c0] sm:$0xff] }
 0x9b8   :  { %6306 = vmatpush1.bf16.msra.mxu1 %v6155_v30  ;;  %v6192_v30 = vld [vmem:[#allocation3 + $0x3d8] sm:$0xff] }
 0x9b9   :  { %6307 = vmatprep.subr.bf16.mxu1 %v6158_v33  ;;  %v6191_v33 = vld [vmem:[#allocation3 + $0x3d0] sm:$0xff] }
 0x9bc   :  { %6308 = vmatpush1.bf16.msra.mxu1 %v6157_v34  ;;  %v6194_v34 = vld [vmem:[#allocation3 + $0x3e8] sm:$0xff] }
 0x9bd   :  { %6309 = vmatprep.subr.bf16.mxu1 %v6160_v38  ;;  %v6193_v38 = vld [vmem:[#allocation3 + $0x3e0] sm:$0xff] }
 0x9c0   :  { %6310 = vmatpush1.bf16.msra.mxu1 %v6159_v26  ;;  %v6196_v26 = vld [vmem:[#allocation3 + $0x3f8] sm:$0xff] }
 0x9c1   :  { %6311 = vmatprep.subr.bf16.mxu1 %v6162_v22  ;;  %v6195_v22 = vld [vmem:[#allocation3 + $0x3f0] sm:$0xff] }
 0x9c4   :  { %6312 = vmatpush1.bf16.msra.mxu1 %v6161_v19  ;;  %v10876_v19 = vld [vmem:[#allocation6 + $0xb8] sm:$0xff] }
 0x9c5   :  { %6313 = vmatprep.subr.bf16.mxu1 %v6164_v23  ;;  %6439 = vmatprep.subr.bf16.mxu0 %v10876_v19  ;;  %v6407_v23 = vld [vmem:[#allocation6 + $0xb0] sm:$0xff] }
 0x9c6   :  { %6440 = vmatpush1.bf16.msra.mxu0 %v6407_v23 }
 0x9c8   :  { %6314 = vmatpush1.bf16.msra.mxu1 %v6163_v1  ;;  %v6410_v1 = vld [vmem:[#allocation6 + $0xc8] sm:$0xff] }
 0x9c9   :  { %6326 = vmatprep.subr.bf16.mxu1 %v6166_v13  ;;  %6441 = vmatprep.subr.bf16.mxu0 %v6410_v1  ;;  %v6409_v13 = vld [vmem:[#allocation6 + $0xc0] sm:$0xff] }
 0x9ca   :  { %6442 = vmatpush1.bf16.msra.mxu0 %v6409_v13 }
 0x9cb   :  { %6316 = vmatmul.mubr.bf16.vlgmr.msra.gmra.mrb[56].mxu1 %v6065_v43  ;;  %v6175_v43 = vld [vmem:[#allocation3 + $0x350] sm:$0xff] }
 0x9cc   :  { %6327 = vmatpush1.bf16.msra.mxu1 %v6165_v15  ;;  %6358 = vmatprep.mubr.bf16.mxu1 %v6068_v21  ;;  %v6180_v21 = vld [vmem:[#allocation3 + $0x378] sm:$0xff] }
 0x9cd   :  { %6328 = vmatprep.subr.bf16.mxu1 %v6168_v16  ;;  %v6412_v15 = vld [vmem:[#allocation6 + $0xd8] sm:$0xff]  ;;  %v6411_v16 = vld [vmem:[#allocation6 + $0xd0] sm:$0xff] }
 0x9ce   :  { %6443 = vmatprep.subr.bf16.mxu0 %v6412_v15 }
 0x9cf   :  { %6444 = vmatpush1.bf16.msra.mxu0 %v6411_v16 }
 0x9d0   :  { %6329 = vmatpush1.bf16.msra.mxu1 %v6167_v45  ;;  %v6414_v45 = vld [vmem:[#allocation6 + $0xe8] sm:$0xff] }
 0x9d1   :  { %6330 = vmatprep.subr.bf16.mxu1 %v6170_v48  ;;  %6445 = vmatprep.subr.bf16.mxu0 %v6414_v45  ;;  %v6413_v48 = vld [vmem:[#allocation6 + $0xe0] sm:$0xff] }
 0x9d3   :  { %6446 = vmatpush1.bf16.msra.mxu0 %v6413_v48 }
 0x9d4   :  { %6331 = vmatpush1.bf16.msra.mxu1 %v6169_v63  ;;  %6447 = vmatprep.subr.bf16.mxu0 %v6416_v37 }
 0x9d5   :  { %6332 = vmatprep.subr.bf16.mxu1 %v6172_v27 }
 0x9d7   :  { %6448 = vmatpush1.bf16.msra.mxu0 %v6415_v10 }
 0x9d8   :  { %6333 = vmatpush1.bf16.msra.mxu1 %v6171_v4  ;;  %6491 = vmatprep.subr.bf16.mxu0 %v10801_v5 }
 0x9d9   :  { %6334 = vmatprep.subr.bf16.mxu1 %v6174_v32 }
 0x9dc   :  { %6335 = vmatpush1.bf16.msra.mxu1 %v6173_v35 }
 0x9dd   :  { %6336 = vmatprep.subr.bf16.mxu1 %v6176_v39 }
 0x9e0   :  { %6337 = vmatpush1.bf16.msra.mxu1 %v6175_v43 }
 0x9e1   :  { %6338 = vmatprep.subr.bf16.mxu1 %v6178_v52 }
 0x9e4   :  { %6339 = vmatpush1.bf16.msra.mxu1 %v6177_v14 }
 0x9e5   :  { %6340 = vmatprep.subr.bf16.mxu1 %v6180_v21 }
 0x9e8   :  { %6341 = vmatpush1.bf16.msra.mxu1 %v6179_v36 }
 0x9e9   :  { %6342 = vmatprep.subr.bf16.mxu1 %v6182_v44 }
 0x9ec   :  { %6343 = vmatpush1.bf16.msra.mxu1 %v6181_v24 }
 0x9ed   :  { %6344 = vmatprep.subr.bf16.mxu1 %v6184_v62 }
 0x9f0   :  { %6345 = vmatpush1.bf16.msra.mxu1 %v6183_v54 }
 0x9f1   :  { %6346 = vmatprep.subr.bf16.mxu1 %v6186_v3 }
 0x9f4   :  { %6347 = vmatpush1.bf16.msra.mxu1 %v6185_v7 }
 0x9f5   :  { %6348 = vmatprep.subr.bf16.mxu1 %v6188_v50 }
 0x9f8   :  { %6349 = vmatpush1.bf16.msra.mxu1 %v6187_v51 }
 0x9f9   :  { %6350 = vmatprep.subr.bf16.mxu1 %v6190_v2 }
 0x9fc   :  { %6351 = vmatpush1.bf16.msra.mxu1 %v6189_v9 }
 0x9fd   :  { %6352 = vmatprep.subr.bf16.mxu1 %v6192_v30 }
 0xa00   :  { %6353 = vmatpush1.bf16.msra.mxu1 %v6191_v33 }
 0xa01   :  { %6354 = vmatprep.subr.bf16.mxu1 %v6194_v34 }
 0xa04   :  { %6355 = vmatpush1.bf16.msra.mxu1 %v6193_v38 }
 0xa05   :  { %6356 = vmatprep.subr.bf16.mxu1 %v6196_v26 }
 0xa08   :  { %6357 = vmatpush1.bf16.msra.mxu1 %v6195_v22 }
 0xa0b   :  { %6359 = vmatmul.mubr.bf16.vlgmr.msra.gmra.mrb[56].mxu1 %v6067_v12 }
 0xade   :  { %v6360_v12 = vpop.f32.mrb[56].mxu1 }
 0xadf   :  { %v6362_v63 = vpop.f32.mrb[57].mxu1 }
 0xae0   :  { %v6364_v27 = vpop.f32.mrb[58].mxu1 }
 0xae1   :  { %v6369_v4 = vadd.f32 %v6364_v27, %v6360_v12  ;;  %v6366_v32 = vpop.f32.mrb[59].mxu1 }
 0xae2   :  { %v6376_v35 = vadd.f32 %v6366_v32, %v6362_v63 }
 0xae3   :  { %v6370_v39 = vrot.slane %v6369_v4, 4 }
 0xae4   :  { %v6377_v43 = vrot.slane %v6376_v35, 4 }
 0xae5   :  { %v6371_v52 = vadd.f32 %v6370_v39, %v6369_v4 }
 0xae6   :  { %v6378_v14 = vadd.f32 %v6377_v43, %v6376_v35 }
 0xae7   :  { %v6372_v21 = vrot.slane %v6371_v52, 2 }
 0xae8   :  { %v6379_v36 = vrot.slane %v6378_v14, 2 }
 0xae9   :  { %v6373_v44 = vadd.f32 %v6372_v21, %v6371_v52 }
 0xaea   :  { %v6380_v24 = vadd.f32 %v6379_v36, %v6378_v14 }
 0xaeb   :  { %v6374_v62 = vrot.slane %v6373_v44, 1 }
 0xaec   :  { %v6381_v54 = vrot.slane %v6380_v24, 1 }
 0xaed   :  { %v6375_v3 = vadd.f32 %v6374_v62, %v6373_v44 }
 0xaee   :  { %v6382_v7 = vadd.f32 %v6381_v54, %v6380_v24 }
 0xaef   :  { %v6383_v5 = vpack.c.bf16 %v6375_v3, %v6375_v3 }
 0xaf0   :  { %v6384_v50 = vpack.c.bf16 %v6382_v7, %v6382_v7 }
 0xaf2   :  { %6449 = vmatprep.mubr.bf16.mxu0 %v6384_v50 }
 0xaf3   :  { %6450 = vmatmul.mubr.bf16.vlgmr.msra.gmra.mrb[56].mxu0 %v6383_v5 }
 0xaf4   :  { %6492 = vmatpush1.bf16.msra.mxu0 %v10803_v6 }
 0xaf5   :  { %6493 = vmatprep.subr.bf16.mxu0 %v10805_v11 }
 0xaf8   :  { %6494 = vmatpush1.bf16.msra.mxu0 %v10810_v42 }
 0xaf9   :  { %6495 = vmatprep.subr.bf16.mxu0 %v10812_v53 }
 0xafc   :  { %6496 = vmatpush1.bf16.msra.mxu0 %v10816_v59 }
 0xafd   :  { %6497 = vmatprep.subr.bf16.mxu0 %v10818_v17 }
 0xb00   :  { %6498 = vmatpush1.bf16.msra.mxu0 %v10822_v20 }
 0xb01   :  { %6499 = vmatprep.subr.bf16.mxu0 %v10824_v49 }
 0xb04   :  { %6500 = vmatpush1.bf16.msra.mxu0 %v10828_v28 }
 0xb05   :  { %6501 = vmatprep.subr.bf16.mxu0 %v10830_v31 }
 0xb08   :  { %6502 = vmatpush1.bf16.msra.mxu0 %v10834_v40 }
 0xb09   :  { %6503 = vmatprep.subr.bf16.mxu0 %v10836_v41 }
 0xb0c   :  { %6504 = vmatpush1.bf16.msra.mxu0 %v10840_v56 }
 0xb0d   :  { %6505 = vmatprep.subr.bf16.mxu0 %v10842_v61 }
 0xb10   :  { %6506 = vmatpush1.bf16.msra.mxu0 %v10846_v58 }
 0xb11   :  { %6507 = vmatprep.subr.bf16.mxu0 %v10848_v60 }
 0xb14   :  { %6508 = vmatpush1.bf16.msra.mxu0 %v10852_v8 }
 0xb15   :  { %6509 = vmatprep.subr.bf16.mxu0 %v10854_v46 }
 0xb18   :  { %6510 = vmatpush1.bf16.msra.mxu0 %v10858_v55 }
 0xb19   :  { %6511 = vmatprep.subr.bf16.mxu0 %v10860_v57 }
 0xb1c   :  { %6512 = vmatpush1.bf16.msra.mxu0 %v10864_v25 }
 0xb1d   :  { %6513 = vmatprep.subr.bf16.mxu0 %v10876_v19 }
 0xb20   :  { %6514 = vmatpush1.bf16.msra.mxu0 %v6407_v23 }
 0xb21   :  { %6515 = vmatprep.subr.bf16.mxu0 %v6410_v1 }
 0xb24   :  { %6516 = vmatpush1.bf16.msra.mxu0 %v6409_v13 }
 0xb25   :  { %6517 = vmatprep.subr.bf16.mxu0 %v6412_v15 }
 0xb28   :  { %6518 = vmatpush1.bf16.msra.mxu0 %v6411_v16 }
 0xb29   :  { %6519 = vmatprep.subr.bf16.mxu0 %v6414_v45 }
 0xb2c   :  { %6520 = vmatpush1.bf16.msra.mxu0 %v6413_v48 }
 0xb2d   :  { %6521 = vmatprep.subr.bf16.mxu0 %v6416_v37 }
 0xb30   :  { %6522 = vmatpush1.bf16.msra.mxu0 %v6415_v10 }
 0xbc6   :  { %v6451_v6 = vpop.f32.mrb[56].mxu0 }
 0xbc7   :  { %v6461_v11 = vrot.slane %v6451_v6, %v10696_v29  ;;  %v6453_v42 = vpop.f32.mrb[57].mxu0 }
 0xbc8   :  { %v6465_v53 = vrot.slane %v6453_v42, %v10696_v29  ;;  %v6455_v59 = vpop.f32.mrb[58].mxu0 }
 0xbc9   :  { %v6466_v17 = vsub.f32 %v6360_v12, %v6461_v11  ;;  %v6468_v20 = vsub.f32 %v6364_v27, %v6461_v11  ;;  %v6456_v49 = vpop.f32.mrb[59].mxu0  ;;  %v6490_v12 = vld [vmem:[%s11074_s9] sm:$0x3] }
 0xbca   :  { %v6467_v28 = vsub.f32 %v6362_v63, %v6465_v53  ;;  %v6469_v31 = vsub.f32 %v6366_v32, %v6465_v53  ;;  %v6568_v27 = vld [vmem:[%s11077_s12] sm:$0x3] }
 0xbcb   :  { %v6470_v40 = vmul.f32 %v6466_v17, %v6466_v17  ;;  %v6472_v41 = vmul.f32 %v6468_v20, %v6468_v20  ;;  %v6573_v39 = vrot.slane %v6568_v27, %v10696_v29  ;;  %v6577_v43 = vrot.slane %v6568_v27, %v10733_v0 }
 0xbcc   :  { %v6471_v56 = vmul.f32 %v6467_v28, %v6467_v28  ;;  %v6473_v61 = vmul.f32 %v6469_v31, %v6469_v31 }
 0xbcd   :  { %v6474_v58 = vadd.f32 %v6472_v41, %v6470_v40 }
 0xbce   :  { %v6481_v60 = vadd.f32 %v6473_v61, %v6471_v56 }
 0xbcf   :  { %v6475_v8 = vrot.slane %v6474_v58, 4 }
 0xbd0   :  { %v6482_v46 = vrot.slane %v6481_v60, 4 }
 0xbd1   :  { %v6476_v55 = vadd.f32 %v6475_v8, %v6474_v58 }
 0xbd2   :  { %v6483_v57 = vadd.f32 %v6482_v46, %v6481_v60 }
 0xbd3   :  { %v6477_v25 = vrot.slane %v6476_v55, 2 }
 0xbd4   :  { %v6484_v51 = vrot.slane %v6483_v57, 2 }
 0xbd5   :  { %v6478_v2 = vadd.f32 %v6477_v25, %v6476_v55 }
 0xbd6   :  { %v6485_v9 = vadd.f32 %v6484_v51, %v6483_v57 }
 0xbd7   :  { %v6479_v30 = vrot.slane %v6478_v2, 1 }
 0xbd8   :  { %v6486_v33 = vrot.slane %v6485_v9, 1 }
 0xbd9   :  { %v6480_v34 = vadd.f32 %v6479_v30, %v6478_v2 }
 0xbda   :  { %v6487_v38 = vadd.f32 %v6486_v33, %v6485_v9 }
 0xbdb   :  { %v6488_v22 = vpack.c.bf16 %v6480_v34, %v6480_v34 }
 0xbdc   :  { %v6489_v26 = vpack.c.bf16 %v6487_v38, %v6487_v38 }
 0xbde   :  { %6523 = vmatprep.mubr.bf16.mxu0 %v6489_v26 }
 0xbdf   :  { %6524 = vmatmul.mubr.bf16.vlgmr.msra.gmra.mrb[60].mxu0 %v6488_v22 }
 0xcb2   :  { %v6525_v19 = vpop.f32.mrb[60].mxu0 }
 0xcb3   :  { %v6526_v23 = vadd.f32 1e-05, %v6525_v19  ;;  %v6527_v1 = vpop.f32.mrb[61].mxu0 }
 0xcb4   :  { %v6528_v13 = vadd.f32 1e-05, %v6527_v1  ;;  %v6529_v15 = vpop.f32.mrb[62].mxu0 }
 0xcb5   :  { %7805 = vrsqrt.f32 %v6526_v23  ;;  %v6530_v16 = vpop.f32.mrb[63].mxu0 }
 0xcb6   :  { %7807 = vrsqrt.f32 %v6528_v13 }
 0xcbf   :  { %v7806_v45 = vpop.eup %7805 }
 0xcc0   :  { %v7808_v48 = vpop.eup %7807 }
 0xcc1   :  { %v6536_v37 = vcombine.low %v7806_v45, %v7808_v48 }
 0xcc3   :  { %v6543_v10 = vrot.slane %v6536_v37, %v10727_v47 }
 0xcc5   :  { %v6550_v63 = vrot.slane %v6543_v10, %v10727_v47 }
 0xcc7   :  { %v6552_v4 = vmul.f32 %v6550_v63, %v6490_v12 }
 0xcc9   :  { %v6557_v32 = vrot.slane %v6552_v4, %v10696_v29  ;;  %v6561_v35 = vrot.slane %v6552_v4, %v10733_v0 }
 0xccb   :  { %v6564_v52 = vmul.f32 %v6557_v32, %v6466_v17  ;;  %v6565_v14 = vmul.f32 %v6561_v35, %v6467_v28  ;;  %v6566_v21 = vmul.f32 %v6557_v32, %v6468_v20  ;;  %v6567_v36 = vmul.f32 %v6561_v35, %v6469_v31 }
 0xccd   :  { %v6580_v44 = vadd.f32 %v6573_v39, %v6564_v52  ;;  %v6581_v24 = vadd.f32 %v6577_v43, %v6565_v14  ;;  %v6582_v62 = vadd.f32 %v6573_v39, %v6566_v21  ;;  %v6583_v54 = vadd.f32 %v6577_v43, %v6567_v36 }
 0xccf   :  { %v6584_v3 = vmul.f32 0.2, %v6580_v44  ;;  %v6585_v7 = vmul.f32 0.2, %v6581_v24  ;;  %v6586_v50 = vmul.f32 0.2, %v6582_v62 }
 0xcd0   :  { %v6587_v5 = vmul.f32 0.2, %v6583_v54 }
 0xcd1   :  { %v6588_v6 = vmax.f32 %v6580_v44, %v6584_v3  ;;  %v6589_v11 = vmax.f32 %v6581_v24, %v6585_v7  ;;  %v6590_v42 = vmax.f32 %v6582_v62, %v6586_v50 }
 0xcd2   :  { %v6591_v53 = vmax.f32 %v6583_v54, %v6587_v5 }
 0xcd3   :  { %7827 = dma.done.wait [#allocation8 + $0x4], 16384 }
 0xcd4   :  { %7828 = vsyncadd [#allocation8 + $0x4], 4294950912 }
 0xcd5   :  { %7829 = dma.done.wait [#allocation8 + $0x5], 4096 }
 0xcd6   :  { %7830 = vsyncadd [#allocation8 + $0x5], 4294963200  ;;  %v6597_v59 = vpack.c.bf16 %v6591_v53, %v6589_v11  ;;  %v6596_v17 = vpack.c.bf16 %v6590_v42, %v6588_v6  ;;  %6651 = vmatprep.mubr.bf16.mxu0 %v7831_v18  ;;  %vm6612_vm2 = vcmask 130048   ;;  %s11100_s2 = sld [smem:[#allocation25_spill]]  ;;  %v6681_v49 = vld [vmem:[#allocation4 + $0x8] sm:$0xff]  ;;  %v6680_v28 = vld [vmem:[#allocation4] sm:$0xff] }
 0xcd7   :  { %v6683_v31 = vld [vmem:[#allocation4 + $0x18] sm:$0xff]  ;;  %v6682_v40 = vld [vmem:[#allocation4 + $0x10] sm:$0xff]  ;;  %v6685_v56 = vld [vmem:[#allocation4 + $0x28] sm:$0xff]  ;;  %vm7834_vm3 = vmmov 0   ;;  %vm7188_vm4 = vcmask 64512   ;;  %vm7268_vm5 = vcmask 1024  }
 0xcd8   :  { %6619 = vmatprep.subr.bf16.mxu0 %v6597_v59  ;;  %v6684_v61 = vld [vmem:[#allocation4 + $0x20] sm:$0xff]  ;;  %v6687_v58 = vld [vmem:[#allocation4 + $0x38] sm:$0xff]  ;;  %v6686_v60 = vld [vmem:[#allocation4 + $0x30] sm:$0xff] }
 0xcd9   :  { %6620 = vmatpush1.bf16.msra.mxu0 %v6596_v17  ;;  %v6689_v8 = vld [vmem:[#allocation4 + $0x48] sm:$0xff]  ;;  %v6691_v46 = vld [vmem:[#allocation4 + $0x58] sm:$0xff]  ;;  %v6690_v55 = vld [vmem:[#allocation4 + $0x50] sm:$0xff] }
 0xcda   :  { %6808 = vmatprep.subr.bf16.mxu0 %v6681_v49  ;;  %v6693_v57 = vld [vmem:[#allocation4 + $0x68] sm:$0xff]  ;;  %v6692_v25 = vld [vmem:[#allocation4 + $0x60] sm:$0xff]  ;;  %v6695_v51 = vld [vmem:[#allocation4 + $0x78] sm:$0xff] }
 0xcdb   :  { %v6694_v2 = vld [vmem:[#allocation4 + $0x70] sm:$0xff]  ;;  %v6697_v9 = vld [vmem:[#allocation4 + $0x88] sm:$0xff]  ;;  %v6696_v30 = vld [vmem:[#allocation4 + $0x80] sm:$0xff] }
 0xcdc   :  { %v7809_v20 = vld [vmem:[%s11100_s2] sm:$0xff]   ;;  %v7810_v41 = vld [vmem:[%s11100_s2 + $0x8] sm:$0xff]   ;;  %v6699_v33 = vld [vmem:[#allocation4 + $0x98] sm:$0xff] }
 0xcdd   :  { %7513 = vmatmul.mubr.msk.bf16.vlgmr.msra.gmra.mrb[64].mxu0 %vm6612_vm2, %v7809_v20  ;;  %v6698_v34 = vld [vmem:[#allocation4 + $0x90] sm:$0xff]  ;;  %v6701_v38 = vld [vmem:[#allocation4 + $0xa8] sm:$0xff]  ;;  %v6700_v26 = vld [vmem:[#allocation4 + $0xa0] sm:$0xff] }
 0xcde   :  { %6661 = vmatprep.mubr.bf16.mxu0 %v7831_v18  ;;  %6809 = vmatpush1.bf16.msra.mxu0 %v6680_v28  ;;  %v6688_v18 = vld [vmem:[#allocation4 + $0x40] sm:$0xff]  ;;  %v6703_v22 = vld [vmem:[#allocation4 + $0xb8] sm:$0xff]  ;;  %v6702_v19 = vld [vmem:[#allocation4 + $0xb0] sm:$0xff] }
 0xcdf   :  { %6810 = vmatprep.subr.bf16.mxu0 %v6683_v31  ;;  %v6705_v23 = vld [vmem:[#allocation4 + $0xc8] sm:$0xff]  ;;  %v6704_v1 = vld [vmem:[#allocation4 + $0xc0] sm:$0xff]  ;;  %v6707_v13 = vld [vmem:[#allocation4 + $0xd8] sm:$0xff] }
 0xce0   :  { %v6706_v15 = vld [vmem:[#allocation4 + $0xd0] sm:$0xff]  ;;  %v6709_v16 = vld [vmem:[#allocation4 + $0xe8] sm:$0xff]  ;;  %v6708_v45 = vld [vmem:[#allocation4 + $0xe0] sm:$0xff] }
 0xce1   :  { %v6711_v48 = vld [vmem:[#allocation4 + $0xf8] sm:$0xff]  ;;  %v6710_v37 = vld [vmem:[#allocation4 + $0xf0] sm:$0xff]  ;;  %v6713_v10 = vld [vmem:[#allocation4 + $0x108] sm:$0xff] }
 0xce2   :  { %6811 = vmatpush1.bf16.msra.mxu0 %v6682_v40  ;;  %v6712_v39 = vld [vmem:[#allocation4 + $0x100] sm:$0xff]  ;;  %v6715_v52 = vld [vmem:[#allocation4 + $0x118] sm:$0xff]  ;;  %v6714_v14 = vld [vmem:[#allocation4 + $0x110] sm:$0xff] }
 0xce3   :  { %6812 = vmatprep.subr.bf16.mxu0 %v6685_v56  ;;  %v6717_v21 = vld [vmem:[#allocation4 + $0x128] sm:$0xff]  ;;  %v6716_v62 = vld [vmem:[#allocation4 + $0x120] sm:$0xff]  ;;  %v6719_v3 = vld [vmem:[#allocation4 + $0x138] sm:$0xff] }
 0xce4   :  { %v6718_v7 = vld [vmem:[#allocation4 + $0x130] sm:$0xff]  ;;  %v6721_v50 = vld [vmem:[#allocation4 + $0x148] sm:$0xff]  ;;  %v6720_v5 = vld [vmem:[#allocation4 + $0x140] sm:$0xff] }
 0xce5   :  { %7514 = vmatmul.mubr.msk.bf16.gmra.mrb[68].mxu0 %vm6612_vm2, %v7810_v41  ;;  %v6723_v6 = vld [vmem:[#allocation4 + $0x158] sm:$0xff]  ;;  %v6722_v11 = vld [vmem:[#allocation4 + $0x150] sm:$0xff]  ;;  %v6725_v42 = vld [vmem:[#allocation4 + $0x168] sm:$0xff] }
 0xce6   :  { %6813 = vmatpush1.bf16.msra.mxu0 %v6684_v61  ;;  %v6724_v53 = vld [vmem:[#allocation4 + $0x160] sm:$0xff]  ;;  %v6727_v59 = vld [vmem:[#allocation4 + $0x178] sm:$0xff]  ;;  %v6726_v17 = vld [vmem:[#allocation4 + $0x170] sm:$0xff] }
 0xce7   :  { %6814 = vmatprep.subr.bf16.mxu0 %v6687_v58  ;;  %v6729_v20 = vld [vmem:[#allocation4 + $0x188] sm:$0xff]  ;;  %v6728_v49 = vld [vmem:[#allocation4 + $0x180] sm:$0xff]  ;;  %v6731_v28 = vld [vmem:[#allocation4 + $0x198] sm:$0xff] }
 0xce8   :  { %v6730_v31 = vld [vmem:[#allocation4 + $0x190] sm:$0xff]  ;;  %v6733_v40 = vld [vmem:[#allocation4 + $0x1a8] sm:$0xff]  ;;  %v6732_v41 = vld [vmem:[#allocation4 + $0x1a0] sm:$0xff] }
 0xce9   :  { %v6735_v56 = vld [vmem:[#allocation4 + $0x1b8] sm:$0xff]  ;;  %v6734_v61 = vld [vmem:[#allocation4 + $0x1b0] sm:$0xff]  ;;  %v6737_v58 = vld [vmem:[#allocation4 + $0x1c8] sm:$0xff] }
 0xcea   :  { %6815 = vmatpush1.bf16.msra.mxu0 %v6686_v60  ;;  %v6736_v60 = vld [vmem:[#allocation4 + $0x1c0] sm:$0xff] }
 0xceb   :  { %6816 = vmatprep.subr.bf16.mxu0 %v6689_v8  ;;  %v6739_v8 = vld [vmem:[#allocation4 + $0x1d8] sm:$0xff] }
 0xcee   :  { %6817 = vmatpush1.bf16.msra.mxu0 %v6688_v18  ;;  %v6738_v18 = vld [vmem:[#allocation4 + $0x1d0] sm:$0xff] }
 0xcef   :  { %6818 = vmatprep.subr.bf16.mxu0 %v6691_v46  ;;  %v6741_v46 = vld [vmem:[#allocation4 + $0x1e8] sm:$0xff] }
 0xcf2   :  { %6819 = vmatpush1.bf16.msra.mxu0 %v6690_v55  ;;  %v6740_v55 = vld [vmem:[#allocation4 + $0x1e0] sm:$0xff] }
 0xcf3   :  { %6820 = vmatprep.subr.bf16.mxu0 %v6693_v57  ;;  %v6743_v57 = vld [vmem:[#allocation4 + $0x1f8] sm:$0xff] }
 0xcf6   :  { %6821 = vmatpush1.bf16.msra.mxu0 %v6692_v25  ;;  %v6742_v25 = vld [vmem:[#allocation4 + $0x1f0] sm:$0xff] }
 0xcf7   :  { %6822 = vmatprep.subr.bf16.mxu0 %v6695_v51  ;;  %v6745_v51 = vld [vmem:[#allocation4 + $0x208] sm:$0xff] }
 0xcfa   :  { %6823 = vmatpush1.bf16.msra.mxu0 %v6694_v2 }
 0xcfb   :  { %6824 = vmatprep.subr.bf16.mxu0 %v6697_v9 }
 0xcfe   :  { %6825 = vmatpush1.bf16.msra.mxu0 %v6696_v30  ;;  %v6744_v30 = vld [vmem:[#allocation4 + $0x200] sm:$0xff] }
 0xcff   :  { %6826 = vmatprep.subr.bf16.mxu0 %v6699_v33  ;;  %v6747_v33 = vld [vmem:[#allocation4 + $0x218] sm:$0xff] }
 0xd02   :  { %6827 = vmatpush1.bf16.msra.mxu0 %v6698_v34  ;;  %v10940_v34 = vld [vmem:[#allocation7 + $0x8] sm:$0xff] }
 0xd03   :  { %6828 = vmatprep.subr.bf16.mxu0 %v6701_v38  ;;  %v10942_v38 = vld [vmem:[#allocation7] sm:$0xff]  ;;  %7018 = vmatprep.subr.bf16.mxu1 %v10940_v34 }
 0xd04   :  { %7019 = vmatpush1.bf16.msra.mxu1 %v10942_v38 }
 0xd06   :  { %6829 = vmatpush1.bf16.msra.mxu0 %v6700_v26  ;;  %v10944_v26 = vld [vmem:[#allocation7 + $0x18] sm:$0xff] }
 0xd07   :  { %6830 = vmatprep.subr.bf16.mxu0 %v6703_v22  ;;  %v6746_v22 = vld [vmem:[#allocation4 + $0x210] sm:$0xff]  ;;  %7020 = vmatprep.subr.bf16.mxu1 %v10944_v26 }
 0xd0a   :  { %6831 = vmatpush1.bf16.msra.mxu0 %v6702_v19  ;;  %v6749_v19 = vld [vmem:[#allocation4 + $0x228] sm:$0xff] }
 0xd0b   :  { %6832 = vmatprep.subr.bf16.mxu0 %v6705_v23  ;;  %v10949_v23 = vld [vmem:[#allocation7 + $0x10] sm:$0xff] }
 0xd0c   :  { %7021 = vmatpush1.bf16.msra.mxu1 %v10949_v23 }
 0xd0e   :  { %6833 = vmatpush1.bf16.msra.mxu0 %v6704_v1  ;;  %v10951_v1 = vld [vmem:[#allocation7 + $0x28] sm:$0xff] }
 0xd0f   :  { %6834 = vmatprep.subr.bf16.mxu0 %v6707_v13  ;;  %v6748_v13 = vld [vmem:[#allocation4 + $0x220] sm:$0xff]  ;;  %7022 = vmatprep.subr.bf16.mxu1 %v10951_v1 }
 0xd12   :  { %6835 = vmatpush1.bf16.msra.mxu0 %v6706_v15  ;;  %v6751_v15 = vld [vmem:[#allocation4 + $0x238] sm:$0xff] }
 0xd13   :  { %6836 = vmatprep.subr.bf16.mxu0 %v6709_v16  ;;  %v10955_v16 = vld [vmem:[#allocation7 + $0x20] sm:$0xff] }
 0xd14   :  { %7023 = vmatpush1.bf16.msra.mxu1 %v10955_v16 }
 0xd16   :  { %6837 = vmatpush1.bf16.msra.mxu0 %v6708_v45  ;;  %v10957_v45 = vld [vmem:[#allocation7 + $0x38] sm:$0xff] }
 0xd17   :  { %6838 = vmatprep.subr.bf16.mxu0 %v6711_v48  ;;  %v6750_v48 = vld [vmem:[#allocation4 + $0x230] sm:$0xff]  ;;  %7024 = vmatprep.subr.bf16.mxu1 %v10957_v45 }
 0xd1a   :  { %6839 = vmatpush1.bf16.msra.mxu0 %v6710_v37  ;;  %v6753_v37 = vld [vmem:[#allocation4 + $0x248] sm:$0xff] }
 0xd1b   :  { %6849 = vmatprep.subr.bf16.mxu0 %v6713_v10  ;;  %v10961_v10 = vld [vmem:[#allocation7 + $0x30] sm:$0xff] }
 0xd1c   :  { %7025 = vmatpush1.bf16.msra.mxu1 %v10961_v10 }
 0xdb0   :  { %v6653_v12 = vpop.f32.mrb[64].mxu0 }
 0xdb1   :  { %v6655_v63 = vpop.f32.mrb[65].mxu0  ;;  %v6672_v32 = vpack.c.bf16 %v6653_v12, %v6653_v12  ;;  %v10963_v12 = vld [vmem:[#allocation7 + $0x48] sm:$0xff] }
 0xdb2   :  { %v6673_v27 = vpack.c.bf16 %v6655_v63, %v6655_v63  ;;  %v10926_v4 = vpop.f32.mrb[66].mxu0  ;;  %v6752_v63 = vld [vmem:[#allocation4 + $0x240] sm:$0xff]  ;;  %7026 = vmatprep.subr.bf16.mxu1 %v10963_v12 }
 0xdb3   :  { %v6659_v35 = vpop.f32.mrb[67].mxu0  ;;  %v6674_v9 = vpack.c.bf16 %v10926_v4, %v10926_v4  ;;  %v10967_v4 = vld [vmem:[#allocation7 + $0x40] sm:$0xff] }
 0xdb4   :  { %v6675_v43 = vpack.c.bf16 %v6659_v35, %v6659_v35  ;;  %6840 = vmatprep.mubr.bf16.mxu0 %v6673_v27  ;;  %v6755_v27 = vld [vmem:[#allocation4 + $0x258] sm:$0xff]  ;;  %v6754_v35 = vld [vmem:[#allocation4 + $0x250] sm:$0xff]  ;;  %7027 = vmatpush1.bf16.msra.mxu1 %v10967_v4 }
 0xdb5   :  { %6841 = vmatmul.mubr.bf16.vlgmr.msra.gmra.mrb[72].mxu0 %v6672_v32  ;;  %v10969_v32 = vld [vmem:[#allocation7 + $0x58] sm:$0xff] }
 0xdb6   :  { %6850 = vmatpush1.bf16.msra.mxu0 %v6712_v39  ;;  %6881 = vmatprep.mubr.bf16.mxu0 %v6675_v43  ;;  %v6757_v39 = vld [vmem:[#allocation4 + $0x268] sm:$0xff]  ;;  %v10973_v43 = vld [vmem:[#allocation7 + $0x50] sm:$0xff] }
 0xdb7   :  { %6851 = vmatprep.subr.bf16.mxu0 %v6715_v52  ;;  %7028 = vmatprep.subr.bf16.mxu1 %v10969_v32  ;;  %v10975_v52 = vld [vmem:[#allocation7 + $0x68] sm:$0xff] }
 0xdb8   :  { %v10928_v36 = vpop.f32.mrb[68].mxu0  ;;  %7029 = vmatpush1.bf16.msra.mxu1 %v10973_v43 }
 0xdb9   :  { %v10930_v44 = vpop.f32.mrb[69].mxu0  ;;  %7030 = vmatprep.subr.bf16.mxu1 %v10975_v52 }
 0xdba   :  { %6852 = vmatpush1.bf16.msra.mxu0 %v6714_v14  ;;  %v10932_v24 = vpop.f32.mrb[70].mxu0  ;;  %v6677_v2 = vpack.c.bf16 %v10930_v44, %v10930_v44  ;;  %v6756_v14 = vld [vmem:[#allocation4 + $0x260] sm:$0xff] }
 0xdbb   :  { %6853 = vmatprep.subr.bf16.mxu0 %v6717_v21  ;;  %v10934_v54 = vpop.f32.mrb[71].mxu0  ;;  %v6759_v21 = vld [vmem:[#allocation4 + $0x278] sm:$0xff]  ;;  %v10979_v44 = vld [vmem:[#allocation7 + $0x60] sm:$0xff] }
 0xdbc   :  { %7031 = vmatpush1.bf16.msra.mxu1 %v10979_v44 }
 0xdbe   :  { %6854 = vmatpush1.bf16.msra.mxu0 %v6716_v62  ;;  %v10981_v62 = vld [vmem:[#allocation7 + $0x78] sm:$0xff] }
 0xdbf   :  { %6855 = vmatprep.subr.bf16.mxu0 %v6719_v3  ;;  %v6758_v3 = vld [vmem:[#allocation4 + $0x270] sm:$0xff]  ;;  %7032 = vmatprep.subr.bf16.mxu1 %v10981_v62 }
 0xdc2   :  { %6856 = vmatpush1.bf16.msra.mxu0 %v6718_v7  ;;  %v6761_v7 = vld [vmem:[#allocation4 + $0x288] sm:$0xff] }
 0xdc3   :  { %6857 = vmatprep.subr.bf16.mxu0 %v6721_v50  ;;  %v10985_v50 = vld [vmem:[#allocation7 + $0x70] sm:$0xff] }
 0xdc4   :  { %7033 = vmatpush1.bf16.msra.mxu1 %v10985_v50 }
 0xdc6   :  { %6858 = vmatpush1.bf16.msra.mxu0 %v6720_v5  ;;  %v10987_v5 = vld [vmem:[#allocation7 + $0x88] sm:$0xff] }
 0xdc7   :  { %6859 = vmatprep.subr.bf16.mxu0 %v6723_v6  ;;  %v6760_v6 = vld [vmem:[#allocation4 + $0x280] sm:$0xff]  ;;  %7034 = vmatprep.subr.bf16.mxu1 %v10987_v5 }
 0xdca   :  { %6860 = vmatpush1.bf16.msra.mxu0 %v6722_v11  ;;  %v6763_v11 = vld [vmem:[#allocation4 + $0x298] sm:$0xff] }
 0xdcb   :  { %6861 = vmatprep.subr.bf16.mxu0 %v6725_v42  ;;  %v10991_v42 = vld [vmem:[#allocation7 + $0x80] sm:$0xff] }
 0xdcc   :  { %7035 = vmatpush1.bf16.msra.mxu1 %v10991_v42 }
 0xdce   :  { %6862 = vmatpush1.bf16.msra.mxu0 %v6724_v53  ;;  %v10993_v53 = vld [vmem:[#allocation7 + $0x98] sm:$0xff] }
 0xdcf   :  { %6863 = vmatprep.subr.bf16.mxu0 %v6727_v59  ;;  %v6762_v59 = vld [vmem:[#allocation4 + $0x290] sm:$0xff]  ;;  %7036 = vmatprep.subr.bf16.mxu1 %v10993_v53 }
 0xdd2   :  { %6864 = vmatpush1.bf16.msra.mxu0 %v6726_v17  ;;  %v6765_v17 = vld [vmem:[#allocation4 + $0x2a8] sm:$0xff] }
 0xdd3   :  { %6865 = vmatprep.subr.bf16.mxu0 %v6729_v20  ;;  %v10997_v20 = vld [vmem:[#allocation7 + $0x90] sm:$0xff] }
 0xdd4   :  { %7037 = vmatpush1.bf16.msra.mxu1 %v10997_v20 }
 0xdd6   :  { %6866 = vmatpush1.bf16.msra.mxu0 %v6728_v49  ;;  %v10999_v49 = vld [vmem:[#allocation7 + $0xa8] sm:$0xff] }
 0xdd7   :  { %6867 = vmatprep.subr.bf16.mxu0 %v6731_v28  ;;  %v6764_v28 = vld [vmem:[#allocation4 + $0x2a0] sm:$0xff]  ;;  %7038 = vmatprep.subr.bf16.mxu1 %v10999_v49 }
 0xdda   :  { %6868 = vmatpush1.bf16.msra.mxu0 %v6730_v31  ;;  %v6767_v31 = vld [vmem:[#allocation4 + $0x2b8] sm:$0xff] }
 0xddb   :  { %6869 = vmatprep.subr.bf16.mxu0 %v6733_v40  ;;  %v11003_v40 = vld [vmem:[#allocation7 + $0xa0] sm:$0xff] }
 0xddc   :  { %7039 = vmatpush1.bf16.msra.mxu1 %v11003_v40 }
 0xdde   :  { %6870 = vmatpush1.bf16.msra.mxu0 %v6732_v41  ;;  %v11005_v41 = vld [vmem:[#allocation7 + $0xb8] sm:$0xff] }
 0xddf   :  { %6871 = vmatprep.subr.bf16.mxu0 %v6735_v56  ;;  %v6766_v56 = vld [vmem:[#allocation4 + $0x2b0] sm:$0xff]  ;;  %7040 = vmatprep.subr.bf16.mxu1 %v11005_v41 }
 0xde2   :  { %6872 = vmatpush1.bf16.msra.mxu0 %v6734_v61  ;;  %v6769_v61 = vld [vmem:[#allocation4 + $0x2c8] sm:$0xff] }
 0xde3   :  { %6873 = vmatprep.subr.bf16.mxu0 %v6737_v58  ;;  %v11009_v58 = vld [vmem:[#allocation7 + $0xb0] sm:$0xff] }
 0xde4   :  { %7041 = vmatpush1.bf16.msra.mxu1 %v11009_v58 }
 0xde6   :  { %6874 = vmatpush1.bf16.msra.mxu0 %v6736_v60  ;;  %v6768_v60 = vld [vmem:[#allocation4 + $0x2c0] sm:$0xff] }
 0xde7   :  { %6875 = vmatprep.subr.bf16.mxu0 %v6739_v8  ;;  %v6771_v8 = vld [vmem:[#allocation4 + $0x2d8] sm:$0xff] }
 0xdea   :  { %6876 = vmatpush1.bf16.msra.mxu0 %v6738_v18  ;;  %v6770_v18 = vld [vmem:[#allocation4 + $0x2d0] sm:$0xff] }
 0xdeb   :  { %6877 = vmatprep.subr.bf16.mxu0 %v6741_v46  ;;  %v6773_v46 = vld [vmem:[#allocation4 + $0x2e8] sm:$0xff] }
 0xdee   :  { %6878 = vmatpush1.bf16.msra.mxu0 %v6740_v55  ;;  %v6772_v55 = vld [vmem:[#allocation4 + $0x2e0] sm:$0xff] }
 0xdef   :  { %6879 = vmatprep.subr.bf16.mxu0 %v6743_v57  ;;  %v6775_v57 = vld [vmem:[#allocation4 + $0x2f8] sm:$0xff] }
 0xdf2   :  { %6880 = vmatpush1.bf16.msra.mxu0 %v6742_v25  ;;  %v6774_v25 = vld [vmem:[#allocation4 + $0x2f0] sm:$0xff] }
 0xdf3   :  { %6890 = vmatprep.subr.bf16.mxu0 %v6745_v51  ;;  %v6777_v51 = vld [vmem:[#allocation4 + $0x308] sm:$0xff] }
 0xdf5   :  { %6882 = vmatmul.mubr.bf16.vlgmr.msra.gmra.mrb[72].mxu0 %v6674_v9  ;;  %v6776_v9 = vld [vmem:[#allocation4 + $0x300] sm:$0xff] }
 0xdf6   :  { %6891 = vmatpush1.bf16.msra.mxu0 %v6744_v30  ;;  %6922 = vmatprep.mubr.bf16.mxu0 %v6677_v2  ;;  %v6676_v2 = vpack.c.bf16 %v10928_v36, %v10928_v36  ;;  %v6679_v30 = vpack.c.bf16 %v10934_v54, %v10934_v54  ;;  %v6782_v36 = vld [vmem:[#allocation4 + $0x330] sm:$0xff] }
 0xdf7   :  { %6892 = vmatprep.subr.bf16.mxu0 %v6747_v33  ;;  %v6779_v33 = vld [vmem:[#allocation4 + $0x318] sm:$0xff]  ;;  %v6786_v54 = vld [vmem:[#allocation4 + $0x350] sm:$0xff] }
 0xdfa   :  { %6893 = vmatpush1.bf16.msra.mxu0 %v6746_v22  ;;  %v6778_v22 = vld [vmem:[#allocation4 + $0x310] sm:$0xff] }
 0xdfb   :  { %6894 = vmatprep.subr.bf16.mxu0 %v6749_v19  ;;  %v6781_v19 = vld [vmem:[#allocation4 + $0x328] sm:$0xff] }
 0xdfe   :  { %6895 = vmatpush1.bf16.msra.mxu0 %v6748_v13  ;;  %v6780_v13 = vld [vmem:[#allocation4 + $0x320] sm:$0xff] }
 0xdff   :  { %6896 = vmatprep.subr.bf16.mxu0 %v6751_v15  ;;  %v6783_v15 = vld [vmem:[#allocation4 + $0x338] sm:$0xff] }
 0xe02   :  { %6897 = vmatpush1.bf16.msra.mxu0 %v6750_v48  ;;  %v6785_v48 = vld [vmem:[#allocation4 + $0x348] sm:$0xff] }
 0xe03   :  { %6898 = vmatprep.subr.bf16.mxu0 %v6753_v37  ;;  %v6784_v37 = vld [vmem:[#allocation4 + $0x340] sm:$0xff] }
 0xe06   :  { %6899 = vmatpush1.bf16.msra.mxu0 %v6752_v63  ;;  %v6787_v63 = vld [vmem:[#allocation4 + $0x358] sm:$0xff] }
 0xe07   :  { %6900 = vmatprep.subr.bf16.mxu0 %v6755_v27  ;;  %v6789_v27 = vld [vmem:[#allocation4 + $0x368] sm:$0xff] }
 0xe0a   :  { %6901 = vmatpush1.bf16.msra.mxu0 %v6754_v35  ;;  %v6788_v35 = vld [vmem:[#allocation4 + $0x360] sm:$0xff] }
 0xe0b   :  { %6902 = vmatprep.subr.bf16.mxu0 %v6757_v39  ;;  %v6791_v39 = vld [vmem:[#allocation4 + $0x378] sm:$0xff] }
 0xe0e   :  { %6903 = vmatpush1.bf16.msra.mxu0 %v6756_v14  ;;  %v6790_v14 = vld [vmem:[#allocation4 + $0x370] sm:$0xff] }
 0xe0f   :  { %6904 = vmatprep.subr.bf16.mxu0 %v6759_v21  ;;  %v6793_v21 = vld [vmem:[#allocation4 + $0x388] sm:$0xff] }
 0xe12   :  { %6905 = vmatpush1.bf16.msra.mxu0 %v6758_v3  ;;  %v6792_v3 = vld [vmem:[#allocation4 + $0x380] sm:$0xff] }
 0xe13   :  { %6906 = vmatprep.subr.bf16.mxu0 %v6761_v7  ;;  %v6795_v7 = vld [vmem:[#allocation4 + $0x398] sm:$0xff] }
 0xe16   :  { %6907 = vmatpush1.bf16.msra.mxu0 %v6760_v6  ;;  %v6794_v6 = vld [vmem:[#allocation4 + $0x390] sm:$0xff] }
 0xe17   :  { %6908 = vmatprep.subr.bf16.mxu0 %v6763_v11  ;;  %v6797_v11 = vld [vmem:[#allocation4 + $0x3a8] sm:$0xff] }
 0xe1a   :  { %6909 = vmatpush1.bf16.msra.mxu0 %v6762_v59  ;;  %v6796_v59 = vld [vmem:[#allocation4 + $0x3a0] sm:$0xff] }
 0xe1b   :  { %6910 = vmatprep.subr.bf16.mxu0 %v6765_v17  ;;  %v6799_v17 = vld [vmem:[#allocation4 + $0x3b8] sm:$0xff] }
 0xe1e   :  { %6911 = vmatpush1.bf16.msra.mxu0 %v6764_v28  ;;  %v6798_v28 = vld [vmem:[#allocation4 + $0x3b0] sm:$0xff] }
 0xe1f   :  { %6912 = vmatprep.subr.bf16.mxu0 %v6767_v31  ;;  %v6801_v31 = vld [vmem:[#allocation4 + $0x3c8] sm:$0xff] }
 0xe22   :  { %6913 = vmatpush1.bf16.msra.mxu0 %v6766_v56  ;;  %v6800_v56 = vld [vmem:[#allocation4 + $0x3c0] sm:$0xff] }
 0xe23   :  { %6914 = vmatprep.subr.bf16.mxu0 %v6769_v61  ;;  %v6803_v61 = vld [vmem:[#allocation4 + $0x3d8] sm:$0xff] }
 0xe26   :  { %6915 = vmatpush1.bf16.msra.mxu0 %v6768_v60  ;;  %v6802_v60 = vld [vmem:[#allocation4 + $0x3d0] sm:$0xff] }
 0xe27   :  { %6916 = vmatprep.subr.bf16.mxu0 %v6771_v8  ;;  %v6805_v8 = vld [vmem:[#allocation4 + $0x3e8] sm:$0xff] }
 0xe2a   :  { %6917 = vmatpush1.bf16.msra.mxu0 %v6770_v18  ;;  %v6804_v18 = vld [vmem:[#allocation4 + $0x3e0] sm:$0xff] }
 0xe2b   :  { %6918 = vmatprep.subr.bf16.mxu0 %v6773_v46  ;;  %v6807_v46 = vld [vmem:[#allocation4 + $0x3f8] sm:$0xff] }
 0xe2e   :  { %6919 = vmatpush1.bf16.msra.mxu0 %v6772_v55  ;;  %v6806_v55 = vld [vmem:[#allocation4 + $0x3f0] sm:$0xff] }
 0xe2f   :  { %6920 = vmatprep.subr.bf16.mxu0 %v6775_v57  ;;  %v6678_v57 = vpack.c.bf16 %v10932_v24, %v10932_v24 }
 0xe32   :  { %6921 = vmatpush1.bf16.msra.mxu0 %v6774_v25  ;;  %v7011_v25 = vld [vmem:[#allocation7 + $0xc8] sm:$0xff] }
 0xe33   :  { %6931 = vmatprep.subr.bf16.mxu0 %v6777_v51  ;;  %7042 = vmatprep.subr.bf16.mxu1 %v7011_v25  ;;  %v7010_v51 = vld [vmem:[#allocation7 + $0xc0] sm:$0xff] }
 0xe34   :  { %7043 = vmatpush1.bf16.msra.mxu1 %v7010_v51 }
 0xe35   :  { %6923 = vmatmul.mubr.bf16.vlgmr.msra.gmra.mrb[72].mxu0 %v6676_v2  ;;  %v7013_v2 = vld [vmem:[#allocation7 + $0xd8] sm:$0xff] }
 0xe36   :  { %6932 = vmatpush1.bf16.msra.mxu0 %v6776_v9  ;;  %6963 = vmatprep.mubr.bf16.mxu0 %v6679_v30  ;;  %v7012_v9 = vld [vmem:[#allocation7 + $0xd0] sm:$0xff]  ;;  %v7015_v30 = vld [vmem:[#allocation7 + $0xe8] sm:$0xff] }
 0xe37   :  { %6933 = vmatprep.subr.bf16.mxu0 %v6779_v33  ;;  %7044 = vmatprep.subr.bf16.mxu1 %v7013_v2  ;;  %v7014_v33 = vld [vmem:[#allocation7 + $0xe0] sm:$0xff] }
 0xe38   :  { %7045 = vmatpush1.bf16.msra.mxu1 %v7012_v9 }
 0xe39   :  { %7046 = vmatprep.subr.bf16.mxu1 %v7015_v30 }
 0xe3a   :  { %6934 = vmatpush1.bf16.msra.mxu0 %v6778_v22  ;;  %v7017_v22 = vld [vmem:[#allocation7 + $0xf8] sm:$0xff] }
 0xe3b   :  { %6935 = vmatprep.subr.bf16.mxu0 %v6781_v19  ;;  %v7016_v19 = vld [vmem:[#allocation7 + $0xf0] sm:$0xff] }
 0xe3c   :  { %7047 = vmatpush1.bf16.msra.mxu1 %v7014_v33 }
 0xe3d   :  { %7048 = vmatprep.subr.bf16.mxu1 %v7017_v22 }
 0xe3e   :  { %6936 = vmatpush1.bf16.msra.mxu0 %v6780_v13 }
 0xe3f   :  { %6937 = vmatprep.subr.bf16.mxu0 %v6783_v15 }
 0xe40   :  { %7049 = vmatpush1.bf16.msra.mxu1 %v7016_v19 }
 0xe41   :  { %7086 = vmatprep.subr.bf16.mxu1 %v10940_v34 }
 0xe42   :  { %6938 = vmatpush1.bf16.msra.mxu0 %v6782_v36 }
 0xe43   :  { %6939 = vmatprep.subr.bf16.mxu0 %v6785_v48 }
 0xe46   :  { %6940 = vmatpush1.bf16.msra.mxu0 %v6784_v37 }
 0xe47   :  { %6941 = vmatprep.subr.bf16.mxu0 %v6787_v63 }
 0xe4a   :  { %6942 = vmatpush1.bf16.msra.mxu0 %v6786_v54 }
 0xe4b   :  { %6943 = vmatprep.subr.bf16.mxu0 %v6789_v27 }
 0xe4e   :  { %6944 = vmatpush1.bf16.msra.mxu0 %v6788_v35 }
 0xe4f   :  { %6945 = vmatprep.subr.bf16.mxu0 %v6791_v39 }
 0xe52   :  { %6946 = vmatpush1.bf16.msra.mxu0 %v6790_v14 }
 0xe53   :  { %6947 = vmatprep.subr.bf16.mxu0 %v6793_v21 }
 0xe56   :  { %6948 = vmatpush1.bf16.msra.mxu0 %v6792_v3 }
 0xe57   :  { %6949 = vmatprep.subr.bf16.mxu0 %v6795_v7 }
 0xe5a   :  { %6950 = vmatpush1.bf16.msra.mxu0 %v6794_v6 }
 0xe5b   :  { %6951 = vmatprep.subr.bf16.mxu0 %v6797_v11 }
 0xe5e   :  { %6952 = vmatpush1.bf16.msra.mxu0 %v6796_v59 }
 0xe5f   :  { %6953 = vmatprep.subr.bf16.mxu0 %v6799_v17 }
 0xe62   :  { %6954 = vmatpush1.bf16.msra.mxu0 %v6798_v28 }
 0xe63   :  { %6955 = vmatprep.subr.bf16.mxu0 %v6801_v31 }
 0xe66   :  { %6956 = vmatpush1.bf16.msra.mxu0 %v6800_v56 }
 0xe67   :  { %6957 = vmatprep.subr.bf16.mxu0 %v6803_v61 }
 0xe6a   :  { %6958 = vmatpush1.bf16.msra.mxu0 %v6802_v60 }
 0xe6b   :  { %6959 = vmatprep.subr.bf16.mxu0 %v6805_v8 }
 0xe6e   :  { %6960 = vmatpush1.bf16.msra.mxu0 %v6804_v18 }
 0xe6f   :  { %6961 = vmatprep.subr.bf16.mxu0 %v6807_v46 }
 0xe72   :  { %6962 = vmatpush1.bf16.msra.mxu0 %v6806_v55 }
 0xe75   :  { %6964 = vmatmul.mubr.bf16.vlgmr.msra.gmra.mrb[72].mxu0 %v6678_v57  ;;  %v7085_v57 = vld [vmem:[%s11075_s10] sm:$0x3] }
 0xf48   :  { %v6965_v24 = vpop.f32.mrb[72].mxu0 }
 0xf49   :  { %v6972_v13 = vrot.slane %v6965_v24, 4  ;;  %v6967_v15 = vpop.f32.mrb[73].mxu0 }
 0xf4a   :  { %v6978_v36 = vrot.slane %v6967_v15, 4  ;;  %v6969_v48 = vpop.f32.mrb[74].mxu0 }
 0xf4b   :  { %v6973_v37 = vadd.f32 %v6972_v13, %v6965_v24  ;;  %v6970_v63 = vpop.f32.mrb[75].mxu0  ;;  %v7179_v13 = vld [vmem:[%s11071_s6] sm:$0xff] }
 0xf4c   :  { %v6979_v54 = vadd.f32 %v6978_v36, %v6967_v15  ;;  %v7181_v63 = vunpack.c.h.bf16 %v7179_v13 }
 0xf4d   :  { %v6974_v27 = vrot.slane %v6973_v37, 2 }
 0xf4e   :  { %v6980_v35 = vrot.slane %v6979_v54, 2 }
 0xf4f   :  { %v6975_v39 = vadd.f32 %v6974_v27, %v6973_v37  ;;  %v7180_v37 = vunpack.c.l.bf16 %v7179_v13 }
 0xf50   :  { %v6981_v14 = vadd.f32 %v6980_v35, %v6979_v54 }
 0xf51   :  { %v6976_v21 = vrot.slane %v6975_v39, 1 }
 0xf52   :  { %v6982_v3 = vrot.slane %v6981_v14, 1 }
 0xf53   :  { %v6977_v7 = vadd.f32 %v6976_v21, %v6975_v39 }
 0xf54   :  { %v6983_v6 = vadd.f32 %v6982_v3, %v6981_v14 }
 0xf55   :  { %v6984_v59 = vpack.c.bf16 %v6977_v7, %v6977_v7 }
 0xf56   :  { %v6985_v11 = vpack.c.bf16 %v6983_v6, %v6983_v6 }
 0xf58   :  { %7050 = vmatprep.mubr.bf16.mxu1 %v6985_v11 }
 0xf59   :  { %7051 = vmatmul.mubr.bf16.vlgmr.msra.gmra.mrb[60].mxu1 %v6984_v59 }
 0xf5a   :  { %7087 = vmatpush1.bf16.msra.mxu1 %v10942_v38 }
 0xf5b   :  { %7088 = vmatprep.subr.bf16.mxu1 %v10944_v26 }
 0xf5e   :  { %7089 = vmatpush1.bf16.msra.mxu1 %v10949_v23 }
 0xf5f   :  { %7090 = vmatprep.subr.bf16.mxu1 %v10951_v1 }
 0xf62   :  { %7091 = vmatpush1.bf16.msra.mxu1 %v10955_v16 }
 0xf63   :  { %7092 = vmatprep.subr.bf16.mxu1 %v10957_v45 }
 0xf66   :  { %7093 = vmatpush1.bf16.msra.mxu1 %v10961_v10 }
 0xf67   :  { %7094 = vmatprep.subr.bf16.mxu1 %v10963_v12 }
 0xf6a   :  { %7095 = vmatpush1.bf16.msra.mxu1 %v10967_v4 }
 0xf6b   :  { %7096 = vmatprep.subr.bf16.mxu1 %v10969_v32 }
 0xf6e   :  { %7097 = vmatpush1.bf16.msra.mxu1 %v10973_v43 }
 0xf6f   :  { %7098 = vmatprep.subr.bf16.mxu1 %v10975_v52 }
 0xf72   :  { %7099 = vmatpush1.bf16.msra.mxu1 %v10979_v44 }
 0xf73   :  { %7100 = vmatprep.subr.bf16.mxu1 %v10981_v62 }
 0xf76   :  { %7101 = vmatpush1.bf16.msra.mxu1 %v10985_v50 }
 0xf77   :  { %7102 = vmatprep.subr.bf16.mxu1 %v10987_v5 }
 0xf7a   :  { %7103 = vmatpush1.bf16.msra.mxu1 %v10991_v42 }
 0xf7b   :  { %7104 = vmatprep.subr.bf16.mxu1 %v10993_v53 }
 0xf7e   :  { %7105 = vmatpush1.bf16.msra.mxu1 %v10997_v20 }
 0xf7f   :  { %7106 = vmatprep.subr.bf16.mxu1 %v10999_v49 }
 0xf82   :  { %7107 = vmatpush1.bf16.msra.mxu1 %v11003_v40 }
 0xf83   :  { %7108 = vmatprep.subr.bf16.mxu1 %v11005_v41 }
 0xf86   :  { %7109 = vmatpush1.bf16.msra.mxu1 %v11009_v58 }
 0xf87   :  { %7110 = vmatprep.subr.bf16.mxu1 %v7011_v25 }
 0xf8a   :  { %7111 = vmatpush1.bf16.msra.mxu1 %v7010_v51  ;;  %v7161_v51 = vld [vmem:[%s11078_s13] sm:$0x3] }
 0xf8b   :  { %7112 = vmatprep.subr.bf16.mxu1 %v7013_v2 }
 0xf8e   :  { %7113 = vmatpush1.bf16.msra.mxu1 %v7012_v9 }
 0xf8f   :  { %7114 = vmatprep.subr.bf16.mxu1 %v7015_v30 }
 0xf92   :  { %7115 = vmatpush1.bf16.msra.mxu1 %v7014_v33  ;;  %v7166_v33 = vrot.slane %v7161_v51, %v10696_v29 }
 0xf93   :  { %7116 = vmatprep.subr.bf16.mxu1 %v7017_v22  ;;  %v7170_v22 = vrot.slane %v7161_v51, %v10733_v0 }
 0xf96   :  { %7117 = vmatpush1.bf16.msra.mxu1 %v7016_v19 }
0x102c   :  { %v7052_v34 = vpop.f32.mrb[60].mxu1 }
0x102d   :  { %v7062_v38 = vrot.slane %v7052_v34, %v10696_v29  ;;  %v7054_v26 = vpop.f32.mrb[61].mxu1 }
0x102e   :  { %v7066_v23 = vrot.slane %v7054_v26, %v10696_v29  ;;  %v7056_v1 = vpop.f32.mrb[62].mxu1 }
0x102f   :  { %v7067_v16 = vsub.f32 %v6965_v24, %v7062_v38  ;;  %v7057_v45 = vpop.f32.mrb[63].mxu1 }
0x1030   :  { %v7068_v10 = vsub.f32 %v6967_v15, %v7066_v23 }
0x1031   :  { %v7069_v12 = vmul.f32 %v7067_v16, %v7067_v16 }
0x1032   :  { %v7070_v4 = vmul.f32 %v7068_v10, %v7068_v10 }
0x1033   :  { %v7071_v32 = vrot.slane %v7069_v12, 4 }
0x1034   :  { %v7077_v43 = vrot.slane %v7070_v4, 4 }
0x1035   :  { %v7072_v52 = vadd.f32 %v7071_v32, %v7069_v12 }
0x1036   :  { %v7078_v44 = vadd.f32 %v7077_v43, %v7070_v4 }
0x1037   :  { %v7073_v62 = vrot.slane %v7072_v52, 2 }
0x1038   :  { %v7079_v50 = vrot.slane %v7078_v44, 2 }
0x1039   :  { %v7074_v5 = vadd.f32 %v7073_v62, %v7072_v52 }
0x103a   :  { %v7080_v42 = vadd.f32 %v7079_v50, %v7078_v44 }
0x103b   :  { %v7075_v53 = vrot.slane %v7074_v5, 1 }
0x103c   :  { %v7081_v20 = vrot.slane %v7080_v42, 1 }
0x103d   :  { %v7076_v49 = vadd.f32 %v7075_v53, %v7074_v5 }
0x103e   :  { %v7082_v40 = vadd.f32 %v7081_v20, %v7080_v42 }
0x103f   :  { %v7083_v58 = vpack.c.bf16 %v7076_v49, %v7076_v49 }
0x1040   :  { %v7084_v41 = vpack.c.bf16 %v7082_v40, %v7082_v40 }
0x1042   :  { %7118 = vmatprep.mubr.bf16.mxu1 %v7084_v41 }
0x1043   :  { %7119 = vmatmul.mubr.bf16.vlgmr.msra.gmra.mrb[64].mxu1 %v7083_v58 }
0x1116   :  { %v7120_v17 = vpop.f32.mrb[64].mxu1 }
0x1117   :  { %v7121_v28 = vadd.f32 1e-05, %v7120_v17  ;;  %v7122_v31 = vpop.f32.mrb[65].mxu1 }
0x1118   :  { %v7123_v56 = vadd.f32 1e-05, %v7122_v31  ;;  %v7124_v61 = vpop.f32.mrb[66].mxu1 }
0x1119   :  { %7811 = vrsqrt.f32 %v7121_v28  ;;  %v7125_v60 = vpop.f32.mrb[67].mxu1 }
0x111a   :  { %7813 = vrsqrt.f32 %v7123_v56 }
0x1123   :  { %v7812_v8 = vpop.eup %7811 }
0x1124   :  { %v7814_v18 = vpop.eup %7813 }
0x1125   :  { %v7131_v46 = vcombine.low %v7812_v8, %v7814_v18 }
0x1127   :  { %v7138_v55 = vrot.slane %v7131_v46, %v10727_v47 }
0x1129   :  { %v7145_v25 = vrot.slane %v7138_v55, %v10727_v47 }
0x112b   :  { %v7147_v2 = vmul.f32 %v7145_v25, %v7085_v57 }
0x112d   :  { %v7152_v9 = vrot.slane %v7147_v2, %v10696_v29  ;;  %v7156_v30 = vrot.slane %v7147_v2, %v10733_v0  ;;  %v7833_v29 = vmov 0.0   ;;  %v7187_v0 = vld [vmem:[%s11072_s7] sm:$0x3] }
0x112e   :  { %7596 = vmatprep.subr.mxu1 %v7833_v29  ;;  %7598 = vmatprep.mubr.msk.f32.mxu1 %vm7834_vm3, %v7833_v29 }
0x112f   :  { %v7159_v19 = vmul.f32 %v7152_v9, %v7067_v16  ;;  %v7160_v24 = vmul.f32 %v7156_v30, %v7068_v10 }
0x1131   :  { %v7173_v47 = vadd.f32 %v7166_v33, %v7159_v19  ;;  %v7174_v15 = vadd.f32 %v7170_v22, %v7160_v24 }
0x1133   :  { %v7175_v36 = vmul.f32 0.2, %v7173_v47  ;;  %v7176_v48 = vmul.f32 0.2, %v7174_v15 }
0x1135   :  { %v7177_v54 = vmax.f32 %v7173_v47, %v7175_v36  ;;  %v7178_v27 = vmax.f32 %v7174_v15, %v7176_v48 }
0x1137   :  { %v7182_v35 = vmul.f32 %v7180_v37, %v7177_v54  ;;  %v7183_v39 = vmul.f32 %v7181_v63, %v7178_v27 }
0x1139   :  { %v7184_v14 = vadd.f32 %v7183_v39, %v7182_v35 }
0x113b   :  { %7185 = vadd.xlane.f32.xlu0 %v7184_v14 }
0x11c8   :  { %v7186_v21 = vpop.xlane.xlu0 %7185 }
0x11c9   :  { %7597 = vmatpush3.msra.mxu1 %v7186_v21 }
0x11ca   :  { %7599 = vmatmul.mubr.msk.f32.vlgmr.msra.gmra.mrb[68].mxu1 %vm7188_vm4, %v7187_v0 }
0x129d   :  { %v7258_v3 = vpop.f32.mrb[68].mxu1 }
0x129e   :  { %v7262_v7 = vsub.f32 0.0, %v7258_v3  ;;  %v7600_v6 = vpop.f32.mrb[69].mxu1 }
0x12a0   :  { %v7263_v11 = vmul.f32 1.442695, %v7262_v7 }
0x12a2   :  { %7815 = vpow2.f32 %v7263_v11 }
0x12ac   :  { %v7816_v59 = vpop.eup %7815 }
0x12ad   :  { %v7265_v34 = vadd.f32 1.0, %v7816_v59 }
0x12af   :  { %7817 = vrcp.f32 %v7265_v34 }
0x12b9   :  { %v7818_v38 = vpop.eup %7817 }
0x12ba   :  { %7269 = vst.msk [vmem:[%s11085_s20] sm:$0x3] %vm7268_vm5, %v7818_v38 }
0x12bb   :  { %7274 = vsyncmov [#allocation8] }
0x12be   :  { %s7275_s7 = vpop.sfrf %7274 }
0x12bf   :  { %p7516_p0 = scmp.ne.s32.totalorder %s7275_s7, 0 }
0x12c1   :  { %7279 = shalt.err (%p7516_p0)  }
0x12c2   :  { %7281 = vsyncmov [#allocation8 + $0x1] }
0x12c5   :  { %s7282_s29 = vpop.sfrf %7281 }
0x12c6   :  { %p7517_p1 = scmp.ne.s32.totalorder %s7282_s29, 0 }
0x12c8   :  { %7286 = shalt.err (%p7517_p1)  }
0x12c9   :  { %7288 = vsyncmov [#allocation8 + $0x2] }
0x12cc   :  { %s7289_s8 = vpop.sfrf %7288 }
0x12cd   :  { %p7518_p2 = scmp.ne.s32.totalorder %s7289_s8, 0 }
0x12cf   :  { %7293 = shalt.err (%p7518_p2)  }
0x12d0   :  { %7295 = vsyncmov [#allocation8 + $0x3] }
0x12d3   :  { %s7296_s11 = vpop.sfrf %7295 }
0x12d4   :  { %p7519_p3 = scmp.ne.s32.totalorder %s7296_s11, 0 }
0x12d6   :  { %7300 = shalt.err (%p7519_p3)  }
0x12d7   :  { %7302 = vsyncmov [#allocation8 + $0x4] }
0x12da   :  { %s7303_s30 = vpop.sfrf %7302 }
0x12db   :  { %p7520_p4 = scmp.ne.s32.totalorder %s7303_s30, 0 }
0x12dd   :  { %7307 = shalt.err (%p7520_p4)  }
0x12de   :  { %7309 = vsyncmov [#allocation8 + $0x5] }
0x12e1   :  { %s7310_s20 = vpop.sfrf %7309 }
0x12e2   :  { %p7521_p5 = scmp.ne.s32.totalorder %s7310_s20, 0 }
0x12e4   :  { %7314 = shalt.err (%p7521_p5)  }

</bundles_post_ra>
